<compile_context>
chip_gen: v7x
topology: tpu7x:2x2x1
jax: 0.10.0
libtpu: 0.0.40
codegen_flags: <defaults>
</compile_context>

<pallas_src>
import functools

import jax
import jax.numpy as jnp
from jax import lax
from jax.experimental import pallas as pl
from jax.experimental.pallas import tpu as pltpu


_VMEM = pl.BlockSpec(memory_space=pltpu.MemorySpace.VMEM)
_VMEM_LIMIT = 32 * 1024 * 1024  # conservative scoped-VMEM request, safe on v5e/v6e/v7x


def _pick_row_tile(n, max_tile=256):
    """Largest legal row tile: whole array if small, else a divisor that is a
    multiple of 8 (sublane aligned); falls back to a single whole-array block."""
    if n <= max_tile:
        return n
    for t in range(max_tile, 7, -1):
        if n % t == 0 and t % 8 == 0:
            return t
    return n


# ---------------------------------------------------------------------------
# Kernel 1: fused kNN graph + EdgeConv edge MLP + max over k neighbours.
# For each query-row tile:
#   d[i, j] = ||s_j||^2 - 2 q_i.s_j   (per-row constant ||q_i||^2 dropped: the
#             per-row ordering -> kNN result is unchanged; NOT true distances)
#   self edge masked (loop=False), then k smallest columns extracted iteratively.
#   Neighbour contribution x_j @ W1n is a row of the resident hn = P @ W1n slab,
#   selected with an exact {0,1} one-hot f32 MXU matmul (identical numerics to
#   gathering x_j and multiplying, since each one-hot row has a single 1.0).
#   h = relu(x_i @ (W1a-W1b) + b1 + x_j @ W1b); z = h @ W2 + b2; max over k.
# Only the (N, 64) EdgeConv output is written to HBM.
# ---------------------------------------------------------------------------
def _edgeconv_knn_kernel(k, q_ref, st_ref, pts_ref, w1c_ref, w1n_ref, b1_ref,
                         w2_ref, b2_ref, out_ref):
    q = q_ref[...]                                                    # (Tq, 3) centres
    st = st_ref[...]                                                  # (3, N) sources (lane-dense)
    pts = pts_ref[...]                                                # (N, 3) sources (row-major)

    inner = jnp.dot(q, st, preferred_element_type=jnp.float32)        # (Tq, N) = q . s
    ss = jnp.sum(st * st, axis=0, keepdims=True)                      # (1, N) source norms
    d = ss - 2.0 * inner                                              # ordering-only distances

    tq, n = d.shape
    row0 = pl.program_id(0) * tq
    r = lax.broadcasted_iota(jnp.int32, (tq, n), 0) + row0
    c = lax.broadcasted_iota(jnp.int32, (tq, n), 1)
    d = jnp.where(r == c, jnp.float32(jnp.inf), d)                    # exclude self-loop

    # per-centre linear part (computed once per tile): x_i @ (W1a - W1b) + b1
    a = jnp.dot(q.astype(jnp.bfloat16), w1c_ref[...],
                preferred_element_type=jnp.float32) + b1_ref[...]     # (Tq, 64)
    # per-source neighbour part, resident for the whole tile: hn[j] = p_j @ W1b
    hn = jnp.dot(pts.astype(jnp.bfloat16), w1n_ref[...],
                 preferred_element_type=jnp.float32)                  # (N, 64)
    w2 = w2_ref[...]
    b2 = b2_ref[...]

    acc = None
    for j in range(k):                                                # k-min extraction + scatter_max
        dmin = jnp.min(d, axis=1, keepdims=True)                      # (Tq, 1)
        amin = jnp.min(jnp.where(d <= dmin, c, n), axis=1, keepdims=True)   # ties -> smallest col
        onehot = (c == amin).astype(jnp.float32)                      # (Tq, N), exact 0/1
        xjh = jnp.dot(onehot, hn, preferred_element_type=jnp.float32)  # row gather via MXU, exact
        h = jnp.maximum(a + xjh, 0.0).astype(jnp.bfloat16)
        z = jnp.dot(h, w2, preferred_element_type=jnp.float32) + b2
        acc = z if acc is None else jnp.maximum(acc, z)
        if j + 1 < k:
            d = jnp.where(c == amin, jnp.float32(jnp.inf), d)         # mask chosen column
    out_ref[...] = acc


def edge_conv(points, points_t, params, k):
    # NOTE: standard EdgeConv semantics (aggregate per centre over its k nearest
    # neighbours), which is what the module intends.
    n = points.shape[0]
    out_dim = params["w2"].shape[1]

    w1 = params["w1"]                                                 # (6, 64)
    w1c = (w1[:3] - w1[3:]).astype(jnp.bfloat16)                      # centre part
    w1n = w1[3:].astype(jnp.bfloat16)                                 # neighbour part
    w2 = params["w2"].astype(jnp.bfloat16)

    tile_n = _pick_row_tile(n)
    kernel = functools.partial(_edgeconv_knn_kernel, k)
    return pl.pallas_call(
        kernel,
        out_shape=jax.ShapeDtypeStruct((n, out_dim), jnp.float32),
        grid=(n // tile_n,),
        in_specs=[
            pl.BlockSpec((tile_n, 3), lambda i: (i, 0)),              # query/centre rows (tiled)
            pl.BlockSpec((3, n), lambda i: (0, 0)),                   # all sources, lane-dense
            pl.BlockSpec((n, 3), lambda i: (0, 0)),                   # all sources, row-major
            pl.BlockSpec((3, 64), lambda i: (0, 0)),                  # w1c
            pl.BlockSpec((3, 64), lambda i: (0, 0)),                  # w1n
            pl.BlockSpec((1, 64), lambda i: (0, 0)),                  # b1
            pl.BlockSpec((64, out_dim), lambda i: (0, 0)),            # w2
            pl.BlockSpec((1, out_dim), lambda i: (0, 0)),             # b2
        ],
        out_specs=pl.BlockSpec((tile_n, out_dim), lambda i: (i, 0)),
        compiler_params=pltpu.CompilerParams(
            dimension_semantics=("parallel",),
            vmem_limit_bytes=_VMEM_LIMIT,
        ),
    )(points, points_t, points, w1c, w1n, params["b1"], w2, params["b2"])


# ---------------------------------------------------------------------------
# Kernel 2: all per-scale MLPs (Linear(64,128)->ReLU->Linear(128,dim)) in one
# pallas_call: grid over scales, per-scale weight slab picked by index_map,
# rows padded to a common (sublane-aligned) S.  bf16 matmul inputs, f32 accum.
# ---------------------------------------------------------------------------
def _scale_mlp_kernel(f_ref, w1_ref, b1_ref, w2_ref, b2_ref, out_ref):
    f = f_ref[...].astype(jnp.bfloat16)                               # (S_pad, 64)
    h = jnp.dot(f, w1_ref[...], preferred_element_type=jnp.float32) + b1_ref[...]
    h = jnp.maximum(h, 0.0).astype(jnp.bfloat16)
    out_ref[...] = jnp.dot(h, w2_ref[...], preferred_element_type=jnp.float32) + b2_ref[...]


def multi_scale_mlp(feats_list, mlp_params):
    n_scales = len(feats_list)
    s_max = max(f.shape[0] for f in feats_list)
    s_pad = max(8, ((s_max + 7) // 8) * 8)
    feats = jnp.stack([
        jnp.pad(f, ((0, s_pad - f.shape[0]), (0, 0))) for f in feats_list
    ])                                                                 # (L, S_pad, 64)
    w1 = jnp.stack([p["w1"] for p in mlp_params]).astype(jnp.bfloat16)  # (L, 64, 128)
    b1 = jnp.stack([p["b1"] for p in mlp_params])                       # (L, 1, 128)
    w2 = jnp.stack([p["w2"] for p in mlp_params]).astype(jnp.bfloat16)  # (L, 128, dim)
    b2 = jnp.stack([p["b2"] for p in mlp_params])                       # (L, 1, dim)
    hid = w1.shape[-1]
    dim = w2.shape[-1]

    out = pl.pallas_call(
        _scale_mlp_kernel,
        out_shape=jax.ShapeDtypeStruct((n_scales, s_pad, dim), jnp.float32),
        grid=(n_scales,),
        in_specs=[
            pl.BlockSpec((None, s_pad, 64), lambda s: (s, 0, 0)),
            pl.BlockSpec((None, 64, hid), lambda s: (s, 0, 0)),
            pl.BlockSpec((None, 1, hid), lambda s: (s, 0, 0)),
            pl.BlockSpec((None, hid, dim), lambda s: (s, 0, 0)),
            pl.BlockSpec((None, 1, dim), lambda s: (s, 0, 0)),
        ],
        out_specs=pl.BlockSpec((None, s_pad, dim), lambda s: (s, 0, 0)),
        compiler_params=pltpu.CompilerParams(
            dimension_semantics=("parallel",),
            vmem_limit_bytes=_VMEM_LIMIT,
        ),
    )(feats, w1, b1, w2, b2)
    return [out[i, : feats_list[i].shape[0]] for i in range(n_scales)]


# ---------------------------------------------------------------------------
# Kernel 3: _find_closest_points — nearest source point for every query point.
# d[i, j] = ||s_j||^2 - 2 q_i.s_j  (per-row constant ||q_i||^2 dropped: the row
# argmin is unchanged).  Source points fed lane-dense as (3, N).
# ---------------------------------------------------------------------------
def _closest_kernel(q_ref, st_ref, idx_ref):
    q = q_ref[...]                                                    # (S, 3)
    st = st_ref[...]                                                  # (3, N)
    inner = jnp.dot(q, st, preferred_element_type=jnp.float32)        # (S, N)
    ss = jnp.sum(st * st, axis=0, keepdims=True)                      # (1, N)
    d = ss - 2.0 * inner                                              # ordering-only
    srows, ncols = d.shape
    dmin = jnp.min(d, axis=1, keepdims=True)
    col = lax.broadcasted_iota(jnp.int32, (srows, ncols), 1)
    idx_ref[...] = jnp.min(jnp.where(d <= dmin, col, ncols), axis=1, keepdims=True)


def find_closest_points(query_points, source_points_t):
    s = query_points.shape[0]
    idx = pl.pallas_call(
        _closest_kernel,
        out_shape=jax.ShapeDtypeStruct((s, 1), jnp.int32),
        in_specs=[_VMEM, _VMEM],
        out_specs=_VMEM,
    )(query_points, source_points_t)
    return idx[:, 0]


# ---------------------------------------------------------------------------
# Farthest point sampling (not defined in the source module; standard FPS,
# deterministic start at index 0).
# TODO(synk): an in-VMEM Pallas FPS (pl.loop keeping the running min-distance
# resident, indices written to SMEM) would avoid per-iteration HBM traffic, but
# the sequential vector-argmax -> scalar-index chain is kept in plain JAX for
# robustness at these tiny sizes.
# ---------------------------------------------------------------------------
def farthest_point_sampling(points, n_samples):
    d0 = jnp.sum((points - points[0]) ** 2, axis=1)
    idxs0 = jnp.zeros((n_samples,), dtype=jnp.int32)

    def body(i, carry):
        idxs, min_d = carry
        nxt = jnp.argmax(min_d).astype(jnp.int32)
        idxs = idxs.at[i].set(nxt)
        d = jnp.sum((points - points[nxt]) ** 2, axis=1)
        return idxs, jnp.minimum(min_d, d)

    idxs, _ = lax.fori_loop(1, n_samples, body, (idxs0, d0))
    return idxs


# ---------------------------------------------------------------------------
# PointBranch forward
# ---------------------------------------------------------------------------
def point_branch_forward(points, params, scales, k=16):
    points_t = points.T                                               # (3, N), once

    # Pallas: fused kNN + EdgeConv -> (N, 64) features (no index / edge tensor in HBM)
    features = edge_conv(points, points_t, params["edge_conv"], k)

    # FPS / gathers are sequential across scales but independent of the MLPs, so
    # collect all sampled points/features first, then run ONE batched MLP call.
    sampled_points_list = []
    sampled_feats_list = []
    prev_points = points
    for i, scale in enumerate(scales):
        src = points if i == 0 else prev_points
        fps_idx = farthest_point_sampling(src, scale)
        sampled_points = src[fps_idx]
        if i == 0:
            sampled_features = features[fps_idx]
        else:
            idx = find_closest_points(sampled_points, points_t)       # Pallas
            sampled_features = features[idx]
        sampled_points_list.append(sampled_points)
        sampled_feats_list.append(sampled_features)
        prev_points = sampled_points

    level_features = multi_scale_mlp(sampled_feats_list, params["mlps"])  # Pallas (1 call)
    return [(sampled_points_list[i], level_features[i]) for i in range(len(scales))]


# ---------------------------------------------------------------------------
# Deterministic parameter init (mimics nn.Linear's U(-1/sqrt(fan_in), +...)).
# ---------------------------------------------------------------------------
def _linear_params(key, in_dim, out_dim):
    kw, kb = jax.random.split(key)
    bound = 1.0 / float(in_dim) ** 0.5
    w = jax.random.uniform(kw, (in_dim, out_dim), jnp.float32, -bound, bound)
    b = jax.random.uniform(kb, (1, out_dim), jnp.float32, -bound, bound)
    return w, b


def init_point_branch_params(key, scales, dim=256):
    n_mlps = len(scales)
    keys = jax.random.split(key, 2 + 2 * n_mlps)
    ew1, eb1 = _linear_params(keys[0], 3 * 2, 64)       # EdgeConv Linear(6, 64)
    ew2, eb2 = _linear_params(keys[1], 64, 64)          # EdgeConv Linear(64, 64)
    mlps = []
    for i in range(n_mlps):
        w1, b1 = _linear_params(keys[2 + 2 * i], 64, 128)
        w2, b2 = _linear_params(keys[3 + 2 * i], 128, dim)
        mlps.append({"w1": w1, "b1": b1, "w2": w2, "b2": b2})
    return {
        "edge_conv": {"w1": ew1, "b1": eb1, "w2": ew2, "b2": eb2},
        "mlps": mlps,
    }


if __name__ == "__main__":
    key = jax.random.PRNGKey(0)
    k_pts, k_par = jax.random.split(key)

    n_points = 64          # N
    scales = (16, 8)       # S_0, S_1
    dim = 256
    k = 16                 # EdgeConv k (hardcoded in the module)

    points = jax.random.normal(k_pts, (n_points, 3), dtype=jnp.float32)
    params = init_point_branch_params(k_par, scales, dim=dim)

    fwd = jax.jit(functools.partial(point_branch_forward, scales=scales, k=k))
    outputs = fwd(points, params)

    for sampled_points, level_features in outputs:
        jax.block_until_ready(sampled_points)
        jax.block_until_ready(level_features)

    # sanity on shapes: list of (S_i, 3) points and (S_i, dim) features
    assert outputs[0][0].shape == (scales[0], 3)
    assert outputs[0][1].shape == (scales[0], dim)
    assert outputs[1][0].shape == (scales[1], 3)
    assert outputs[1][1].shape == (scales[1], dim)

    print("KERNEL_OK")
</pallas_src>

<mosaic_0001>
module attributes {stable_mosaic.version = 11 : i64} {
  func.func @_closest_kernel(%arg0: memref<8x3xf32, #tpu.memory_space<vmem>>, %arg1: memref<3x64xf32, #tpu.memory_space<vmem>>, %arg2: memref<8x1xi32, #tpu.memory_space<vmem>>) attributes {dimension_semantics = [], scalar_prefetch = 0 : i64, scratch_operands = 0 : i64, tpu.core_type = #tpu.core_type<tc>} {
    %c0 = arith.constant 0 : index
    %c0_0 = arith.constant 0 : index
    %0 = vector.load %arg0[%c0, %c0_0] : memref<8x3xf32, #tpu.memory_space<vmem>>, vector<8x3xf32>
    %c0_1 = arith.constant 0 : index
    %c0_2 = arith.constant 0 : index
    %1 = vector.load %arg1[%c0_1, %c0_2] : memref<3x64xf32, #tpu.memory_space<vmem>>, vector<3x64xf32>
    %cst = arith.constant dense<0.000000e+00> : vector<8x64xf32>
    %2 = tpu.matmul %0, %1, %cst {dimension_numbers = #tpu.dot_dimension_numbers<[1], [0], [0], [1], [0, 0, 1, 1], [], []>} : vector<8x3xf32>, vector<3x64xf32>, vector<8x64xf32> -> vector<8x64xf32>
    %3 = arith.mulf %1, %1 : vector<3x64xf32>
    %cst_3 = arith.constant dense<0.000000e+00> : vector<64xf32>
    %4 = vector.multi_reduction <add>, %3, %cst_3 [0] : vector<3x64xf32> to vector<64xf32>
    %5 = vector.shape_cast %4 : vector<64xf32> to vector<1x64xf32>
    %cst_4 = arith.constant 2.000000e+00 : f32
    %6 = vector.broadcast %cst_4 : f32 to vector<8x64xf32>
    %7 = arith.mulf %6, %2 : vector<8x64xf32>
    %8 = vector.broadcast %5 : vector<1x64xf32> to vector<8x64xf32>
    %9 = arith.subf %8, %7 : vector<8x64xf32>
    %cst_5 = arith.constant dense<0x7F800000> : vector<8xf32>
    %10 = vector.multi_reduction <minimumf>, %9, %cst_5 [1] : vector<8x64xf32> to vector<8xf32>
    %11 = vector.shape_cast %10 : vector<8xf32> to vector<8x1xf32>
    %12 = tpu.iota {dimensions = array<i32: 1>} : vector<8x64xi32>
    %13 = vector.broadcast %11 : vector<8x1xf32> to vector<8x64xf32>
    %14 = arith.cmpf ole, %9, %13 : vector<8x64xf32>
    %c64_i32 = arith.constant 64 : i32
    %15 = vector.broadcast %c64_i32 : i32 to vector<8x64xi32>
    %16 = arith.select %14, %12, %15 : vector<8x64xi1>, vector<8x64xi32>
    %cst_6 = arith.constant dense<2147483647> : vector<8xi32>
    %17 = vector.multi_reduction <minsi>, %16, %cst_6 [1] : vector<8x64xi32> to vector<8xi32>
    %18 = vector.shape_cast %17 : vector<8xi32> to vector<8x1xi32>
    %c0_7 = arith.constant 0 : index
    %c0_8 = arith.constant 0 : index
    %19 = vector.load %arg2[%c0_7, %c0_8] : memref<8x1xi32, #tpu.memory_space<vmem>>, vector<8x1xi32>
    tpu.vector_store %arg2[%c0_7, %c0_8], %18 {strides = array<i32>} : memref<8x1xi32, #tpu.memory_space<vmem>>, vector<8x1xi32>,
    return
  }
}

module attributes {stable_mosaic.version = 11 : i64} {
  func.func @_edgeconv_knn_kernel(%arg0: i32, %arg1: memref<64x3xf32, #tpu.memory_space<vmem>>, %arg2: memref<3x64xf32, #tpu.memory_space<vmem>>, %arg3: memref<64x3xf32, #tpu.memory_space<vmem>>, %arg4: memref<3x64xbf16, #tpu.memory_space<vmem>>, %arg5: memref<3x64xbf16, #tpu.memory_space<vmem>>, %arg6: memref<1x64xf32, #tpu.memory_space<vmem>>, %arg7: memref<64x64xbf16, #tpu.memory_space<vmem>>, %arg8: memref<1x64xf32, #tpu.memory_space<vmem>>, %arg9: memref<64x64xf32, #tpu.memory_space<vmem>>) attributes {dimension_semantics = [#tpu.dimension_semantics<parallel>], iteration_bounds = array<i64: 1>, scalar_prefetch = 0 : i64, scratch_operands = 0 : i64, tpu.core_type = #tpu.core_type<tc>, window_params = [{transform_indices = @transform_0, window_bounds = array<i64: 64, 3>}, {pipeline_mode = #tpu.pipeline_mode<synchronous>, transform_indices = @transform_1, window_bounds = array<i64: 3, 64>}, {pipeline_mode = #tpu.pipeline_mode<synchronous>, transform_indices = @transform_2, window_bounds = array<i64: 64, 3>}, {pipeline_mode = #tpu.pipeline_mode<synchronous>, transform_indices = @transform_3, window_bounds = array<i64: 3, 64>}, {pipeline_mode = #tpu.pipeline_mode<synchronous>, transform_indices = @transform_4, window_bounds = array<i64: 3, 64>}, {pipeline_mode = #tpu.pipeline_mode<synchronous>, transform_indices = @transform_5, window_bounds = array<i64: 1, 64>}, {pipeline_mode = #tpu.pipeline_mode<synchronous>, transform_indices = @transform_6, window_bounds = array<i64: 64, 64>}, {pipeline_mode = #tpu.pipeline_mode<synchronous>, transform_indices = @transform_7, window_bounds = array<i64: 1, 64>}, {transform_indices = @transform_8, window_bounds = array<i64: 64, 64>}]} {
    %c0 = arith.constant 0 : index
    %c0_0 = arith.constant 0 : index
    %0 = vector.load %arg1[%c0, %c0_0] : memref<64x3xf32, #tpu.memory_space<vmem>>, vector<64x3xf32>
    %c0_1 = arith.constant 0 : index
    %c0_2 = arith.constant 0 : index
    %1 = vector.load %arg2[%c0_1, %c0_2] : memref<3x64xf32, #tpu.memory_space<vmem>>, vector<3x64xf32>
    %c0_3 = arith.constant 0 : index
    %c0_4 = arith.constant 0 : index
    %2 = vector.load %arg3[%c0_3, %c0_4] : memref<64x3xf32, #tpu.memory_space<vmem>>, vector<64x3xf32>
    %cst = arith.constant dense<0.000000e+00> : vector<64x64xf32>
    %3 = tpu.matmul %0, %1, %cst {dimension_numbers = #tpu.dot_dimension_numbers<[1], [0], [0], [1], [0, 0, 1, 1], [], []>} : vector<64x3xf32>, vector<3x64xf32>, vector<64x64xf32> -> vector<64x64xf32>
    %4 = arith.mulf %1, %1 : vector<3x64xf32>
    %cst_5 = arith.constant dense<0.000000e+00> : vector<64xf32>
    %5 = vector.multi_reduction <add>, %4, %cst_5 [0] : vector<3x64xf32> to vector<64xf32>
    %6 = vector.shape_cast %5 : vector<64xf32> to vector<1x64xf32>
    %cst_6 = arith.constant 2.000000e+00 : f32
    %7 = vector.broadcast %cst_6 : f32 to vector<64x64xf32>
    %8 = arith.mulf %7, %3 : vector<64x64xf32>
    %9 = vector.broadcast %6 : vector<1x64xf32> to vector<64x64xf32>
    %10 = arith.subf %9, %8 : vector<64x64xf32>
    %c64_i32 = arith.constant 64 : i32
    %11 = arith.muli %arg0, %c64_i32 : i32
    %12 = tpu.iota {dimensions = array<i32: 0>} : vector<64x64xi32>
    %13 = vector.broadcast %11 : i32 to vector<64x64xi32>
    %14 = arith.addi %12, %13 : vector<64x64xi32>
    %15 = tpu.iota {dimensions = array<i32: 1>} : vector<64x64xi32>
    %16 = arith.cmpi eq, %14, %15 : vector<64x64xi32>
    %cst_7 = arith.constant 0x7F800000 : f32
    %17 = vector.broadcast %cst_7 : f32 to vector<64x64xf32>
    %18 = arith.select %16, %17, %10 : vector<64x64xi1>, vector<64x64xf32>
    %19 = arith.truncf %0 : vector<64x3xf32> to vector<64x3xbf16>
    %c0_8 = arith.constant 0 : index
    %c0_9 = arith.constant 0 : index
    %20 = vector.load %arg4[%c0_8, %c0_9] : memref<3x64xbf16, #tpu.memory_space<vmem>>, vector<3x64xbf16>
    %cst_10 = arith.constant dense<0.000000e+00> : vector<64x64xf32>
    %21 = tpu.matmul %19, %20, %cst_10 {dimension_numbers = #tpu.dot_dimension_numbers<[1], [0], [0], [1], [0, 0, 1, 1], [], []>} : vector<64x3xbf16>, vector<3x64xbf16>, vector<64x64xf32> -> vector<64x64xf32>
    %c0_11 = arith.constant 0 : index
    %c0_12 = arith.constant 0 : index
    %22 = vector.load %arg6[%c0_11, %c0_12] : memref<1x64xf32, #tpu.memory_space<vmem>>, vector<1x64xf32>
    %23 = vector.broadcast %22 : vector<1x64xf32> to vector<64x64xf32>
    %24 = arith.addf %21, %23 : vector<64x64xf32>
    %25 = arith.truncf %2 : vector<64x3xf32> to vector<64x3xbf16>
    %c0_13 = arith.constant 0 : index
    %c0_14 = arith.constant 0 : index
    %26 = vector.load %arg5[%c0_13, %c0_14] : memref<3x64xbf16, #tpu.memory_space<vmem>>, vector<3x64xbf16>
    %cst_15 = arith.constant dense<0.000000e+00> : vector<64x64xf32>
    %27 = tpu.matmul %25, %26, %cst_15 {dimension_numbers = #tpu.dot_dimension_numbers<[1], [0], [0], [1], [0, 0, 1, 1], [], []>} : vector<64x3xbf16>, vector<3x64xbf16>, vector<64x64xf32> -> vector<64x64xf32>
    %c0_16 = arith.constant 0 : index
    %c0_17 = arith.constant 0 : index
    %28 = vector.load %arg7[%c0_16, %c0_17] : memref<64x64xbf16, #tpu.memory_space<vmem>>, vector<64x64xbf16>
    %c0_18 = arith.constant 0 : index
    %c0_19 = arith.constant 0 : index
    %29 = vector.load %arg8[%c0_18, %c0_19] : memref<1x64xf32, #tpu.memory_space<vmem>>, vector<1x64xf32>
    %cst_20 = arith.constant dense<0x7F800000> : vector<64xf32>
    %30 = vector.multi_reduction <minimumf>, %18, %cst_20 [1] : vector<64x64xf32> to vector<64xf32>
    %31 = vector.shape_cast %30 : vector<64xf32> to vector<64x1xf32>
    %32 = vector.broadcast %31 : vector<64x1xf32> to vector<64x64xf32>
    %33 = arith.cmpf ole, %18, %32 : vector<64x64xf32>
    %c64_i32_21 = arith.constant 64 : i32
    %34 = vector.broadcast %c64_i32_21 : i32 to vector<64x64xi32>
    %35 = arith.select %33, %15, %34 : vector<64x64xi1>, vector<64x64xi32>
    %cst_22 = arith.constant dense<2147483647> : vector<64xi32>
    %36 = vector.multi_reduction <minsi>, %35, %cst_22 [1] : vector<64x64xi32> to vector<64xi32>
    %37 = vector.shape_cast %36 : vector<64xi32> to vector<64x1xi32>
    %38 = vector.broadcast %37 : vector<64x1xi32> to vector<64x64xi32>
    %39 = arith.cmpi eq, %15, %38 : vector<64x64xi32>
    %40 = arith.extui %39 : vector<64x64xi1> to vector<64x64xi32>
    %41 = arith.sitofp %40 : vector<64x64xi32> to vector<64x64xf32>
    %cst_23 = arith.constant dense<0.000000e+00> : vector<64x64xf32>
    %42 = tpu.matmul %41, %27, %cst_23 {dimension_numbers = #tpu.dot_dimension_numbers<[1], [0], [0], [1], [0, 0, 1, 1], [], []>} : vector<64x64xf32>, vector<64x64xf32>, vector<64x64xf32> -> vector<64x64xf32>
    %43 = arith.addf %24, %42 : vector<64x64xf32>
    %cst_24 = arith.constant 0.000000e+00 : f32
    %44 = vector.broadcast %cst_24 : f32 to vector<64x64xf32>
    %45 = arith.maximumf %43, %44 : vector<64x64xf32>
    %46 = arith.truncf %45 : vector<64x64xf32> to vector<64x64xbf16>
    %cst_25 = arith.constant dense<0.000000e+00> : vector<64x64xf32>
    %47 = tpu.matmul %46, %28, %cst_25 {dimension_numbers = #tpu.dot_dimension_numbers<[1], [0], [0], [1], [0, 0, 1, 1], [], []>} : vector<64x64xbf16>, vector<64x64xbf16>, vector<64x64xf32> -> vector<64x64xf32>
    %48 = vector.broadcast %29 : vector<1x64xf32> to vector<64x64xf32>
    %49 = arith.addf %47, %48 : vector<64x64xf32>
    %50 = vector.broadcast %37 : vector<64x1xi32> to vector<64x64xi32>
    %51 = arith.cmpi eq, %15, %50 : vector<64x64xi32>
    %cst_26 = arith.constant 0x7F800000 : f32
    %52 = vector.broadcast %cst_26 : f32 to vector<64x64xf32>
    %53 = arith.select %51, %52, %18 : vector<64x64xi1>, vector<64x64xf32>
    %cst_27 = arith.constant dense<0x7F800000> : vector<64xf32>
    %54 = vector.multi_reduction <minimumf>, %53, %cst_27 [1] : vector<64x64xf32> to vector<64xf32>
    %55 = vector.shape_cast %54 : vector<64xf32> to vector<64x1xf32>
    %56 = vector.broadcast %55 : vector<64x1xf32> to vector<64x64xf32>
    %57 = arith.cmpf ole, %53, %56 : vector<64x64xf32>
    %c64_i32_28 = arith.constant 64 : i32
    %58 = vector.broadcast %c64_i32_28 : i32 to vector<64x64xi32>
    %59 = arith.select %57, %15, %58 : vector<64x64xi1>, vector<64x64xi32>
    %cst_29 = arith.constant dense<2147483647> : vector<64xi32>
    %60 = vector.multi_reduction <minsi>, %59, %cst_29 [1] : vector<64x64xi32> to vector<64xi32>
    %61 = vector.shape_cast %60 : vector<64xi32> to vector<64x1xi32>
    %62 = vector.broadcast %61 : vector<64x1xi32> to vector<64x64xi32>
    %63 = arith.cmpi eq, %15, %62 : vector<64x64xi32>
    %64 = arith.extui %63 : vector<64x64xi1> to vector<64x64xi32>
    %65 = arith.sitofp %64 : vector<64x64xi32> to vector<64x64xf32>
    %cst_30 = arith.constant dense<0.000000e+00> : vector<64x64xf32>
    %66 = tpu.matmul %65, %27, %cst_30 {dimension_numbers = #tpu.dot_dimension_numbers<[1], [0], [0], [1], [0, 0, 1, 1], [], []>} : vector<64x64xf32>, vector<64x64xf32>, vector<64x64xf32> -> vector<64x64xf32>
    %67 = arith.addf %24, %66 : vector<64x64xf32>
    %cst_31 = arith.constant 0.000000e+00 : f32
    %68 = vector.broadcast %cst_31 : f32 to vector<64x64xf32>
    %69 = arith.maximumf %67, %68 : vector<64x64xf32>
    %70 = arith.truncf %69 : vector<64x64xf32> to vector<64x64xbf16>
    %cst_32 = arith.constant dense<0.000000e+00> : vector<64x64xf32>
    %71 = tpu.matmul %70, %28, %cst_32 {dimension_numbers = #tpu.dot_dimension_numbers<[1], [0], [0], [1], [0, 0, 1, 1], [], []>} : vector<64x64xbf16>, vector<64x64xbf16>, vector<64x64xf32> -> vector<64x64xf32>
    %72 = vector.broadcast %29 : vector<1x64xf32> to vector<64x64xf32>
    %73 = arith.addf %71, %72 : vector<64x64xf32>
    %74 = arith.maximumf %49, %73 : vector<64x64xf32>
    %75 = vector.broadcast %61 : vector<64x1xi32> to vector<64x64xi32>
    %76 = arith.cmpi eq, %15, %75 : vector<64x64xi32>
    %cst_33 = arith.constant 0x7F800000 : f32
    %77 = vector.broadcast %cst_33 : f32 to vector<64x64xf32>
    %78 = arith.select %76, %77, %53 : vector<64x64xi1>, vector<64x64xf32>
    %cst_34 = arith.constant dense<0x7F800000> : vector<64xf32>
    %79 = vector.multi_reduction <minimumf>, %78, %cst_34 [1] : vector<64x64xf32> to vector<64xf32>
    %80 = vector.shape_cast %79 : vector<64xf32> to vector<64x1xf32>
    %81 = vector.broadcast %80 : vector<64x1xf32> to vector<64x64xf32>
    %82 = arith.cmpf ole, %78, %81 : vector<64x64xf32>
    %c64_i32_35 = arith.constant 64 : i32
    %83 = vector.broadcast %c64_i32_35 : i32 to vector<64x64xi32>
    %84 = arith.select %82, %15, %83 : vector<64x64xi1>, vector<64x64xi32>
    %cst_36 = arith.constant dense<2147483647> : vector<64xi32>
    %85 = vector.multi_reduction <minsi>, %84, %cst_36 [1] : vector<64x64xi32> to vector<64xi32>
    %86 = vector.shape_cast %85 : vector<64xi32> to vector<64x1xi32>
    %87 = vector.broadcast %86 : vector<64x1xi32> to vector<64x64xi32>
    %88 = arith.cmpi eq, %15, %87 : vector<64x64xi32>
    %89 = arith.extui %88 : vector<64x64xi1> to vector<64x64xi32>
    %90 = arith.sitofp %89 : vector<64x64xi32> to vector<64x64xf32>
    %cst_37 = arith.constant dense<0.000000e+00> : vector<64x64xf32>
    %91 = tpu.matmul %90, %27, %cst_37 {dimension_numbers = #tpu.dot_dimension_numbers<[1], [0], [0], [1], [0, 0, 1, 1], [], []>} : vector<64x64xf32>, vector<64x64xf32>, vector<64x64xf32> -> vector<64x64xf32>
    %92 = arith.addf %24, %91 : vector<64x64xf32>
    %cst_38 = arith.constant 0.000000e+00 : f32
    %93 = vector.broadcast %cst_38 : f32 to vector<64x64xf32>
    %94 = arith.maximumf %92, %93 : vector<64x64xf32>
    %95 = arith.truncf %94 : vector<64x64xf32> to vector<64x64xbf16>
    %cst_39 = arith.constant dense<0.000000e+00> : vector<64x64xf32>
    %96 = tpu.matmul %95, %28, %cst_39 {dimension_numbers = #tpu.dot_dimension_numbers<[1], [0], [0], [1], [0, 0, 1, 1], [], []>} : vector<64x64xbf16>, vector<64x64xbf16>, vector<64x64xf32> -> vector<64x64xf32>
    %97 = vector.broadcast %29 : vector<1x64xf32> to vector<64x64xf32>
    %98 = arith.addf %96, %97 : vector<64x64xf32>
    %99 = arith.maximumf %74, %98 : vector<64x64xf32>
    %100 = vector.broadcast %86 : vector<64x1xi32> to vector<64x64xi32>
    %101 = arith.cmpi eq, %15, %100 : vector<64x64xi32>
    %cst_40 = arith.constant 0x7F800000 : f32
    %102 = vector.broadcast %cst_40 : f32 to vector<64x64xf32>
    %103 = arith.select %101, %102, %78 : vector<64x64xi1>, vector<64x64xf32>
    %cst_41 = arith.constant dense<0x7F800000> : vector<64xf32>
    %104 = vector.multi_reduction <minimumf>, %103, %cst_41 [1] : vector<64x64xf32> to vector<64xf32>
    %105 = vector.shape_cast %104 : vector<64xf32> to vector<64x1xf32>
    %106 = vector.broadcast %105 : vector<64x1xf32> to vector<64x64xf32>
    %107 = arith.cmpf ole, %103, %106 : vector<64x64xf32>
    %c64_i32_42 = arith.constant 64 : i32
    %108 = vector.broadcast %c64_i32_42 : i32 to vector<64x64xi32>
    %109 = arith.select %107, %15, %108 : vector<64x64xi1>, vector<64x64xi32>
    %cst_43 = arith.constant dense<2147483647> : vector<64xi32>
    %110 = vector.multi_reduction <minsi>, %109, %cst_43 [1] : vector<64x64xi32> to vector<64xi32>
    %111 = vector.shape_cast %110 : vector<64xi32> to vector<64x1xi32>
    %112 = vector.broadcast %111 : vector<64x1xi32> to vector<64x64xi32>
    %113 = arith.cmpi eq, %15, %112 : vector<64x64xi32>
    %114 = arith.extui %113 : vector<64x64xi1> to vector<64x64xi32>
    %115 = arith.sitofp %114 : vector<64x64xi32> to vector<64x64xf32>
    %cst_44 = arith.constant dense<0.000000e+00> : vector<64x64xf32>
    %116 = tpu.matmul %115, %27, %cst_44 {dimension_numbers = #tpu.dot_dimension_numbers<[1], [0], [0], [1], [0, 0, 1, 1], [], []>} : vector<64x64xf32>, vector<64x64xf32>, vector<64x64xf32> -> vector<64x64xf32>
    %117 = arith.addf %24, %116 : vector<64x64xf32>
    %cst_45 = arith.constant 0.000000e+00 : f32
    %118 = vector.broadcast %cst_45 : f32 to vector<64x64xf32>
    %119 = arith.maximumf %117, %118 : vector<64x64xf32>
    %120 = arith.truncf %119 : vector<64x64xf32> to vector<64x64xbf16>
    %cst_46 = arith.constant dense<0.000000e+00> : vector<64x64xf32>
    %121 = tpu.matmul %120, %28, %cst_46 {dimension_numbers = #tpu.dot_dimension_numbers<[1], [0], [0], [1], [0, 0, 1, 1], [], []>} : vector<64x64xbf16>, vector<64x64xbf16>, vector<64x64xf32> -> vector<64x64xf32>
    %122 = vector.broadcast %29 : vector<1x64xf32> to vector<64x64xf32>
    %123 = arith.addf %121, %122 : vector<64x64xf32>
    %124 = arith.maximumf %99, %123 : vector<64x64xf32>
    %125 = vector.broadcast %111 : vector<64x1xi32> to vector<64x64xi32>
    %126 = arith.cmpi eq, %15, %125 : vector<64x64xi32>
    %cst_47 = arith.constant 0x7F800000 : f32
    %127 = vector.broadcast %cst_47 : f32 to vector<64x64xf32>
    %128 = arith.select %126, %127, %103 : vector<64x64xi1>, vector<64x64xf32>
    %cst_48 = arith.constant dense<0x7F800000> : vector<64xf32>
    %129 = vector.multi_reduction <minimumf>, %128, %cst_48 [1] : vector<64x64xf32> to vector<64xf32>
    %130 = vector.shape_cast %129 : vector<64xf32> to vector<64x1xf32>
    %131 = vector.broadcast %130 : vector<64x1xf32> to vector<64x64xf32>
    %132 = arith.cmpf ole, %128, %131 : vector<64x64xf32>
    %c64_i32_49 = arith.constant 64 : i32
    %133 = vector.broadcast %c64_i32_49 : i32 to vector<64x64xi32>
    %134 = arith.select %132, %15, %133 : vector<64x64xi1>, vector<64x64xi32>
    %cst_50 = arith.constant dense<2147483647> : vector<64xi32>
    %135 = vector.multi_reduction <minsi>, %134, %cst_50 [1] : vector<64x64xi32> to vector<64xi32>
    %136 = vector.shape_cast %135 : vector<64xi32> to vector<64x1xi32>
    %137 = vector.broadcast %136 : vector<64x1xi32> to vector<64x64xi32>
    %138 = arith.cmpi eq, %15, %137 : vector<64x64xi32>
    %139 = arith.extui %138 : vector<64x64xi1> to vector<64x64xi32>
    %140 = arith.sitofp %139 : vector<64x64xi32> to vector<64x64xf32>
    %cst_51 = arith.constant dense<0.000000e+00> : vector<64x64xf32>
    %141 = tpu.matmul %140, %27, %cst_51 {dimension_numbers = #tpu.dot_dimension_numbers<[1], [0], [0], [1], [0, 0, 1, 1], [], []>} : vector<64x64xf32>, vector<64x64xf32>, vector<64x64xf32> -> vector<64x64xf32>
    %142 = arith.addf %24, %141 : vector<64x64xf32>
    %cst_52 = arith.constant 0.000000e+00 : f32
    %143 = vector.broadcast %cst_52 : f32 to vector<64x64xf32>
    %144 = arith.maximumf %142, %143 : vector<64x64xf32>
    %145 = arith.truncf %144 : vector<64x64xf32> to vector<64x64xbf16>
    %cst_53 = arith.constant dense<0.000000e+00> : vector<64x64xf32>
    %146 = tpu.matmul %145, %28, %cst_53 {dimension_numbers = #tpu.dot_dimension_numbers<[1], [0], [0], [1], [0, 0, 1, 1], [], []>} : vector<64x64xbf16>, vector<64x64xbf16>, vector<64x64xf32> -> vector<64x64xf32>
    %147 = vector.broadcast %29 : vector<1x64xf32> to vector<64x64xf32>
    %148 = arith.addf %146, %147 : vector<64x64xf32>
    %149 = arith.maximumf %124, %148 : vector<64x64xf32>
    %150 = vector.broadcast %136 : vector<64x1xi32> to vector<64x64xi32>
    %151 = arith.cmpi eq, %15, %150 : vector<64x64xi32>
    %cst_54 = arith.constant 0x7F800000 : f32
    %152 = vector.broadcast %cst_54 : f32 to vector<64x64xf32>
    %153 = arith.select %151, %152, %128 : vector<64x64xi1>, vector<64x64xf32>
    %cst_55 = arith.constant dense<0x7F800000> : vector<64xf32>
    %154 = vector.multi_reduction <minimumf>, %153, %cst_55 [1] : vector<64x64xf32> to vector<64xf32>
    %155 = vector.shape_cast %154 : vector<64xf32> to vector<64x1xf32>
    %156 = vector.broadcast %155 : vector<64x1xf32> to vector<64x64xf32>
    %157 = arith.cmpf ole, %153, %156 : vector<64x64xf32>
    %c64_i32_56 = arith.constant 64 : i32
    %158 = vector.broadcast %c64_i32_56 : i32 to vector<64x64xi32>
    %159 = arith.select %157, %15, %158 : vector<64x64xi1>, vector<64x64xi32>
    %cst_57 = arith.constant dense<2147483647> : vector<64xi32>
    %160 = vector.multi_reduction <minsi>, %159, %cst_57 [1] : vector<64x64xi32> to vector<64xi32>
    %161 = vector.shape_cast %160 : vector<64xi32> to vector<64x1xi32>
    %162 = vector.broadcast %161 : vector<64x1xi32> to vector<64x64xi32>
    %163 = arith.cmpi eq, %15, %162 : vector<64x64xi32>
    %164 = arith.extui %163 : vector<64x64xi1> to vector<64x64xi32>
    %165 = arith.sitofp %164 : vector<64x64xi32> to vector<64x64xf32>
    %cst_58 = arith.constant dense<0.000000e+00> : vector<64x64xf32>
    %166 = tpu.matmul %165, %27, %cst_58 {dimension_numbers = #tpu.dot_dimension_numbers<[1], [0], [0], [1], [0, 0, 1, 1], [], []>} : vector<64x64xf32>, vector<64x64xf32>, vector<64x64xf32> -> vector<64x64xf32>
    %167 = arith.addf %24, %166 : vector<64x64xf32>
    %cst_59 = arith.constant 0.000000e+00 : f32
    %168 = vector.broadcast %cst_59 : f32 to vector<64x64xf32>
    %169 = arith.maximumf %167, %168 : vector<64x64xf32>
    %170 = arith.truncf %169 : vector<64x64xf32> to vector<64x64xbf16>
    %cst_60 = arith.constant dense<0.000000e+00> : vector<64x64xf32>
    %171 = tpu.matmul %170, %28, %cst_60 {dimension_numbers = #tpu.dot_dimension_numbers<[1], [0], [0], [1], [0, 0, 1, 1], [], []>} : vector<64x64xbf16>, vector<64x64xbf16>, vector<64x64xf32> -> vector<64x64xf32>
    %172 = vector.broadcast %29 : vector<1x64xf32> to vector<64x64xf32>
    %173 = arith.addf %171, %172 : vector<64x64xf32>
    %174 = arith.maximumf %149, %173 : vector<64x64xf32>
    %175 = vector.broadcast %161 : vector<64x1xi32> to vector<64x64xi32>
    %176 = arith.cmpi eq, %15, %175 : vector<64x64xi32>
    %cst_61 = arith.constant 0x7F800000 : f32
    %177 = vector.broadcast %cst_61 : f32 to vector<64x64xf32>
    %178 = arith.select %176, %177, %153 : vector<64x64xi1>, vector<64x64xf32>
    %cst_62 = arith.constant dense<0x7F800000> : vector<64xf32>
    %179 = vector.multi_reduction <minimumf>, %178, %cst_62 [1] : vector<64x64xf32> to vector<64xf32>
    %180 = vector.shape_cast %179 : vector<64xf32> to vector<64x1xf32>
    %181 = vector.broadcast %180 : vector<64x1xf32> to vector<64x64xf32>
    %182 = arith.cmpf ole, %178, %181 : vector<64x64xf32>
    %c64_i32_63 = arith.constant 64 : i32
    %183 = vector.broadcast %c64_i32_63 : i32 to vector<64x64xi32>
    %184 = arith.select %182, %15, %183 : vector<64x64xi1>, vector<64x64xi32>
    %cst_64 = arith.constant dense<2147483647> : vector<64xi32>
    %185 = vector.multi_reduction <minsi>, %184, %cst_64 [1] : vector<64x64xi32> to vector<64xi32>
    %186 = vector.shape_cast %185 : vector<64xi32> to vector<64x1xi32>
    %187 = vector.broadcast %186 : vector<64x1xi32> to vector<64x64xi32>
    %188 = arith.cmpi eq, %15, %187 : vector<64x64xi32>
    %189 = arith.extui %188 : vector<64x64xi1> to vector<64x64xi32>
    %190 = arith.sitofp %189 : vector<64x64xi32> to vector<64x64xf32>
    %cst_65 = arith.constant dense<0.000000e+00> : vector<64x64xf32>
    %191 = tpu.matmul %190, %27, %cst_65 {dimension_numbers = #tpu.dot_dimension_numbers<[1], [0], [0], [1], [0, 0, 1, 1], [], []>} : vector<64x64xf32>, vector<64x64xf32>, vector<64x64xf32> -> vector<64x64xf32>
    %192 = arith.addf %24, %191 : vector<64x64xf32>
    %cst_66 = arith.constant 0.000000e+00 : f32
    %193 = vector.broadcast %cst_66 : f32 to vector<64x64xf32>
    %194 = arith.maximumf %192, %193 : vector<64x64xf32>
    %195 = arith.truncf %194 : vector<64x64xf32> to vector<64x64xbf16>
    %cst_67 = arith.constant dense<0.000000e+00> : vector<64x64xf32>
    %196 = tpu.matmul %195, %28, %cst_67 {dimension_numbers = #tpu.dot_dimension_numbers<[1], [0], [0], [1], [0, 0, 1, 1], [], []>} : vector<64x64xbf16>, vector<64x64xbf16>, vector<64x64xf32> -> vector<64x64xf32>
    %197 = vector.broadcast %29 : vector<1x64xf32> to vector<64x64xf32>
    %198 = arith.addf %196, %197 : vector<64x64xf32>
    %199 = arith.maximumf %174, %198 : vector<64x64xf32>
    %200 = vector.broadcast %186 : vector<64x1xi32> to vector<64x64xi32>
    %201 = arith.cmpi eq, %15, %200 : vector<64x64xi32>
    %cst_68 = arith.constant 0x7F800000 : f32
    %202 = vector.broadcast %cst_68 : f32 to vector<64x64xf32>
    %203 = arith.select %201, %202, %178 : vector<64x64xi1>, vector<64x64xf32>
    %cst_69 = arith.constant dense<0x7F800000> : vector<64xf32>
    %204 = vector.multi_reduction <minimumf>, %203, %cst_69 [1] : vector<64x64xf32> to vector<64xf32>
    %205 = vector.shape_cast %204 : vector<64xf32> to vector<64x1xf32>
    %206 = vector.broadcast %205 : vector<64x1xf32> to vector<64x64xf32>
    %207 = arith.cmpf ole, %203, %206 : vector<64x64xf32>
    %c64_i32_70 = arith.constant 64 : i32
    %208 = vector.broadcast %c64_i32_70 : i32 to vector<64x64xi32>
    %209 = arith.select %207, %15, %208 : vector<64x64xi1>, vector<64x64xi32>
    %cst_71 = arith.constant dense<2147483647> : vector<64xi32>
    %210 = vector.multi_reduction <minsi>, %209, %cst_71 [1] : vector<64x64xi32> to vector<64xi32>
    %211 = vector.shape_cast %210 : vector<64xi32> to vector<64x1xi32>
    %212 = vector.broadcast %211 : vector<64x1xi32> to vector<64x64xi32>
    %213 = arith.cmpi eq, %15, %212 : vector<64x64xi32>
    %214 = arith.extui %213 : vector<64x64xi1> to vector<64x64xi32>
    %215 = arith.sitofp %214 : vector<64x64xi32> to vector<64x64xf32>
    %cst_72 = arith.constant dense<0.000000e+00> : vector<64x64xf32>
    %216 = tpu.matmul %215, %27, %cst_72 {dimension_numbers = #tpu.dot_dimension_numbers<[1], [0], [0], [1], [0, 0, 1, 1], [], []>} : vector<64x64xf32>, vector<64x64xf32>, vector<64x64xf32> -> vector<64x64xf32>
    %217 = arith.addf %24, %216 : vector<64x64xf32>
    %cst_73 = arith.constant 0.000000e+00 : f32
    %218 = vector.broadcast %cst_73 : f32 to vector<64x64xf32>
    %219 = arith.maximumf %217, %218 : vector<64x64xf32>
    %220 = arith.truncf %219 : vector<64x64xf32> to vector<64x64xbf16>
    %cst_74 = arith.constant dense<0.000000e+00> : vector<64x64xf32>
    %221 = tpu.matmul %220, %28, %cst_74 {dimension_numbers = #tpu.dot_dimension_numbers<[1], [0], [0], [1], [0, 0, 1, 1], [], []>} : vector<64x64xbf16>, vector<64x64xbf16>, vector<64x64xf32> -> vector<64x64xf32>
    %222 = vector.broadcast %29 : vector<1x64xf32> to vector<64x64xf32>
    %223 = arith.addf %221, %222 : vector<64x64xf32>
    %224 = arith.maximumf %199, %223 : vector<64x64xf32>
    %225 = vector.broadcast %211 : vector<64x1xi32> to vector<64x64xi32>
    %226 = arith.cmpi eq, %15, %225 : vector<64x64xi32>
    %cst_75 = arith.constant 0x7F800000 : f32
    %227 = vector.broadcast %cst_75 : f32 to vector<64x64xf32>
    %228 = arith.select %226, %227, %203 : vector<64x64xi1>, vector<64x64xf32>
    %cst_76 = arith.constant dense<0x7F800000> : vector<64xf32>
    %229 = vector.multi_reduction <minimumf>, %228, %cst_76 [1] : vector<64x64xf32> to vector<64xf32>
    %230 = vector.shape_cast %229 : vector<64xf32> to vector<64x1xf32>
    %231 = vector.broadcast %230 : vector<64x1xf32> to vector<64x64xf32>
    %232 = arith.cmpf ole, %228, %231 : vector<64x64xf32>
    %c64_i32_77 = arith.constant 64 : i32
    %233 = vector.broadcast %c64_i32_77 : i32 to vector<64x64xi32>
    %234 = arith.select %232, %15, %233 : vector<64x64xi1>, vector<64x64xi32>
    %cst_78 = arith.constant dense<2147483647> : vector<64xi32>
    %235 = vector.multi_reduction <minsi>, %234, %cst_78 [1] : vector<64x64xi32> to vector<64xi32>
    %236 = vector.shape_cast %235 : vector<64xi32> to vector<64x1xi32>
    %237 = vector.broadcast %236 : vector<64x1xi32> to vector<64x64xi32>
    %238 = arith.cmpi eq, %15, %237 : vector<64x64xi32>
    %239 = arith.extui %238 : vector<64x64xi1> to vector<64x64xi32>
    %240 = arith.sitofp %239 : vector<64x64xi32> to vector<64x64xf32>
    %cst_79 = arith.constant dense<0.000000e+00> : vector<64x64xf32>
    %241 = tpu.matmul %240, %27, %cst_79 {dimension_numbers = #tpu.dot_dimension_numbers<[1], [0], [0], [1], [0, 0, 1, 1], [], []>} : vector<64x64xf32>, vector<64x64xf32>, vector<64x64xf32> -> vector<64x64xf32>
    %242 = arith.addf %24, %241 : vector<64x64xf32>
    %cst_80 = arith.constant 0.000000e+00 : f32
    %243 = vector.broadcast %cst_80 : f32 to vector<64x64xf32>
    %244 = arith.maximumf %242, %243 : vector<64x64xf32>
    %245 = arith.truncf %244 : vector<64x64xf32> to vector<64x64xbf16>
    %cst_81 = arith.constant dense<0.000000e+00> : vector<64x64xf32>
    %246 = tpu.matmul %245, %28, %cst_81 {dimension_numbers = #tpu.dot_dimension_numbers<[1], [0], [0], [1], [0, 0, 1, 1], [], []>} : vector<64x64xbf16>, vector<64x64xbf16>, vector<64x64xf32> -> vector<64x64xf32>
    %247 = vector.broadcast %29 : vector<1x64xf32> to vector<64x64xf32>
    %248 = arith.addf %246, %247 : vector<64x64xf32>
    %249 = arith.maximumf %224, %248 : vector<64x64xf32>
    %250 = vector.broadcast %236 : vector<64x1xi32> to vector<64x64xi32>
    %251 = arith.cmpi eq, %15, %250 : vector<64x64xi32>
    %cst_82 = arith.constant 0x7F800000 : f32
    %252 = vector.broadcast %cst_82 : f32 to vector<64x64xf32>
    %253 = arith.select %251, %252, %228 : vector<64x64xi1>, vector<64x64xf32>
    %cst_83 = arith.constant dense<0x7F800000> : vector<64xf32>
    %254 = vector.multi_reduction <minimumf>, %253, %cst_83 [1] : vector<64x64xf32> to vector<64xf32>
    %255 = vector.shape_cast %254 : vector<64xf32> to vector<64x1xf32>
    %256 = vector.broadcast %255 : vector<64x1xf32> to vector<64x64xf32>
    %257 = arith.cmpf ole, %253, %256 : vector<64x64xf32>
    %c64_i32_84 = arith.constant 64 : i32
    %258 = vector.broadcast %c64_i32_84 : i32 to vector<64x64xi32>
    %259 = arith.select %257, %15, %258 : vector<64x64xi1>, vector<64x64xi32>
    %cst_85 = arith.constant dense<2147483647> : vector<64xi32>
    %260 = vector.multi_reduction <minsi>, %259, %cst_85 [1] : vector<64x64xi32> to vector<64xi32>
    %261 = vector.shape_cast %260 : vector<64xi32> to vector<64x1xi32>
    %262 = vector.broadcast %261 : vector<64x1xi32> to vector<64x64xi32>
    %263 = arith.cmpi eq, %15, %262 : vector<64x64xi32>
    %264 = arith.extui %263 : vector<64x64xi1> to vector<64x64xi32>
    %265 = arith.sitofp %264 : vector<64x64xi32> to vector<64x64xf32>
    %cst_86 = arith.constant dense<0.000000e+00> : vector<64x64xf32>
    %266 = tpu.matmul %265, %27, %cst_86 {dimension_numbers = #tpu.dot_dimension_numbers<[1], [0], [0], [1], [0, 0, 1, 1], [], []>} : vector<64x64xf32>, vector<64x64xf32>, vector<64x64xf32> -> vector<64x64xf32>
    %267 = arith.addf %24, %266 : vector<64x64xf32>
    %cst_87 = arith.constant 0.000000e+00 : f32
    %268 = vector.broadcast %cst_87 : f32 to vector<64x64xf32>
    %269 = arith.maximumf %267, %268 : vector<64x64xf32>
    %270 = arith.truncf %269 : vector<64x64xf32> to vector<64x64xbf16>
    %cst_88 = arith.constant dense<0.000000e+00> : vector<64x64xf32>
    %271 = tpu.matmul %270, %28, %cst_88 {dimension_numbers = #tpu.dot_dimension_numbers<[1], [0], [0], [1], [0, 0, 1, 1], [], []>} : vector<64x64xbf16>, vector<64x64xbf16>, vector<64x64xf32> -> vector<64x64xf32>
    %272 = vector.broadcast %29 : vector<1x64xf32> to vector<64x64xf32>
    %273 = arith.addf %271, %272 : vector<64x64xf32>
    %274 = arith.maximumf %249, %273 : vector<64x64xf32>
    %275 = vector.broadcast %261 : vector<64x1xi32> to vector<64x64xi32>
    %276 = arith.cmpi eq, %15, %275 : vector<64x64xi32>
    %cst_89 = arith.constant 0x7F800000 : f32
    %277 = vector.broadcast %cst_89 : f32 to vector<64x64xf32>
    %278 = arith.select %276, %277, %253 : vector<64x64xi1>, vector<64x64xf32>
    %cst_90 = arith.constant dense<0x7F800000> : vector<64xf32>
    %279 = vector.multi_reduction <minimumf>, %278, %cst_90 [1] : vector<64x64xf32> to vector<64xf32>
    %280 = vector.shape_cast %279 : vector<64xf32> to vector<64x1xf32>
    %281 = vector.broadcast %280 : vector<64x1xf32> to vector<64x64xf32>
    %282 = arith.cmpf ole, %278, %281 : vector<64x64xf32>
    %c64_i32_91 = arith.constant 64 : i32
    %283 = vector.broadcast %c64_i32_91 : i32 to vector<64x64xi32>
    %284 = arith.select %282, %15, %283 : vector<64x64xi1>, vector<64x64xi32>
    %cst_92 = arith.constant dense<2147483647> : vector<64xi32>
    %285 = vector.multi_reduction <minsi>, %284, %cst_92 [1] : vector<64x64xi32> to vector<64xi32>
    %286 = vector.shape_cast %285 : vector<64xi32> to vector<64x1xi32>
    %287 = vector.broadcast %286 : vector<64x1xi32> to vector<64x64xi32>
    %288 = arith.cmpi eq, %15, %287 : vector<64x64xi32>
    %289 = arith.extui %288 : vector<64x64xi1> to vector<64x64xi32>
    %290 = arith.sitofp %289 : vector<64x64xi32> to vector<64x64xf32>
    %cst_93 = arith.constant dense<0.000000e+00> : vector<64x64xf32>
    %291 = tpu.matmul %290, %27, %cst_93 {dimension_numbers = #tpu.dot_dimension_numbers<[1], [0], [0], [1], [0, 0, 1, 1], [], []>} : vector<64x64xf32>, vector<64x64xf32>, vector<64x64xf32> -> vector<64x64xf32>
    %292 = arith.addf %24, %291 : vector<64x64xf32>
    %cst_94 = arith.constant 0.000000e+00 : f32
    %293 = vector.broadcast %cst_94 : f32 to vector<64x64xf32>
    %294 = arith.maximumf %292, %293 : vector<64x64xf32>
    %295 = arith.truncf %294 : vector<64x64xf32> to vector<64x64xbf16>
    %cst_95 = arith.constant dense<0.000000e+00> : vector<64x64xf32>
    %296 = tpu.matmul %295, %28, %cst_95 {dimension_numbers = #tpu.dot_dimension_numbers<[1], [0], [0], [1], [0, 0, 1, 1], [], []>} : vector<64x64xbf16>, vector<64x64xbf16>, vector<64x64xf32> -> vector<64x64xf32>
    %297 = vector.broadcast %29 : vector<1x64xf32> to vector<64x64xf32>
    %298 = arith.addf %296, %297 : vector<64x64xf32>
    %299 = arith.maximumf %274, %298 : vector<64x64xf32>
    %300 = vector.broadcast %286 : vector<64x1xi32> to vector<64x64xi32>
    %301 = arith.cmpi eq, %15, %300 : vector<64x64xi32>
    %cst_96 = arith.constant 0x7F800000 : f32
    %302 = vector.broadcast %cst_96 : f32 to vector<64x64xf32>
    %303 = arith.select %301, %302, %278 : vector<64x64xi1>, vector<64x64xf32>
    %cst_97 = arith.constant dense<0x7F800000> : vector<64xf32>
    %304 = vector.multi_reduction <minimumf>, %303, %cst_97 [1] : vector<64x64xf32> to vector<64xf32>
    %305 = vector.shape_cast %304 : vector<64xf32> to vector<64x1xf32>
    %306 = vector.broadcast %305 : vector<64x1xf32> to vector<64x64xf32>
    %307 = arith.cmpf ole, %303, %306 : vector<64x64xf32>
    %c64_i32_98 = arith.constant 64 : i32
    %308 = vector.broadcast %c64_i32_98 : i32 to vector<64x64xi32>
    %309 = arith.select %307, %15, %308 : vector<64x64xi1>, vector<64x64xi32>
    %cst_99 = arith.constant dense<2147483647> : vector<64xi32>
    %310 = vector.multi_reduction <minsi>, %309, %cst_99 [1] : vector<64x64xi32> to vector<64xi32>
    %311 = vector.shape_cast %310 : vector<64xi32> to vector<64x1xi32>
    %312 = vector.broadcast %311 : vector<64x1xi32> to vector<64x64xi32>
    %313 = arith.cmpi eq, %15, %312 : vector<64x64xi32>
    %314 = arith.extui %313 : vector<64x64xi1> to vector<64x64xi32>
    %315 = arith.sitofp %314 : vector<64x64xi32> to vector<64x64xf32>
    %cst_100 = arith.constant dense<0.000000e+00> : vector<64x64xf32>
    %316 = tpu.matmul %315, %27, %cst_100 {dimension_numbers = #tpu.dot_dimension_numbers<[1], [0], [0], [1], [0, 0, 1, 1], [], []>} : vector<64x64xf32>, vector<64x64xf32>, vector<64x64xf32> -> vector<64x64xf32>
    %317 = arith.addf %24, %316 : vector<64x64xf32>
    %cst_101 = arith.constant 0.000000e+00 : f32
    %318 = vector.broadcast %cst_101 : f32 to vector<64x64xf32>
    %319 = arith.maximumf %317, %318 : vector<64x64xf32>
    %320 = arith.truncf %319 : vector<64x64xf32> to vector<64x64xbf16>
    %cst_102 = arith.constant dense<0.000000e+00> : vector<64x64xf32>
    %321 = tpu.matmul %320, %28, %cst_102 {dimension_numbers = #tpu.dot_dimension_numbers<[1], [0], [0], [1], [0, 0, 1, 1], [], []>} : vector<64x64xbf16>, vector<64x64xbf16>, vector<64x64xf32> -> vector<64x64xf32>
    %322 = vector.broadcast %29 : vector<1x64xf32> to vector<64x64xf32>
    %323 = arith.addf %321, %322 : vector<64x64xf32>
    %324 = arith.maximumf %299, %323 : vector<64x64xf32>
    %325 = vector.broadcast %311 : vector<64x1xi32> to vector<64x64xi32>
    %326 = arith.cmpi eq, %15, %325 : vector<64x64xi32>
    %cst_103 = arith.constant 0x7F800000 : f32
    %327 = vector.broadcast %cst_103 : f32 to vector<64x64xf32>
    %328 = arith.select %326, %327, %303 : vector<64x64xi1>, vector<64x64xf32>
    %cst_104 = arith.constant dense<0x7F800000> : vector<64xf32>
    %329 = vector.multi_reduction <minimumf>, %328, %cst_104 [1] : vector<64x64xf32> to vector<64xf32>
    %330 = vector.shape_cast %329 : vector<64xf32> to vector<64x1xf32>
    %331 = vector.broadcast %330 : vector<64x1xf32> to vector<64x64xf32>
    %332 = arith.cmpf ole, %328, %331 : vector<64x64xf32>
    %c64_i32_105 = arith.constant 64 : i32
    %333 = vector.broadcast %c64_i32_105 : i32 to vector<64x64xi32>
    %334 = arith.select %332, %15, %333 : vector<64x64xi1>, vector<64x64xi32>
    %cst_106 = arith.constant dense<2147483647> : vector<64xi32>
    %335 = vector.multi_reduction <minsi>, %334, %cst_106 [1] : vector<64x64xi32> to vector<64xi32>
    %336 = vector.shape_cast %335 : vector<64xi32> to vector<64x1xi32>
    %337 = vector.broadcast %336 : vector<64x1xi32> to vector<64x64xi32>
    %338 = arith.cmpi eq, %15, %337 : vector<64x64xi32>
    %339 = arith.extui %338 : vector<64x64xi1> to vector<64x64xi32>
    %340 = arith.sitofp %339 : vector<64x64xi32> to vector<64x64xf32>
    %cst_107 = arith.constant dense<0.000000e+00> : vector<64x64xf32>
    %341 = tpu.matmul %340, %27, %cst_107 {dimension_numbers = #tpu.dot_dimension_numbers<[1], [0], [0], [1], [0, 0, 1, 1], [], []>} : vector<64x64xf32>, vector<64x64xf32>, vector<64x64xf32> -> vector<64x64xf32>
    %342 = arith.addf %24, %341 : vector<64x64xf32>
    %cst_108 = arith.constant 0.000000e+00 : f32
    %343 = vector.broadcast %cst_108 : f32 to vector<64x64xf32>
    %344 = arith.maximumf %342, %343 : vector<64x64xf32>
    %345 = arith.truncf %344 : vector<64x64xf32> to vector<64x64xbf16>
    %cst_109 = arith.constant dense<0.000000e+00> : vector<64x64xf32>
    %346 = tpu.matmul %345, %28, %cst_109 {dimension_numbers = #tpu.dot_dimension_numbers<[1], [0], [0], [1], [0, 0, 1, 1], [], []>} : vector<64x64xbf16>, vector<64x64xbf16>, vector<64x64xf32> -> vector<64x64xf32>
    %347 = vector.broadcast %29 : vector<1x64xf32> to vector<64x64xf32>
    %348 = arith.addf %346, %347 : vector<64x64xf32>
    %349 = arith.maximumf %324, %348 : vector<64x64xf32>
    %350 = vector.broadcast %336 : vector<64x1xi32> to vector<64x64xi32>
    %351 = arith.cmpi eq, %15, %350 : vector<64x64xi32>
    %cst_110 = arith.constant 0x7F800000 : f32
    %352 = vector.broadcast %cst_110 : f32 to vector<64x64xf32>
    %353 = arith.select %351, %352, %328 : vector<64x64xi1>, vector<64x64xf32>
    %cst_111 = arith.constant dense<0x7F800000> : vector<64xf32>
    %354 = vector.multi_reduction <minimumf>, %353, %cst_111 [1] : vector<64x64xf32> to vector<64xf32>
    %355 = vector.shape_cast %354 : vector<64xf32> to vector<64x1xf32>
    %356 = vector.broadcast %355 : vector<64x1xf32> to vector<64x64xf32>
    %357 = arith.cmpf ole, %353, %356 : vector<64x64xf32>
    %c64_i32_112 = arith.constant 64 : i32
    %358 = vector.broadcast %c64_i32_112 : i32 to vector<64x64xi32>
    %359 = arith.select %357, %15, %358 : vector<64x64xi1>, vector<64x64xi32>
    %cst_113 = arith.constant dense<2147483647> : vector<64xi32>
    %360 = vector.multi_reduction <minsi>, %359, %cst_113 [1] : vector<64x64xi32> to vector<64xi32>
    %361 = vector.shape_cast %360 : vector<64xi32> to vector<64x1xi32>
    %362 = vector.broadcast %361 : vector<64x1xi32> to vector<64x64xi32>
    %363 = arith.cmpi eq, %15, %362 : vector<64x64xi32>
    %364 = arith.extui %363 : vector<64x64xi1> to vector<64x64xi32>
    %365 = arith.sitofp %364 : vector<64x64xi32> to vector<64x64xf32>
    %cst_114 = arith.constant dense<0.000000e+00> : vector<64x64xf32>
    %366 = tpu.matmul %365, %27, %cst_114 {dimension_numbers = #tpu.dot_dimension_numbers<[1], [0], [0], [1], [0, 0, 1, 1], [], []>} : vector<64x64xf32>, vector<64x64xf32>, vector<64x64xf32> -> vector<64x64xf32>
    %367 = arith.addf %24, %366 : vector<64x64xf32>
    %cst_115 = arith.constant 0.000000e+00 : f32
    %368 = vector.broadcast %cst_115 : f32 to vector<64x64xf32>
    %369 = arith.maximumf %367, %368 : vector<64x64xf32>
    %370 = arith.truncf %369 : vector<64x64xf32> to vector<64x64xbf16>
    %cst_116 = arith.constant dense<0.000000e+00> : vector<64x64xf32>
    %371 = tpu.matmul %370, %28, %cst_116 {dimension_numbers = #tpu.dot_dimension_numbers<[1], [0], [0], [1], [0, 0, 1, 1], [], []>} : vector<64x64xbf16>, vector<64x64xbf16>, vector<64x64xf32> -> vector<64x64xf32>
    %372 = vector.broadcast %29 : vector<1x64xf32> to vector<64x64xf32>
    %373 = arith.addf %371, %372 : vector<64x64xf32>
    %374 = arith.maximumf %349, %373 : vector<64x64xf32>
    %375 = vector.broadcast %361 : vector<64x1xi32> to vector<64x64xi32>
    %376 = arith.cmpi eq, %15, %375 : vector<64x64xi32>
    %cst_117 = arith.constant 0x7F800000 : f32
    %377 = vector.broadcast %cst_117 : f32 to vector<64x64xf32>
    %378 = arith.select %376, %377, %353 : vector<64x64xi1>, vector<64x64xf32>
    %cst_118 = arith.constant dense<0x7F800000> : vector<64xf32>
    %379 = vector.multi_reduction <minimumf>, %378, %cst_118 [1] : vector<64x64xf32> to vector<64xf32>
    %380 = vector.shape_cast %379 : vector<64xf32> to vector<64x1xf32>
    %381 = vector.broadcast %380 : vector<64x1xf32> to vector<64x64xf32>
    %382 = arith.cmpf ole, %378, %381 : vector<64x64xf32>
    %c64_i32_119 = arith.constant 64 : i32
    %383 = vector.broadcast %c64_i32_119 : i32 to vector<64x64xi32>
    %384 = arith.select %382, %15, %383 : vector<64x64xi1>, vector<64x64xi32>
    %cst_120 = arith.constant dense<2147483647> : vector<64xi32>
    %385 = vector.multi_reduction <minsi>, %384, %cst_120 [1] : vector<64x64xi32> to vector<64xi32>
    %386 = vector.shape_cast %385 : vector<64xi32> to vector<64x1xi32>
    %387 = vector.broadcast %386 : vector<64x1xi32> to vector<64x64xi32>
    %388 = arith.cmpi eq, %15, %387 : vector<64x64xi32>
    %389 = arith.extui %388 : vector<64x64xi1> to vector<64x64xi32>
    %390 = arith.sitofp %389 : vector<64x64xi32> to vector<64x64xf32>
    %cst_121 = arith.constant dense<0.000000e+00> : vector<64x64xf32>
    %391 = tpu.matmul %390, %27, %cst_121 {dimension_numbers = #tpu.dot_dimension_numbers<[1], [0], [0], [1], [0, 0, 1, 1], [], []>} : vector<64x64xf32>, vector<64x64xf32>, vector<64x64xf32> -> vector<64x64xf32>
    %392 = arith.addf %24, %391 : vector<64x64xf32>
    %cst_122 = arith.constant 0.000000e+00 : f32
    %393 = vector.broadcast %cst_122 : f32 to vector<64x64xf32>
    %394 = arith.maximumf %392, %393 : vector<64x64xf32>
    %395 = arith.truncf %394 : vector<64x64xf32> to vector<64x64xbf16>
    %cst_123 = arith.constant dense<0.000000e+00> : vector<64x64xf32>
    %396 = tpu.matmul %395, %28, %cst_123 {dimension_numbers = #tpu.dot_dimension_numbers<[1], [0], [0], [1], [0, 0, 1, 1], [], []>} : vector<64x64xbf16>, vector<64x64xbf16>, vector<64x64xf32> -> vector<64x64xf32>
    %397 = vector.broadcast %29 : vector<1x64xf32> to vector<64x64xf32>
    %398 = arith.addf %396, %397 : vector<64x64xf32>
    %399 = arith.maximumf %374, %398 : vector<64x64xf32>
    %400 = vector.broadcast %386 : vector<64x1xi32> to vector<64x64xi32>
    %401 = arith.cmpi eq, %15, %400 : vector<64x64xi32>
    %cst_124 = arith.constant 0x7F800000 : f32
    %402 = vector.broadcast %cst_124 : f32 to vector<64x64xf32>
    %403 = arith.select %401, %402, %378 : vector<64x64xi1>, vector<64x64xf32>
    %cst_125 = arith.constant dense<0x7F800000> : vector<64xf32>
    %404 = vector.multi_reduction <minimumf>, %403, %cst_125 [1] : vector<64x64xf32> to vector<64xf32>
    %405 = vector.shape_cast %404 : vector<64xf32> to vector<64x1xf32>
    %406 = vector.broadcast %405 : vector<64x1xf32> to vector<64x64xf32>
    %407 = arith.cmpf ole, %403, %406 : vector<64x64xf32>
    %c64_i32_126 = arith.constant 64 : i32
    %408 = vector.broadcast %c64_i32_126 : i32 to vector<64x64xi32>
    %409 = arith.select %407, %15, %408 : vector<64x64xi1>, vector<64x64xi32>
    %cst_127 = arith.constant dense<2147483647> : vector<64xi32>
    %410 = vector.multi_reduction <minsi>, %409, %cst_127 [1] : vector<64x64xi32> to vector<64xi32>
    %411 = vector.shape_cast %410 : vector<64xi32> to vector<64x1xi32>
    %412 = vector.broadcast %411 : vector<64x1xi32> to vector<64x64xi32>
    %413 = arith.cmpi eq, %15, %412 : vector<64x64xi32>
    %414 = arith.extui %413 : vector<64x64xi1> to vector<64x64xi32>
    %415 = arith.sitofp %414 : vector<64x64xi32> to vector<64x64xf32>
    %cst_128 = arith.constant dense<0.000000e+00> : vector<64x64xf32>
    %416 = tpu.matmul %415, %27, %cst_128 {dimension_numbers = #tpu.dot_dimension_numbers<[1], [0], [0], [1], [0, 0, 1, 1], [], []>} : vector<64x64xf32>, vector<64x64xf32>, vector<64x64xf32> -> vector<64x64xf32>
    %417 = arith.addf %24, %416 : vector<64x64xf32>
    %cst_129 = arith.constant 0.000000e+00 : f32
    %418 = vector.broadcast %cst_129 : f32 to vector<64x64xf32>
    %419 = arith.maximumf %417, %418 : vector<64x64xf32>
    %420 = arith.truncf %419 : vector<64x64xf32> to vector<64x64xbf16>
    %cst_130 = arith.constant dense<0.000000e+00> : vector<64x64xf32>
    %421 = tpu.matmul %420, %28, %cst_130 {dimension_numbers = #tpu.dot_dimension_numbers<[1], [0], [0], [1], [0, 0, 1, 1], [], []>} : vector<64x64xbf16>, vector<64x64xbf16>, vector<64x64xf32> -> vector<64x64xf32>
    %422 = vector.broadcast %29 : vector<1x64xf32> to vector<64x64xf32>
    %423 = arith.addf %421, %422 : vector<64x64xf32>
    %424 = arith.maximumf %399, %423 : vector<64x64xf32>
    %c0_131 = arith.constant 0 : index
    %c0_132 = arith.constant 0 : index
    %425 = vector.load %arg9[%c0_131, %c0_132] : memref<64x64xf32, #tpu.memory_space<vmem>>, vector<64x64xf32>
    tpu.vector_store %arg9[%c0_131, %c0_132], %424 {strides = array<i32>} : memref<64x64xf32, #tpu.memory_space<vmem>>, vector<64x64xf32>,
    return
  }
  func.func @transform_0(%arg0: i32) -> (i32, i32) {
    %c0_i32 = arith.constant 0 : i32
    %c0_i32_0 = arith.constant 0 : i32
    return %arg0, %c0_i32 : i32, i32
  }
  func.func @transform_1(%arg0: i32) -> (i32, i32) {
    %c0_i32 = arith.constant 0 : i32
    %c0_i32_0 = arith.constant 0 : i32
    %c0_i32_1 = arith.constant 0 : i32
    return %c0_i32, %c0_i32_0 : i32, i32
  }
  func.func @transform_2(%arg0: i32) -> (i32, i32) {
    %c0_i32 = arith.constant 0 : i32
    %c0_i32_0 = arith.constant 0 : i32
    %c0_i32_1 = arith.constant 0 : i32
    return %c0_i32, %c0_i32_0 : i32, i32
  }
  func.func @transform_3(%arg0: i32) -> (i32, i32) {
    %c0_i32 = arith.constant 0 : i32
    %c0_i32_0 = arith.constant 0 : i32
    %c0_i32_1 = arith.constant 0 : i32
    return %c0_i32, %c0_i32_0 : i32, i32
  }
  func.func @transform_4(%arg0: i32) -> (i32, i32) {
    %c0_i32 = arith.constant 0 : i32
    %c0_i32_0 = arith.constant 0 : i32
    %c0_i32_1 = arith.constant 0 : i32
    return %c0_i32, %c0_i32_0 : i32, i32
  }
  func.func @transform_5(%arg0: i32) -> (i32, i32) {
    %c0_i32 = arith.constant 0 : i32
    %c0_i32_0 = arith.constant 0 : i32
    %c0_i32_1 = arith.constant 0 : i32
    return %c0_i32, %c0_i32_0 : i32, i32
  }
  func.func @transform_6(%arg0: i32) -> (i32, i32) {
    %c0_i32 = arith.constant 0 : i32
    %c0_i32_0 = arith.constant 0 : i32
    %c0_i32_1 = arith.constant 0 : i32
    return %c0_i32, %c0_i32_0 : i32, i32
  }
  func.func @transform_7(%arg0: i32) -> (i32, i32) {
    %c0_i32 = arith.constant 0 : i32
    %c0_i32_0 = arith.constant 0 : i32
    %c0_i32_1 = arith.constant 0 : i32
    return %c0_i32, %c0_i32_0 : i32, i32
  }
  func.func @transform_8(%arg0: i32) -> (i32, i32) {
    %c0_i32 = arith.constant 0 : i32
    %c0_i32_0 = arith.constant 0 : i32
    return %arg0, %c0_i32 : i32, i32
  }
}

module attributes {stable_mosaic.version = 11 : i64} {
  func.func @_scale_mlp_kernel(%arg0: i32, %arg1: memref<1x16x64xf32, #tpu.memory_space<vmem>>, %arg2: memref<1x64x128xbf16, #tpu.memory_space<vmem>>, %arg3: memref<1x1x128xf32, #tpu.memory_space<vmem>>, %arg4: memref<1x128x256xbf16, #tpu.memory_space<vmem>>, %arg5: memref<1x1x256xf32, #tpu.memory_space<vmem>>, %arg6: memref<1x16x256xf32, #tpu.memory_space<vmem>>) attributes {dimension_semantics = [#tpu.dimension_semantics<parallel>], iteration_bounds = array<i64: 2>, scalar_prefetch = 0 : i64, scratch_operands = 0 : i64, tpu.core_type = #tpu.core_type<tc>, window_params = [{transform_indices = @transform_0, window_bounds = array<i64: 1, 16, 64>}, {transform_indices = @transform_1, window_bounds = array<i64: 1, 64, 128>}, {transform_indices = @transform_2, window_bounds = array<i64: 1, 1, 128>}, {transform_indices = @transform_3, window_bounds = array<i64: 1, 128, 256>}, {transform_indices = @transform_4, window_bounds = array<i64: 1, 1, 256>}, {transform_indices = @transform_5, window_bounds = array<i64: 1, 16, 256>}]} {
    %c0 = arith.constant 0 : index
    %c0_0 = arith.constant 0 : index
    %c0_1 = arith.constant 0 : index
    %0 = vector.load %arg1[%c0, %c0_0, %c0_1] : memref<1x16x64xf32, #tpu.memory_space<vmem>>, vector<1x16x64xf32>
    %1 = vector.shape_cast %0 : vector<1x16x64xf32> to vector<16x64xf32>
    %2 = arith.truncf %1 : vector<16x64xf32> to vector<16x64xbf16>
    %c0_2 = arith.constant 0 : index
    %c0_3 = arith.constant 0 : index
    %c0_4 = arith.constant 0 : index
    %3 = vector.load %arg2[%c0_2, %c0_3, %c0_4] : memref<1x64x128xbf16, #tpu.memory_space<vmem>>, vector<1x64x128xbf16>
    %4 = vector.shape_cast %3 : vector<1x64x128xbf16> to vector<64x128xbf16>
    %cst = arith.constant dense<0.000000e+00> : vector<16x128xf32>
    %5 = tpu.matmul %2, %4, %cst {dimension_numbers = #tpu.dot_dimension_numbers<[1], [0], [0], [1], [0, 0, 1, 1], [], []>} : vector<16x64xbf16>, vector<64x128xbf16>, vector<16x128xf32> -> vector<16x128xf32>
    %c0_5 = arith.constant 0 : index
    %c0_6 = arith.constant 0 : index
    %c0_7 = arith.constant 0 : index
    %6 = vector.load %arg3[%c0_5, %c0_6, %c0_7] : memref<1x1x128xf32, #tpu.memory_space<vmem>>, vector<1x1x128xf32>
    %7 = vector.shape_cast %6 : vector<1x1x128xf32> to vector<1x128xf32>
    %8 = vector.broadcast %7 : vector<1x128xf32> to vector<16x128xf32>
    %9 = arith.addf %5, %8 : vector<16x128xf32>
    %cst_8 = arith.constant 0.000000e+00 : f32
    %10 = vector.broadcast %cst_8 : f32 to vector<16x128xf32>
    %11 = arith.maximumf %9, %10 : vector<16x128xf32>
    %12 = arith.truncf %11 : vector<16x128xf32> to vector<16x128xbf16>
    %c0_9 = arith.constant 0 : index
    %c0_10 = arith.constant 0 : index
    %c0_11 = arith.constant 0 : index
    %13 = vector.load %arg4[%c0_9, %c0_10, %c0_11] : memref<1x128x256xbf16, #tpu.memory_space<vmem>>, vector<1x128x256xbf16>
    %14 = vector.shape_cast %13 : vector<1x128x256xbf16> to vector<128x256xbf16>
    %cst_12 = arith.constant dense<0.000000e+00> : vector<16x256xf32>
    %15 = tpu.matmul %12, %14, %cst_12 {dimension_numbers = #tpu.dot_dimension_numbers<[1], [0], [0], [1], [0, 0, 1, 1], [], []>} : vector<16x128xbf16>, vector<128x256xbf16>, vector<16x256xf32> -> vector<16x256xf32>
    %c0_13 = arith.constant 0 : index
    %c0_14 = arith.constant 0 : index
    %c0_15 = arith.constant 0 : index
    %16 = vector.load %arg5[%c0_13, %c0_14, %c0_15] : memref<1x1x256xf32, #tpu.memory_space<vmem>>, vector<1x1x256xf32>
    %17 = vector.shape_cast %16 : vector<1x1x256xf32> to vector<1x256xf32>
    %18 = vector.broadcast %17 : vector<1x256xf32> to vector<16x256xf32>
    %19 = arith.addf %15, %18 : vector<16x256xf32>
    %c0_16 = arith.constant 0 : index
    %c0_17 = arith.constant 0 : index
    %c0_18 = arith.constant 0 : index
    %20 = vector.load %arg6[%c0_16, %c0_17, %c0_18] : memref<1x16x256xf32, #tpu.memory_space<vmem>>, vector<1x16x256xf32>
    %21 = vector.shape_cast %20 : vector<1x16x256xf32> to vector<16x256xf32>
    %22 = vector.shape_cast %19 : vector<16x256xf32> to vector<1x16x256xf32>
    tpu.vector_store %arg6[%c0_16, %c0_17, %c0_18], %22 {strides = array<i32>} : memref<1x16x256xf32, #tpu.memory_space<vmem>>, vector<1x16x256xf32>,
    return
  }
  func.func @transform_0(%arg0: i32) -> (i32, i32, i32) {
    %c0_i32 = arith.constant 0 : i32
    %c0_i32_0 = arith.constant 0 : i32
    %c0_i32_1 = arith.constant 0 : i32
    return %arg0, %c0_i32, %c0_i32_0 : i32, i32, i32
  }
  func.func @transform_1(%arg0: i32) -> (i32, i32, i32) {
    %c0_i32 = arith.constant 0 : i32
    %c0_i32_0 = arith.constant 0 : i32
    %c0_i32_1 = arith.constant 0 : i32
    return %arg0, %c0_i32, %c0_i32_0 : i32, i32, i32
  }
  func.func @transform_2(%arg0: i32) -> (i32, i32, i32) {
    %c0_i32 = arith.constant 0 : i32
    %c0_i32_0 = arith.constant 0 : i32
    %c0_i32_1 = arith.constant 0 : i32
    return %arg0, %c0_i32, %c0_i32_0 : i32, i32, i32
  }
  func.func @transform_3(%arg0: i32) -> (i32, i32, i32) {
    %c0_i32 = arith.constant 0 : i32
    %c0_i32_0 = arith.constant 0 : i32
    %c0_i32_1 = arith.constant 0 : i32
    return %arg0, %c0_i32, %c0_i32_0 : i32, i32, i32
  }
  func.func @transform_4(%arg0: i32) -> (i32, i32, i32) {
    %c0_i32 = arith.constant 0 : i32
    %c0_i32_0 = arith.constant 0 : i32
    %c0_i32_1 = arith.constant 0 : i32
    return %arg0, %c0_i32, %c0_i32_0 : i32, i32, i32
  }
  func.func @transform_5(%arg0: i32) -> (i32, i32, i32) {
    %c0_i32 = arith.constant 0 : i32
    %c0_i32_0 = arith.constant 0 : i32
    %c0_i32_1 = arith.constant 0 : i32
    return %arg0, %c0_i32, %c0_i32_0 : i32, i32, i32
  }
}

</mosaic_0001>

<bundles_post_ra>
// kernel: point_branch_forward.4
= control target key start
LH: loop header
LB: loop body
LE: loop exit
PB: predicated region body
PF: predicated region fallthrough
CT: control target
= control target key end

     0   :  { %vm17_vm0 = vcmask 1042432   ;;  %v142_v0 = vmov 0.0   ;;  %vm143_vm1 = vmmov 0   ;;  %vm13_vm2 = vcmask 23552   ;;  %s168_s1 = inlined_call_operand.vmem [shape: f32[3,64], index: 1, kind: input, shape index: {}]   ;;  %s169_s0 = inlined_call_operand.vmem [shape: f32[8,3], index: 0, kind: input, shape index: {}]   ;;  %s170_s2 = inlined_call_operand.vmem [shape: s32[8,1], index: 2, kind: output, shape index: {}]  }
   0x1   :  { %135 = vmatprep.subr.mxu0 %v142_v0  ;;  %v12_v1 = vld [vmem:[%s168_s1] sm:$0x7]  ;;  %137 = vmatprep.mubr.msk.f32.mxu0 %vm143_vm1, %v142_v0  ;;  %vm92_vm3 = vcmask 518144   ;;  %vm102_vm4 = vcmask 523264   ;;  %v106_v16 = vlaneseq  ;;  %vm125_vm7 = vcmask 7168  }
   0x2   :  { %v11_v2 = vld [vmem:[%s169_s0] sm:$0xff]  ;;  %136 = vmatpush3.msk.msra.mxu0 %vm17_vm0, %v12_v1  ;;  %v91_v3 = vmul.f32 %v12_v1, %v12_v1 }
   0x3   :  { %138 = vmatmul.mubr.msk.f32.vlgmr.msra.gmra.mrb[0].mxu0 %vm13_vm2, %v11_v2  ;;  %v107_v17 = vand.u32 127, %v106_v16 }
   0x4   :  { %v93_v4 = vsel %vm92_vm3, %v91_v3, 0.0 }
   0x5   :  { %v94_v5 = vrot.slane %v93_v4, 4 }
   0x7   :  { %v95_v6 = vadd.f32 %v94_v5, %v93_v4 }
   0x9   :  { %v96_v7 = vrot.slane %v95_v6, 2 }
   0xb   :  { %v97_v8 = vadd.f32 %v96_v7, %v95_v6 }
   0xd   :  { %v98_v9 = vrot.slane %v97_v8, 1 }
   0xf   :  { %v99_v10 = vadd.f32 %v98_v9, %v97_v8 }
  0xd6   :  { %v87_v11 = vpop.f32.mrb[0].mxu0 }
  0xd7   :  { %v100_v12 = vmul.f32 2.0, %v87_v11  ;;  %v139_v13 = vpop.f32.mrb[1].mxu0 }
  0xd9   :  { %v101_v14 = vsub.f32 %v99_v10, %v100_v12 }
  0xdb   :  { %v103_v15 = vsel %vm102_vm4, %v101_v14, inf }
  0xdc   :  { %104 = vmin.xlane.f32.xlu0 %v103_v15 }
 0x169   :  { %v105_v18 = vpop.xlane.xlu0 %104 }
 0x16a   :  { %vm108_vm5 = vcmp.le.f32.partialorder %v101_v14, %v105_v18 }
 0x16b   :  { %v109_v19 = vsel %vm108_vm5, %v107_v17, 64 }
 0x16c   :  { %v110_v20 = vsel %vm102_vm4, %v109_v19, 2147483647 }
 0x16d   :  { %v112_v21 = vshra.s32 %v110_v20, 16  ;;  %v111_v23 = vand.u32 65535, %v110_v20 }
 0x16f   :  { %v114_v22 = vcvt.s32.f32 %v112_v21  ;;  %v113_v25 = vcvt.s32.f32 %v111_v23 }
 0x171   :  { %115 = vmin.xlane.f32.xlu0 %v114_v22 }
 0x1fe   :  { %v116_v24 = vpop.xlane.xlu0 %115 }
 0x1ff   :  { %vm117_vm6 = vcmp.eq.f32.partialorder %v114_v22, %v116_v24  ;;  %v122_v27 = vcvt.f32.s32 %v116_v24 }
 0x200   :  { %v118_v26 = vsel %vm117_vm6, %v113_v25, inf }
 0x201   :  { %119 = vmin.xlane.f32.xlu1 %v118_v26  ;;  %v123_v29 = vshll.u32 %v122_v27, 16 }
 0x28e   :  { %v120_v28 = vpop.xlane.xlu1 %119 }
 0x28f   :  { %v121_v30 = vcvt.f32.s32 %v120_v28 }
 0x291   :  { %v124_v31 = vadd.s32 %v123_v29, %v121_v30 }
 0x293   :  { %126 = vst.msk [vmem:[%s170_s2] sm:$0xff] %vm125_vm7, %v124_v31 }

// kernel: point_branch_forward.5
= control target key start
LH: loop header
LB: loop body
LE: loop exit
PB: predicated region body
PF: predicated region fallthrough
CT: control target
= control target key end

     0   :  { %s781_s18 = smov 0   ;;  %s839_s0 = inlined_call_operand.vmem [shape: f32[2,16,64], index: 0, kind: input, shape index: {}]   ;;  %s840_s1 = inlined_call_operand.vmem [shape: bf16[2,64,128], index: 1, kind: input, shape index: {}]   ;;  %s841_s2 = inlined_call_operand.vmem [shape: f32[2,1,128], index: 2, kind: input, shape index: {}]   ;;  %s842_s3 = inlined_call_operand.vmem [shape: bf16[2,128,256], index: 3, kind: input, shape index: {}]   ;;  %s843_s4 = inlined_call_operand.vmem [shape: f32[2,1,256], index: 4, kind: input, shape index: {}]   ;;  %s844_s5 = inlined_call_operand.vmem [shape: f32[2,16,256], index: 5, kind: output, shape index: {}]  }
   0x1 LB: > { %s642_s19 = sadd.s32 4294967295, %s746_s18   ;;  %p646_p0 = scmp.ge.s32.totalorder %s746_s18, 1  ;;  %s746_s18 = sphi %s781_s18, %s15_s18  }
   0x2   : > { %p224_p1 = scmp.lt.s32.totalorder %s746_s18, 3 }
   0x4   : > { %p225_p2 = pnand %p646_p0, %p224_p1 }
   0x5   : > { %p269_p3 = scmp.lt.s32.totalorder (!%p225_p2), %s642_s19, 1  ;;  %v748_v0 = vmov (!%p225_p2), 0.0   ;;  %vm749_vm0 = vmmov (!%p225_p2), 0   ;;  %vm339_vm1 = vcmask (!%p225_p2), 523264   ;;  %v750_v24 = vmov (!%p225_p2), 0  }
   0x6   : > { %228 = sbr.rel (%p225_p2) target bundleno = 470 (0x1d6), region = 40  ;;  %689 = vmatprep.subr.bf16.mxu0 (!%p225_p2), %v748_v0  ;;  %697 = vmatprep.mubr.msk.bf16.mxu0 (!%p225_p2), %vm749_vm0, %v748_v0  ;;  %v405_v35 = vlaneseq (!%p225_p2) }
   0x7   : > { %527 = vmatprep.mubr.bf16.mxu1 (!%p225_p2), %v750_v24 }
   0x8   : > { %v406_v36 = vshrl.u32 (!%p225_p2), %v405_v35, 7 }
   0xa   : > { %v407_v37 = vsub.s32 (!%p225_p2), 0, %v406_v36  ;;  %v411_v39 = vsub.s32 (!%p225_p2), 1, %v406_v36 }
   0xd   : > { %s846_s19 = smov (!%p269_p3, %s642_s19), 1 }
   0xe   : > { %s681_s20 = sshll.u32 %s846_s19, 5  ;;  %s682_s24 = sshll.u32 %s846_s19, 7 }
   0xf   : > { %s278_s23 = scalar_lea.vmem %s840_s1, %s681_s20  ;;  %s801_s27 = scalar_lea.vmem %s842_s3, %s682_s24 }
  0x10   : > { %v712_v1 = vld [vmem:[%s278_s23] sm:$0xff]   ;;  %v713_v2 = vld [vmem:[%s278_s23 + $0x8] sm:$0xff]   ;;  %s680_s28 = sshll.u32 %s846_s19, 4  ;;  %v714_v3 = vld [vmem:[%s278_s23 + $0x10] sm:$0xff]   ;;  %s281_s9 = scalar_lea.vmem %s841_s2, %s846_s19 }
  0x11   : > { %690 = vmatpush3.bf16.msra.mxu0 %v712_v1  ;;  %v716_v4 = vld [vmem:[%s801_s27 + $0x4] ss:$8 sps:$4 sm:$0xff]   ;;  %v718_v5 = vld [vmem:[%s801_s27] ss:$8 sps:$4 sm:$0xff]   ;;  %s273_s6 = scalar_lea.vmem %s839_s0, %s680_s28  ;;  %v719_v6 = vld [vmem:[%s801_s27 + $0x14] ss:$8 sps:$4 sm:$0xff]   ;;  %s295_s16 = scalar_lea.vmem %s844_s5, %s681_s20 }
  0x12   : > { %691 = vmatprep.subr.bf16.mxu0 %v748_v0  ;;  %495 = vmatprep.subr.bf16.mxu1 %v716_v4  ;;  %v715_v7 = vld [vmem:[%s278_s23 + $0x18] sm:$0xff]   ;;  %v297_v9 = vld [vmem:[%s273_s6] sm:$0xff]  ;;  %v298_v11 = vld [vmem:[%s273_s6 + $0x8] sm:$0xff]  ;;  %s653_s10 = sshll.u32 %s846_s19, 1 }
  0x13   : > { %496 = vmatpush1.bf16.msra.mxu1 %v718_v5  ;;  %v721_v8 = vld [vmem:[%s801_s27 + $0x10] ss:$8 sps:$4 sm:$0xff]   ;;  %v722_v10 = vld [vmem:[%s801_s27 + $0x24] ss:$8 sps:$4 sm:$0xff]   ;;  %v724_v12 = vld [vmem:[%s801_s27 + $0x20] ss:$8 sps:$4 sm:$0xff]   ;;  %v299_v14 = vpack.c.bf16 %v298_v11, %v297_v9  ;;  %s290_s13 = scalar_lea.vmem %s843_s4, %s653_s10 }
  0x14   : > { %497 = vmatprep.subr.bf16.mxu1 %v719_v6  ;;  %v725_v13 = vld [vmem:[%s801_s27 + $0x34] ss:$8 sps:$4 sm:$0xff]   ;;  %v727_v15 = vld [vmem:[%s801_s27 + $0x30] ss:$8 sps:$4 sm:$0xff]   ;;  %v728_v16 = vld [vmem:[%s801_s27 + $0x44] ss:$8 sps:$4 sm:$0xff]  }
  0x15   : > { %692 = vmatpush3.bf16.msra.mxu0 %v713_v2  ;;  %v730_v17 = vld [vmem:[%s801_s27 + $0x40] ss:$8 sps:$4 sm:$0xff]   ;;  %v731_v18 = vld [vmem:[%s801_s27 + $0x54] ss:$8 sps:$4 sm:$0xff]   ;;  %v733_v19 = vld [vmem:[%s801_s27 + $0x50] ss:$8 sps:$4 sm:$0xff]  }
  0x16   : > { %693 = vmatprep.subr.bf16.mxu0 %v748_v0  ;;  %v734_v20 = vld [vmem:[%s801_s27 + $0x64] ss:$8 sps:$4 sm:$0xff]   ;;  %v736_v21 = vld [vmem:[%s801_s27 + $0x60] ss:$8 sps:$4 sm:$0xff]   ;;  %v737_v22 = vld [vmem:[%s801_s27 + $0x74] ss:$8 sps:$4 sm:$0xff]  }
  0x17   : > { %498 = vmatpush1.bf16.msra.mxu1 %v721_v8  ;;  %v739_v23 = vld [vmem:[%s801_s27 + $0x70] ss:$8 sps:$4 sm:$0xff]   ;;  %v656_v25 = vld [vmem:[%s281_s9] ss:$0 sm:$0xff] }
  0x18   : > { %499 = vmatprep.subr.bf16.mxu1 %v722_v10  ;;  %v403_v38 = vld [vmem:[%s290_s13] sm:$0x3] }
  0x19   : > { %694 = vmatpush3.bf16.msra.mxu0 %v714_v3  ;;  %v408_v40 = vrot.slane %v403_v38, %v407_v37  ;;  %v412_v41 = vrot.slane %v403_v38, %v411_v39 }
  0x1a   : > { %695 = vmatprep.subr.bf16.mxu0 %v748_v0 }
  0x1b   : > { %500 = vmatpush1.bf16.msra.mxu1 %v724_v12 }
  0x1c   : > { %501 = vmatprep.subr.bf16.mxu1 %v725_v13 }
  0x1d   : > { %696 = vmatpush3.bf16.msra.mxu0 %v715_v7 }
  0x1f   : > { %502 = vmatpush1.bf16.msra.mxu1 %v727_v15 }
  0x20   : > { %698 = vmatmul.mubr.msk.bf16.vlgmr.msra.gmra.mrb[0].mxu0 %vm339_vm1, %v299_v14  ;;  %503 = vmatprep.subr.bf16.mxu1 %v728_v16 }
  0x23   : > { %504 = vmatpush1.bf16.msra.mxu1 %v730_v17 }
  0x24   : > { %505 = vmatprep.subr.bf16.mxu1 %v731_v18 }
  0x27   : > { %506 = vmatpush1.bf16.msra.mxu1 %v733_v19 }
  0x28   : > { %507 = vmatprep.subr.bf16.mxu1 %v734_v20 }
  0x2b   : > { %508 = vmatpush1.bf16.msra.mxu1 %v736_v21 }
  0x2c   : > { %509 = vmatprep.subr.bf16.mxu1 %v737_v22 }
  0x2f   : > { %510 = vmatpush1.bf16.msra.mxu1 %v739_v23 }
  0xf3   : > { %v377_v26 = vpop.f32.mrb[0].mxu0 }
  0xf4   : > { %v378_v27 = vadd.f32 %v656_v25, %v377_v26  ;;  %v699_v28 = vpop.f32.mrb[1].mxu0 }
  0xf5   : > { %v380_v29 = vpop.f32.mrb[2].mxu0 }
  0xf6   : > { %v381_v30 = vadd.f32 %v656_v25, %v380_v29  ;;  %v700_v31 = vpop.f32.mrb[3].mxu0  ;;  %v384_v32 = vmax.f32 %v378_v27, 0.0 }
  0xf8   : > { %v385_v33 = vmax.f32 %v381_v30, 0.0 }
  0xfa   : > { %v386_v34 = vpack.c.bf16 %v385_v33, %v384_v32 }
  0xfc   : > { %528 = vmatmul.mubr.bf16.vlgmr.msra.gmra.mrb[0].mxu1 %v386_v34 }
 0x1cf   : > { %v529_v42 = vpop.f32.mrb[0].mxu1 }
 0x1d0   : > { %v530_v43 = vadd.f32 %v529_v42, %v408_v40  ;;  %v531_v44 = vpop.f32.mrb[1].mxu1 }
 0x1d1   : > { %v532_v45 = vadd.f32 %v531_v44, %v412_v41  ;;  %v533_v46 = vpop.f32.mrb[2].mxu1 }
 0x1d2   : > { %538 = vst [vmem:[%s295_s16] sm:$0xff] %v530_v43  ;;  %v534_v47 = vadd.f32 %v533_v46, %v408_v40  ;;  %v535_v48 = vpop.f32.mrb[3].mxu1 }
 0x1d3   : > { %539 = vst [vmem:[%s295_s16 + $0x8] sm:$0xff] %v532_v45  ;;  %v536_v49 = vadd.f32 %v535_v48, %v412_v41 }
 0x1d4   : > { %540 = vst [vmem:[%s295_s16 + $0x10] sm:$0xff] %v534_v47 }
 0x1d5   : > { %541 = vst [vmem:[%s295_s16 + $0x18] sm:$0xff] %v536_v49 }
 0x1d6 PF: > { %s15_s18 = sadd.s32 1, %s746_s18  }
 0x1d7   : > { %p12_p4 = scmp.ge.s32.totalorder %s15_s18, 4  }
 0x1d9   :  { %14 = sbr.rel (!%p12_p4) target bundleno = 1 (0x1), region = 82 }

// kernel: point_branch_forward.3
= control target key start
LH: loop header
LB: loop body
LE: loop exit
PB: predicated region body
PF: predicated region fallthrough
CT: control target
= control target key end

     0   :  { %vm72_vm0 = vcmask 1042432   ;;  %vm47_vm1 = vcmask 23552   ;;  %vm182_vm2 = vcmask 518144   ;;  %v207_v19 = vlaneseq  ;;  %s13346_s1 = inlined_call_operand.vmem [shape: f32[3,64], index: 1, kind: input, shape index: {}]   ;;  %s13347_s0 = inlined_call_operand.vmem [shape: f32[64,3], index: 0, kind: input, shape index: {}, may-alias: {0,2}]   ;;  %s13348_s4 = inlined_call_operand.vmem [shape: bf16[3,64], index: 4, kind: input, shape index: {}]   ;;  %s13349_s2 = inlined_call_operand.vmem [shape: f32[64,3], index: 2, kind: input, shape index: {}, may-alias: {0,2}]   ;;  %s13350_s3 = inlined_call_operand.vmem [shape: bf16[3,64], index: 3, kind: input, shape index: {}]   ;;  %s13351_s6 = inlined_call_operand.vmem [shape: bf16[64,64], index: 6, kind: input, shape index: {}]   ;;  %s13352_s5 = inlined_call_operand.vmem [shape: f32[1,64], index: 5, kind: input, shape index: {}]   ;;  %s13353_s7 = inlined_call_operand.vmem [shape: f32[1,64], index: 7, kind: input, shape index: {}]   ;;  %s13354_s8 = inlined_call_operand.vmem [shape: f32[64,64], index: 8, kind: output, shape index: {}]  }
   0x1   :  { %v38_v0 = vld [vmem:[%s13346_s1] sm:$0x7]  ;;  %v31_v2 = vld [vmem:[%s13347_s0 + $0x8] sm:$0xff]  ;;  %v9119_v3 = vld [vmem:[%s13347_s0 + $0x10] sm:$0xff]  ;;  %vm433_vm4 = vcmask 523264   ;;  %vm267_vm12 = vcmask 1040384  }
   0x2   :  { %v30_v1 = vld [vmem:[%s13347_s0] sm:$0xff]  ;;  %8022 = vmatprep.subr.msk.mxu0 %vm72_vm0, %v38_v0  ;;  %v9124_v4 = vld [vmem:[%s13347_s0 + $0x18] sm:$0xff]  ;;  %9016 = vmatprep.subr.msk.mxu1 %vm72_vm0, %v38_v0  ;;  %v9138_v7 = vld [vmem:[%s13347_s0 + $0x28] sm:$0xff]  ;;  %v181_v13 = vmul.f32 %v38_v0, %v38_v0  ;;  %v208_v21 = vshrl.u32 %v207_v19, 7  ;;  %v9171_v23 = vand.u32 127, %v207_v19  ;;  %vm268_vm13 = vcmask 1041408  }
   0x3   :  { %8024 = vmatprep.mubr.msk.f32.mxu0 %vm47_vm1, %v30_v1  ;;  %v9129_v5 = vld [vmem:[%s13347_s0 + $0x20] sm:$0xff]  ;;  %8023 = vmatpush3.msk.msra.mxu0 %vm72_vm0, %v38_v0  ;;  %v244_v6 = vpack.c.bf16 %v9124_v4, %v9119_v3  ;;  %v9143_v8 = vld [vmem:[%s13347_s0 + $0x30] sm:$0xff]  ;;  %v9148_v9 = vld [vmem:[%s13347_s0 + $0x38] sm:$0xff]  ;;  %v243_v12 = vpack.c.bf16 %v31_v2, %v30_v1 }
   0x4   :  { %8025 = vmatmul.mubr.msk.f32.vlgmr.msra.gmra.mrb[0].mxu0 %vm47_vm1, %v31_v2  ;;  %9017 = vmatpush3.msk.msra.mxu1 %vm72_vm0, %v38_v0  ;;  %v245_v10 = vpack.c.bf16 %v9138_v7, %v9129_v5  ;;  %v246_v11 = vpack.c.bf16 %v9148_v9, %v9143_v8  ;;  %v183_v14 = vsel %vm182_vm2, %v181_v13, 0.0  ;;  %v209_v25 = vadd.s32 8, %v208_v21  ;;  %v39_v19 = vld [vmem:[%s13349_s2] sm:$0xff] }
   0x5   :  { %8027 = vmatprep.mubr.msk.f32.mxu0 %vm47_vm1, %v9119_v3  ;;  %8030 = vmatprep.mubr.msk.f32.mxu1 %vm47_vm1, %v9129_v5  ;;  %v184_v15 = vrot.slane %v183_v14, 4  ;;  %v210_v28 = vadd.s32 16, %v208_v21  ;;  %v212_v31 = vadd.s32 32, %v208_v21  ;;  %vm227_vm3 = vcmp.eq.s32.totalorder %v208_v21, %v9171_v23 }
   0x6   :  { %8031 = vmatmul.mubr.msk.f32.vlgmr.msra.gmra.mrb[0].mxu1 %vm47_vm1, %v9138_v7  ;;  %vm228_vm5 = vcmp.eq.s32.totalorder %v209_v25, %v9171_v23  ;;  %v211_v41 = vadd.s32 24, %v208_v21  ;;  %v214_v50 = vadd.s32 48, %v208_v21  ;;  %v213_v55 = vadd.s32 40, %v208_v21  ;;  %v42_v25 = vld [vmem:[%s13349_s2 + $0x18] sm:$0xff] }
   0x7   :  { %8033 = vmatprep.mubr.msk.f32.mxu1 %vm47_vm1, %v9143_v8  ;;  %v185_v16 = vadd.f32 %v184_v15, %v183_v14  ;;  %vm229_vm6 = vcmp.eq.s32.totalorder %v210_v28, %v9171_v23  ;;  %vm231_vm7 = vcmp.eq.s32.totalorder %v212_v31, %v9171_v23  ;;  %v215_v63 = vadd.s32 56, %v208_v21  ;;  %v44_v28 = vld [vmem:[%s13349_s2 + $0x28] sm:$0xff]  ;;  %v45_v31 = vld [vmem:[%s13349_s2 + $0x30] sm:$0xff] }
   0x8   :  { %8028 = vmatmul.mubr.msk.f32.gmra.mrb[2].mxu0 %vm47_vm1, %v9124_v4  ;;  %vm230_vm8 = vcmp.eq.s32.totalorder %v211_v41, %v9171_v23  ;;  %vm233_vm9 = vcmp.eq.s32.totalorder %v214_v50, %v9171_v23  ;;  %vm232_vm10 = vcmp.eq.s32.totalorder %v213_v55, %v9171_v23 }
   0x9   :  { %v186_v17 = vrot.slane %v185_v16, 2  ;;  %vm234_vm11 = vcmp.eq.s32.totalorder %v215_v63, %v9171_v23 }
   0xa   :  { %8034 = vmatmul.mubr.msk.f32.gmra.mrb[2].mxu1 %vm47_vm1, %v9148_v9 }
   0xb   :  { %8038 = vmatprep.mubr.msk.bf16.mxu1 %vm47_vm1, %v243_v12  ;;  %v187_v18 = vadd.f32 %v186_v17, %v185_v16  ;;  %v9058_v16 = vmov 65535  }
   0xc   :  { %v269_v17 = vsel %vm267_vm12, 4294967295, %v9058_v16 }
   0xd   :  { %v188_v20 = vrot.slane %v187_v18, 1  ;;  %v9234_v21 = vsel %vm268_vm13, %v269_v17, 0 }
   0xf   :  { %v9169_v22 = vadd.f32 %v188_v20, %v187_v18  ;;  %v343_v18 = vld [vmem:[%s13348_s4] sm:$0x3]  ;;  %v40_v20 = vld [vmem:[%s13349_s2 + $0x8] sm:$0xff] }
  0xd7   :  { %v8026_v24 = vpop.f32.mrb[0].mxu0 }
  0xd8   :  { %v191_v26 = vmul.f32 2.0, %v8026_v24  ;;  %v142_v27 = vpop.f32.mrb[1].mxu0  ;;  %v41_v24 = vld [vmem:[%s13349_s2 + $0x10] sm:$0xff] }
  0xd9   :  { %v190_v29 = vmul.f32 2.0, %v142_v27  ;;  %v8032_v30 = vpop.f32.mrb[0].mxu1  ;;  %v43_v27 = vld [vmem:[%s13349_s2 + $0x20] sm:$0xff] }
  0xda   :  { %v199_v32 = vsub.f32 %v9169_v22, %v191_v26  ;;  %v195_v33 = vmul.f32 2.0, %v8032_v30  ;;  %v162_v34 = vpop.f32.mrb[1].mxu1  ;;  %v357_v26 = vand.u32 %v343_v18, %v9234_v21  ;;  %v341_v30 = vpack.c.bf16 %v44_v28, %v43_v27 }
  0xdb   :  { %v198_v35 = vsub.f32 %v9169_v22, %v190_v29  ;;  %v8029_v36 = vpop.f32.mrb[2].mxu0  ;;  %v194_v37 = vmul.f32 2.0, %v162_v34  ;;  %v340_v29 = vpack.c.bf16 %v42_v25, %v41_v24 }
  0xdc   :  { %v193_v38 = vmul.f32 2.0, %v8029_v36  ;;  %v152_v39 = vpop.f32.mrb[3].mxu0  ;;  %v203_v40 = vsub.f32 %v9169_v22, %v195_v33  ;;  %v9189_v52 = vsel %vm228_vm5, inf, %v199_v32  ;;  %8046 = vmatprep.subr.bf16.mxu0 %v357_v26  ;;  %v46_v32 = vld [vmem:[%s13349_s2 + $0x38] sm:$0xff] }
  0xdd   :  { %v192_v42 = vmul.f32 2.0, %v152_v39  ;;  %v9179_v43 = vsel %vm227_vm3, inf, %v198_v35  ;;  %v202_v44 = vsub.f32 %v9169_v22, %v194_v37  ;;  %v8035_v45 = vpop.f32.mrb[2].mxu1  ;;  %v437_v59 = vsel %vm433_vm4, %v9189_v52, inf  ;;  %8047 = vmatpush3.bf16.msra.mxu0 %v357_v26 }
  0xde   :  { %v201_v46 = vsub.f32 %v9169_v22, %v193_v38  ;;  %v434_v47 = vsel %vm433_vm4, %v9179_v43, inf  ;;  %v197_v48 = vmul.f32 2.0, %v8035_v45  ;;  %v172_v49 = vpop.f32.mrb[3].mxu1  ;;  %v9214_v2 = vsel %vm232_vm10, inf, %v203_v40 }
  0xdf   :  { %v200_v51 = vsub.f32 %v9169_v22, %v192_v42  ;;  %435 = vmin.xlane.f32.xlu0 %v434_v47  ;;  %v196_v53 = vmul.f32 2.0, %v172_v49  ;;  %v9198_v58 = vsel %vm231_vm7, inf, %v202_v44  ;;  %v449_v13 = vsel %vm433_vm4, %v9214_v2, inf }
  0xe0   :  { %v205_v54 = vsub.f32 %v9169_v22, %v197_v48  ;;  %v9205_v61 = vsel %vm230_vm8, inf, %v201_v46  ;;  %v446_v62 = vsel %vm433_vm4, %v9198_v58, inf  ;;  %v342_v33 = vpack.c.bf16 %v46_v32, %v45_v31 }
  0xe1   :  { %v9195_v56 = vsel %vm229_vm6, inf, %v200_v51  ;;  %v204_v57 = vsub.f32 %v9169_v22, %v196_v53  ;;  %v443_v1 = vsel %vm433_vm4, %v9205_v61, inf  ;;  %v339_v22 = vpack.c.bf16 %v40_v20, %v39_v19 }
  0xe2   :  { %v440_v60 = vsel %vm433_vm4, %v9195_v56, inf  ;;  %v9221_v14 = vsel %vm234_vm11, inf, %v205_v54 }
  0xe3   :  { %438 = vmin.xlane.f32.xlu0 %v437_v59  ;;  %441 = vmin.xlane.f32.xlu1 %v440_v60  ;;  %v9210_v0 = vsel %vm233_vm9, inf, %v204_v57  ;;  %v455_v15 = vsel %vm433_vm4, %v9221_v14, inf }
  0xe4   :  { %v452_v12 = vsel %vm433_vm4, %v9210_v0, inf  ;;  %8048 = vmatprep.mubr.msk.bf16.mxu0 %vm47_vm1, %v339_v22 }
  0xe5   :  { %8049 = vmatmul.mubr.msk.bf16.vlgmr.msra.gmra.mrb[4].mxu0 %vm47_vm1, %v340_v29  ;;  %v247_v29 = vld [vmem:[%s13350_s3] sm:$0x3] }
  0xe6   :  { %8052 = vmatprep.mubr.msk.bf16.mxu0 %vm47_vm1, %v341_v30  ;;  %v272_v30 = vand.u32 %v9234_v21, %v247_v29 }
  0xe7   :  { %447 = vmin.xlane.f32.xlu0 %v446_v62  ;;  %444 = vmin.xlane.f32.xlu1 %v443_v1 }
  0xe8   :  { %8036 = vmatprep.subr.bf16.mxu1 %v272_v30 }
  0xe9   :  { %8037 = vmatpush3.bf16.msra.mxu1 %v272_v30 }
  0xeb   :  { %453 = vmin.xlane.f32.xlu0 %v452_v12  ;;  %450 = vmin.xlane.f32.xlu1 %v449_v13 }
  0xec   :  { %8039 = vmatmul.mubr.msk.bf16.vlgmr.msra.gmra.mrb[4].mxu1 %vm47_vm1, %v244_v6 }
  0xed   :  { %8053 = vmatmul.mubr.msk.bf16.gmra.mrb[8].mxu0 %vm47_vm1, %v342_v33  ;;  %8042 = vmatprep.mubr.msk.bf16.mxu1 %vm47_vm1, %v245_v10 }
  0xef   :  { %456 = vmin.xlane.f32.xlu1 %v455_v15 }
  0xf4   :  { %8043 = vmatmul.mubr.msk.bf16.gmra.mrb[8].mxu1 %vm47_vm1, %v246_v11 }
 0x16c   :  { %v436_v34 = vpop.xlane.xlu0 %435 }
 0x16d   :  { %vm458_vm14 = vcmp.le.f32.partialorder %v9179_v43, %v436_v34 }
 0x16e   :  { %v466_v35 = vsel %vm458_vm14, %v9171_v23, 64 }
 0x16f   :  { %v9262_v36 = vsel %vm433_vm4, %v466_v35, 2147483647 }
 0x170   :  { %v439_v37 = vpop.xlane.xlu0 %438  ;;  %v442_v38 = vpop.xlane.xlu1 %441  ;;  %v476_v39 = vshra.s32 %v9262_v36, 16  ;;  %v475_v9 = vand.u32 65535, %v9262_v36 }
 0x171   :  { %vm459_vm15 = vcmp.le.f32.partialorder %v9189_v52, %v439_v37  ;;  %vm460_vm0 = vcmp.le.f32.partialorder %v9195_v56, %v442_v38 }
 0x172   :  { %v467_v40 = vsel %vm459_vm15, %v9171_v23, 64  ;;  %v468_v41 = vsel %vm460_vm0, %v9171_v23, 64  ;;  %v9269_v42 = vcvt.s32.f32 %v476_v39  ;;  %v477_v11 = vcvt.s32.f32 %v475_v9 }
 0x173   :  { %v9272_v44 = vsel %vm433_vm4, %v467_v40, 2147483647  ;;  %v9275_v45 = vsel %vm433_vm4, %v468_v41, 2147483647 }
 0x174   :  { %479 = vmin.xlane.f32.xlu0 %v9269_v42  ;;  %v448_v46 = vpop.xlane.xlu0 %447  ;;  %v445_v47 = vpop.xlane.xlu1 %444  ;;  %v491_v48 = vshra.s32 %v9272_v44, 16  ;;  %v506_v49 = vshra.s32 %v9275_v45, 16  ;;  %v505_v37 = vand.u32 65535, %v9275_v45  ;;  %v490_v38 = vand.u32 65535, %v9272_v44 }
 0x175   :  { %vm462_vm2 = vcmp.le.f32.partialorder %v9198_v58, %v448_v46  ;;  %vm461_vm3 = vcmp.le.f32.partialorder %v9205_v61, %v445_v47 }
 0x176   :  { %v470_v50 = vsel %vm462_vm2, %v9171_v23, 64  ;;  %v469_v51 = vsel %vm461_vm3, %v9171_v23, 64  ;;  %v9284_v53 = vcvt.s32.f32 %v491_v48  ;;  %v9286_v54 = vcvt.s32.f32 %v506_v49 }
 0x177   :  { %v9289_v55 = vsel %vm433_vm4, %v470_v50, 2147483647  ;;  %v9292_v57 = vsel %vm433_vm4, %v469_v51, 2147483647  ;;  %v507_v46 = vcvt.s32.f32 %v505_v37  ;;  %v492_v47 = vcvt.s32.f32 %v490_v38 }
 0x178   :  { %v454_v59 = vpop.xlane.xlu0 %453  ;;  %494 = vmin.xlane.f32.xlu1 %v9284_v53  ;;  %509 = vmin.xlane.f32.xlu0 %v9286_v54  ;;  %v451_v60 = vpop.xlane.xlu1 %450  ;;  %v536_v62 = vshra.s32 %v9289_v55, 16  ;;  %v521_v63 = vshra.s32 %v9292_v57, 16  ;;  %v535_v48 = vand.u32 65535, %v9289_v55  ;;  %v520_v49 = vand.u32 65535, %v9292_v57 }
 0x179   :  { %vm464_vm5 = vcmp.le.f32.partialorder %v9210_v0, %v454_v59  ;;  %vm463_vm6 = vcmp.le.f32.partialorder %v9214_v2, %v451_v60 }
 0x17a   :  { %v472_v1 = vsel %vm464_vm5, %v9171_v23, 64  ;;  %v471_v12 = vsel %vm463_vm6, %v9171_v23, 64  ;;  %v9302_v13 = vcvt.s32.f32 %v536_v62  ;;  %v9304_v15 = vcvt.s32.f32 %v521_v63 }
 0x17b   :  { %v9307_v16 = vsel %vm433_vm4, %v472_v1, 2147483647  ;;  %v9310_v17 = vsel %vm433_vm4, %v471_v12, 2147483647  ;;  %v537_v50 = vcvt.s32.f32 %v535_v48  ;;  %v522_v51 = vcvt.s32.f32 %v520_v49 }
 0x17c   :  { %539 = vmin.xlane.f32.xlu0 %v9302_v13  ;;  %524 = vmin.xlane.f32.xlu1 %v9304_v15  ;;  %v457_v18 = vpop.xlane.xlu1 %456  ;;  %v566_v19 = vshra.s32 %v9307_v16, 16  ;;  %v551_v20 = vshra.s32 %v9310_v17, 16  ;;  %v565_v59 = vand.u32 65535, %v9307_v16  ;;  %v550_v60 = vand.u32 65535, %v9310_v17 }
 0x17d   :  { %vm465_vm7 = vcmp.le.f32.partialorder %v9221_v14, %v457_v18 }
 0x17e   :  { %v473_v22 = vsel %vm465_vm7, %v9171_v23, 64  ;;  %v9318_v24 = vcvt.s32.f32 %v566_v19  ;;  %v9320_v25 = vcvt.s32.f32 %v551_v20  ;;  %v567_v62 = vcvt.s32.f32 %v565_v59 }
 0x17f   :  { %v9323_v26 = vsel %vm433_vm4, %v473_v22, 2147483647  ;;  %v552_v63 = vcvt.s32.f32 %v550_v60 }
 0x180   :  { %569 = vmin.xlane.f32.xlu0 %v9318_v24  ;;  %554 = vmin.xlane.f32.xlu1 %v9320_v25  ;;  %v581_v27 = vshra.s32 %v9323_v26, 16  ;;  %v580_v1 = vand.u32 65535, %v9323_v26 }
 0x182   :  { %v9328_v28 = vcvt.s32.f32 %v581_v27 }
 0x184   :  { %584 = vmin.xlane.f32.xlu1 %v9328_v28 }
 0x1b8   :  { %v8050_v31 = vpop.f32.mrb[4].mxu0 }
 0x1b9   :  { %v393_v32 = vpop.f32.mrb[5].mxu0 }
 0x1ba   :  { %v8051_v21 = vpop.f32.mrb[6].mxu0 }
 0x1bb   :  { %v9347_v33 = vpack.c.bf16 %v8051_v21, %v8050_v31  ;;  %v396_v34 = vpop.f32.mrb[7].mxu0 }
 0x1bc   :  { %v9349_v35 = vpack.c.bf16 %v396_v34, %v393_v32 }
 0x1be   :  { %8761 = vmatprep.subr.bf16.mxu1 %v9349_v35 }
 0x1bf   :  { %8763 = vmatpush3.bf16.msra.mxu1 %v9349_v35 }
 0x1c0   :  { %v8054_v3 = vpop.f32.mrb[8].mxu0  ;;  %8765 = vmatprep.subr.bf16.mxu1 %v9347_v33 }
 0x1c1   :  { %v409_v4 = vpop.f32.mrb[9].mxu0 }
 0x1c2   :  { %v8055_v5 = vpop.f32.mrb[10].mxu0 }
 0x1c3   :  { %v9354_v6 = vpack.c.bf16 %v8055_v5, %v8054_v3  ;;  %v412_v7 = vpop.f32.mrb[11].mxu0  ;;  %8767 = vmatpush3.bf16.msra.mxu1 %v9347_v33 }
 0x1c4   :  { %v9357_v8 = vpack.c.bf16 %v412_v7, %v409_v4 }
 0x1c5   :  { %13405 = vst [vmem:[#allocation2_spill] sm:$0xff] %v9354_v6 }
 0x1c6   :  { %13406 = vst [vmem:[#allocation3_spill] sm:$0xff] %v9357_v8  ;;  %8769 = vmatprep.subr.bf16.mxu1 %v9357_v8 }
 0x1c7   :  { %8771 = vmatpush3.bf16.msra.mxu1 %v9357_v8 }
 0x1c8   :  { %8773 = vmatprep.subr.bf16.mxu1 %v9354_v6 }
 0x1cb   :  { %8775 = vmatpush3.bf16.msra.mxu1 %v9354_v6 }
 0x1cc   :  { %8777 = vmatprep.subr.bf16.mxu1 %v9349_v35 }
 0x201   :  { %v480_v10 = vpop.xlane.xlu0 %479 }
 0x202   :  { %vm481_vm1 = vcmp.eq.f32.partialorder %v9269_v42, %v480_v10  ;;  %v486_v18 = vcvt.f32.s32 %v480_v10 }
 0x203   :  { %v482_v39 = vsel %vm481_vm1, %v477_v11, inf }
 0x204   :  { %483 = vmin.xlane.f32.xlu0 %v482_v39  ;;  %v487_v22 = vshll.u32 %v486_v18, 16 }
 0x205   :  { %v510_v40 = vpop.xlane.xlu0 %509  ;;  %v495_v41 = vpop.xlane.xlu1 %494 }
 0x206   :  { %vm511_vm8 = vcmp.eq.f32.partialorder %v9286_v54, %v510_v40  ;;  %vm496_vm9 = vcmp.eq.f32.partialorder %v9284_v53, %v495_v41  ;;  %v516_v19 = vcvt.f32.s32 %v510_v40  ;;  %v501_v26 = vcvt.f32.s32 %v495_v41 }
 0x207   :  { %v512_v36 = vsel %vm511_vm8, %v507_v46, inf  ;;  %v497_v45 = vsel %vm496_vm9, %v492_v47, inf }
 0x208   :  { %513 = vmin.xlane.f32.xlu0 %v512_v36  ;;  %498 = vmin.xlane.f32.xlu1 %v497_v45  ;;  %v502_v21 = vshll.u32 %v501_v26, 16 }
 0x209   :  { %v540_v44 = vpop.xlane.xlu0 %539  ;;  %v525_v42 = vpop.xlane.xlu1 %524 }
 0x20a   :  { %vm541_vm10 = vcmp.eq.f32.partialorder %v9302_v13, %v540_v44  ;;  %vm526_vm11 = vcmp.eq.f32.partialorder %v9304_v15, %v525_v42  ;;  %v582_v15 = vcvt.s32.f32 %v580_v1  ;;  %v546_v29 = vcvt.f32.s32 %v540_v44 }
 0x20b   :  { %v542_v55 = vsel %vm541_vm10, %v537_v50, inf  ;;  %v527_v54 = vsel %vm526_vm11, %v522_v51, inf  ;;  %v531_v30 = vcvt.f32.s32 %v525_v42 }
 0x20c   :  { %543 = vmin.xlane.f32.xlu0 %v542_v55  ;;  %528 = vmin.xlane.f32.xlu1 %v527_v54  ;;  %v547_v11 = vshll.u32 %v546_v29, 16 }
 0x20d   :  { %v570_v53 = vpop.xlane.xlu0 %569  ;;  %v555_v57 = vpop.xlane.xlu1 %554  ;;  %v532_v37 = vshll.u32 %v531_v30, 16 }
 0x20e   :  { %vm571_vm12 = vcmp.eq.f32.partialorder %v9318_v24, %v570_v53  ;;  %vm556_vm13 = vcmp.eq.f32.partialorder %v9320_v25, %v555_v57  ;;  %v517_v25 = vshll.u32 %v516_v19, 16  ;;  %v576_v38 = vcvt.f32.s32 %v570_v53 }
 0x20f   :  { %v572_v12 = vsel %vm571_vm12, %v567_v62, inf  ;;  %v557_v16 = vsel %vm556_vm13, %v552_v63, inf  ;;  %v561_v39 = vcvt.f32.s32 %v555_v57 }
 0x210   :  { %573 = vmin.xlane.f32.xlu0 %v572_v12  ;;  %558 = vmin.xlane.f32.xlu1 %v557_v16  ;;  %v577_v51 = vshll.u32 %v576_v38, 16 }
 0x211   :  { %v9379_v13 = vpop.xlane.xlu1 %584  ;;  %v562_v59 = vshll.u32 %v561_v39, 16 }
 0x212   :  { %vm586_vm14 = vcmp.eq.f32.partialorder %v9328_v28, %v9379_v13  ;;  %v13355_v28 = vmov 0.0  }
 0x213   :  { %v587_v17 = vsel %vm586_vm14, %v582_v15, inf }
 0x214   :  { %588 = vmin.xlane.f32.xlu1 %v587_v17 }
 0x291   :  { %v484_v20 = vpop.xlane.xlu0 %483 }
 0x292   :  { %v485_v24 = vcvt.f32.s32 %v484_v20 }
 0x294   :  { %v488_v27 = vadd.s32 %v487_v22, %v485_v24 }
 0x295   :  { %v514_v31 = vpop.xlane.xlu0 %513  ;;  %v499_v32 = vpop.xlane.xlu1 %498 }
 0x296   :  { %v515_v34 = vcvt.f32.s32 %v514_v31  ;;  %v500_v3 = vcvt.f32.s32 %v499_v32  ;;  %vm594_vm15 = vcmp.eq.s32.totalorder %v9171_v23, %v488_v27 }
 0x297   :  { %v7294_v4 = vsel %vm594_vm15, 1.0, %v13355_v28  ;;  %v9386_v5 = vsel %vm594_vm15, inf, %v9179_v43 }
 0x298   :  { %v518_v7 = vadd.s32 %v517_v25, %v515_v34  ;;  %v503_v9 = vadd.s32 %v502_v21, %v500_v3  ;;  %8072 = vmatprep.mubr.msk.f32.mxu1 %vm433_vm4, %v7294_v4  ;;  %v882_v10 = vsel %vm433_vm4, %v9386_v5, inf  ;;  %v9456_v25 = vpop.f32.mrb[4].mxu1  ;;  %v9482_v4 = vld [vmem:[%s13351_s6 + $0x8] sm:$0xff]  }
 0x299   :  { %883 = vmin.xlane.f32.xlu0 %v882_v10  ;;  %v544_v40 = vpop.xlane.xlu0 %543  ;;  %v529_v41 = vpop.xlane.xlu1 %528 }
 0x29a   :  { %vm595_vm0 = vcmp.eq.s32.totalorder %v9171_v23, %v503_v9  ;;  %v545_v46 = vcvt.f32.s32 %v544_v40  ;;  %v530_v47 = vcvt.f32.s32 %v529_v41  ;;  %vm596_vm2 = vcmp.eq.s32.totalorder %v9171_v23, %v518_v7  ;;  %v9458_v29 = vpop.f32.mrb[5].mxu1  ;;  %v9489_v7 = vld [vmem:[%s13351_s6 + $0x10] sm:$0xff]   ;;  %v9496_v9 = vld [vmem:[%s13351_s6 + $0x18] sm:$0xff]  }
 0x29b   :  { %v7295_v43 = vsel %vm595_vm0, 1.0, %v13355_v28  ;;  %v9395_v48 = vsel %vm596_vm2, inf, %v9195_v56  ;;  %v9398_v49 = vsel %vm595_vm0, inf, %v9189_v52  ;;  %v7296_v36 = vsel %vm596_vm2, 1.0, %v13355_v28  ;;  %v9465_v30 = vpop.f32.mrb[6].mxu1 }
 0x29c   :  { %v548_v45 = vadd.s32 %v547_v11, %v545_v46  ;;  %v533_v44 = vadd.s32 %v532_v37, %v530_v47  ;;  %8073 = vmatmul.mubr.msk.f32.vlgmr.msra.gmra.mrb[12].mxu1 %vm433_vm4, %v7295_v43  ;;  %v888_v42 = vsel %vm433_vm4, %v9395_v48, inf  ;;  %v885_v50 = vsel %vm433_vm4, %v9398_v49, inf  ;;  %v9467_v31 = vpop.f32.mrb[7].mxu1 }
 0x29d   :  { %v591_v56 = vcvt.f32.s32 %v9379_v13  ;;  %889 = vmin.xlane.f32.xlu0 %v888_v42  ;;  %v574_v60 = vpop.xlane.xlu0 %573  ;;  %886 = vmin.xlane.f32.xlu1 %v885_v50  ;;  %v559_v52 = vpop.xlane.xlu1 %558 }
 0x29e   :  { %v575_v55 = vcvt.f32.s32 %v574_v60  ;;  %8075 = vmatprep.mubr.msk.f32.mxu1 %vm433_vm4, %v7296_v36  ;;  %v560_v54 = vcvt.f32.s32 %v559_v52  ;;  %vm597_vm3 = vcmp.eq.s32.totalorder %v9171_v23, %v533_v44  ;;  %vm598_vm5 = vcmp.eq.s32.totalorder %v9171_v23, %v548_v45  ;;  %8779 = vmatpush3.bf16.msra.mxu1 %v9349_v35  ;;  %v9470_v32 = vpop.f32.mrb[8].mxu1 }
 0x29f   :  { %v7297_v53 = vsel %vm597_vm3, 1.0, %v13355_v28  ;;  %v9413_v57 = vsel %vm598_vm5, inf, %v9198_v58  ;;  %v9416_v62 = vsel %vm597_vm3, inf, %v9205_v61  ;;  %v7298_v63 = vsel %vm598_vm5, 1.0, %v13355_v28  ;;  %8781 = vmatprep.subr.bf16.mxu1 %v9347_v33  ;;  %v9473_v21 = vpop.f32.mrb[9].mxu1 }
 0x2a0   :  { %v578_v1 = vadd.s32 %v577_v51, %v575_v55  ;;  %v563_v12 = vadd.s32 %v562_v59, %v560_v54  ;;  %8076 = vmatmul.mubr.msk.f32.gmra.mrb[14].mxu1 %vm433_vm4, %v7297_v53  ;;  %v894_v16 = vsel %vm433_vm4, %v9413_v57, inf  ;;  %v891_v13 = vsel %vm433_vm4, %v9416_v62, inf  ;;  %v9475_v34 = vpop.f32.mrb[10].mxu1 }
 0x2a1   :  { %895 = vmin.xlane.f32.xlu0 %v894_v16  ;;  %892 = vmin.xlane.f32.xlu1 %v891_v13  ;;  %v589_v58 = vpop.xlane.xlu1 %588  ;;  %v592_v15 = vshll.u32 %v591_v56, 16  ;;  %v9477_v3 = vpop.f32.mrb[11].mxu1 }
 0x2a2   :  { %8078 = vmatprep.mubr.msk.f32.mxu1 %vm433_vm4, %v7298_v63  ;;  %v590_v61 = vcvt.f32.s32 %v589_v58  ;;  %vm599_vm6 = vcmp.eq.s32.totalorder %v9171_v23, %v563_v12  ;;  %vm600_vm7 = vcmp.eq.s32.totalorder %v9171_v23, %v578_v1  ;;  %8783 = vmatpush3.bf16.msra.mxu1 %v9347_v33 }
 0x2a3   :  { %v7299_v17 = vsel %vm599_vm6, 1.0, %v13355_v28  ;;  %v9431_v18 = vsel %vm600_vm7, inf, %v9210_v0  ;;  %v9434_v19 = vsel %vm599_vm6, inf, %v9214_v2  ;;  %v7300_v20 = vsel %vm600_vm7, 1.0, %v13355_v28  ;;  %8785 = vmatprep.subr.bf16.mxu1 %v9357_v8 }
 0x2a4   :  { %v593_v22 = vadd.s32 %v592_v15, %v590_v61  ;;  %8079 = vmatmul.mubr.msk.f32.gmra.mrb[16].mxu1 %vm433_vm4, %v7299_v17  ;;  %v900_v26 = vsel %vm433_vm4, %v9431_v18, inf  ;;  %v897_v24 = vsel %vm433_vm4, %v9434_v19, inf }
 0x2a5   :  { %901 = vmin.xlane.f32.xlu0 %v900_v26  ;;  %898 = vmin.xlane.f32.xlu1 %v897_v24 }
 0x2a6   :  { %8081 = vmatprep.mubr.msk.f32.mxu1 %vm433_vm4, %v7300_v20  ;;  %vm601_vm1 = vcmp.eq.s32.totalorder %v9171_v23, %v593_v22  ;;  %8787 = vmatpush3.bf16.msra.mxu1 %v9357_v8 }
 0x2a7   :  { %v7301_v0 = vsel %vm601_vm1, 1.0, %v13355_v28  ;;  %v9448_v2 = vsel %vm601_vm1, inf, %v9221_v14  ;;  %8789 = vmatprep.subr.bf16.mxu1 %v9354_v6  ;;  %v9463_v14 = vld [vmem:[%s13351_s6] sm:$0xff]  }
 0x2a8   :  { %8082 = vmatmul.mubr.msk.f32.gmra.mrb[18].mxu1 %vm433_vm4, %v7301_v0  ;;  %v903_v27 = vsel %vm433_vm4, %v9448_v2, inf  ;;  %8084 = vmatprep.subr.bf16.mxu0 %v9463_v14 }
 0x2a9   :  { %904 = vmin.xlane.f32.xlu1 %v903_v27  ;;  %8085 = vmatpush3.bf16.msra.mxu0 %v9463_v14 }
 0x2aa   :  { %8791 = vmatpush3.bf16.msra.mxu1 %v9354_v6  ;;  %8086 = vmatprep.subr.bf16.mxu0 %v9482_v4 }
 0x2ab   :  { %8793 = vmatprep.subr.bf16.mxu1 %v9349_v35 }
 0x2ad   :  { %8087 = vmatpush3.bf16.msra.mxu0 %v9482_v4 }
 0x2ae   :  { %8088 = vmatprep.subr.bf16.mxu0 %v9489_v7 }
 0x2b1   :  { %8089 = vmatpush3.bf16.msra.mxu0 %v9489_v7 }
 0x2b2   :  { %8090 = vmatprep.subr.bf16.mxu0 %v9496_v9 }
 0x2b5   :  { %8091 = vmatpush3.bf16.msra.mxu0 %v9496_v9 }
 0x2b6   :  { %8128 = vmatprep.subr.bf16.mxu0 %v9463_v14 }
 0x326   :  { %v884_v10 = vpop.xlane.xlu0 %883 }
 0x327   :  { %vm906_vm8 = vcmp.le.f32.partialorder %v9386_v5, %v884_v10 }
 0x328   :  { %v914_v11 = vsel %vm906_vm8, %v9171_v23, 64 }
 0x329   :  { %v9504_v37 = vsel %vm433_vm4, %v914_v11, 2147483647 }
 0x32a   :  { %v890_v38 = vpop.xlane.xlu0 %889  ;;  %v887_v39 = vpop.xlane.xlu1 %886  ;;  %v924_v40 = vshra.s32 %v9504_v37, 16 }
 0x32b   :  { %vm908_vm9 = vcmp.le.f32.partialorder %v9395_v48, %v890_v38  ;;  %vm907_vm10 = vcmp.le.f32.partialorder %v9398_v49, %v887_v39  ;;  %v7285_v38 = vld [vmem:[%s13352_s5] ss:$0 sm:$0xff] }
 0x32c   :  { %v916_v41 = vsel %vm908_vm9, %v9171_v23, 64  ;;  %v915_v46 = vsel %vm907_vm10, %v9171_v23, 64  ;;  %v9511_v47 = vcvt.s32.f32 %v924_v40  ;;  %v9577_v39 = vadd.f32 %v7285_v38, %v9467_v31 }
 0x32d   :  { %v9514_v43 = vsel %vm433_vm4, %v916_v41, 2147483647  ;;  %v9517_v36 = vsel %vm433_vm4, %v915_v46, 2147483647  ;;  %v9580_v40 = vadd.f32 %v7285_v38, %v9458_v29  ;;  %v9583_v46 = vadd.f32 %v9465_v30, %v7285_v38 }
 0x32e   :  { %927 = vmin.xlane.f32.xlu0 %v9511_v47  ;;  %v896_v45 = vpop.xlane.xlu0 %895  ;;  %v893_v44 = vpop.xlane.xlu1 %892  ;;  %v954_v42 = vshra.s32 %v9514_v43, 16  ;;  %v939_v50 = vshra.s32 %v9517_v36, 16  ;;  %13407 = vst [vmem:[#allocation4_spill] sm:$0xff] %v9577_v39  ;;  %v9591_v31 = vadd.f32 %v7285_v38, %v9477_v3  ;;  %v9595_v30 = vadd.f32 %v7285_v38, %v9473_v21 }
 0x32f   :  { %vm910_vm11 = vcmp.le.f32.partialorder %v9413_v57, %v896_v45  ;;  %vm909_vm12 = vcmp.le.f32.partialorder %v9416_v62, %v893_v44  ;;  %13408 = vst [vmem:[#allocation5_spill] sm:$0xff] %v9580_v40 }
 0x330   :  { %v918_v51 = vsel %vm910_vm11, %v9171_v23, 64  ;;  %v917_v59 = vsel %vm909_vm12, %v9171_v23, 64  ;;  %v9526_v56 = vcvt.s32.f32 %v954_v42  ;;  %v9528_v60 = vcvt.s32.f32 %v939_v50 }
 0x331   :  { %v9531_v52 = vsel %vm433_vm4, %v918_v51, 2147483647  ;;  %v9534_v55 = vsel %vm433_vm4, %v917_v59, 2147483647  ;;  %v9587_v42 = vadd.f32 %v9456_v25, %v7285_v38 }
 0x332   :  { %957 = vmin.xlane.f32.xlu0 %v9526_v56  ;;  %v902_v54 = vpop.xlane.xlu0 %901  ;;  %942 = vmin.xlane.f32.xlu1 %v9528_v60  ;;  %v899_v53 = vpop.xlane.xlu1 %898  ;;  %v984_v63 = vshra.s32 %v9531_v52, 16  ;;  %v969_v1 = vshra.s32 %v9534_v55, 16 }
 0x333   :  { %vm912_vm13 = vcmp.le.f32.partialorder %v9431_v18, %v902_v54  ;;  %vm911_vm14 = vcmp.le.f32.partialorder %v9434_v19, %v899_v53 }
 0x334   :  { %v920_v12 = vsel %vm912_vm13, %v9171_v23, 64  ;;  %v919_v16 = vsel %vm911_vm14, %v9171_v23, 64  ;;  %v9544_v13 = vcvt.s32.f32 %v984_v63  ;;  %v9546_v58 = vcvt.s32.f32 %v969_v1 }
 0x335   :  { %v9549_v15 = vsel %vm433_vm4, %v920_v12, 2147483647  ;;  %v9552_v61 = vsel %vm433_vm4, %v919_v16, 2147483647 }
 0x336   :  { %987 = vmin.xlane.f32.xlu0 %v9544_v13  ;;  %972 = vmin.xlane.f32.xlu1 %v9546_v58  ;;  %v905_v17 = vpop.xlane.xlu1 %904  ;;  %v1014_v20 = vshra.s32 %v9549_v15, 16  ;;  %v999_v22 = vshra.s32 %v9552_v61, 16 }
 0x337   :  { %vm913_vm15 = vcmp.le.f32.partialorder %v9448_v2, %v905_v17  ;;  %v9600_v17 = vadd.f32 %v9475_v34, %v7285_v38 }
 0x338   :  { %v921_v26 = vsel %vm913_vm15, %v9171_v23, 64  ;;  %v9560_v24 = vcvt.s32.f32 %v1014_v20  ;;  %v9562_v0 = vcvt.s32.f32 %v999_v22  ;;  %v9604_v22 = vadd.f32 %v9470_v32, %v7285_v38 }
 0x339   :  { %v9565_v27 = vsel %vm433_vm4, %v921_v26, 2147483647 }
 0x33a   :  { %1017 = vmin.xlane.f32.xlu0 %v9560_v24  ;;  %1002 = vmin.xlane.f32.xlu1 %v9562_v0  ;;  %v1029_v10 = vshra.s32 %v9565_v27, 16 }
 0x33c   :  { %v9570_v11 = vcvt.s32.f32 %v1029_v10 }
 0x33e   :  { %1032 = vmin.xlane.f32.xlu1 %v9570_v11 }
 0x36f   :  { %v8074_v41 = vpop.f32.mrb[12].mxu1 }
 0x370   :  { %v748_v45 = vadd.f32 %v8074_v41, %v9577_v39  ;;  %v708_v44 = vpop.f32.mrb[13].mxu1 }
 0x371   :  { %v747_v50 = vadd.f32 %v708_v44, %v9580_v40 }
 0x372   :  { %v756_v51 = vmax.f32 %v748_v45, 0.0 }
 0x373   :  { %v755_v59 = vmax.f32 %v747_v50, 0.0  ;;  %v8077_v54 = vpop.f32.mrb[14].mxu1 }
 0x374   :  { %v750_v29 = vadd.f32 %v8077_v54, %v9583_v46  ;;  %v718_v53 = vpop.f32.mrb[15].mxu1  ;;  %v923_v54 = vand.u32 65535, %v9504_v37 }
 0x375   :  { %v763_v63 = vpack.c.bf16 %v756_v51, %v755_v59  ;;  %v749_v1 = vadd.f32 %v718_v53, %v9587_v42 }
 0x376   :  { %v758_v12 = vmax.f32 %v750_v29, 0.0  ;;  %v925_v53 = vcvt.s32.f32 %v923_v54 }
 0x377   :  { %v757_v25 = vmax.f32 %v749_v1, 0.0  ;;  %v8080_v16 = vpop.f32.mrb[16].mxu1  ;;  %8092 = vmatprep.mubr.msk.bf16.mxu0 %vm433_vm4, %v763_v63  ;;  %v953_v63 = vand.u32 65535, %v9514_v43  ;;  %v938_v1 = vand.u32 65535, %v9517_v36 }
 0x378   :  { %v752_v3 = vadd.f32 %v8080_v16, %v9591_v31  ;;  %v728_v20 = vpop.f32.mrb[17].mxu1 }
 0x379   :  { %v764_v26 = vpack.c.bf16 %v758_v12, %v757_v25  ;;  %v751_v21 = vadd.f32 %v728_v20, %v9595_v30  ;;  %v940_v20 = vcvt.s32.f32 %v938_v1 }
 0x37a   :  { %v760_v10 = vmax.f32 %v752_v3, 0.0  ;;  %v955_v3 = vcvt.s32.f32 %v953_v63 }
 0x37b   :  { %v759_v41 = vmax.f32 %v751_v21, 0.0  ;;  %v8083_v45 = vpop.f32.mrb[18].mxu1  ;;  %8093 = vmatmul.mubr.msk.bf16.vlgmr.msra.gmra.mrb[12].mxu0 %vm433_vm4, %v764_v26  ;;  %v983_v26 = vand.u32 65535, %v9531_v52  ;;  %v968_v21 = vand.u32 65535, %v9534_v55 }
 0x37c   :  { %v754_v44 = vadd.f32 %v8083_v45, %v9600_v17  ;;  %v738_v50 = vpop.f32.mrb[19].mxu1  ;;  %8129 = vmatpush3.bf16.msra.mxu0 %v9463_v14  ;;  %v1013_v45 = vand.u32 65535, %v9549_v15 }
 0x37d   :  { %v765_v34 = vpack.c.bf16 %v760_v10, %v759_v41  ;;  %v753_v51 = vadd.f32 %v738_v50, %v9604_v22  ;;  %8130 = vmatprep.subr.bf16.mxu0 %v9482_v4  ;;  %v985_v10 = vcvt.s32.f32 %v983_v26  ;;  %v970_v41 = vcvt.s32.f32 %v968_v21 }
 0x37e   :  { %v762_v32 = vmax.f32 %v754_v44, 0.0  ;;  %v998_v44 = vand.u32 65535, %v9552_v61  ;;  %v1015_v50 = vcvt.s32.f32 %v1013_v45 }
 0x37f   :  { %v761_v38 = vmax.f32 %v753_v51, 0.0  ;;  %8096 = vmatprep.mubr.msk.bf16.mxu0 %vm433_vm4, %v765_v34  ;;  %v1028_v51 = vand.u32 65535, %v9565_v27 }
 0x380   :  { %8131 = vmatpush3.bf16.msra.mxu0 %v9482_v4  ;;  %v1000_v34 = vcvt.s32.f32 %v998_v44 }
 0x381   :  { %v766_v59 = vpack.c.bf16 %v762_v32, %v761_v38  ;;  %8132 = vmatprep.subr.bf16.mxu0 %v9489_v7  ;;  %v1030_v61 = vcvt.s32.f32 %v1028_v51 }
 0x383   :  { %8097 = vmatmul.mubr.msk.bf16.gmra.mrb[16].mxu0 %vm433_vm4, %v766_v59 }
 0x384   :  { %8133 = vmatpush3.bf16.msra.mxu0 %v9489_v7 }
 0x385   :  { %8134 = vmatprep.subr.bf16.mxu0 %v9496_v9 }
 0x388   :  { %8135 = vmatpush3.bf16.msra.mxu0 %v9496_v9 }
 0x389   :  { %8172 = vmatprep.subr.bf16.mxu0 %v9463_v14 }
 0x3bb   :  { %v928_v29 = vpop.xlane.xlu0 %927 }
 0x3bc   :  { %vm929_vm0 = vcmp.eq.f32.partialorder %v9511_v47, %v928_v29  ;;  %v934_v38 = vcvt.f32.s32 %v928_v29 }
 0x3bd   :  { %v930_v12 = vsel %vm929_vm0, %v925_v53, inf }
 0x3be   :  { %931 = vmin.xlane.f32.xlu0 %v930_v12  ;;  %v935_v59 = vshll.u32 %v934_v38, 16 }
 0x3bf   :  { %v958_v25 = vpop.xlane.xlu0 %957  ;;  %v943_v16 = vpop.xlane.xlu1 %942 }
 0x3c0   :  { %vm959_vm2 = vcmp.eq.f32.partialorder %v9526_v56, %v958_v25  ;;  %vm944_vm3 = vcmp.eq.f32.partialorder %v9528_v60, %v943_v16  ;;  %v964_v54 = vcvt.f32.s32 %v958_v25  ;;  %v949_v53 = vcvt.f32.s32 %v943_v16 }
 0x3c1   :  { %v960_v37 = vsel %vm959_vm2, %v955_v3, inf  ;;  %v945_v43 = vsel %vm944_vm3, %v940_v20, inf }
 0x3c2   :  { %961 = vmin.xlane.f32.xlu0 %v960_v37  ;;  %946 = vmin.xlane.f32.xlu1 %v945_v43  ;;  %v965_v26 = vshll.u32 %v964_v54, 16  ;;  %v950_v29 = vshll.u32 %v949_v53, 16 }
 0x3c3   :  { %v988_v36 = vpop.xlane.xlu0 %987  ;;  %v973_v47 = vpop.xlane.xlu1 %972 }
 0x3c4   :  { %vm989_vm5 = vcmp.eq.f32.partialorder %v9544_v13, %v988_v36  ;;  %vm974_vm6 = vcmp.eq.f32.partialorder %v9546_v58, %v973_v47  ;;  %v994_v1 = vcvt.f32.s32 %v988_v36  ;;  %v979_v12 = vcvt.f32.s32 %v973_v47 }
 0x3c5   :  { %v990_v52 = vsel %vm989_vm5, %v985_v10, inf  ;;  %v975_v56 = vsel %vm974_vm6, %v970_v41, inf }
 0x3c6   :  { %991 = vmin.xlane.f32.xlu0 %v990_v52  ;;  %976 = vmin.xlane.f32.xlu1 %v975_v56  ;;  %v995_v41 = vshll.u32 %v994_v1, 16  ;;  %v980_v45 = vshll.u32 %v979_v12, 16 }
 0x3c7   :  { %v9632_v60 = vpop.xlane.xlu0 %1017  ;;  %v9634_v55 = vpop.xlane.xlu1 %1002 }
 0x3c8   :  { %vm1019_vm7 = vcmp.eq.f32.partialorder %v9560_v24, %v9632_v60  ;;  %vm1004_vm1 = vcmp.eq.f32.partialorder %v9562_v0, %v9634_v55  ;;  %v1024_v56 = vcvt.f32.s32 %v9632_v60 }
 0x3c9   :  { %v1020_v13 = vsel %vm1019_vm7, %v1015_v50, inf  ;;  %v1005_v58 = vsel %vm1004_vm1, %v1000_v34, inf  ;;  %v1009_v50 = vcvt.f32.s32 %v9634_v55 }
 0x3ca   :  { %1021 = vmin.xlane.f32.xlu0 %v1020_v13  ;;  %1006 = vmin.xlane.f32.xlu1 %v1005_v58 }
 0x3cb   :  { %v9641_v15 = vpop.xlane.xlu1 %1032  ;;  %v1010_v12 = vshll.u32 %v1009_v50, 16 }
 0x3cc   :  { %vm1034_vm8 = vcmp.eq.f32.partialorder %v9570_v11, %v9641_v15  ;;  %v1039_v53 = vcvt.f32.s32 %v9641_v15 }
 0x3cd   :  { %v1035_v32 = vsel %vm1034_vm8, %v1030_v61, inf }
 0x3ce   :  { %1036 = vmin.xlane.f32.xlu1 %v1035_v32 }
 0x44b   :  { %v932_v27 = vpop.xlane.xlu0 %931 }
 0x44c   :  { %v933_v24 = vcvt.f32.s32 %v932_v27 }
 0x44e   :  { %v936_v63 = vadd.s32 %v935_v59, %v933_v24  ;;  %v9645_v0 = vpop.f32.mrb[12].mxu0  ;;  %v1025_v24 = vshll.u32 %v1024_v56, 16 }
 0x44f   :  { %v962_v3 = vpop.xlane.xlu0 %961  ;;  %v9647_v20 = vpop.f32.mrb[13].mxu0 }
 0x450   :  { %v963_v21 = vcvt.f32.s32 %v962_v3  ;;  %v947_v37 = vpop.xlane.xlu1 %946  ;;  %v9649_v11 = vpop.f32.mrb[14].mxu0  ;;  %vm1042_vm9 = vcmp.eq.s32.totalorder %v9171_v23, %v936_v63 }
 0x451   :  { %v948_v43 = vcvt.f32.s32 %v947_v37  ;;  %v9652_v25 = vpop.f32.mrb[15].mxu0  ;;  %v7319_v16 = vsel %vm1042_vm9, 1.0, %v13355_v28  ;;  %v9656_v10 = vsel %vm1042_vm9, inf, %v9386_v5 }
 0x452   :  { %v966_v36 = vadd.s32 %v965_v26, %v963_v21  ;;  %8116 = vmatprep.mubr.msk.f32.mxu1 %vm433_vm4, %v7319_v16  ;;  %v1308_v47 = vsel %vm433_vm4, %v9656_v10, inf }
 0x453   :  { %v951_v44 = vadd.s32 %v950_v29, %v948_v43  ;;  %1309 = vmin.xlane.f32.xlu0 %v1308_v47  ;;  %v992_v52 = vpop.xlane.xlu0 %991 }
 0x454   :  { %v993_v34 = vcvt.f32.s32 %v992_v52  ;;  %v977_v51 = vpop.xlane.xlu1 %976  ;;  %vm1044_vm10 = vcmp.eq.s32.totalorder %v9171_v23, %v966_v36  ;;  %v1040_v36 = vshll.u32 %v1039_v53, 16 }
 0x455   :  { %vm1043_vm11 = vcmp.eq.s32.totalorder %v9171_v23, %v951_v44  ;;  %v978_v5 = vcvt.f32.s32 %v977_v51  ;;  %v9666_v13 = vsel %vm1044_vm10, inf, %v9395_v48  ;;  %v7321_v58 = vsel %vm1044_vm10, 1.0, %v13355_v28 }
 0x456   :  { %v7320_v61 = vsel %vm1043_vm11, 1.0, %v13355_v28  ;;  %v996_v32 = vadd.s32 %v995_v41, %v993_v34  ;;  %v9670_v38 = vpop.f32.mrb[16].mxu0  ;;  %v1314_v60 = vsel %vm433_vm4, %v9666_v13, inf  ;;  %v9675_v55 = vsel %vm1043_vm11, inf, %v9398_v49 }
 0x457   :  { %v981_v27 = vadd.s32 %v980_v45, %v978_v5  ;;  %8117 = vmatmul.mubr.msk.f32.vlgmr.msra.gmra.mrb[20].mxu1 %vm433_vm4, %v7320_v61  ;;  %1315 = vmin.xlane.f32.xlu0 %v1314_v60  ;;  %v1022_v59 = vpop.xlane.xlu0 %1021  ;;  %v9678_v48 = vpop.f32.mrb[17].mxu0  ;;  %v1311_v54 = vsel %vm433_vm4, %v9675_v55, inf }
 0x458   :  { %v1023_v63 = vcvt.f32.s32 %v1022_v59  ;;  %1312 = vmin.xlane.f32.xlu1 %v1311_v54  ;;  %8119 = vmatprep.mubr.msk.f32.mxu1 %vm433_vm4, %v7321_v58  ;;  %v1007_v1 = vpop.xlane.xlu1 %1006  ;;  %v9684_v49 = vpop.f32.mrb[18].mxu0  ;;  %vm1046_vm12 = vcmp.eq.s32.totalorder %v9171_v23, %v996_v32 }
 0x459   :  { %v1008_v3 = vcvt.f32.s32 %v1007_v1  ;;  %v9687_v26 = vpop.f32.mrb[19].mxu0  ;;  %vm1045_vm13 = vcmp.eq.s32.totalorder %v9171_v23, %v981_v27  ;;  %v9691_v21 = vsel %vm1046_vm12, inf, %v9413_v57  ;;  %8795 = vmatpush3.bf16.msra.mxu1 %v9349_v35  ;;  %v7323_v57 = vsel %vm1046_vm12, 1.0, %v13355_v28 }
 0x45a   :  { %v1026_v15 = vadd.s32 %v1025_v24, %v1023_v63  ;;  %v7322_v37 = vsel %vm1045_vm13, 1.0, %v13355_v28  ;;  %v1320_v29 = vsel %vm433_vm4, %v9691_v21, inf  ;;  %8797 = vmatprep.subr.bf16.mxu1 %v9347_v33  ;;  %v9700_v16 = vsel %vm1045_vm13, inf, %v9416_v62 }
 0x45b   :  { %v1011_v43 = vadd.s32 %v1010_v12, %v1008_v3  ;;  %8120 = vmatmul.mubr.msk.f32.gmra.mrb[22].mxu1 %vm433_vm4, %v7322_v37  ;;  %1321 = vmin.xlane.f32.xlu0 %v1320_v29  ;;  %v1317_v47 = vsel %vm433_vm4, %v9700_v16, inf }
 0x45c   :  { %8122 = vmatprep.mubr.msk.f32.mxu1 %vm433_vm4, %v7323_v57  ;;  %v1037_v41 = vpop.xlane.xlu1 %1036  ;;  %vm1048_vm14 = vcmp.eq.s32.totalorder %v9171_v23, %v1026_v15  ;;  %1318 = vmin.xlane.f32.xlu1 %v1317_v47 }
 0x45d   :  { %v1038_v45 = vcvt.f32.s32 %v1037_v41  ;;  %vm1047_vm15 = vcmp.eq.s32.totalorder %v9171_v23, %v1011_v43  ;;  %v9709_v44 = vsel %vm1048_vm14, inf, %v9431_v18  ;;  %v7325_v62 = vsel %vm1048_vm14, 1.0, %v13355_v28  ;;  %8799 = vmatpush3.bf16.msra.mxu1 %v9347_v33 }
 0x45e   :  { %v7324_v52 = vsel %vm1047_vm15, 1.0, %v13355_v28  ;;  %v1326_v56 = vsel %vm433_vm4, %v9709_v44, inf  ;;  %v9717_v50 = vsel %vm1047_vm15, inf, %v9434_v19  ;;  %8801 = vmatprep.subr.bf16.mxu1 %v9357_v8 }
 0x45f   :  { %v1041_v34 = vadd.s32 %v1040_v36, %v1038_v45  ;;  %8123 = vmatmul.mubr.msk.f32.gmra.mrb[24].mxu1 %vm433_vm4, %v7324_v52  ;;  %1327 = vmin.xlane.f32.xlu0 %v1326_v56  ;;  %v1323_v18 = vsel %vm433_vm4, %v9717_v50, inf }
 0x460   :  { %8125 = vmatprep.mubr.msk.f32.mxu1 %vm433_vm4, %v7325_v62  ;;  %1324 = vmin.xlane.f32.xlu1 %v1323_v18 }
 0x461   :  { %vm1049_vm0 = vcmp.eq.s32.totalorder %v9171_v23, %v1041_v34  ;;  %8803 = vmatpush3.bf16.msra.mxu1 %v9357_v8 }
 0x462   :  { %v7326_v51 = vsel %vm1049_vm0, 1.0, %v13355_v28  ;;  %v9728_v19 = vsel %vm1049_vm0, inf, %v9448_v2  ;;  %8805 = vmatprep.subr.bf16.mxu1 %v9354_v6 }
 0x463   :  { %8126 = vmatmul.mubr.msk.f32.gmra.mrb[26].mxu1 %vm433_vm4, %v7326_v51  ;;  %v1329_v5 = vsel %vm433_vm4, %v9728_v19, inf }
 0x464   :  { %1330 = vmin.xlane.f32.xlu1 %v1329_v5 }
 0x465   :  { %8807 = vmatpush3.bf16.msra.mxu1 %v9354_v6 }
 0x466   :  { %8809 = vmatprep.subr.bf16.mxu1 %v9349_v35 }
 0x4e0   :  { %v1310_v58 = vpop.xlane.xlu0 %1309 }
 0x4e1   :  { %vm1332_vm2 = vcmp.le.f32.partialorder %v9656_v10, %v1310_v58 }
 0x4e2   :  { %v1340_v61 = vsel %vm1332_vm2, %v9171_v23, 64 }
 0x4e3   :  { %v9739_v2 = vsel %vm433_vm4, %v1340_v61, 2147483647 }
 0x4e4   :  { %v1316_v32 = vpop.xlane.xlu0 %1315  ;;  %v1350_v60 = vshra.s32 %v9739_v2, 16 }
 0x4e5   :  { %vm1334_vm3 = vcmp.le.f32.partialorder %v9666_v13, %v1316_v32  ;;  %v1313_v27 = vpop.xlane.xlu1 %1312 }
 0x4e6   :  { %v1342_v59 = vsel %vm1334_vm3, %v9171_v23, 64  ;;  %vm1333_vm5 = vcmp.le.f32.partialorder %v9675_v55, %v1313_v27  ;;  %v9745_v54 = vcvt.s32.f32 %v1350_v60 }
 0x4e7   :  { %v1341_v24 = vsel %vm1333_vm5, %v9171_v23, 64  ;;  %v9749_v53 = vsel %vm433_vm4, %v1342_v59, 2147483647 }
 0x4e8   :  { %1353 = vmin.xlane.f32.xlu0 %v9745_v54  ;;  %v1322_v63 = vpop.xlane.xlu0 %1321  ;;  %v1380_v1 = vshra.s32 %v9749_v53, 16  ;;  %v9754_v12 = vsel %vm433_vm4, %v1341_v24, 2147483647 }
 0x4e9   :  { %vm1336_vm6 = vcmp.le.f32.partialorder %v9691_v21, %v1322_v63  ;;  %v1365_v3 = vshra.s32 %v9754_v12, 16  ;;  %v1319_v37 = vpop.xlane.xlu1 %1318 }
 0x4ea   :  { %v1344_v15 = vsel %vm1336_vm6, %v9171_v23, 64  ;;  %v9759_v29 = vcvt.s32.f32 %v1380_v1  ;;  %vm1335_vm7 = vcmp.le.f32.partialorder %v9700_v16, %v1319_v37 }
 0x4eb   :  { %v9762_v43 = vcvt.s32.f32 %v1365_v3  ;;  %v9765_v57 = vsel %vm433_vm4, %v1344_v15, 2147483647  ;;  %v1343_v36 = vsel %vm1335_vm7, %v9171_v23, 64 }
 0x4ec   :  { %1383 = vmin.xlane.f32.xlu0 %v9759_v29  ;;  %v1328_v47 = vpop.xlane.xlu0 %1327  ;;  %v1410_v41 = vshra.s32 %v9765_v57, 16  ;;  %v9773_v45 = vsel %vm433_vm4, %v1343_v36, 2147483647 }
 0x4ed   :  { %vm1338_vm1 = vcmp.le.f32.partialorder %v9709_v44, %v1328_v47  ;;  %1368 = vmin.xlane.f32.xlu1 %v9762_v43  ;;  %v1325_v52 = vpop.xlane.xlu1 %1324  ;;  %v1395_v34 = vshra.s32 %v9773_v45, 16 }
 0x4ee   :  { %v1346_v62 = vsel %vm1338_vm1, %v9171_v23, 64  ;;  %v9776_v56 = vcvt.s32.f32 %v1410_v41  ;;  %vm1337_vm8 = vcmp.le.f32.partialorder %v9717_v50, %v1325_v52 }
 0x4ef   :  { %v9781_v18 = vsel %vm433_vm4, %v1346_v62, 2147483647  ;;  %v1345_v51 = vsel %vm1337_vm8, %v9171_v23, 64  ;;  %v9785_v5 = vcvt.s32.f32 %v1395_v34 }
 0x4f0   :  { %1413 = vmin.xlane.f32.xlu0 %v9776_v56  ;;  %v1440_v58 = vshra.s32 %v9781_v18, 16  ;;  %v9789_v61 = vsel %vm433_vm4, %v1345_v51, 2147483647 }
 0x4f1   :  { %1398 = vmin.xlane.f32.xlu1 %v9785_v5  ;;  %v1331_v32 = vpop.xlane.xlu1 %1330  ;;  %v1425_v27 = vshra.s32 %v9789_v61, 16 }
 0x4f2   :  { %v9792_v60 = vcvt.s32.f32 %v1440_v58  ;;  %vm1339_vm9 = vcmp.le.f32.partialorder %v9728_v19, %v1331_v32 }
 0x4f3   :  { %v1347_v59 = vsel %vm1339_vm9, %v9171_v23, 64  ;;  %v9798_v24 = vcvt.s32.f32 %v1425_v27 }
 0x4f4   :  { %1443 = vmin.xlane.f32.xlu0 %v9792_v60  ;;  %v9801_v63 = vsel %vm433_vm4, %v1347_v59, 2147483647 }
 0x4f5   :  { %1428 = vmin.xlane.f32.xlu1 %v9798_v24  ;;  %v1455_v1 = vshra.s32 %v9801_v63, 16 }
 0x4f7   :  { %v9805_v3 = vcvt.s32.f32 %v1455_v1 }
 0x4f9   :  { %1458 = vmin.xlane.f32.xlu1 %v9805_v3 }
 0x52a   :  { %v8118_v15 = vpop.f32.mrb[20].mxu1 }
 0x52b   :  { %v1196_v37 = vadd.f32 %v8118_v15, %v9577_v39  ;;  %v1156_v36 = vpop.f32.mrb[21].mxu1 }
 0x52c   :  { %v1195_v47 = vadd.f32 %v1156_v36, %v9580_v40 }
 0x52d   :  { %v1204_v41 = vmax.f32 %v1196_v37, 0.0 }
 0x52e   :  { %v1203_v62 = vmax.f32 %v1195_v47, 0.0  ;;  %v8121_v52 = vpop.f32.mrb[22].mxu1 }
 0x52f   :  { %v1198_v34 = vadd.f32 %v8121_v52, %v9583_v46  ;;  %v1166_v51 = vpop.f32.mrb[23].mxu1 }
 0x530   :  { %v1211_v58 = vpack.c.bf16 %v1204_v41, %v1203_v62  ;;  %v1197_v32 = vadd.f32 %v1166_v51, %v9587_v42 }
 0x531   :  { %v1206_v27 = vmax.f32 %v1198_v34, 0.0 }
 0x532   :  { %v1205_v59 = vmax.f32 %v1197_v32, 0.0  ;;  %v8124_v1 = vpop.f32.mrb[24].mxu1  ;;  %8136 = vmatprep.mubr.msk.bf16.mxu0 %vm433_vm4, %v1211_v58 }
 0x533   :  { %v1200_v28 = vadd.f32 %v8124_v1, %v9591_v31  ;;  %v1176_v15 = vpop.f32.mrb[25].mxu1 }
 0x534   :  { %v1212_v39 = vpack.c.bf16 %v1206_v27, %v1205_v59  ;;  %v1199_v36 = vadd.f32 %v1176_v15, %v9595_v30  ;;  %v1379_v27 = vand.u32 65535, %v9749_v53  ;;  %v1409_v15 = vand.u32 65535, %v9765_v57 }
 0x535   :  { %v1208_v37 = vmax.f32 %v1200_v28, 0.0 }
 0x536   :  { %v1207_v47 = vmax.f32 %v1199_v36, 0.0  ;;  %v8127_v40 = vpop.f32.mrb[26].mxu1  ;;  %8137 = vmatmul.mubr.msk.bf16.vlgmr.msra.gmra.mrb[20].mxu0 %vm433_vm4, %v1212_v39  ;;  %v1349_v39 = vand.u32 65535, %v9739_v2  ;;  %v1394_v2 = vand.u32 65535, %v9773_v45 }
 0x537   :  { %v1202_v41 = vadd.f32 %v8127_v40, %v9600_v17  ;;  %v1186_v62 = vpop.f32.mrb[27].mxu1  ;;  %8173 = vmatpush3.bf16.msra.mxu0 %v9463_v14 }
 0x538   :  { %v1213_v52 = vpack.c.bf16 %v1208_v37, %v1207_v47  ;;  %v1201_v34 = vadd.f32 %v1186_v62, %v9604_v22  ;;  %8174 = vmatprep.subr.bf16.mxu0 %v9482_v4  ;;  %v1351_v32 = vcvt.s32.f32 %v1349_v39  ;;  %v1439_v37 = vand.u32 65535, %v9781_v18 }
 0x539   :  { %v1210_v51 = vmax.f32 %v1202_v41, 0.0  ;;  %v1396_v41 = vcvt.s32.f32 %v1394_v2 }
 0x53a   :  { %v1209_v58 = vmax.f32 %v1201_v34, 0.0  ;;  %8140 = vmatprep.mubr.msk.bf16.mxu0 %vm433_vm4, %v1213_v52  ;;  %v1441_v45 = vcvt.s32.f32 %v1439_v37  ;;  %v1454_v34 = vand.u32 65535, %v9801_v63 }
 0x53b   :  { %8175 = vmatpush3.bf16.msra.mxu0 %v9482_v4  ;;  %v1364_v4 = vand.u32 65535, %v9754_v12  ;;  %v1411_v12 = vcvt.s32.f32 %v1409_v15 }
 0x53c   :  { %v1214_v28 = vpack.c.bf16 %v1210_v51, %v1209_v58  ;;  %8176 = vmatprep.subr.bf16.mxu0 %v9489_v7  ;;  %v1456_v51 = vcvt.s32.f32 %v1454_v34 }
 0x53e   :  { %8141 = vmatmul.mubr.msk.bf16.gmra.mrb[24].mxu0 %vm433_vm4, %v1214_v28  ;;  %v9856_v28 = vld [vmem:[%s13353_s7] ss:$0 sm:$0xff] }
 0x53f   :  { %8177 = vmatpush3.bf16.msra.mxu0 %v9489_v7  ;;  %v1381_v7 = vcvt.s32.f32 %v1379_v27  ;;  %v9876_v15 = vadd.f32 %v9670_v38, %v9856_v28 }
 0x540   :  { %8178 = vmatprep.subr.bf16.mxu0 %v9496_v9 }
 0x543   :  { %8179 = vmatpush3.bf16.msra.mxu0 %v9496_v9 }
 0x544   :  { %8216 = vmatprep.subr.bf16.mxu0 %v9463_v14  ;;  %v1366_v14 = vcvt.s32.f32 %v1364_v4 }
 0x575   :  { %v1354_v40 = vpop.xlane.xlu0 %1353 }
 0x576   :  { %vm1355_vm10 = vcmp.eq.f32.partialorder %v9745_v54, %v1354_v40 }
 0x577   :  { %v1356_v59 = vsel %vm1355_vm10, %v1351_v32, inf }
 0x578   :  { %1357 = vmin.xlane.f32.xlu0 %v1356_v59 }
 0x579   :  { %v1384_v1 = vpop.xlane.xlu0 %1383 }
 0x57a   :  { %v1369_v36 = vpop.xlane.xlu1 %1368  ;;  %vm1385_vm11 = vcmp.eq.f32.partialorder %v9759_v29, %v1384_v1  ;;  %v1424_v29 = vand.u32 65535, %v9789_v61  ;;  %v1390_v63 = vcvt.f32.s32 %v1384_v1  ;;  %v9872_v1 = vadd.f32 %v9856_v28, %v9652_v25 }
 0x57b   :  { %v1386_v9 = vsel %vm1385_vm11, %v1381_v7, inf  ;;  %vm1370_vm12 = vcmp.eq.f32.partialorder %v9762_v43, %v1369_v36  ;;  %v1375_v39 = vcvt.f32.s32 %v1369_v36  ;;  %v9860_v7 = vadd.f32 %v9645_v0, %v9856_v28 }
 0x57c   :  { %1387 = vmin.xlane.f32.xlu0 %v1386_v9  ;;  %v1371_v53 = vsel %vm1370_vm12, %v1366_v14, inf  ;;  %v9880_v0 = vadd.f32 %v9856_v28, %v9678_v48  ;;  %v1391_v14 = vshll.u32 %v1390_v63, 16 }
 0x57d   :  { %1372 = vmin.xlane.f32.xlu1 %v1371_v53  ;;  %v1414_v54 = vpop.xlane.xlu0 %1413 }
 0x57e   :  { %vm1415_vm13 = vcmp.eq.f32.partialorder %v9776_v56, %v1414_v54  ;;  %v1399_v47 = vpop.xlane.xlu1 %1398  ;;  %v1426_v56 = vcvt.s32.f32 %v1424_v29  ;;  %v1420_v32 = vcvt.f32.s32 %v1414_v54 }
 0x57f   :  { %v1416_v57 = vsel %vm1415_vm13, %v1411_v12, inf  ;;  %vm1400_vm14 = vcmp.eq.f32.partialorder %v9785_v5, %v1399_v47 }
 0x580   :  { %1417 = vmin.xlane.f32.xlu0 %v1416_v57  ;;  %v1401_v43 = vsel %vm1400_vm14, %v1396_v41, inf  ;;  %v1421_v9 = vshll.u32 %v1420_v32, 16  ;;  %v13409_v41 = vmov 0.0  }
 0x581   :  { %v9840_v62 = vpop.xlane.xlu0 %1443  ;;  %1402 = vmin.xlane.f32.xlu1 %v1401_v43 }
 0x582   :  { %vm1445_vm15 = vcmp.eq.f32.partialorder %v9792_v60, %v9840_v62  ;;  %v9844_v52 = vpop.xlane.xlu1 %1428  ;;  %v1360_v60 = vcvt.f32.s32 %v1354_v40  ;;  %v9868_v40 = vadd.f32 %v9649_v11, %v9856_v28  ;;  %v1450_v54 = vcvt.f32.s32 %v9840_v62 }
 0x583   :  { %v1446_v18 = vsel %vm1445_vm15, %v1441_v45, inf  ;;  %vm1430_vm0 = vcmp.eq.f32.partialorder %v9798_v24, %v9844_v52  ;;  %v1405_v24 = vcvt.f32.s32 %v1399_v47 }
 0x584   :  { %1447 = vmin.xlane.f32.xlu0 %v1446_v18  ;;  %v1431_v61 = vsel %vm1430_vm0, %v1426_v56, inf  ;;  %v1361_v4 = vshll.u32 %v1360_v60, 16 }
 0x585   :  { %1432 = vmin.xlane.f32.xlu1 %v1431_v61  ;;  %v1406_v2 = vshll.u32 %v1405_v24, 16  ;;  %v1435_v61 = vcvt.f32.s32 %v9844_v52  ;;  %v13415_v52 = vld [vmem:[#allocation5_spill] sm:$0xff] }
 0x586   :  { %v9849_v5 = vpop.xlane.xlu1 %1458 }
 0x587   :  { %vm1460_vm2 = vcmp.eq.f32.partialorder %v9805_v3, %v9849_v5  ;;  %v9864_v3 = vadd.f32 %v9856_v28, %v9647_v20  ;;  %v1376_v20 = vshll.u32 %v1375_v39, 16  ;;  %v1465_v63 = vcvt.f32.s32 %v9849_v5 }
 0x588   :  { %v1461_v58 = vsel %vm1460_vm2, %v1456_v51, inf }
 0x589   :  { %1462 = vmin.xlane.f32.xlu1 %v1461_v58 }
 0x605   :  { %v1358_v27 = vpop.xlane.xlu0 %1357 }
 0x606   :  { %v1359_v59 = vcvt.f32.s32 %v1358_v27 }
 0x608   :  { %v1362_v36 = vadd.s32 %v1361_v4, %v1359_v59 }
 0x609   :  { %v8138_v53 = vpop.f32.mrb[20].mxu0  ;;  %v1388_v11 = vpop.xlane.xlu0 %1387 }
 0x60a   :  { %v9884_v25 = vadd.f32 %v8138_v53, %v9856_v28  ;;  %v1389_v12 = vcvt.f32.s32 %v1388_v11  ;;  %v1261_v37 = vpop.f32.mrb[21].mxu0  ;;  %v1373_v38 = vpop.xlane.xlu1 %1372  ;;  %vm1468_vm3 = vcmp.eq.s32.totalorder %v9171_v23, %v1362_v36  ;;  %v9930_v53 = vadd.f32 %v9856_v28, %v9687_v26 }
 0x60b   :  { %v9888_v48 = vadd.f32 %v9856_v28, %v1261_v37  ;;  %v1374_v47 = vcvt.f32.s32 %v1373_v38  ;;  %v8139_v57 = vpop.f32.mrb[22].mxu0  ;;  %v7339_v29 = vsel %vm1468_vm3, 1.0, %v13409_v41  ;;  %v9892_v43 = vsel %vm1468_vm3, inf, %v9656_v10 }
 0x60c   :  { %v1392_v45 = vadd.s32 %v1391_v14, %v1389_v12  ;;  %v9897_v18 = vadd.f32 %v8139_v57, %v9856_v28  ;;  %v1264_v56 = vpop.f32.mrb[23].mxu0  ;;  %8160 = vmatprep.mubr.msk.f32.mxu1 %vm433_vm4, %v7339_v29  ;;  %v1734_v34 = vsel %vm433_vm4, %v9892_v43, inf  ;;  %v1466_v57 = vshll.u32 %v1465_v63, 16 }
 0x60d   :  { %v1377_v10 = vadd.s32 %v1376_v20, %v1374_v47  ;;  %v9906_v58 = vadd.f32 %v9856_v28, %v1264_v56  ;;  %1735 = vmin.xlane.f32.xlu0 %v1734_v34  ;;  %v1418_v60 = vpop.xlane.xlu0 %1417  ;;  %v9926_v20 = vadd.f32 %v9684_v49, %v9856_v28 }
 0x60e   :  { %v1419_v32 = vcvt.f32.s32 %v1418_v60  ;;  %vm1470_vm5 = vcmp.eq.s32.totalorder %v9171_v23, %v1392_v45  ;;  %v1403_v24 = vpop.xlane.xlu1 %1402  ;;  %v13414_v60 = vld [vmem:[#allocation4_spill] sm:$0xff] }
 0x60f   :  { %vm1469_vm6 = vcmp.eq.s32.totalorder %v9171_v23, %v1377_v10  ;;  %v9916_v27 = vsel %vm1470_vm5, inf, %v9666_v13  ;;  %v7341_v4 = vsel %vm1470_vm5, 1.0, %v13409_v41  ;;  %v1404_v36 = vcvt.f32.s32 %v1403_v24 }
 0x610   :  { %v7340_v5 = vsel %vm1469_vm6, 1.0, %v13409_v41  ;;  %v1422_v59 = vadd.s32 %v1421_v9, %v1419_v32  ;;  %v1740_v14 = vsel %vm433_vm4, %v9916_v27, inf  ;;  %v1451_v13 = vshll.u32 %v1450_v54, 16 }
 0x611   :  { %v8142_v11 = vpop.f32.mrb[24].mxu0  ;;  %8161 = vmatmul.mubr.msk.f32.vlgmr.msra.gmra.mrb[28].mxu1 %vm433_vm4, %v7340_v5  ;;  %1741 = vmin.xlane.f32.xlu0 %v1740_v14  ;;  %v1448_v12 = vpop.xlane.xlu0 %1447  ;;  %v9936_v9 = vsel %vm1469_vm6, inf, %v9675_v55  ;;  %v1407_v37 = vadd.s32 %v1406_v2, %v1404_v36  ;;  %v1436_v54 = vshll.u32 %v1435_v61, 16 }
 0x612   :  { %v9939_v38 = vadd.f32 %v8142_v11, %v9856_v28  ;;  %v1449_v49 = vcvt.f32.s32 %v1448_v12  ;;  %v1277_v47 = vpop.f32.mrb[25].mxu0  ;;  %v1737_v26 = vsel %vm433_vm4, %v9936_v9, inf  ;;  %8163 = vmatprep.mubr.msk.f32.mxu1 %vm433_vm4, %v7341_v4  ;;  %8811 = vmatpush3.bf16.msra.mxu1 %v9349_v35  ;;  %v1433_v55 = vpop.xlane.xlu1 %1432  ;;  %vm1472_vm7 = vcmp.eq.s32.totalorder %v9171_v23, %v1422_v59 }
 0x613   :  { %v9946_v29 = vadd.f32 %v9856_v28, %v1277_v47  ;;  %1738 = vmin.xlane.f32.xlu1 %v1737_v26  ;;  %v8143_v2 = vpop.f32.mrb[26].mxu0  ;;  %8813 = vmatprep.subr.bf16.mxu1 %v9347_v33  ;;  %v1434_v34 = vcvt.f32.s32 %v1433_v55  ;;  %vm1471_vm1 = vcmp.eq.s32.totalorder %v9171_v23, %v1407_v37  ;;  %v9964_v32 = vsel %vm1472_vm7, inf, %v9691_v21 }
 0x614   :  { %v1452_v56 = vadd.s32 %v1451_v13, %v1449_v49  ;;  %v9953_v10 = vadd.f32 %v8143_v2, %v9856_v28  ;;  %v1280_v61 = vpop.f32.mrb[27].mxu0  ;;  %v7342_v5 = vsel %vm1471_vm1, 1.0, %v13409_v41  ;;  %v1746_v36 = vsel %vm433_vm4, %v9964_v32, inf }
 0x615   :  { %v9958_v63 = vadd.f32 %v9856_v28, %v1280_v61  ;;  %v1437_v24 = vadd.s32 %v1436_v54, %v1434_v34  ;;  %8164 = vmatmul.mubr.msk.f32.gmra.mrb[30].mxu1 %vm433_vm4, %v7342_v5  ;;  %1747 = vmin.xlane.f32.xlu0 %v1746_v36  ;;  %v9976_v21 = vsel %vm1471_vm1, inf, %v9700_v16  ;;  %v7343_v13 = vsel %vm1472_vm7, 1.0, %v13409_v41 }
 0x616   :  { %8815 = vmatpush3.bf16.msra.mxu1 %v9347_v33  ;;  %v1463_v11 = vpop.xlane.xlu1 %1462  ;;  %vm1474_vm8 = vcmp.eq.s32.totalorder %v9171_v23, %v1452_v56  ;;  %v1743_v12 = vsel %vm433_vm4, %v9976_v21, inf  ;;  %8166 = vmatprep.mubr.msk.f32.mxu1 %vm433_vm4, %v7343_v13 }
 0x617   :  { %13410 = vst [vmem:[#allocation6_spill] sm:$0xff] %v9958_v63  ;;  %v1464_v37 = vcvt.f32.s32 %v1463_v11  ;;  %vm1473_vm9 = vcmp.eq.s32.totalorder %v9171_v23, %v1437_v24  ;;  %v9987_v49 = vsel %vm1474_vm8, inf, %v9709_v44  ;;  %8817 = vmatprep.subr.bf16.mxu1 %v9357_v8  ;;  %1744 = vmin.xlane.f32.xlu1 %v1743_v12  ;;  %v7345_v26 = vsel %vm1474_vm8, 1.0, %v13409_v41 }
 0x618   :  { %13411 = vst [vmem:[#allocation7_spill] sm:$0xff] %v9987_v49  ;;  %v7344_v16 = vsel %vm1473_vm9, 1.0, %v13409_v41  ;;  %v1752_v59 = vsel %vm433_vm4, %v9987_v49, inf  ;;  %v9994_v47 = vsel %vm1473_vm9, inf, %v9717_v50 }
 0x619   :  { %13412 = vst [vmem:[#allocation8_spill] sm:$0xff] %v9994_v47  ;;  %v1467_v54 = vadd.s32 %v1466_v57, %v1464_v37  ;;  %v1749_v55 = vsel %vm433_vm4, %v9994_v47, inf  ;;  %8167 = vmatmul.mubr.msk.f32.gmra.mrb[32].mxu1 %vm433_vm4, %v7344_v16  ;;  %1753 = vmin.xlane.f32.xlu0 %v1752_v59 }
 0x61a   :  { %8819 = vmatpush3.bf16.msra.mxu1 %v9357_v8  ;;  %8169 = vmatprep.mubr.msk.f32.mxu1 %vm433_vm4, %v7345_v26 }
 0x61b   :  { %vm1475_vm10 = vcmp.eq.s32.totalorder %v9171_v23, %v1467_v54  ;;  %8821 = vmatprep.subr.bf16.mxu1 %v9354_v6  ;;  %1750 = vmin.xlane.f32.xlu1 %v1749_v55 }
 0x61c   :  { %v7346_v44 = vsel %vm1475_vm10, 1.0, %v13409_v41  ;;  %v10006_v50 = vsel %vm1475_vm10, inf, %v9728_v19 }
 0x61d   :  { %13413 = vst [vmem:[#allocation9_spill] sm:$0xff] %v10006_v50  ;;  %v1755_v57 = vsel %vm433_vm4, %v10006_v50, inf  ;;  %8170 = vmatmul.mubr.msk.f32.gmra.mrb[34].mxu1 %vm433_vm4, %v7346_v44 }
 0x61e   :  { %8823 = vmatpush3.bf16.msra.mxu1 %v9354_v6 }
 0x61f   :  { %8825 = vmatprep.subr.bf16.mxu1 %v9349_v35  ;;  %1756 = vmin.xlane.f32.xlu1 %v1755_v57 }
 0x69a   :  { %v1736_v2 = vpop.xlane.xlu0 %1735 }
 0x69b   :  { %vm1758_vm11 = vcmp.le.f32.partialorder %v9892_v43, %v1736_v2 }
 0x69c   :  { %v1766_v56 = vsel %vm1758_vm11, %v9171_v23, 64 }
 0x69d   :  { %v10016_v34 = vsel %vm433_vm4, %v1766_v56, 2147483647 }
 0x69e   :  { %v1742_v19 = vpop.xlane.xlu0 %1741  ;;  %v1776_v61 = vshra.s32 %v10016_v34, 16 }
 0x69f   :  { %vm1760_vm12 = vcmp.le.f32.partialorder %v9916_v27, %v1742_v19 }
 0x6a0   :  { %v1768_v24 = vsel %vm1760_vm12, %v9171_v23, 64  ;;  %v1739_v5 = vpop.xlane.xlu1 %1738  ;;  %v10021_v36 = vcvt.s32.f32 %v1776_v61 }
 0x6a1   :  { %vm1759_vm13 = vcmp.le.f32.partialorder %v9936_v9, %v1739_v5  ;;  %v10025_v13 = vsel %vm433_vm4, %v1768_v24, 2147483647 }
 0x6a2   :  { %v1767_v11 = vsel %vm1759_vm13, %v9171_v23, 64  ;;  %1779 = vmin.xlane.f32.xlu0 %v10021_v36  ;;  %v1806_v12 = vshra.s32 %v10025_v13, 16  ;;  %v1748_v16 = vpop.xlane.xlu0 %1747 }
 0x6a3   :  { %v10031_v37 = vsel %vm433_vm4, %v1767_v11, 2147483647  ;;  %vm1762_vm14 = vcmp.le.f32.partialorder %v9964_v32, %v1748_v16 }
 0x6a4   :  { %v10033_v59 = vcvt.s32.f32 %v1806_v12  ;;  %v1791_v26 = vshra.s32 %v10031_v37, 16  ;;  %v1770_v54 = vsel %vm1762_vm14, %v9171_v23, 64  ;;  %v1745_v55 = vpop.xlane.xlu1 %1744 }
 0x6a5   :  { %vm1761_vm15 = vcmp.le.f32.partialorder %v9976_v21, %v1745_v55  ;;  %v10043_v57 = vsel %vm433_vm4, %v1770_v54, 2147483647 }
 0x6a6   :  { %1809 = vmin.xlane.f32.xlu0 %v10033_v59  ;;  %v10039_v44 = vcvt.s32.f32 %v1791_v26  ;;  %v1769_v2 = vsel %vm1761_vm15, %v9171_v23, 64  ;;  %v1754_v56 = vpop.xlane.xlu0 %1753  ;;  %v1836_v19 = vshra.s32 %v10043_v57, 16 }
 0x6a7   :  { %vm1764_vm0 = vcmp.le.f32.partialorder %v9987_v49, %v1754_v56  ;;  %v10050_v61 = vsel %vm433_vm4, %v1769_v2, 2147483647 }
 0x6a8   :  { %1794 = vmin.xlane.f32.xlu1 %v10039_v44  ;;  %v1772_v24 = vsel %vm1764_vm0, %v9171_v23, 64  ;;  %v1751_v5 = vpop.xlane.xlu1 %1750  ;;  %v10053_v11 = vcvt.s32.f32 %v1836_v19  ;;  %v1821_v12 = vshra.s32 %v10050_v61, 16 }
 0x6a9   :  { %vm1763_vm2 = vcmp.le.f32.partialorder %v9994_v47, %v1751_v5  ;;  %v10058_v16 = vsel %vm433_vm4, %v1772_v24, 2147483647 }
 0x6aa   :  { %v1771_v26 = vsel %vm1763_vm2, %v9171_v23, 64  ;;  %1839 = vmin.xlane.f32.xlu0 %v10053_v11  ;;  %v10062_v54 = vcvt.s32.f32 %v1821_v12  ;;  %v1866_v55 = vshra.s32 %v10058_v16, 16 }
 0x6ab   :  { %v10066_v2 = vsel %vm433_vm4, %v1771_v26, 2147483647 }
 0x6ac   :  { %1824 = vmin.xlane.f32.xlu1 %v10062_v54  ;;  %v1757_v56 = vpop.xlane.xlu1 %1756  ;;  %v10069_v19 = vcvt.s32.f32 %v1866_v55  ;;  %v1851_v5 = vshra.s32 %v10066_v2, 16 }
 0x6ad   :  { %vm1765_vm3 = vcmp.le.f32.partialorder %v10006_v50, %v1757_v56 }
 0x6ae   :  { %v1773_v24 = vsel %vm1765_vm3, %v9171_v23, 64  ;;  %1869 = vmin.xlane.f32.xlu0 %v10069_v19  ;;  %v10075_v12 = vcvt.s32.f32 %v1851_v5 }
 0x6af   :  { %v10078_v14 = vsel %vm433_vm4, %v1773_v24, 2147483647 }
 0x6b0   :  { %1854 = vmin.xlane.f32.xlu1 %v10075_v12  ;;  %v1881_v26 = vshra.s32 %v10078_v14, 16 }
 0x6b2   :  { %v10082_v4 = vcvt.s32.f32 %v1881_v26 }
 0x6b4   :  { %1884 = vmin.xlane.f32.xlu1 %v10082_v4 }
 0x6e4   :  { %v8162_v55 = vpop.f32.mrb[28].mxu1 }
 0x6e5   :  { %v1622_v56 = vadd.f32 %v8162_v55, %v13414_v60  ;;  %v1582_v45 = vpop.f32.mrb[29].mxu1 }
 0x6e6   :  { %v1621_v39 = vadd.f32 %v1582_v45, %v13415_v52 }
 0x6e7   :  { %v1630_v51 = vmax.f32 %v1622_v56, 0.0 }
 0x6e8   :  { %v1629_v5 = vmax.f32 %v1621_v39, 0.0  ;;  %v8165_v50 = vpop.f32.mrb[30].mxu1 }
 0x6e9   :  { %v1624_v24 = vadd.f32 %v8165_v50, %v9583_v46  ;;  %v1592_v6 = vpop.f32.mrb[31].mxu1 }
 0x6ea   :  { %v1637_v62 = vpack.c.bf16 %v1630_v51, %v1629_v5  ;;  %v1623_v47 = vadd.f32 %v1592_v6, %v9587_v42  ;;  %v10097_v6 = vld [vmem:[%s13351_s6] sm:$0xff]  }
 0x6eb   :  { %v1632_v26 = vmax.f32 %v1624_v24, 0.0  ;;  %v10112_v24 = vld [vmem:[%s13351_s6 + $0x10] sm:$0xff]  }
 0x6ec   :  { %8180 = vmatprep.mubr.msk.bf16.mxu0 %vm433_vm4, %v1637_v62  ;;  %v1631_v49 = vmax.f32 %v1623_v47, 0.0  ;;  %v8168_v8 = vpop.f32.mrb[32].mxu1 }
 0x6ed   :  { %v1626_v63 = vadd.f32 %v8168_v8, %v9591_v31  ;;  %v1602_v55 = vpop.f32.mrb[33].mxu1 }
 0x6ee   :  { %v1638_v60 = vpack.c.bf16 %v1632_v26, %v1631_v49  ;;  %v1625_v45 = vadd.f32 %v1602_v55, %v9595_v30  ;;  %v10120_v26 = vld [vmem:[%s13351_s6 + $0x18] sm:$0xff]   ;;  %v1775_v55 = vand.u32 65535, %v10016_v34 }
 0x6ef   :  { %v1634_v56 = vmax.f32 %v1626_v63, 0.0  ;;  %v10104_v63 = vld [vmem:[%s13351_s6 + $0x8] sm:$0xff]  }
 0x6f0   :  { %v1633_v39 = vmax.f32 %v1625_v45, 0.0  ;;  %v8171_v51 = vpop.f32.mrb[34].mxu1  ;;  %8181 = vmatmul.mubr.msk.bf16.vlgmr.msra.gmra.mrb[28].mxu0 %vm433_vm4, %v1638_v60 }
 0x6f1   :  { %v1628_v50 = vadd.f32 %v8171_v51, %v9600_v17  ;;  %v1612_v5 = vpop.f32.mrb[35].mxu1  ;;  %8217 = vmatpush3.bf16.msra.mxu0 %v10097_v6 }
 0x6f2   :  { %v1639_v8 = vpack.c.bf16 %v1634_v56, %v1633_v39  ;;  %v1627_v62 = vadd.f32 %v1612_v5, %v9604_v22  ;;  %8218 = vmatprep.subr.bf16.mxu0 %v10104_v63  ;;  %v1777_v56 = vcvt.s32.f32 %v1775_v55  ;;  %v1805_v39 = vand.u32 65535, %v10025_v13 }
 0x6f3   :  { %v1636_v60 = vmax.f32 %v1628_v50, 0.0  ;;  %v1790_v50 = vand.u32 65535, %v10031_v37  ;;  %v1820_v13 = vand.u32 65535, %v10050_v61  ;;  %v1865_v37 = vand.u32 65535, %v10058_v16 }
 0x6f4   :  { %v1635_v49 = vmax.f32 %v1627_v62, 0.0  ;;  %8184 = vmatprep.mubr.msk.bf16.mxu0 %vm433_vm4, %v1639_v8  ;;  %v1807_v8 = vcvt.s32.f32 %v1805_v39 }
 0x6f5   :  { %8219 = vmatpush3.bf16.msra.mxu0 %v10104_v63  ;;  %v1822_v39 = vcvt.s32.f32 %v1820_v13  ;;  %v1867_v61 = vcvt.s32.f32 %v1865_v37 }
 0x6f6   :  { %v1640_v47 = vpack.c.bf16 %v1636_v60, %v1635_v49  ;;  %8220 = vmatprep.subr.bf16.mxu0 %v10112_v24  ;;  %v1792_v49 = vcvt.s32.f32 %v1790_v50 }
 0x6f8   :  { %8185 = vmatmul.mubr.msk.bf16.gmra.mrb[32].mxu0 %vm433_vm4, %v1640_v47  ;;  %v1835_v47 = vand.u32 65535, %v10043_v57 }
 0x6f9   :  { %8221 = vmatpush3.bf16.msra.mxu0 %v10112_v24 }
 0x6fa   :  { %8222 = vmatprep.subr.bf16.mxu0 %v10120_v26  ;;  %v1837_v55 = vcvt.s32.f32 %v1835_v47 }
 0x6fd   :  { %8223 = vmatpush3.bf16.msra.mxu0 %v10120_v26 }
 0x6fe   :  { %8260 = vmatprep.subr.bf16.mxu0 %v10097_v6 }
 0x72f   :  { %v1780_v45 = vpop.xlane.xlu0 %1779 }
 0x730   :  { %vm1781_vm5 = vcmp.eq.f32.partialorder %v10021_v36, %v1780_v45 }
 0x731   :  { %v1782_v51 = vsel %vm1781_vm5, %v1777_v56, inf }
 0x732   :  { %1783 = vmin.xlane.f32.xlu0 %v1782_v51  ;;  %v1850_v51 = vand.u32 65535, %v10066_v2 }
 0x733   :  { %v1810_v5 = vpop.xlane.xlu0 %1809 }
 0x734   :  { %vm1811_vm6 = vcmp.eq.f32.partialorder %v10033_v59, %v1810_v5  ;;  %v1852_v50 = vcvt.s32.f32 %v1850_v51  ;;  %v1816_v13 = vcvt.f32.s32 %v1810_v5 }
 0x735   :  { %v1795_v62 = vpop.xlane.xlu1 %1794  ;;  %v1812_v60 = vsel %vm1811_vm6, %v1807_v8, inf  ;;  %v1880_v8 = vand.u32 65535, %v10078_v14 }
 0x736   :  { %1813 = vmin.xlane.f32.xlu0 %v1812_v60  ;;  %vm1796_vm7 = vcmp.eq.f32.partialorder %v10039_v44, %v1795_v62  ;;  %v1801_v14 = vcvt.f32.s32 %v1795_v62 }
 0x737   :  { %v1797_v34 = vsel %vm1796_vm7, %v1792_v49, inf  ;;  %v1840_v36 = vpop.xlane.xlu0 %1839  ;;  %v1882_v60 = vcvt.s32.f32 %v1880_v8 }
 0x738   :  { %1798 = vmin.xlane.f32.xlu1 %v1797_v34  ;;  %vm1841_vm1 = vcmp.eq.f32.partialorder %v10053_v11, %v1840_v36  ;;  %v1846_v37 = vcvt.f32.s32 %v1840_v36 }
 0x739   :  { %v10135_v56 = vpop.xlane.xlu1 %1824  ;;  %v1842_v59 = vsel %vm1841_vm1, %v1837_v55, inf }
 0x73a   :  { %1843 = vmin.xlane.f32.xlu0 %v1842_v59  ;;  %vm1826_vm8 = vcmp.eq.f32.partialorder %v10062_v54, %v10135_v56 }
 0x73b   :  { %v1827_v44 = vsel %vm1826_vm8, %v1822_v39, inf  ;;  %v10140_v57 = vpop.xlane.xlu0 %1869 }
 0x73c   :  { %1828 = vmin.xlane.f32.xlu1 %v1827_v44  ;;  %vm1871_vm9 = vcmp.eq.f32.partialorder %v10069_v19, %v10140_v57  ;;  %v1786_v19 = vcvt.f32.s32 %v1780_v45  ;;  %v1802_v44 = vshll.u32 %v1801_v14, 16 }
 0x73d   :  { %v10144_v16 = vpop.xlane.xlu1 %1854  ;;  %v1872_v11 = vsel %vm1871_vm9, %v1867_v61, inf  ;;  %v1847_v61 = vshll.u32 %v1846_v37, 16 }
 0x73e   :  { %1873 = vmin.xlane.f32.xlu0 %v1872_v11  ;;  %vm1856_vm10 = vcmp.eq.f32.partialorder %v10075_v12, %v10144_v16  ;;  %v1787_v34 = vshll.u32 %v1786_v19, 16  ;;  %v1817_v12 = vshll.u32 %v1816_v13, 16  ;;  %v1861_v19 = vcvt.f32.s32 %v10144_v16 }
 0x73f   :  { %v1857_v2 = vsel %vm1856_vm10, %v1852_v50, inf }
 0x740   :  { %1858 = vmin.xlane.f32.xlu1 %v1857_v2 }
 0x741   :  { %v10149_v54 = vpop.xlane.xlu1 %1884 }
 0x742   :  { %vm1886_vm11 = vcmp.eq.f32.partialorder %v10082_v4, %v10149_v54 }
 0x743   :  { %v1887_v49 = vsel %vm1886_vm11, %v1882_v60, inf  ;;  %v1831_v60 = vcvt.f32.s32 %v10135_v56  ;;  %v13417_v56 = vmax.f32 %v9864_v3, %v9888_v48 }
 0x744   :  { %1888 = vmin.xlane.f32.xlu1 %v1887_v49  ;;  %v1876_v49 = vcvt.f32.s32 %v10140_v57 }
 0x7bf   :  { %v1784_v47 = vpop.xlane.xlu0 %1783 }
 0x7c0   :  { %v1785_v55 = vcvt.f32.s32 %v1784_v47 }
 0x7c2   :  { %v1788_v59 = vadd.s32 %v1787_v34, %v1785_v55  ;;  %v13416_v34 = vmax.f32 %v9860_v7, %v9884_v25  ;;  %v13418_v25 = vmax.f32 %v9868_v40, %v9897_v18 }
 0x7c3   :  { %v1814_v39 = vpop.xlane.xlu0 %1813  ;;  %v8182_v11 = vpop.f32.mrb[28].mxu0 }
 0x7c4   :  { %v1815_v51 = vcvt.f32.s32 %v1814_v39  ;;  %vm1894_vm12 = vcmp.eq.s32.totalorder %v9171_v23, %v1788_v59  ;;  %v1696_v5 = vadd.f32 %v8182_v11, %v9856_v28  ;;  %v1687_v62 = vpop.f32.mrb[29].mxu0 }
 0x7c5   :  { %v1799_v50 = vpop.xlane.xlu1 %1798  ;;  %v7359_v4 = vsel %vm1894_vm12, 1.0, %v13409_v41  ;;  %v10156_v45 = vsel %vm1894_vm12, inf, %v9892_v43  ;;  %v1688_v47 = vadd.f32 %v9856_v28, %v1687_v62  ;;  %v8183_v43 = vpop.f32.mrb[30].mxu0  ;;  %v1862_v62 = vshll.u32 %v1861_v19, 16 }
 0x7c6   :  { %v1818_v8 = vadd.s32 %v1817_v12, %v1815_v51  ;;  %v1800_v36 = vcvt.f32.s32 %v1799_v50  ;;  %8204 = vmatprep.mubr.msk.f32.mxu1 %vm433_vm4, %v7359_v4  ;;  %v2160_v2 = vsel %vm433_vm4, %v10156_v45, inf  ;;  %v10169_v13 = vmax.f32 %v13416_v34, %v1696_v5  ;;  %v1690_v37 = vpop.f32.mrb[31].mxu0 }
 0x7c7   :  { %2161 = vmin.xlane.f32.xlu0 %v2160_v2  ;;  %v1699_v14 = vadd.f32 %v8183_v43, %v9856_v28  ;;  %v10176_v57 = vmax.f32 %v13417_v56, %v1688_v47  ;;  %v1691_v16 = vadd.f32 %v9856_v28, %v1690_v37  ;;  %v1844_v59 = vpop.xlane.xlu0 %1843  ;;  %v1832_v4 = vshll.u32 %v1831_v60, 16 }
 0x7c8   :  { %v1803_v55 = vadd.s32 %v1802_v44, %v1800_v36  ;;  %vm1896_vm13 = vcmp.eq.s32.totalorder %v9171_v23, %v1818_v8  ;;  %v1845_v51 = vcvt.f32.s32 %v1844_v59  ;;  %v13419_v44 = vmax.f32 %v9872_v1, %v9906_v58 }
 0x7c9   :  { %v10180_v39 = vsel %vm1896_vm13, inf, %v9916_v27  ;;  %v7361_v7 = vsel %vm1896_vm13, 1.0, %v13409_v41  ;;  %v10187_v12 = vmax.f32 %v13418_v25, %v1699_v14  ;;  %v1829_v11 = vpop.xlane.xlu1 %1828  ;;  %v1877_v8 = vshll.u32 %v1876_v49, 16 }
 0x7ca   :  { %vm1895_vm14 = vcmp.eq.s32.totalorder %v9171_v23, %v1803_v55  ;;  %v2166_v3 = vsel %vm433_vm4, %v10180_v39, inf  ;;  %v10195_v27 = vmax.f32 %v13419_v44, %v1691_v16  ;;  %v1848_v40 = vadd.s32 %v1847_v61, %v1845_v51  ;;  %v13426_v44 = vld [vmem:[#allocation3_spill] sm:$0xff] }
 0x7cb   :  { %v7360_v48 = vsel %vm1895_vm14, 1.0, %v13409_v41  ;;  %2167 = vmin.xlane.f32.xlu0 %v2166_v3  ;;  %v10198_v50 = vsel %vm1895_vm14, inf, %v9936_v9  ;;  %v1830_v18 = vcvt.f32.s32 %v1829_v11  ;;  %v8186_v36 = vpop.f32.mrb[32].mxu0  ;;  %v1874_v2 = vpop.xlane.xlu0 %1873  ;;  %v1891_v61 = vcvt.f32.s32 %v10149_v54 }
 0x7cc   :  { %8205 = vmatmul.mubr.msk.f32.vlgmr.msra.gmra.mrb[36].mxu1 %vm433_vm4, %v7360_v48  ;;  %v2163_v5 = vsel %vm433_vm4, %v10198_v50, inf  ;;  %v1712_v58 = vadd.f32 %v8186_v36, %v9856_v28  ;;  %v1875_v9 = vcvt.f32.s32 %v1874_v2  ;;  %v1703_v47 = vpop.f32.mrb[33].mxu0  ;;  %vm1898_vm15 = vcmp.eq.s32.totalorder %v9171_v23, %v1848_v40 }
 0x7cd   :  { %2164 = vmin.xlane.f32.xlu1 %v2163_v5  ;;  %8207 = vmatprep.mubr.msk.f32.mxu1 %vm433_vm4, %v7361_v7  ;;  %v1833_v1 = vadd.s32 %v1832_v4, %v1830_v18  ;;  %v1704_v60 = vadd.f32 %v9856_v28, %v1703_v47  ;;  %v1859_v49 = vpop.xlane.xlu1 %1858  ;;  %v8187_v19 = vpop.f32.mrb[34].mxu0  ;;  %v10210_v43 = vsel %vm1898_vm15, inf, %v9964_v32  ;;  %v7363_v34 = vsel %vm1898_vm15, 1.0, %v13409_v41  ;;  %v13428_v5 = vld [vmem:[#allocation8_spill] sm:$0xff] }
 0x7ce   :  { %8827 = vmatpush3.bf16.msra.mxu1 %v9349_v35  ;;  %v13420_v55 = vmax.f32 %v9876_v15, %v9939_v38  ;;  %v1878_v37 = vadd.s32 %v1877_v8, %v1875_v9  ;;  %v1860_v56 = vcvt.f32.s32 %v1859_v49  ;;  %v1715_v54 = vadd.f32 %v8187_v19, %v9856_v28  ;;  %v1706_v16 = vpop.f32.mrb[35].mxu0  ;;  %v13430_v9 = vld [vmem:[#allocation9_spill] sm:$0xff] }
 0x7cf   :  { %8829 = vmatprep.subr.bf16.mxu1 %v9347_v33  ;;  %v13421_v59 = vmax.f32 %v9880_v0, %v9946_v29  ;;  %v1707_v32 = vadd.f32 %v9856_v28, %v1706_v16  ;;  %vm1897_vm0 = vcmp.eq.s32.totalorder %v9171_v23, %v1833_v1  ;;  %v2172_v25 = vsel %vm433_vm4, %v10210_v43, inf  ;;  %v13423_v28 = vld [vmem:[#allocation6_spill] sm:$0xff] }
 0x7d0   :  { %v10217_v14 = vmax.f32 %v13420_v55, %v1712_v58  ;;  %v1863_v15 = vadd.s32 %v1862_v62, %v1860_v56  ;;  %v13422_v38 = vmax.f32 %v9926_v20, %v9953_v10  ;;  %v7362_v3 = vsel %vm1897_vm0, 1.0, %v13409_v41  ;;  %2173 = vmin.xlane.f32.xlu0 %v2172_v25  ;;  %v13429_v1 = vld [vmem:[#allocation2_spill] sm:$0xff] }
 0x7d1   :  { %v10223_v7 = vmax.f32 %v13421_v59, %v1704_v60  ;;  %v10236_v0 = vsel %vm1897_vm0, inf, %v9976_v21  ;;  %v13424_v29 = vmax.f32 %v9930_v53, %v13423_v28  ;;  %8208 = vmatmul.mubr.msk.f32.gmra.mrb[38].mxu1 %vm433_vm4, %v7362_v3  ;;  %v1889_v10 = vpop.xlane.xlu1 %1888  ;;  %vm1900_vm2 = vcmp.eq.s32.totalorder %v9171_v23, %v1878_v37  ;;  %v13427_v53 = vld [vmem:[#allocation7_spill] sm:$0xff] }
 0x7d2   :  { %v10232_v51 = vmax.f32 %v13422_v38, %v1715_v54  ;;  %8831 = vmatpush3.bf16.msra.mxu1 %v9347_v33  ;;  %v2169_v20 = vsel %vm433_vm4, %v10236_v0, inf  ;;  %v1892_v11 = vshll.u32 %v1891_v61, 16  ;;  %8210 = vmatprep.mubr.msk.f32.mxu1 %vm433_vm4, %v7363_v34  ;;  %v1890_v21 = vcvt.f32.s32 %v1889_v10 }
 0x7d3   :  { %v10242_v48 = vmax.f32 %v13424_v29, %v1707_v32  ;;  %8833 = vmatprep.subr.bf16.mxu1 %v13426_v44  ;;  %2170 = vmin.xlane.f32.xlu1 %v2169_v20  ;;  %vm1899_vm3 = vcmp.eq.s32.totalorder %v9171_v23, %v1863_v15  ;;  %v10252_v4 = vsel %vm1900_vm2, inf, %v13427_v53  ;;  %v7365_v62 = vsel %vm1900_vm2, 1.0, %v13409_v41 }
 0x7d4   :  { %v7364_v40 = vsel %vm1899_vm3, 1.0, %v13409_v41  ;;  %v2178_v18 = vsel %vm433_vm4, %v10252_v4, inf  ;;  %v10258_v8 = vsel %vm1899_vm3, inf, %v13428_v5  ;;  %v1893_v36 = vadd.s32 %v1892_v11, %v1890_v21 }
 0x7d5   :  { %13425 = vst [vmem:[#allocation5_spill] sm:$0xff] %v10242_v48  ;;  %2179 = vmin.xlane.f32.xlu0 %v2178_v18  ;;  %v2175_v2 = vsel %vm433_vm4, %v10258_v8, inf  ;;  %8211 = vmatmul.mubr.msk.f32.gmra.mrb[40].mxu1 %vm433_vm4, %v7364_v40 }
 0x7d6   :  { %8835 = vmatpush3.bf16.msra.mxu1 %v13426_v44  ;;  %8213 = vmatprep.mubr.msk.f32.mxu1 %vm433_vm4, %v7365_v62  ;;  %vm1901_vm5 = vcmp.eq.s32.totalorder %v9171_v23, %v1893_v36 }
 0x7d7   :  { %8837 = vmatprep.subr.bf16.mxu1 %v13429_v1  ;;  %2176 = vmin.xlane.f32.xlu1 %v2175_v2  ;;  %v7366_v58 = vsel %vm1901_vm5, 1.0, %v13409_v41  ;;  %v10270_v47 = vsel %vm1901_vm5, inf, %v13430_v9 }
 0x7d8   :  { %13431 = vst [vmem:[#allocation6_spill] sm:$0xff] %v10270_v47  ;;  %v2181_v61 = vsel %vm433_vm4, %v10270_v47, inf }
 0x7d9   :  { %8214 = vmatmul.mubr.msk.f32.gmra.mrb[42].mxu1 %vm433_vm4, %v7366_v58 }
 0x7da   :  { %8839 = vmatpush3.bf16.msra.mxu1 %v13429_v1 }
 0x7db   :  { %8841 = vmatprep.subr.bf16.mxu1 %v9349_v35  ;;  %2182 = vmin.xlane.f32.xlu1 %v2181_v61 }
 0x854   :  { %v2162_v60 = vpop.xlane.xlu0 %2161 }
 0x855   :  { %vm2184_vm6 = vcmp.le.f32.partialorder %v10156_v45, %v2162_v60 }
 0x856   :  { %v2192_v49 = vsel %vm2184_vm6, %v9171_v23, 64 }
 0x857   :  { %v10280_v19 = vsel %vm433_vm4, %v2192_v49, 2147483647 }
 0x858   :  { %v2168_v34 = vpop.xlane.xlu0 %2167  ;;  %v2202_v55 = vshra.s32 %v10280_v19, 16 }
 0x859   :  { %vm2186_vm7 = vcmp.le.f32.partialorder %v10180_v39, %v2168_v34 }
 0x85a   :  { %v2194_v37 = vsel %vm2186_vm7, %v9171_v23, 64  ;;  %v2165_v56 = vpop.xlane.xlu1 %2164  ;;  %v10285_v54 = vcvt.s32.f32 %v2202_v55 }
 0x85b   :  { %v10288_v16 = vsel %vm433_vm4, %v2194_v37, 2147483647  ;;  %vm2185_vm1 = vcmp.le.f32.partialorder %v10198_v50, %v2165_v56 }
 0x85c   :  { %v2193_v59 = vsel %vm2185_vm1, %v9171_v23, 64  ;;  %2205 = vmin.xlane.f32.xlu0 %v10285_v54  ;;  %v2232_v32 = vshra.s32 %v10288_v16, 16 }
 0x85d   :  { %v10295_v25 = vsel %vm433_vm4, %v2193_v59, 2147483647  ;;  %v2174_v3 = vpop.xlane.xlu0 %2173 }
 0x85e   :  { %v10297_v15 = vcvt.s32.f32 %v2232_v32  ;;  %v2217_v38 = vshra.s32 %v10295_v25, 16  ;;  %vm2188_vm8 = vcmp.le.f32.partialorder %v10210_v43, %v2174_v3 }
 0x85f   :  { %v2196_v29 = vsel %vm2188_vm8, %v9171_v23, 64 }
 0x860   :  { %2235 = vmin.xlane.f32.xlu0 %v10297_v15  ;;  %v10302_v28 = vcvt.s32.f32 %v2217_v38  ;;  %v2171_v20 = vpop.xlane.xlu1 %2170  ;;  %v10306_v10 = vsel %vm433_vm4, %v2196_v29, 2147483647  ;;  %v13432_v29 = vld [vmem:[#allocation4_spill] sm:$0xff] }
 0x861   :  { %vm2187_vm9 = vcmp.le.f32.partialorder %v10236_v0, %v2171_v20  ;;  %v2262_v53 = vshra.s32 %v10306_v10, 16 }
 0x862   :  { %2220 = vmin.xlane.f32.xlu1 %v10302_v28  ;;  %v2195_v11 = vsel %vm2187_vm9, %v9171_v23, 64  ;;  %v2180_v21 = vpop.xlane.xlu0 %2179 }
 0x863   :  { %v10313_v40 = vsel %vm433_vm4, %v2195_v11, 2147483647  ;;  %vm2190_vm10 = vcmp.le.f32.partialorder %v10252_v4, %v2180_v21  ;;  %v10317_v62 = vcvt.s32.f32 %v2262_v53 }
 0x864   :  { %v2198_v18 = vsel %vm2190_vm10, %v9171_v23, 64  ;;  %v2177_v5 = vpop.xlane.xlu1 %2176  ;;  %v2247_v36 = vshra.s32 %v10313_v40, 16 }
 0x865   :  { %v10321_v2 = vsel %vm433_vm4, %v2198_v18, 2147483647  ;;  %vm2189_vm11 = vcmp.le.f32.partialorder %v10258_v8, %v2177_v5  ;;  %2265 = vmin.xlane.f32.xlu0 %v10317_v62 }
 0x866   :  { %v2197_v58 = vsel %vm2189_vm11, %v9171_v23, 64  ;;  %v10326_v9 = vcvt.s32.f32 %v2247_v36  ;;  %v2292_v61 = vshra.s32 %v10321_v2, 16 }
 0x867   :  { %v10330_v60 = vsel %vm433_vm4, %v2197_v58, 2147483647 }
 0x868   :  { %2250 = vmin.xlane.f32.xlu1 %v10326_v9  ;;  %v2183_v49 = vpop.xlane.xlu1 %2182  ;;  %v10333_v34 = vcvt.s32.f32 %v2292_v61  ;;  %v2277_v55 = vshra.s32 %v10330_v60, 16 }
 0x869   :  { %vm2191_vm12 = vcmp.le.f32.partialorder %v10270_v47, %v2183_v49 }
 0x86a   :  { %v2199_v37 = vsel %vm2191_vm12, %v9171_v23, 64  ;;  %2295 = vmin.xlane.f32.xlu0 %v10333_v34  ;;  %v10339_v56 = vcvt.s32.f32 %v2277_v55 }
 0x86b   :  { %v10342_v59 = vsel %vm433_vm4, %v2199_v37, 2147483647 }
 0x86c   :  { %2280 = vmin.xlane.f32.xlu1 %v10339_v56  ;;  %v2307_v32 = vshra.s32 %v10342_v59, 16 }
 0x86e   :  { %v10346_v38 = vcvt.s32.f32 %v2307_v32 }
 0x870   :  { %2310 = vmin.xlane.f32.xlu1 %v10346_v38 }
 0x89f   :  { %v8206_v3 = vpop.f32.mrb[36].mxu1 }
 0x8a0   :  { %v2048_v20 = vadd.f32 %v8206_v3, %v13432_v29  ;;  %v2008_v11 = vpop.f32.mrb[37].mxu1 }
 0x8a1   :  { %v2047_v21 = vadd.f32 %v2008_v11, %v13415_v52 }
 0x8a2   :  { %v2056_v53 = vmax.f32 %v2048_v20, 0.0 }
 0x8a3   :  { %v2055_v18 = vmax.f32 %v2047_v21, 0.0 }
 0x8a4   :  { %v8209_v36 = vpop.f32.mrb[38].mxu1 }
 0x8a5   :  { %v2063_v5 = vpack.c.bf16 %v2056_v53, %v2055_v18  ;;  %v2050_v58 = vadd.f32 %v8209_v36, %v9583_v46  ;;  %v2018_v61 = vpop.f32.mrb[39].mxu1 }
 0x8a6   :  { %v2049_v49 = vadd.f32 %v2018_v61, %v9587_v42 }
 0x8a7   :  { %8224 = vmatprep.mubr.msk.bf16.mxu0 %vm433_vm4, %v2063_v5  ;;  %v2058_v55 = vmax.f32 %v2050_v58, 0.0 }
 0x8a8   :  { %v2057_v37 = vmax.f32 %v2049_v49, 0.0  ;;  %v8212_v32 = vpop.f32.mrb[40].mxu1 }
 0x8a9   :  { %v2052_v47 = vadd.f32 %v8212_v32, %v9591_v31  ;;  %v2028_v3 = vpop.f32.mrb[41].mxu1  ;;  %v2231_v32 = vand.u32 65535, %v10288_v16 }
 0x8aa   :  { %v2064_v29 = vpack.c.bf16 %v2058_v55, %v2057_v37  ;;  %v2051_v11 = vadd.f32 %v2028_v3, %v9595_v30  ;;  %v2216_v3 = vand.u32 65535, %v10295_v25  ;;  %v2291_v25 = vand.u32 65535, %v10321_v2 }
 0x8ab   :  { %v2060_v20 = vmax.f32 %v2052_v47, 0.0 }
 0x8ac   :  { %v2059_v21 = vmax.f32 %v2051_v11, 0.0  ;;  %v8215_v53 = vpop.f32.mrb[42].mxu1  ;;  %8225 = vmatmul.mubr.msk.bf16.vlgmr.msra.gmra.mrb[36].mxu0 %vm433_vm4, %v2064_v29  ;;  %v2201_v29 = vand.u32 65535, %v10280_v19 }
 0x8ad   :  { %v2054_v18 = vadd.f32 %v8215_v53, %v9600_v17  ;;  %v2038_v36 = vpop.f32.mrb[43].mxu1  ;;  %8261 = vmatpush3.bf16.msra.mxu0 %v10097_v6 }
 0x8ae   :  { %v2065_v5 = vpack.c.bf16 %v2060_v20, %v2059_v21  ;;  %v2053_v58 = vadd.f32 %v2038_v36, %v9604_v22  ;;  %8262 = vmatprep.subr.bf16.mxu0 %v10104_v63  ;;  %v2203_v37 = vcvt.s32.f32 %v2201_v29  ;;  %v2218_v21 = vcvt.s32.f32 %v2216_v3 }
 0x8af   :  { %v2062_v61 = vmax.f32 %v2054_v18, 0.0 }
 0x8b0   :  { %v2061_v49 = vmax.f32 %v2053_v58, 0.0  ;;  %8228 = vmatprep.mubr.msk.bf16.mxu0 %vm433_vm4, %v2065_v5  ;;  %v2276_v5 = vand.u32 65535, %v10330_v60 }
 0x8b1   :  { %8263 = vmatpush3.bf16.msra.mxu0 %v10104_v63 }
 0x8b2   :  { %v2066_v47 = vpack.c.bf16 %v2062_v61, %v2061_v49  ;;  %8264 = vmatprep.subr.bf16.mxu0 %v10112_v24  ;;  %v2278_v58 = vcvt.s32.f32 %v2276_v5  ;;  %v2306_v61 = vand.u32 65535, %v10342_v59 }
 0x8b4   :  { %8229 = vmatmul.mubr.msk.bf16.gmra.mrb[40].mxu0 %vm433_vm4, %v2066_v47  ;;  %v2308_v49 = vcvt.s32.f32 %v2306_v61 }
 0x8b5   :  { %8265 = vmatpush3.bf16.msra.mxu0 %v10112_v24  ;;  %v2233_v24 = vcvt.s32.f32 %v2231_v32 }
 0x8b6   :  { %8266 = vmatprep.subr.bf16.mxu0 %v10120_v26 }
 0x8b9   :  { %8267 = vmatpush3.bf16.msra.mxu0 %v10120_v26 }
 0x8ba   :  { %8304 = vmatprep.subr.bf16.mxu0 %v10097_v6  ;;  %v2261_v6 = vand.u32 65535, %v10306_v10 }
 0x8bc   :  { %v2263_v53 = vcvt.s32.f32 %v2261_v6 }
 0x8e9   :  { %v2206_v55 = vpop.xlane.xlu0 %2205 }
 0x8ea   :  { %vm2207_vm13 = vcmp.eq.f32.partialorder %v10285_v54, %v2206_v55  ;;  %v2246_v54 = vand.u32 65535, %v10313_v40  ;;  %v2293_v40 = vcvt.s32.f32 %v2291_v25 }
 0x8eb   :  { %v2208_v63 = vsel %vm2207_vm13, %v2203_v37, inf }
 0x8ec   :  { %2209 = vmin.xlane.f32.xlu0 %v2208_v63  ;;  %v2248_v36 = vcvt.s32.f32 %v2246_v54 }
 0x8ed   :  { %v2236_v11 = vpop.xlane.xlu0 %2235 }
 0x8ee   :  { %vm2237_vm14 = vcmp.eq.f32.partialorder %v10297_v15, %v2236_v11  ;;  %v2242_v32 = vcvt.f32.s32 %v2236_v11 }
 0x8ef   :  { %v2221_v20 = vpop.xlane.xlu1 %2220  ;;  %v2238_v26 = vsel %vm2237_vm14, %v2233_v24, inf }
 0x8f0   :  { %2239 = vmin.xlane.f32.xlu0 %v2238_v26  ;;  %vm2222_vm15 = vcmp.eq.f32.partialorder %v10302_v28, %v2221_v20  ;;  %v2227_v59 = vcvt.f32.s32 %v2221_v20 }
 0x8f1   :  { %v2223_v19 = vsel %vm2222_vm15, %v2218_v21, inf }
 0x8f2   :  { %2224 = vmin.xlane.f32.xlu1 %v2223_v19  ;;  %v2266_v16 = vpop.xlane.xlu0 %2265  ;;  %v2228_v54 = vshll.u32 %v2227_v59, 16 }
 0x8f3   :  { %vm2267_vm0 = vcmp.eq.f32.partialorder %v10317_v62, %v2266_v16  ;;  %v2272_v24 = vcvt.f32.s32 %v2266_v16 }
 0x8f4   :  { %v2268_v15 = vsel %vm2267_vm0, %v2263_v53, inf }
 0x8f5   :  { %v10379_v18 = vpop.xlane.xlu1 %2250  ;;  %2269 = vmin.xlane.f32.xlu0 %v2268_v15  ;;  %v2273_v20 = vshll.u32 %v2272_v24, 16 }
 0x8f6   :  { %vm2252_vm2 = vcmp.eq.f32.partialorder %v10326_v9, %v10379_v18  ;;  %v2257_v16 = vcvt.f32.s32 %v10379_v18 }
 0x8f7   :  { %v2253_v28 = vsel %vm2252_vm2, %v2248_v36, inf  ;;  %v10384_v10 = vpop.xlane.xlu0 %2295 }
 0x8f8   :  { %2254 = vmin.xlane.f32.xlu1 %v2253_v28  ;;  %vm2297_vm3 = vcmp.eq.f32.partialorder %v10333_v34, %v10384_v10  ;;  %v2212_v34 = vcvt.f32.s32 %v2206_v55  ;;  %v2302_v15 = vcvt.f32.s32 %v10384_v10 }
 0x8f9   :  { %v10388_v2 = vpop.xlane.xlu1 %2280  ;;  %v2298_v62 = vsel %vm2297_vm3, %v2293_v40, inf }
 0x8fa   :  { %2299 = vmin.xlane.f32.xlu0 %v2298_v62  ;;  %vm2282_vm5 = vcmp.eq.f32.partialorder %v10339_v56, %v10388_v2  ;;  %v2213_v37 = vshll.u32 %v2212_v34, 16  ;;  %v2243_v56 = vshll.u32 %v2242_v32, 16  ;;  %v2287_v40 = vcvt.f32.s32 %v10388_v2 }
 0x8fb   :  { %v2283_v60 = vsel %vm2282_vm5, %v2278_v58, inf  ;;  %v2258_v32 = vshll.u32 %v2257_v16, 16 }
 0x8fc   :  { %2284 = vmin.xlane.f32.xlu1 %v2283_v60 }
 0x8fd   :  { %v10393_v9 = vpop.xlane.xlu1 %2310 }
 0x8fe   :  { %vm2312_vm6 = vcmp.eq.f32.partialorder %v10346_v38, %v10393_v9 }
 0x8ff   :  { %v2313_v47 = vsel %vm2312_vm6, %v2308_v49, inf }
 0x900   :  { %2314 = vmin.xlane.f32.xlu1 %v2313_v47 }
 0x979   :  { %v2210_v29 = vpop.xlane.xlu0 %2209 }
 0x97a   :  { %v2211_v63 = vcvt.f32.s32 %v2210_v29 }
 0x97c   :  { %v2214_v3 = vadd.s32 %v2213_v37, %v2211_v63 }
 0x97d   :  { %v2240_v26 = vpop.xlane.xlu0 %2239 }
 0x97e   :  { %v2241_v21 = vcvt.f32.s32 %v2240_v26  ;;  %vm2320_vm7 = vcmp.eq.s32.totalorder %v9171_v23, %v2214_v3 }
 0x97f   :  { %v2225_v6 = vpop.xlane.xlu1 %2224  ;;  %v7379_v19 = vsel %vm2320_vm7, 1.0, %v13409_v41  ;;  %v10400_v38 = vsel %vm2320_vm7, inf, %v10156_v45  ;;  %v8226_v25 = vpop.f32.mrb[36].mxu0  ;;  %v10410_v45 = vld [vmem:[%s13353_s7] ss:$0 sm:$0xff] }
 0x980   :  { %v2244_v55 = vadd.s32 %v2243_v56, %v2241_v21  ;;  %v2226_v53 = vcvt.f32.s32 %v2225_v6  ;;  %8248 = vmatprep.mubr.msk.f32.mxu1 %vm433_vm4, %v7379_v19  ;;  %v2586_v11 = vsel %vm433_vm4, %v10400_v38, inf  ;;  %v10413_v36 = vadd.f32 %v10410_v45, %v8226_v25  ;;  %v2113_v5 = vpop.f32.mrb[37].mxu0 }
 0x981   :  { %2587 = vmin.xlane.f32.xlu0 %v2586_v11  ;;  %v10418_v18 = vadd.f32 %v10410_v45, %v2113_v5  ;;  %v8227_v62 = vpop.f32.mrb[38].mxu0  ;;  %v2303_v6 = vshll.u32 %v2302_v15, 16  ;;  %v2317_v11 = vcvt.f32.s32 %v10393_v9  ;;  %v13438_v9 = vld [vmem:[#allocation4_spill] sm:$0xff] }
 0x982   :  { %v2229_v28 = vadd.s32 %v2228_v54, %v2226_v53  ;;  %vm2322_vm1 = vcmp.eq.s32.totalorder %v9171_v23, %v2244_v55  ;;  %v10428_v60 = vadd.f32 %v10410_v45, %v8227_v62  ;;  %v2116_v49 = vpop.f32.mrb[39].mxu0  ;;  %v2270_v47 = vpop.xlane.xlu0 %2269  ;;  %v2288_v54 = vshll.u32 %v2287_v40, 16 }
 0x983   :  { %v10421_v10 = vsel %vm2322_vm1, inf, %v10180_v39  ;;  %v7381_v58 = vsel %vm2322_vm1, 1.0, %v13409_v41  ;;  %v10436_v29 = vadd.f32 %v10410_v45, %v2116_v49  ;;  %v2271_v37 = vcvt.f32.s32 %v2270_v47 }
 0x984   :  { %vm2321_vm8 = vcmp.eq.s32.totalorder %v9171_v23, %v2229_v28  ;;  %v2592_v2 = vsel %vm433_vm4, %v10421_v10, inf }
 0x985   :  { %v7380_v39 = vsel %vm2321_vm8, 1.0, %v13409_v41  ;;  %2593 = vmin.xlane.f32.xlu0 %v2592_v2  ;;  %v2255_v59 = vpop.xlane.xlu1 %2254  ;;  %v10442_v3 = vsel %vm2321_vm8, inf, %v10198_v50  ;;  %v2274_v26 = vadd.s32 %v2273_v20, %v2271_v37 }
 0x986   :  { %8249 = vmatmul.mubr.msk.f32.vlgmr.msra.gmra.mrb[44].mxu1 %vm433_vm4, %v7380_v39  ;;  %v2256_v56 = vcvt.f32.s32 %v2255_v59  ;;  %v2589_v21 = vsel %vm433_vm4, %v10442_v3, inf }
 0x987   :  { %8251 = vmatprep.mubr.msk.f32.mxu1 %vm433_vm4, %v7381_v58  ;;  %8843 = vmatpush3.bf16.msra.mxu1 %v9349_v35  ;;  %v2300_v19 = vpop.xlane.xlu0 %2299  ;;  %v8230_v55 = vpop.f32.mrb[40].mxu0  ;;  %vm2324_vm9 = vcmp.eq.s32.totalorder %v9171_v23, %v2274_v26  ;;  %v2318_v26 = vshll.u32 %v2317_v11, 16 }
 0x988   :  { %2590 = vmin.xlane.f32.xlu1 %v2589_v21  ;;  %8845 = vmatprep.subr.bf16.mxu1 %v9347_v33  ;;  %v2259_v50 = vadd.s32 %v2258_v32, %v2256_v56  ;;  %v2301_v53 = vcvt.f32.s32 %v2300_v19  ;;  %v10454_v20 = vadd.f32 %v10410_v45, %v8230_v55  ;;  %v2129_v16 = vpop.f32.mrb[41].mxu0  ;;  %v10457_v5 = vsel %vm2324_vm9, inf, %v10210_v43 }
 0x989   :  { %v2285_v25 = vpop.xlane.xlu1 %2284  ;;  %v7383_v15 = vsel %vm2324_vm9, 1.0, %v13409_v41  ;;  %v10461_v40 = vadd.f32 %v10410_v45, %v2129_v16  ;;  %v8231_v58 = vpop.f32.mrb[42].mxu0  ;;  %v2598_v2 = vsel %vm433_vm4, %v10457_v5, inf }
 0x98a   :  { %v2304_v28 = vadd.s32 %v2303_v6, %v2301_v53  ;;  %v2286_v62 = vcvt.f32.s32 %v2285_v25  ;;  %vm2323_vm10 = vcmp.eq.s32.totalorder %v9171_v23, %v2259_v50  ;;  %v10468_v49 = vadd.f32 %v10410_v45, %v8231_v58  ;;  %v2132_v43 = vpop.f32.mrb[43].mxu0  ;;  %2599 = vmin.xlane.f32.xlu0 %v2598_v2  ;;  %v13436_v25 = vld [vmem:[#allocation6_spill] sm:$0xff] }
 0x98b   :  { %8847 = vmatpush3.bf16.msra.mxu1 %v9347_v33  ;;  %v7382_v47 = vsel %vm2323_vm10, 1.0, %v13409_v41  ;;  %v10477_v32 = vadd.f32 %v10410_v45, %v2132_v43  ;;  %v10481_v59 = vsel %vm2323_vm10, inf, %v10236_v0 }
 0x98c   :  { %8849 = vmatprep.subr.bf16.mxu1 %v13426_v44  ;;  %v2289_v37 = vadd.s32 %v2288_v54, %v2286_v62  ;;  %8252 = vmatmul.mubr.msk.f32.gmra.mrb[46].mxu1 %vm433_vm4, %v7382_v47  ;;  %v2595_v21 = vsel %vm433_vm4, %v10481_v59, inf  ;;  %vm2326_vm11 = vcmp.eq.s32.totalorder %v9171_v23, %v2304_v28 }
 0x98d   :  { %13433 = vst [vmem:[#allocation3_spill] sm:$0xff] %v10477_v32  ;;  %8254 = vmatprep.mubr.msk.f32.mxu1 %vm433_vm4, %v7383_v15  ;;  %v2315_v6 = vpop.xlane.xlu1 %2314  ;;  %2596 = vmin.xlane.f32.xlu1 %v2595_v21  ;;  %v10493_v0 = vsel %vm2326_vm11, inf, %v10252_v4  ;;  %v7385_v11 = vsel %vm2326_vm11, 1.0, %v13409_v41 }
 0x98e   :  { %v2316_v54 = vcvt.f32.s32 %v2315_v6  ;;  %vm2325_vm12 = vcmp.eq.s32.totalorder %v9171_v23, %v2289_v37  ;;  %13434 = vst [vmem:[#allocation7_spill] sm:$0xff] %v10493_v0  ;;  %v2604_v55 = vsel %vm433_vm4, %v10493_v0, inf }
 0x98f   :  { %8851 = vmatpush3.bf16.msra.mxu1 %v13426_v44  ;;  %v7384_v50 = vsel %vm2325_vm12, 1.0, %v13409_v41  ;;  %v10500_v53 = vsel %vm2325_vm12, inf, %v10258_v8  ;;  %2605 = vmin.xlane.f32.xlu0 %v2604_v55 }
 0x990   :  { %13435 = vst [vmem:[#allocation8_spill] sm:$0xff] %v10500_v53  ;;  %8853 = vmatprep.subr.bf16.mxu1 %v13429_v1  ;;  %v2319_v16 = vadd.s32 %v2318_v26, %v2316_v54  ;;  %8255 = vmatmul.mubr.msk.f32.gmra.mrb[48].mxu1 %vm433_vm4, %v7384_v50  ;;  %v2601_v4 = vsel %vm433_vm4, %v10500_v53, inf }
 0x991   :  { %8257 = vmatprep.mubr.msk.f32.mxu1 %vm433_vm4, %v7385_v11  ;;  %2602 = vmin.xlane.f32.xlu1 %v2601_v4 }
 0x992   :  { %vm2327_vm13 = vcmp.eq.s32.totalorder %v9171_v23, %v2319_v16 }
 0x993   :  { %8855 = vmatpush3.bf16.msra.mxu1 %v13429_v1  ;;  %v7386_v8 = vsel %vm2327_vm13, 1.0, %v13409_v41  ;;  %v10512_v15 = vsel %vm2327_vm13, inf, %v13436_v25 }
 0x994   :  { %13437 = vst [vmem:[#allocation9_spill] sm:$0xff] %v10512_v15  ;;  %8857 = vmatprep.subr.bf16.mxu1 %v9349_v35  ;;  %8258 = vmatmul.mubr.msk.f32.gmra.mrb[50].mxu1 %vm433_vm4, %v7386_v8  ;;  %v2607_v28 = vsel %vm433_vm4, %v10512_v15, inf }
 0x995   :  { %2608 = vmin.xlane.f32.xlu1 %v2607_v28 }
 0xa0e   :  { %v2588_v62 = vpop.xlane.xlu0 %2587 }
 0xa0f   :  { %vm2610_vm14 = vcmp.le.f32.partialorder %v10400_v38, %v2588_v62 }
 0xa10   :  { %v2618_v58 = vsel %vm2610_vm14, %v9171_v23, 64 }
 0xa11   :  { %v10521_v43 = vsel %vm433_vm4, %v2618_v58, 2147483647 }
 0xa12   :  { %v2594_v47 = vpop.xlane.xlu0 %2593  ;;  %v2628_v2 = vshra.s32 %v10521_v43, 16 }
 0xa13   :  { %vm2612_vm15 = vcmp.le.f32.partialorder %v10421_v10, %v2594_v47 }
 0xa14   :  { %v2620_v37 = vsel %vm2612_vm15, %v9171_v23, 64  ;;  %v10526_v26 = vcvt.s32.f32 %v2628_v2 }
 0xa15   :  { %v10529_v21 = vsel %vm433_vm4, %v2620_v37, 2147483647  ;;  %v2591_v6 = vpop.xlane.xlu1 %2590 }
 0xa16   :  { %vm2611_vm0 = vcmp.le.f32.partialorder %v10442_v3, %v2591_v6  ;;  %2631 = vmin.xlane.f32.xlu0 %v10526_v26  ;;  %v2658_v54 = vshra.s32 %v10529_v21, 16 }
 0xa17   :  { %v2619_v50 = vsel %vm2611_vm0, %v9171_v23, 64  ;;  %v2600_v4 = vpop.xlane.xlu0 %2599 }
 0xa18   :  { %v10536_v55 = vsel %vm433_vm4, %v2619_v50, 2147483647  ;;  %v10538_v11 = vcvt.s32.f32 %v2658_v54  ;;  %vm2614_vm2 = vcmp.le.f32.partialorder %v10457_v5, %v2600_v4 }
 0xa19   :  { %v2643_v16 = vshra.s32 %v10536_v55, 16  ;;  %v2622_v25 = vsel %vm2614_vm2, %v9171_v23, 64 }
 0xa1a   :  { %2661 = vmin.xlane.f32.xlu0 %v10538_v11  ;;  %v2597_v28 = vpop.xlane.xlu1 %2596  ;;  %v10547_v62 = vsel %vm433_vm4, %v2622_v25, 2147483647 }
 0xa1b   :  { %v10543_v8 = vcvt.s32.f32 %v2643_v16  ;;  %vm2613_vm3 = vcmp.le.f32.partialorder %v10481_v59, %v2597_v28  ;;  %v2688_v2 = vshra.s32 %v10547_v62, 16 }
 0xa1c   :  { %v2621_v58 = vsel %vm2613_vm3, %v9171_v23, 64  ;;  %v2606_v47 = vpop.xlane.xlu0 %2605 }
 0xa1d   :  { %2646 = vmin.xlane.f32.xlu1 %v10543_v8  ;;  %v10554_v37 = vsel %vm433_vm4, %v2621_v58, 2147483647  ;;  %vm2616_vm5 = vcmp.le.f32.partialorder %v10493_v0, %v2606_v47  ;;  %v10558_v50 = vcvt.s32.f32 %v2688_v2 }
 0xa1e   :  { %v2624_v6 = vsel %vm2616_vm5, %v9171_v23, 64  ;;  %v2603_v54 = vpop.xlane.xlu1 %2602  ;;  %v2673_v16 = vshra.s32 %v10554_v37, 16 }
 0xa1f   :  { %v10562_v4 = vsel %vm433_vm4, %v2624_v6, 2147483647  ;;  %vm2615_vm6 = vcmp.le.f32.partialorder %v10500_v53, %v2603_v54  ;;  %2691 = vmin.xlane.f32.xlu0 %v10558_v50 }
 0xa20   :  { %v2623_v25 = vsel %vm2615_vm6, %v9171_v23, 64  ;;  %v10567_v28 = vcvt.s32.f32 %v2673_v16  ;;  %v2718_v58 = vshra.s32 %v10562_v4, 16 }
 0xa21   :  { %v10571_v47 = vsel %vm433_vm4, %v2623_v25, 2147483647 }
 0xa22   :  { %2676 = vmin.xlane.f32.xlu1 %v10567_v28  ;;  %v2609_v2 = vpop.xlane.xlu1 %2608  ;;  %v10574_v19 = vcvt.s32.f32 %v2718_v58  ;;  %v2703_v6 = vshra.s32 %v10571_v47, 16 }
 0xa23   :  { %vm2617_vm7 = vcmp.le.f32.partialorder %v10512_v15, %v2609_v2 }
 0xa24   :  { %v2625_v54 = vsel %vm2617_vm7, %v9171_v23, 64  ;;  %2721 = vmin.xlane.f32.xlu0 %v10574_v19  ;;  %v10580_v16 = vcvt.s32.f32 %v2703_v6 }
 0xa25   :  { %v10583_v56 = vsel %vm433_vm4, %v2625_v54, 2147483647 }
 0xa26   :  { %2706 = vmin.xlane.f32.xlu1 %v10580_v16  ;;  %v2733_v25 = vshra.s32 %v10583_v56, 16 }
 0xa28   :  { %v10587_v39 = vcvt.s32.f32 %v2733_v25 }
 0xa2a   :  { %2736 = vmin.xlane.f32.xlu1 %v10587_v39 }
 0xa59   :  { %v8250_v58 = vpop.f32.mrb[44].mxu1 }
 0xa5a   :  { %v2474_v2 = vadd.f32 %v8250_v58, %v13438_v9  ;;  %v2434_v24 = vpop.f32.mrb[45].mxu1 }
 0xa5b   :  { %v2473_v63 = vadd.f32 %v2434_v24, %v13415_v52 }
 0xa5c   :  { %v2482_v34 = vmax.f32 %v2474_v2, 0.0 }
 0xa5d   :  { %v2481_v6 = vmax.f32 %v2473_v63, 0.0 }
 0xa5f   :  { %v2489_v61 = vpack.c.bf16 %v2482_v34, %v2481_v6  ;;  %v8253_v15 = vpop.f32.mrb[46].mxu1 }
 0xa60   :  { %v2476_v54 = vadd.f32 %v8253_v15, %v9583_v46  ;;  %v2444_v1 = vpop.f32.mrb[47].mxu1 }
 0xa61   :  { %8268 = vmatprep.mubr.msk.bf16.mxu0 %vm433_vm4, %v2489_v61  ;;  %v2475_v25 = vadd.f32 %v2444_v1, %v9587_v42  ;;  %v10602_v1 = vld [vmem:[%s13351_s6] sm:$0xff]  }
 0xa62   :  { %v2484_v53 = vmax.f32 %v2476_v54, 0.0  ;;  %v10617_v54 = vld [vmem:[%s13351_s6 + $0x10] sm:$0xff]  }
 0xa63   :  { %v2483_v0 = vmax.f32 %v2475_v25, 0.0  ;;  %v8256_v32 = vpop.f32.mrb[48].mxu1  ;;  %v10625_v25 = vld [vmem:[%s13351_s6 + $0x18] sm:$0xff]  }
 0xa64   :  { %v2478_v48 = vadd.f32 %v8256_v32, %v9591_v31  ;;  %v2454_v58 = vpop.f32.mrb[49].mxu1 }
 0xa65   :  { %v2490_v9 = vpack.c.bf16 %v2484_v53, %v2483_v0  ;;  %v2477_v24 = vadd.f32 %v2454_v58, %v9595_v30  ;;  %v2627_v58 = vand.u32 65535, %v10521_v43  ;;  %v2687_v43 = vand.u32 65535, %v10547_v62 }
 0xa66   :  { %v2486_v2 = vmax.f32 %v2478_v48, 0.0  ;;  %v10609_v48 = vld [vmem:[%s13351_s6 + $0x8] sm:$0xff]  }
 0xa67   :  { %v2485_v63 = vmax.f32 %v2477_v24, 0.0  ;;  %v8259_v34 = vpop.f32.mrb[50].mxu1  ;;  %8269 = vmatmul.mubr.msk.bf16.vlgmr.msra.gmra.mrb[44].mxu0 %vm433_vm4, %v2490_v9 }
 0xa68   :  { %v2480_v15 = vadd.f32 %v8259_v34, %v9600_v17  ;;  %v2464_v6 = vpop.f32.mrb[51].mxu1  ;;  %8305 = vmatpush3.bf16.msra.mxu0 %v10602_v1 }
 0xa69   :  { %v2491_v61 = vpack.c.bf16 %v2486_v2, %v2485_v63  ;;  %v2479_v32 = vadd.f32 %v2464_v6, %v9604_v22  ;;  %8306 = vmatprep.subr.bf16.mxu0 %v10609_v48  ;;  %v2629_v2 = vcvt.s32.f32 %v2627_v58  ;;  %v2657_v63 = vand.u32 65535, %v10529_v21 }
 0xa6a   :  { %v2488_v9 = vmax.f32 %v2480_v15, 0.0  ;;  %v2642_v15 = vand.u32 65535, %v10536_v55  ;;  %v2689_v58 = vcvt.s32.f32 %v2687_v43  ;;  %v2717_v55 = vand.u32 65535, %v10562_v4 }
 0xa6b   :  { %v2487_v0 = vmax.f32 %v2479_v32, 0.0  ;;  %8272 = vmatprep.mubr.msk.bf16.mxu0 %vm433_vm4, %v2491_v61  ;;  %v2659_v61 = vcvt.s32.f32 %v2657_v63 }
 0xa6c   :  { %8307 = vmatpush3.bf16.msra.mxu0 %v10609_v48 }
 0xa6d   :  { %v2492_v53 = vpack.c.bf16 %v2488_v9, %v2487_v0  ;;  %8308 = vmatprep.subr.bf16.mxu0 %v10617_v54  ;;  %v2644_v0 = vcvt.s32.f32 %v2642_v15 }
 0xa6f   :  { %8273 = vmatmul.mubr.msk.bf16.gmra.mrb[48].mxu0 %vm433_vm4, %v2492_v53 }
 0xa70   :  { %8309 = vmatpush3.bf16.msra.mxu0 %v10617_v54 }
 0xa71   :  { %8310 = vmatprep.subr.bf16.mxu0 %v10625_v25 }
 0xa74   :  { %8311 = vmatpush3.bf16.msra.mxu0 %v10625_v25 }
 0xa75   :  { %8348 = vmatprep.subr.bf16.mxu0 %v10602_v1 }
 0xaa3   :  { %v2632_v24 = vpop.xlane.xlu0 %2631 }
 0xaa4   :  { %vm2633_vm1 = vcmp.eq.f32.partialorder %v10526_v26, %v2632_v24  ;;  %v2672_v26 = vand.u32 65535, %v10554_v37  ;;  %v2719_v37 = vcvt.s32.f32 %v2717_v55 }
 0xaa5   :  { %v2634_v34 = vsel %vm2633_vm1, %v2629_v2, inf }
 0xaa6   :  { %2635 = vmin.xlane.f32.xlu0 %v2634_v34  ;;  %v2674_v63 = vcvt.s32.f32 %v2672_v26  ;;  %v2702_v34 = vand.u32 65535, %v10571_v47 }
 0xaa7   :  { %v2662_v6 = vpop.xlane.xlu0 %2661 }
 0xaa8   :  { %vm2663_vm8 = vcmp.eq.f32.partialorder %v10538_v11, %v2662_v6  ;;  %v2704_v15 = vcvt.s32.f32 %v2702_v34  ;;  %v2668_v26 = vcvt.f32.s32 %v2662_v6 }
 0xaa9   :  { %v2664_v32 = vsel %vm2663_vm8, %v2659_v61, inf  ;;  %v2732_v61 = vand.u32 65535, %v10583_v56 }
 0xaaa   :  { %v2647_v9 = vpop.xlane.xlu1 %2646  ;;  %2665 = vmin.xlane.f32.xlu0 %v2664_v32 }
 0xaab   :  { %vm2648_vm9 = vcmp.eq.f32.partialorder %v10543_v8, %v2647_v9  ;;  %v2734_v32 = vcvt.s32.f32 %v2732_v61  ;;  %v2653_v55 = vcvt.f32.s32 %v2647_v9 }
 0xaac   :  { %v2649_v53 = vsel %vm2648_vm9, %v2644_v0, inf  ;;  %v2692_v21 = vpop.xlane.xlu0 %2691 }
 0xaad   :  { %2650 = vmin.xlane.f32.xlu1 %v2649_v53  ;;  %vm2693_vm10 = vcmp.eq.f32.partialorder %v10558_v50, %v2692_v21  ;;  %v2654_v6 = vshll.u32 %v2653_v55, 16 }
 0xaae   :  { %v2694_v11 = vsel %vm2693_vm10, %v2689_v58, inf }
 0xaaf   :  { %v10640_v2 = vpop.xlane.xlu1 %2676  ;;  %2695 = vmin.xlane.f32.xlu0 %v2694_v11 }
 0xab0   :  { %vm2678_vm11 = vcmp.eq.f32.partialorder %v10567_v28, %v10640_v2  ;;  %v2683_v61 = vcvt.f32.s32 %v10640_v2  ;;  %v13439_v2 = vmax.f32 %v10169_v13, %v10413_v36 }
 0xab1   :  { %v2679_v8 = vsel %vm2678_vm11, %v2674_v63, inf  ;;  %v10645_v62 = vpop.xlane.xlu0 %2721  ;;  %v2669_v63 = vshll.u32 %v2668_v26, 16 }
 0xab2   :  { %2680 = vmin.xlane.f32.xlu1 %v2679_v8  ;;  %vm2723_vm12 = vcmp.eq.f32.partialorder %v10574_v19, %v10645_v62  ;;  %v2638_v19 = vcvt.f32.s32 %v2632_v24 }
 0xab3   :  { %v10649_v4 = vpop.xlane.xlu1 %2706  ;;  %v2724_v50 = vsel %vm2723_vm12, %v2719_v37, inf }
 0xab4   :  { %2725 = vmin.xlane.f32.xlu0 %v2724_v50  ;;  %vm2708_vm13 = vcmp.eq.f32.partialorder %v10580_v16, %v10649_v4  ;;  %v2639_v53 = vshll.u32 %v2638_v19, 16  ;;  %v2698_v16 = vcvt.f32.s32 %v2692_v21  ;;  %v2713_v26 = vcvt.f32.s32 %v10649_v4 }
 0xab5   :  { %v2709_v47 = vsel %vm2708_vm13, %v2704_v15, inf }
 0xab6   :  { %2710 = vmin.xlane.f32.xlu1 %v2709_v47  ;;  %v2699_v21 = vshll.u32 %v2698_v16, 16  ;;  %v13441_v16 = vmax.f32 %v10187_v12, %v10428_v60 }
 0xab7   :  { %v10654_v28 = vpop.xlane.xlu1 %2736 }
 0xab8   :  { %vm2738_vm14 = vcmp.eq.f32.partialorder %v10587_v39, %v10654_v28 }
 0xab9   :  { %v2739_v0 = vsel %vm2738_vm14, %v2734_v32, inf }
 0xaba   :  { %2740 = vmin.xlane.f32.xlu1 %v2739_v0 }
 0xb33   :  { %v2636_v43 = vpop.xlane.xlu0 %2635 }
 0xb34   :  { %v2637_v58 = vcvt.f32.s32 %v2636_v43 }
 0xb36   :  { %v2640_v56 = vadd.s32 %v2639_v53, %v2637_v58 }
 0xb37   :  { %v2666_v11 = vpop.xlane.xlu0 %2665 }
 0xb38   :  { %v2667_v34 = vcvt.f32.s32 %v2666_v11  ;;  %vm2746_vm15 = vcmp.eq.s32.totalorder %v9171_v23, %v2640_v56  ;;  %v13440_v11 = vmax.f32 %v10176_v57, %v10418_v18 }
 0xb39   :  { %v7399_v8 = vsel %vm2746_vm15, 1.0, %v13409_v41  ;;  %v10661_v37 = vsel %vm2746_vm15, inf, %v10400_v38  ;;  %v2728_v38 = vcvt.f32.s32 %v10645_v62 }
 0xb3a   :  { %v2670_v39 = vadd.s32 %v2669_v63, %v2667_v34  ;;  %v2651_v50 = vpop.xlane.xlu1 %2650  ;;  %8292 = vmatprep.mubr.msk.f32.mxu1 %vm433_vm4, %v7399_v8  ;;  %v3012_v24 = vsel %vm433_vm4, %v10661_v37, inf  ;;  %v8270_v9 = vpop.f32.mrb[44].mxu0  ;;  %v13442_v8 = vmax.f32 %v10195_v27, %v10436_v29 }
 0xb3b   :  { %v2652_v15 = vcvt.f32.s32 %v2651_v50  ;;  %3013 = vmin.xlane.f32.xlu0 %v3012_v24  ;;  %v2548_v47 = vadd.f32 %v10410_v45, %v8270_v9  ;;  %v2539_v32 = vpop.f32.mrb[45].mxu0  ;;  %v2729_v60 = vshll.u32 %v2728_v38, 16 }
 0xb3c   :  { %vm2748_vm0 = vcmp.eq.s32.totalorder %v9171_v23, %v2670_v39  ;;  %v2540_v0 = vadd.f32 %v10410_v45, %v2539_v32  ;;  %v8271_v43 = vpop.f32.mrb[46].mxu0  ;;  %v2696_v4 = vpop.xlane.xlu0 %2695 }
 0xb3d   :  { %v2655_v19 = vadd.s32 %v2654_v6, %v2652_v15  ;;  %v10674_v53 = vsel %vm2748_vm0, inf, %v10421_v10  ;;  %v10680_v58 = vmax.f32 %v13439_v2, %v2548_v47  ;;  %v2551_v56 = vadd.f32 %v10410_v45, %v8271_v43  ;;  %v2542_v55 = vpop.f32.mrb[47].mxu0 }
 0xb3e   :  { %v3018_v62 = vsel %vm433_vm4, %v10674_v53, inf  ;;  %v10688_v63 = vmax.f32 %v13440_v11, %v2540_v0  ;;  %v2543_v10 = vadd.f32 %v10410_v45, %v2542_v55  ;;  %v7401_v13 = vsel %vm2748_vm0, 1.0, %v13409_v41 }
 0xb3f   :  { %vm2747_vm2 = vcmp.eq.s32.totalorder %v9171_v23, %v2655_v19  ;;  %3019 = vmin.xlane.f32.xlu0 %v3018_v62  ;;  %v10699_v34 = vmax.f32 %v13441_v16, %v2551_v56  ;;  %v2697_v57 = vcvt.f32.s32 %v2696_v4  ;;  %v2681_v24 = vpop.xlane.xlu1 %2680  ;;  %v2684_v6 = vshll.u32 %v2683_v61, 16 }
 0xb40   :  { %v7400_v36 = vsel %vm2747_vm2, 1.0, %v13409_v41  ;;  %v10702_v18 = vsel %vm2747_vm2, inf, %v10442_v3  ;;  %v10707_v50 = vmax.f32 %v13442_v8, %v2543_v10  ;;  %v2682_v12 = vcvt.f32.s32 %v2681_v24 }
 0xb41   :  { %8293 = vmatmul.mubr.msk.f32.vlgmr.msra.gmra.mrb[52].mxu1 %vm433_vm4, %v7400_v36  ;;  %v3015_v39 = vsel %vm433_vm4, %v10702_v18, inf  ;;  %v2700_v9 = vadd.s32 %v2699_v21, %v2697_v57  ;;  %v2714_v3 = vshll.u32 %v2713_v26, 16  ;;  %v2726_v47 = vpop.xlane.xlu0 %2725  ;;  %v2743_v21 = vcvt.f32.s32 %v10654_v28 }
 0xb42   :  { %3016 = vmin.xlane.f32.xlu1 %v3015_v39  ;;  %8295 = vmatprep.mubr.msk.f32.mxu1 %vm433_vm4, %v7401_v13  ;;  %v8274_v15 = vpop.f32.mrb[48].mxu0  ;;  %v2685_v27 = vadd.s32 %v2684_v6, %v2682_v12  ;;  %v2727_v32 = vcvt.f32.s32 %v2726_v47  ;;  %v13443_v2 = vmax.f32 %v10217_v14, %v10454_v20  ;;  %v13444_v28 = vmax.f32 %v10223_v7, %v10461_v40  ;;  %v13447_v40 = vld [vmem:[#allocation3_spill] sm:$0xff] }
 0xb43   :  { %8859 = vmatpush3.bf16.msra.mxu1 %v9349_v35  ;;  %v2564_v29 = vadd.f32 %v10410_v45, %v8274_v15  ;;  %v2555_v0 = vpop.f32.mrb[49].mxu0  ;;  %vm2750_vm3 = vcmp.eq.s32.totalorder %v9171_v23, %v2700_v9  ;;  %v2711_v19 = vpop.xlane.xlu1 %2710  ;;  %v13445_v20 = vmax.f32 %v10232_v51, %v10468_v49  ;;  %v2744_v24 = vshll.u32 %v2743_v21, 16  ;;  %v13450_v39 = vld [vmem:[#allocation7_spill] sm:$0xff] }
 0xb44   :  { %8861 = vmatprep.subr.bf16.mxu1 %v9347_v33  ;;  %v2556_v61 = vadd.f32 %v10410_v45, %v2555_v0  ;;  %v8275_v38 = vpop.f32.mrb[50].mxu0  ;;  %v10720_v43 = vsel %vm2750_vm3, inf, %v10457_v5  ;;  %v7403_v26 = vsel %vm2750_vm3, 1.0, %v13409_v41  ;;  %v2730_v55 = vadd.s32 %v2729_v60, %v2727_v32  ;;  %v13451_v60 = vld [vmem:[#allocation8_spill] sm:$0xff]  ;;  %v13453_v0 = vld [vmem:[#allocation9_spill] sm:$0xff] }
 0xb45   :  { %v10726_v56 = vmax.f32 %v13443_v2, %v2564_v29  ;;  %v2712_v62 = vcvt.f32.s32 %v2711_v19  ;;  %v2567_v11 = vadd.f32 %v10410_v45, %v8275_v38  ;;  %v2558_v10 = vpop.f32.mrb[51].mxu0  ;;  %vm2749_vm5 = vcmp.eq.s32.totalorder %v9171_v23, %v2685_v27  ;;  %v13452_v29 = vld [vmem:[#allocation2_spill] sm:$0xff] }
 0xb46   :  { %v10732_v4 = vmax.f32 %v13444_v28, %v2556_v61  ;;  %v2559_v5 = vadd.f32 %v10410_v45, %v2558_v10  ;;  %v3024_v13 = vsel %vm433_vm4, %v10720_v43, inf  ;;  %v7402_v16 = vsel %vm2749_vm5, 1.0, %v13409_v41  ;;  %v13446_v45 = vld [vmem:[#allocation5_spill] sm:$0xff] }
 0xb47   :  { %8863 = vmatpush3.bf16.msra.mxu1 %v9347_v33  ;;  %v2715_v14 = vadd.s32 %v2714_v3, %v2712_v62  ;;  %v10742_v36 = vmax.f32 %v13445_v20, %v2567_v11  ;;  %3025 = vmin.xlane.f32.xlu0 %v3024_v13  ;;  %v10746_v7 = vsel %vm2749_vm5, inf, %v10481_v59  ;;  %v13448_v57 = vmax.f32 %v13446_v45, %v13447_v40  ;;  %v2741_v49 = vpop.xlane.xlu1 %2740 }
 0xb48   :  { %8865 = vmatprep.subr.bf16.mxu1 %v13426_v44  ;;  %8296 = vmatmul.mubr.msk.f32.gmra.mrb[54].mxu1 %vm433_vm4, %v7402_v16  ;;  %v3021_v51 = vsel %vm433_vm4, %v10746_v7, inf  ;;  %vm2752_vm6 = vcmp.eq.s32.totalorder %v9171_v23, %v2730_v55  ;;  %v2742_v59 = vcvt.f32.s32 %v2741_v49 }
 0xb49   :  { %v10752_v8 = vmax.f32 %v13448_v57, %v2559_v5  ;;  %3022 = vmin.xlane.f32.xlu1 %v3021_v51  ;;  %8298 = vmatprep.mubr.msk.f32.mxu1 %vm433_vm4, %v7403_v26  ;;  %vm2751_vm7 = vcmp.eq.s32.totalorder %v9171_v23, %v2715_v14  ;;  %v10761_v6 = vsel %vm2752_vm6, inf, %v13450_v39  ;;  %v7405_v15 = vsel %vm2752_vm6, 1.0, %v13409_v41 }
 0xb4a   :  { %v7404_v9 = vsel %vm2751_vm7, 1.0, %v13409_v41  ;;  %v3030_v12 = vsel %vm433_vm4, %v10761_v6, inf  ;;  %v10767_v3 = vsel %vm2751_vm7, inf, %v13451_v60  ;;  %v2745_v47 = vadd.s32 %v2744_v24, %v2742_v59 }
 0xb4b   :  { %13449 = vst [vmem:[#allocation6_spill] sm:$0xff] %v10752_v8  ;;  %8867 = vmatpush3.bf16.msra.mxu1 %v13426_v44  ;;  %3031 = vmin.xlane.f32.xlu0 %v3030_v12  ;;  %v3027_v27 = vsel %vm433_vm4, %v10767_v3, inf }
 0xb4c   :  { %8869 = vmatprep.subr.bf16.mxu1 %v13452_v29  ;;  %8299 = vmatmul.mubr.msk.f32.gmra.mrb[56].mxu1 %vm433_vm4, %v7404_v9  ;;  %vm2753_vm1 = vcmp.eq.s32.totalorder %v9171_v23, %v2745_v47 }
 0xb4d   :  { %3028 = vmin.xlane.f32.xlu1 %v3027_v27  ;;  %8301 = vmatprep.mubr.msk.f32.mxu1 %vm433_vm4, %v7405_v15  ;;  %v7406_v32 = vsel %vm2753_vm1, 1.0, %v13409_v41  ;;  %v10779_v21 = vsel %vm2753_vm1, inf, %v13453_v0 }
 0xb4e   :  { %13454 = vst [vmem:[#allocation5_spill] sm:$0xff] %v10779_v21  ;;  %v3033_v61 = vsel %vm433_vm4, %v10779_v21, inf }
 0xb4f   :  { %8871 = vmatpush3.bf16.msra.mxu1 %v13452_v29 }
 0xb50   :  { %8873 = vmatprep.subr.bf16.mxu1 %v9349_v35  ;;  %8302 = vmatmul.mubr.msk.f32.gmra.mrb[58].mxu1 %vm433_vm4, %v7406_v32 }
 0xb51   :  { %3034 = vmin.xlane.f32.xlu1 %v3033_v61 }
 0xbc8   :  { %v3014_v19 = vpop.xlane.xlu0 %3013 }
 0xbc9   :  { %vm3036_vm8 = vcmp.le.f32.partialorder %v10661_v37, %v3014_v19 }
 0xbca   :  { %v3044_v38 = vsel %vm3036_vm8, %v9171_v23, 64 }
 0xbcb   :  { %v10789_v26 = vsel %vm433_vm4, %v3044_v38, 2147483647 }
 0xbcc   :  { %v3020_v2 = vpop.xlane.xlu0 %3019  ;;  %v3054_v55 = vshra.s32 %v10789_v26, 16 }
 0xbcd   :  { %vm3038_vm9 = vcmp.le.f32.partialorder %v10674_v53, %v3020_v2 }
 0xbce   :  { %v3046_v62 = vsel %vm3038_vm9, %v9171_v23, 64  ;;  %v10794_v11 = vcvt.s32.f32 %v3054_v55 }
 0xbcf   :  { %v10797_v10 = vsel %vm433_vm4, %v3046_v62, 2147483647  ;;  %v3017_v28 = vpop.xlane.xlu1 %3016 }
 0xbd0   :  { %vm3037_vm10 = vcmp.le.f32.partialorder %v10702_v18, %v3017_v28  ;;  %3057 = vmin.xlane.f32.xlu0 %v10794_v11  ;;  %v3084_v5 = vshra.s32 %v10797_v10, 16 }
 0xbd1   :  { %v3045_v13 = vsel %vm3037_vm10, %v9171_v23, 64 }
 0xbd2   :  { %v10804_v14 = vsel %vm433_vm4, %v3045_v13, 2147483647  ;;  %v10806_v20 = vcvt.s32.f32 %v3084_v5 }
 0xbd3   :  { %v3069_v16 = vshra.s32 %v10804_v14, 16 }
 0xbd4   :  { %3087 = vmin.xlane.f32.xlu0 %v10806_v20  ;;  %v3026_v45 = vpop.xlane.xlu0 %3025 }
 0xbd5   :  { %v10810_v40 = vcvt.s32.f32 %v3069_v16  ;;  %vm3040_vm11 = vcmp.le.f32.partialorder %v10720_v43, %v3026_v45 }
 0xbd6   :  { %v3048_v57 = vsel %vm3040_vm11, %v9171_v23, 64  ;;  %v3023_v51 = vpop.xlane.xlu1 %3022 }
 0xbd7   :  { %3072 = vmin.xlane.f32.xlu1 %v10810_v40  ;;  %v10816_v49 = vsel %vm433_vm4, %v3048_v57, 2147483647  ;;  %vm3039_vm12 = vcmp.le.f32.partialorder %v10746_v7, %v3023_v51  ;;  %v13455_v57 = vld [vmem:[#allocation4_spill] sm:$0xff] }
 0xbd8   :  { %v3047_v24 = vsel %vm3039_vm12, %v9171_v23, 64  ;;  %v3032_v59 = vpop.xlane.xlu0 %3031  ;;  %v3114_v39 = vshra.s32 %v10816_v49, 16 }
 0xbd9   :  { %v10822_v9 = vsel %vm433_vm4, %v3047_v24, 2147483647  ;;  %vm3042_vm13 = vcmp.le.f32.partialorder %v10761_v6, %v3032_v59 }
 0xbda   :  { %v3050_v12 = vsel %vm3042_vm13, %v9171_v23, 64  ;;  %v3029_v60 = vpop.xlane.xlu1 %3028  ;;  %v10826_v15 = vcvt.s32.f32 %v3114_v39  ;;  %v3099_v47 = vshra.s32 %v10822_v9, 16 }
 0xbdb   :  { %v10830_v27 = vsel %vm433_vm4, %v3050_v12, 2147483647  ;;  %vm3041_vm14 = vcmp.le.f32.partialorder %v10767_v3, %v3029_v60 }
 0xbdc   :  { %v3049_v32 = vsel %vm3041_vm14, %v9171_v23, 64  ;;  %3117 = vmin.xlane.f32.xlu0 %v10826_v15  ;;  %v10835_v0 = vcvt.s32.f32 %v3099_v47  ;;  %v3144_v61 = vshra.s32 %v10830_v27, 16 }
 0xbdd   :  { %v10839_v19 = vsel %vm433_vm4, %v3049_v32, 2147483647 }
 0xbde   :  { %3102 = vmin.xlane.f32.xlu1 %v10835_v0  ;;  %v3035_v38 = vpop.xlane.xlu1 %3034  ;;  %v10842_v2 = vcvt.s32.f32 %v3144_v61  ;;  %v3129_v55 = vshra.s32 %v10839_v19, 16 }
 0xbdf   :  { %vm3043_vm15 = vcmp.le.f32.partialorder %v10779_v21, %v3035_v38 }
 0xbe0   :  { %v3051_v62 = vsel %vm3043_vm15, %v9171_v23, 64  ;;  %3147 = vmin.xlane.f32.xlu0 %v10842_v2  ;;  %v10848_v28 = vcvt.s32.f32 %v3129_v55 }
 0xbe1   :  { %v10851_v5 = vsel %vm433_vm4, %v3051_v62, 2147483647 }
 0xbe2   :  { %3132 = vmin.xlane.f32.xlu1 %v10848_v28  ;;  %v3159_v13 = vshra.s32 %v10851_v5, 16 }
 0xbe4   :  { %v10855_v16 = vcvt.s32.f32 %v3159_v13 }
 0xbe6   :  { %3162 = vmin.xlane.f32.xlu1 %v10855_v16 }
 0xc14   :  { %v8294_v45 = vpop.f32.mrb[52].mxu1 }
 0xc15   :  { %v2900_v51 = vadd.f32 %v8294_v45, %v13455_v57  ;;  %v2860_v24 = vpop.f32.mrb[53].mxu1 }
 0xc16   :  { %v2899_v59 = vadd.f32 %v2860_v24, %v13415_v52 }
 0xc17   :  { %v2908_v39 = vmax.f32 %v2900_v51, 0.0 }
 0xc18   :  { %v2907_v12 = vmax.f32 %v2899_v59, 0.0 }
 0xc1a   :  { %v2915_v60 = vpack.c.bf16 %v2908_v39, %v2907_v12 }
 0xc1b   :  { %v8297_v47 = vpop.f32.mrb[54].mxu1 }
 0xc1c   :  { %8312 = vmatprep.mubr.msk.bf16.mxu0 %vm433_vm4, %v2915_v60  ;;  %v2902_v32 = vadd.f32 %v8297_v47, %v9583_v46  ;;  %v2870_v61 = vpop.f32.mrb[55].mxu1 }
 0xc1d   :  { %v2901_v38 = vadd.f32 %v2870_v61, %v9587_v42 }
 0xc1e   :  { %v2910_v55 = vmax.f32 %v2902_v32, 0.0 }
 0xc1f   :  { %v2909_v62 = vmax.f32 %v2901_v38, 0.0  ;;  %v8300_v13 = vpop.f32.mrb[56].mxu1 }
 0xc20   :  { %v2904_v21 = vadd.f32 %v8300_v13, %v9591_v31  ;;  %v2880_v45 = vpop.f32.mrb[57].mxu1  ;;  %v3083_v13 = vand.u32 65535, %v10797_v10 }
 0xc21   :  { %v2916_v57 = vpack.c.bf16 %v2910_v55, %v2909_v62  ;;  %v2903_v24 = vadd.f32 %v2880_v45, %v9595_v30  ;;  %v3068_v45 = vand.u32 65535, %v10804_v14  ;;  %v3143_v14 = vand.u32 65535, %v10830_v27 }
 0xc22   :  { %v2912_v51 = vmax.f32 %v2904_v21, 0.0 }
 0xc23   :  { %v2911_v59 = vmax.f32 %v2903_v24, 0.0  ;;  %v8303_v39 = vpop.f32.mrb[58].mxu1  ;;  %8313 = vmatmul.mubr.msk.bf16.vlgmr.msra.gmra.mrb[52].mxu0 %vm433_vm4, %v2916_v57  ;;  %v3053_v57 = vand.u32 65535, %v10789_v26 }
 0xc24   :  { %v2906_v12 = vadd.f32 %v8303_v39, %v9600_v17  ;;  %v2890_v60 = vpop.f32.mrb[59].mxu1  ;;  %8349 = vmatpush3.bf16.msra.mxu0 %v10602_v1 }
 0xc25   :  { %v2917_v47 = vpack.c.bf16 %v2912_v51, %v2911_v59  ;;  %v2905_v32 = vadd.f32 %v2890_v60, %v9604_v22  ;;  %8350 = vmatprep.subr.bf16.mxu0 %v10609_v48  ;;  %v3055_v62 = vcvt.s32.f32 %v3053_v57  ;;  %v3113_v59 = vand.u32 65535, %v10816_v49 }
 0xc26   :  { %v2914_v61 = vmax.f32 %v2906_v12, 0.0 }
 0xc27   :  { %v2913_v38 = vmax.f32 %v2905_v32, 0.0  ;;  %8316 = vmatprep.mubr.msk.bf16.mxu0 %vm433_vm4, %v2917_v47  ;;  %v3115_v39 = vcvt.s32.f32 %v3113_v59  ;;  %v3128_v47 = vand.u32 65535, %v10839_v19 }
 0xc28   :  { %8351 = vmatpush3.bf16.msra.mxu0 %v10609_v48 }
 0xc29   :  { %v2918_v21 = vpack.c.bf16 %v2914_v61, %v2913_v38  ;;  %8352 = vmatprep.subr.bf16.mxu0 %v10617_v54  ;;  %v3130_v32 = vcvt.s32.f32 %v3128_v47  ;;  %v3158_v61 = vand.u32 65535, %v10851_v5  ;;  %v10925_v47 = vld [vmem:[%s13353_s7] ss:$0 sm:$0xff] }
 0xc2b   :  { %8317 = vmatmul.mubr.msk.bf16.gmra.mrb[56].mxu0 %vm433_vm4, %v2918_v21  ;;  %v3160_v38 = vcvt.s32.f32 %v3158_v61 }
 0xc2c   :  { %8353 = vmatpush3.bf16.msra.mxu0 %v10617_v54  ;;  %v3085_v54 = vcvt.s32.f32 %v3083_v13 }
 0xc2d   :  { %8354 = vmatprep.subr.bf16.mxu0 %v10625_v25 }
 0xc30   :  { %8355 = vmatpush3.bf16.msra.mxu0 %v10625_v25 }
 0xc31   :  { %8392 = vmatprep.subr.bf16.mxu0 %v10602_v1  ;;  %v3070_v1 = vcvt.s32.f32 %v3068_v45 }
 0xc5d   :  { %v3058_v55 = vpop.xlane.xlu0 %3057 }
 0xc5e   :  { %vm3059_vm0 = vcmp.eq.f32.partialorder %v10794_v11, %v3058_v55  ;;  %v3098_v11 = vand.u32 65535, %v10822_v9  ;;  %v3145_v9 = vcvt.s32.f32 %v3143_v14 }
 0xc5f   :  { %v3060_v48 = vsel %vm3059_vm0, %v3055_v62, inf }
 0xc60   :  { %3061 = vmin.xlane.f32.xlu0 %v3060_v48  ;;  %v3100_v60 = vcvt.s32.f32 %v3098_v11 }
 0xc61   :  { %v3088_v24 = vpop.xlane.xlu0 %3087 }
 0xc62   :  { %vm3089_vm2 = vcmp.eq.f32.partialorder %v10806_v20, %v3088_v24  ;;  %v3094_v13 = vcvt.f32.s32 %v3088_v24 }
 0xc63   :  { %v3090_v51 = vsel %vm3089_vm2, %v3085_v54, inf }
 0xc64   :  { %v3073_v25 = vpop.xlane.xlu1 %3072  ;;  %3091 = vmin.xlane.f32.xlu0 %v3090_v51  ;;  %v3095_v51 = vshll.u32 %v3094_v13, 16 }
 0xc65   :  { %vm3074_vm3 = vcmp.eq.f32.partialorder %v10810_v40, %v3073_v25  ;;  %v3079_v45 = vcvt.f32.s32 %v3073_v25 }
 0xc66   :  { %v3075_v26 = vsel %vm3074_vm3, %v3070_v1, inf }
 0xc67   :  { %3076 = vmin.xlane.f32.xlu1 %v3075_v26  ;;  %v3080_v24 = vshll.u32 %v3079_v45, 16 }
 0xc69   :  { %v3118_v10 = vpop.xlane.xlu0 %3117 }
 0xc6a   :  { %vm3119_vm5 = vcmp.eq.f32.partialorder %v10826_v15, %v3118_v10  ;;  %v3124_v1 = vcvt.f32.s32 %v3118_v10 }
 0xc6b   :  { %v10888_v12 = vpop.xlane.xlu1 %3102  ;;  %v3120_v20 = vsel %vm3119_vm5, %v3115_v39, inf }
 0xc6c   :  { %3121 = vmin.xlane.f32.xlu0 %v3120_v20  ;;  %vm3104_vm6 = vcmp.eq.f32.partialorder %v10835_v0, %v10888_v12  ;;  %v3125_v39 = vshll.u32 %v3124_v1, 16  ;;  %v3109_v20 = vcvt.f32.s32 %v10888_v12 }
 0xc6d   :  { %v3105_v40 = vsel %vm3104_vm6, %v3100_v60, inf  ;;  %v10893_v49 = vpop.xlane.xlu0 %3147 }
 0xc6e   :  { %3106 = vmin.xlane.f32.xlu1 %v3105_v40  ;;  %vm3149_vm7 = vcmp.eq.f32.partialorder %v10842_v2, %v10893_v49  ;;  %v3064_v2 = vcvt.f32.s32 %v3058_v55  ;;  %v3154_v60 = vcvt.f32.s32 %v10893_v49 }
 0xc6f   :  { %v10897_v27 = vpop.xlane.xlu1 %3132  ;;  %v3150_v15 = vsel %vm3149_vm7, %v3145_v9, inf }
 0xc70   :  { %3151 = vmin.xlane.f32.xlu0 %v3150_v15  ;;  %vm3134_vm1 = vcmp.eq.f32.partialorder %v10848_v28, %v10897_v27  ;;  %v3065_v62 = vshll.u32 %v3064_v2, 16  ;;  %v3155_v1 = vshll.u32 %v3154_v60, 16 }
 0xc71   :  { %v3135_v19 = vsel %vm3134_vm1, %v3130_v32, inf  ;;  %v3139_v32 = vcvt.f32.s32 %v10897_v27 }
 0xc72   :  { %3136 = vmin.xlane.f32.xlu1 %v3135_v19 }
 0xc73   :  { %v10902_v0 = vpop.xlane.xlu1 %3162 }
 0xc74   :  { %vm3164_vm8 = vcmp.eq.f32.partialorder %v10855_v16, %v10902_v0 }
 0xc75   :  { %v3165_v21 = vsel %vm3164_vm8, %v3160_v38, inf }
 0xc76   :  { %3166 = vmin.xlane.f32.xlu1 %v3165_v21 }
 0xced   :  { %v3062_v57 = vpop.xlane.xlu0 %3061 }
 0xcee   :  { %v3063_v48 = vcvt.f32.s32 %v3062_v57 }
 0xcf0   :  { %v3066_v5 = vadd.s32 %v3065_v62, %v3063_v48 }
 0xcf1   :  { %v3092_v54 = vpop.xlane.xlu0 %3091 }
 0xcf2   :  { %v3093_v28 = vcvt.f32.s32 %v3092_v54  ;;  %vm3172_vm9 = vcmp.eq.s32.totalorder %v9171_v23, %v3066_v5 }
 0xcf3   :  { %v7419_v26 = vsel %vm3172_vm9, 1.0, %v13409_v41  ;;  %v10909_v59 = vsel %vm3172_vm9, inf, %v10661_v37 }
 0xcf4   :  { %v3096_v16 = vadd.s32 %v3095_v51, %v3093_v28  ;;  %v3077_v11 = vpop.xlane.xlu1 %3076  ;;  %8336 = vmatprep.mubr.msk.f32.mxu1 %vm433_vm4, %v7419_v26  ;;  %v3438_v55 = vsel %vm433_vm4, %v10909_v59, inf }
 0xcf5   :  { %v3078_v25 = vcvt.f32.s32 %v3077_v11  ;;  %3439 = vmin.xlane.f32.xlu0 %v3438_v55 }
 0xcf6   :  { %vm3174_vm10 = vcmp.eq.s32.totalorder %v9171_v23, %v3096_v16  ;;  %v8314_v14 = vpop.f32.mrb[52].mxu0  ;;  %v3140_v16 = vshll.u32 %v3139_v32, 16 }
 0xcf7   :  { %v3081_v10 = vadd.s32 %v3080_v24, %v3078_v25  ;;  %v10918_v37 = vsel %vm3174_vm10, inf, %v10674_v53  ;;  %v10928_v40 = vadd.f32 %v10925_v47, %v8314_v14  ;;  %v2965_v9 = vpop.f32.mrb[53].mxu0  ;;  %v7421_v49 = vsel %vm3174_vm10, 1.0, %v13409_v41 }
 0xcf8   :  { %v3444_v15 = vsel %vm433_vm4, %v10918_v37, inf  ;;  %v10934_v53 = vadd.f32 %v10925_v47, %v2965_v9  ;;  %v8315_v12 = vpop.f32.mrb[54].mxu0  ;;  %v3169_v25 = vcvt.f32.s32 %v10902_v0  ;;  %v13461_v0 = vld [vmem:[#allocation4_spill] sm:$0xff] }
 0xcf9   :  { %vm3173_vm11 = vcmp.eq.s32.totalorder %v9171_v23, %v3081_v10  ;;  %3445 = vmin.xlane.f32.xlu0 %v3444_v15  ;;  %v10944_v38 = vadd.f32 %v10925_v47, %v8315_v12  ;;  %v2968_v27 = vpop.f32.mrb[55].mxu0  ;;  %v3122_v21 = vpop.xlane.xlu0 %3121 }
 0xcfa   :  { %v7420_v19 = vsel %vm3173_vm11, 1.0, %v13409_v41  ;;  %v10947_v2 = vsel %vm3173_vm11, inf, %v10702_v18  ;;  %v10952_v62 = vadd.f32 %v10925_v47, %v2968_v27  ;;  %v3123_v13 = vcvt.f32.s32 %v3122_v21 }
 0xcfb   :  { %8337 = vmatmul.mubr.msk.f32.vlgmr.msra.gmra.mrb[60].mxu1 %vm433_vm4, %v7420_v19  ;;  %v3441_v48 = vsel %vm433_vm4, %v10947_v2, inf  ;;  %v3107_v45 = vpop.xlane.xlu1 %3106  ;;  %v3110_v18 = vshll.u32 %v3109_v20, 16 }
 0xcfc   :  { %3442 = vmin.xlane.f32.xlu1 %v3441_v48  ;;  %8339 = vmatprep.mubr.msk.f32.mxu1 %vm433_vm4, %v7421_v49  ;;  %v3126_v51 = vadd.s32 %v3125_v39, %v3123_v13  ;;  %v3108_v28 = vcvt.f32.s32 %v3107_v45 }
 0xcfd   :  { %8875 = vmatpush3.bf16.msra.mxu1 %v9349_v35  ;;  %v3152_v26 = vpop.xlane.xlu0 %3151 }
 0xcfe   :  { %8877 = vmatprep.subr.bf16.mxu1 %v9347_v33  ;;  %v3111_v11 = vadd.s32 %v3110_v18, %v3108_v28  ;;  %v8318_v55 = vpop.f32.mrb[56].mxu0  ;;  %v3153_v24 = vcvt.f32.s32 %v3152_v26  ;;  %vm3176_vm12 = vcmp.eq.s32.totalorder %v9171_v23, %v3126_v51  ;;  %v3170_v18 = vshll.u32 %v3169_v25, 16 }
 0xcff   :  { %v10967_v14 = vadd.f32 %v10925_v47, %v8318_v55  ;;  %v2981_v10 = vpop.f32.mrb[57].mxu0  ;;  %v3137_v39 = vpop.xlane.xlu1 %3136  ;;  %v10970_v20 = vsel %vm3176_vm12, inf, %v10720_v43  ;;  %v7423_v60 = vsel %vm3176_vm12, 1.0, %v13409_v41 }
 0xd00   :  { %v3156_v9 = vadd.s32 %v3155_v1, %v3153_v24  ;;  %v10974_v15 = vadd.f32 %v10925_v47, %v2981_v10  ;;  %v3138_v32 = vcvt.f32.s32 %v3137_v39  ;;  %v8319_v12 = vpop.f32.mrb[58].mxu0  ;;  %vm3175_vm13 = vcmp.eq.s32.totalorder %v9171_v23, %v3111_v11  ;;  %v13459_v39 = vld [vmem:[#allocation5_spill] sm:$0xff] }
 0xd01   :  { %8879 = vmatpush3.bf16.msra.mxu1 %v9347_v33  ;;  %v10981_v49 = vadd.f32 %v10925_v47, %v8319_v12  ;;  %v2984_v43 = vpop.f32.mrb[59].mxu0  ;;  %v7422_v19 = vsel %vm3175_vm13, 1.0, %v13409_v41  ;;  %v3450_v27 = vsel %vm433_vm4, %v10970_v20, inf  ;;  %v10994_v45 = vsel %vm3175_vm13, inf, %v10746_v7 }
 0xd02   :  { %8881 = vmatprep.subr.bf16.mxu1 %v13426_v44  ;;  %v3141_v13 = vadd.s32 %v3140_v16, %v3138_v32  ;;  %v10990_v48 = vadd.f32 %v10925_v47, %v2984_v43  ;;  %8340 = vmatmul.mubr.msk.f32.gmra.mrb[62].mxu1 %vm433_vm4, %v7422_v19  ;;  %v3447_v28 = vsel %vm433_vm4, %v10994_v45, inf  ;;  %vm3178_vm14 = vcmp.eq.s32.totalorder %v9171_v23, %v3156_v9 }
 0xd03   :  { %3451 = vmin.xlane.f32.xlu0 %v3450_v27  ;;  %8342 = vmatprep.mubr.msk.f32.mxu1 %vm433_vm4, %v7423_v60  ;;  %v3167_v1 = vpop.xlane.xlu1 %3166  ;;  %v11006_v7 = vsel %vm3178_vm14, inf, %v10761_v6  ;;  %v7425_v25 = vsel %vm3178_vm14, 1.0, %v13409_v41 }
 0xd04   :  { %13456 = vst [vmem:[#allocation3_spill] sm:$0xff] %v10990_v48  ;;  %3448 = vmin.xlane.f32.xlu1 %v3447_v28  ;;  %v3168_v16 = vcvt.f32.s32 %v3167_v1  ;;  %vm3177_vm15 = vcmp.eq.s32.totalorder %v9171_v23, %v3141_v13  ;;  %13457 = vst [vmem:[#allocation7_spill] sm:$0xff] %v11006_v7  ;;  %v3456_v55 = vsel %vm433_vm4, %v11006_v7, inf }
 0xd05   :  { %8883 = vmatpush3.bf16.msra.mxu1 %v13426_v44  ;;  %v7424_v11 = vsel %vm3177_vm15, 1.0, %v13409_v41  ;;  %v11013_v24 = vsel %vm3177_vm15, inf, %v10767_v3 }
 0xd06   :  { %13458 = vst [vmem:[#allocation8_spill] sm:$0xff] %v11013_v24  ;;  %8885 = vmatprep.subr.bf16.mxu1 %v13452_v29  ;;  %v3171_v10 = vadd.s32 %v3170_v18, %v3168_v16  ;;  %8343 = vmatmul.mubr.msk.f32.gmra.mrb[64].mxu1 %vm433_vm4, %v7424_v11  ;;  %v3453_v6 = vsel %vm433_vm4, %v11013_v24, inf }
 0xd07   :  { %3457 = vmin.xlane.f32.xlu0 %v3456_v55  ;;  %8345 = vmatprep.mubr.msk.f32.mxu1 %vm433_vm4, %v7425_v25 }
 0xd08   :  { %3454 = vmin.xlane.f32.xlu1 %v3453_v6  ;;  %vm3179_vm0 = vcmp.eq.s32.totalorder %v9171_v23, %v3171_v10 }
 0xd09   :  { %8887 = vmatpush3.bf16.msra.mxu1 %v13452_v29  ;;  %v7426_v3 = vsel %vm3179_vm0, 1.0, %v13409_v41  ;;  %v11025_v60 = vsel %vm3179_vm0, inf, %v13459_v39 }
 0xd0a   :  { %13460 = vst [vmem:[#allocation9_spill] sm:$0xff] %v11025_v60  ;;  %8889 = vmatprep.subr.bf16.mxu1 %v9349_v35  ;;  %8346 = vmatmul.mubr.msk.f32.gmra.mrb[66].mxu1 %vm433_vm4, %v7426_v3  ;;  %v3459_v9 = vsel %vm433_vm4, %v11025_v60, inf }
 0xd0c   :  { %3460 = vmin.xlane.f32.xlu1 %v3459_v9 }
 0xd82   :  { %v3440_v32 = vpop.xlane.xlu0 %3439 }
 0xd83   :  { %vm3462_vm2 = vcmp.le.f32.partialorder %v10909_v59, %v3440_v32 }
 0xd84   :  { %v3470_v12 = vsel %vm3462_vm2, %v9171_v23, 64 }
 0xd85   :  { %v11034_v43 = vsel %vm433_vm4, %v3470_v12, 2147483647 }
 0xd86   :  { %v3446_v19 = vpop.xlane.xlu0 %3445  ;;  %v3480_v27 = vshra.s32 %v11034_v43, 16 }
 0xd87   :  { %vm3464_vm3 = vcmp.le.f32.partialorder %v10918_v37, %v3446_v19 }
 0xd88   :  { %v3472_v13 = vsel %vm3464_vm3, %v9171_v23, 64  ;;  %v11039_v18 = vcvt.s32.f32 %v3480_v27 }
 0xd89   :  { %v11042_v28 = vsel %vm433_vm4, %v3472_v13, 2147483647  ;;  %v3443_v1 = vpop.xlane.xlu1 %3442 }
 0xd8a   :  { %vm3463_vm5 = vcmp.le.f32.partialorder %v10947_v2, %v3443_v1  ;;  %3483 = vmin.xlane.f32.xlu0 %v11039_v18  ;;  %v3510_v16 = vshra.s32 %v11042_v28, 16 }
 0xd8b   :  { %v3471_v11 = vsel %vm3463_vm5, %v9171_v23, 64 }
 0xd8c   :  { %v11049_v55 = vsel %vm433_vm4, %v3471_v11, 2147483647  ;;  %v11051_v25 = vcvt.s32.f32 %v3510_v16 }
 0xd8d   :  { %v3495_v10 = vshra.s32 %v11049_v55, 16 }
 0xd8e   :  { %3513 = vmin.xlane.f32.xlu0 %v11051_v25 }
 0xd8f   :  { %v11055_v6 = vcvt.s32.f32 %v3495_v10 }
 0xd90   :  { %v3452_v3 = vpop.xlane.xlu0 %3451 }
 0xd91   :  { %vm3466_vm6 = vcmp.le.f32.partialorder %v10970_v20, %v3452_v3  ;;  %3498 = vmin.xlane.f32.xlu1 %v11055_v6  ;;  %v3449_v9 = vpop.xlane.xlu1 %3448 }
 0xd92   :  { %v3474_v39 = vsel %vm3466_vm6, %v9171_v23, 64  ;;  %vm3465_vm7 = vcmp.le.f32.partialorder %v10994_v45, %v3449_v9 }
 0xd93   :  { %v11061_v32 = vsel %vm433_vm4, %v3474_v39, 2147483647  ;;  %v3473_v12 = vsel %vm3465_vm7, %v9171_v23, 64 }
 0xd94   :  { %v3458_v19 = vpop.xlane.xlu0 %3457  ;;  %v3540_v27 = vshra.s32 %v11061_v32, 16  ;;  %v11067_v13 = vsel %vm433_vm4, %v3473_v12, 2147483647 }
 0xd95   :  { %vm3468_vm1 = vcmp.le.f32.partialorder %v11006_v7, %v3458_v19  ;;  %v3455_v16 = vpop.xlane.xlu1 %3454  ;;  %v3525_v10 = vshra.s32 %v11067_v13, 16 }
 0xd96   :  { %v3476_v1 = vsel %vm3468_vm1, %v9171_v23, 64  ;;  %v11071_v11 = vcvt.s32.f32 %v3540_v27  ;;  %vm3467_vm8 = vcmp.le.f32.partialorder %v11013_v24, %v3455_v16 }
 0xd97   :  { %v11075_v3 = vsel %vm433_vm4, %v3476_v1, 2147483647  ;;  %v3475_v39 = vsel %vm3467_vm8, %v9171_v23, 64  ;;  %v11080_v9 = vcvt.s32.f32 %v3525_v10 }
 0xd98   :  { %3543 = vmin.xlane.f32.xlu0 %v11071_v11  ;;  %v3570_v12 = vshra.s32 %v11075_v3, 16  ;;  %v11084_v19 = vsel %vm433_vm4, %v3475_v39, 2147483647 }
 0xd99   :  { %3528 = vmin.xlane.f32.xlu1 %v11080_v9  ;;  %v3461_v27 = vpop.xlane.xlu1 %3460  ;;  %v3555_v1 = vshra.s32 %v11084_v19, 16 }
 0xd9a   :  { %v11087_v26 = vcvt.s32.f32 %v3570_v12  ;;  %vm3469_vm9 = vcmp.le.f32.partialorder %v11025_v60, %v3461_v27 }
 0xd9b   :  { %v3477_v16 = vsel %vm3469_vm9, %v9171_v23, 64  ;;  %v11093_v10 = vcvt.s32.f32 %v3555_v1 }
 0xd9c   :  { %3573 = vmin.xlane.f32.xlu0 %v11087_v26  ;;  %v11096_v51 = vsel %vm433_vm4, %v3477_v16, 2147483647 }
 0xd9d   :  { %3558 = vmin.xlane.f32.xlu1 %v11093_v10  ;;  %v3585_v39 = vshra.s32 %v11096_v51, 16 }
 0xd9f   :  { %v11100_v21 = vcvt.s32.f32 %v3585_v39 }
 0xda1   :  { %3588 = vmin.xlane.f32.xlu1 %v11100_v21 }
 0xdce   :  { %v8338_v12 = vpop.f32.mrb[60].mxu1 }
 0xdcf   :  { %v3326_v27 = vadd.f32 %v8338_v12, %v13461_v0  ;;  %v3286_v54 = vpop.f32.mrb[61].mxu1 }
 0xdd0   :  { %v3325_v5 = vadd.f32 %v3286_v54, %v13415_v52 }
 0xdd1   :  { %v3334_v57 = vmax.f32 %v3326_v27, 0.0 }
 0xdd2   :  { %v3333_v1 = vmax.f32 %v3325_v5, 0.0 }
 0xdd4   :  { %v3341_v61 = vpack.c.bf16 %v3334_v57, %v3333_v1 }
 0xdd5   :  { %v8341_v60 = vpop.f32.mrb[62].mxu1 }
 0xdd6   :  { %8356 = vmatprep.mubr.msk.bf16.mxu0 %vm433_vm4, %v3341_v61  ;;  %v3328_v16 = vadd.f32 %v8341_v60, %v9583_v46  ;;  %v3296_v29 = vpop.f32.mrb[63].mxu1 }
 0xdd7   :  { %v3327_v39 = vadd.f32 %v3296_v29, %v9587_v42  ;;  %v11115_v29 = vld [vmem:[%s13351_s6] sm:$0xff]  }
 0xdd8   :  { %v3336_v24 = vmax.f32 %v3328_v16, 0.0  ;;  %v11130_v16 = vld [vmem:[%s13351_s6 + $0x10] sm:$0xff]  }
 0xdd9   :  { %v3335_v7 = vmax.f32 %v3327_v39, 0.0  ;;  %v8344_v48 = vpop.f32.mrb[64].mxu1  ;;  %v11138_v39 = vld [vmem:[%s13351_s6 + $0x18] sm:$0xff]  }
 0xdda   :  { %v3330_v8 = vadd.f32 %v8344_v48, %v9591_v31  ;;  %v3306_v12 = vpop.f32.mrb[65].mxu1 }
 0xddb   :  { %v3342_v0 = vpack.c.bf16 %v3336_v24, %v3335_v7  ;;  %v3329_v54 = vadd.f32 %v3306_v12, %v9595_v30  ;;  %v3479_v12 = vand.u32 65535, %v11034_v43 }
 0xddc   :  { %v3338_v27 = vmax.f32 %v3330_v8, 0.0  ;;  %v11122_v8 = vld [vmem:[%s13351_s6 + $0x8] sm:$0xff]  }
 0xddd   :  { %v3337_v5 = vmax.f32 %v3329_v54, 0.0  ;;  %v8347_v57 = vpop.f32.mrb[66].mxu1  ;;  %8357 = vmatmul.mubr.msk.bf16.vlgmr.msra.gmra.mrb[60].mxu0 %vm433_vm4, %v3342_v0 }
 0xdde   :  { %v3332_v61 = vadd.f32 %v8347_v57, %v9600_v17  ;;  %v3316_v60 = vpop.f32.mrb[67].mxu1  ;;  %8393 = vmatpush3.bf16.msra.mxu0 %v11115_v29 }
 0xddf   :  { %v3343_v48 = vpack.c.bf16 %v3338_v27, %v3337_v5  ;;  %v3331_v7 = vadd.f32 %v3316_v60, %v9604_v22  ;;  %8394 = vmatprep.subr.bf16.mxu0 %v11122_v8  ;;  %v3481_v27 = vcvt.s32.f32 %v3479_v12  ;;  %v3509_v5 = vand.u32 65535, %v11042_v28 }
 0xde0   :  { %v3340_v0 = vmax.f32 %v3332_v61, 0.0  ;;  %v3494_v61 = vand.u32 65535, %v11049_v55  ;;  %v3539_v28 = vand.u32 65535, %v11061_v32  ;;  %v3569_v55 = vand.u32 65535, %v11075_v3 }
 0xde1   :  { %v3339_v24 = vmax.f32 %v3331_v7, 0.0  ;;  %8360 = vmatprep.mubr.msk.bf16.mxu0 %vm433_vm4, %v3343_v48  ;;  %v3511_v48 = vcvt.s32.f32 %v3509_v5 }
 0xde2   :  { %8395 = vmatpush3.bf16.msra.mxu0 %v11122_v8  ;;  %v3541_v12 = vcvt.s32.f32 %v3539_v28 }
 0xde3   :  { %v3344_v1 = vpack.c.bf16 %v3340_v0, %v3339_v24  ;;  %8396 = vmatprep.subr.bf16.mxu0 %v11130_v16  ;;  %v3496_v24 = vcvt.s32.f32 %v3494_v61 }
 0xde5   :  { %8361 = vmatmul.mubr.msk.bf16.gmra.mrb[64].mxu0 %vm433_vm4, %v3344_v1 }
 0xde6   :  { %8397 = vmatpush3.bf16.msra.mxu0 %v11130_v16 }
 0xde7   :  { %8398 = vmatprep.subr.bf16.mxu0 %v11138_v39 }
 0xdea   :  { %8399 = vmatpush3.bf16.msra.mxu0 %v11138_v39 }
 0xdeb   :  { %8436 = vmatprep.subr.bf16.mxu0 %v11115_v29 }
 0xe17   :  { %v3484_v54 = vpop.xlane.xlu0 %3483 }
 0xe18   :  { %vm3485_vm10 = vcmp.eq.f32.partialorder %v11039_v18, %v3484_v54  ;;  %v3524_v18 = vand.u32 65535, %v11067_v13 }
 0xe19   :  { %v3486_v57 = vsel %vm3485_vm10, %v3481_v27, inf }
 0xe1a   :  { %3487 = vmin.xlane.f32.xlu0 %v3486_v57  ;;  %v3526_v5 = vcvt.s32.f32 %v3524_v18  ;;  %v3571_v57 = vcvt.s32.f32 %v3569_v55 }
 0xe1b   :  { %v3514_v60 = vpop.xlane.xlu0 %3513 }
 0xe1c   :  { %vm3515_vm11 = vcmp.eq.f32.partialorder %v11051_v25, %v3514_v60  ;;  %v3520_v18 = vcvt.f32.s32 %v3514_v60 }
 0xe1d   :  { %v3516_v7 = vsel %vm3515_vm11, %v3511_v48, inf  ;;  %v3584_v48 = vand.u32 65535, %v11096_v51 }
 0xe1e   :  { %v3499_v0 = vpop.xlane.xlu1 %3498  ;;  %3517 = vmin.xlane.f32.xlu0 %v3516_v7 }
 0xe1f   :  { %vm3500_vm12 = vcmp.eq.f32.partialorder %v11055_v6, %v3499_v0  ;;  %v3554_v6 = vand.u32 65535, %v11084_v19  ;;  %v3586_v7 = vcvt.s32.f32 %v3584_v48  ;;  %v3505_v55 = vcvt.f32.s32 %v3499_v0 }
 0xe20   :  { %v3501_v43 = vsel %vm3500_vm12, %v3496_v24, inf }
 0xe21   :  { %3502 = vmin.xlane.f32.xlu1 %v3501_v43  ;;  %v3556_v61 = vcvt.s32.f32 %v3554_v6  ;;  %v3506_v60 = vshll.u32 %v3505_v55, 16 }
 0xe25   :  { %v11151_v1 = vpop.xlane.xlu0 %3543 }
 0xe26   :  { %vm3545_vm13 = vcmp.eq.f32.partialorder %v11071_v11, %v11151_v1  ;;  %v11156_v25 = vpop.xlane.xlu1 %3528 }
 0xe27   :  { %v3546_v27 = vsel %vm3545_vm13, %v3541_v12, inf  ;;  %vm3530_vm14 = vcmp.eq.f32.partialorder %v11080_v9, %v11156_v25 }
 0xe28   :  { %3547 = vmin.xlane.f32.xlu0 %v3546_v27  ;;  %v3531_v32 = vsel %vm3530_vm14, %v3526_v5, inf  ;;  %v3521_v5 = vshll.u32 %v3520_v18, 16 }
 0xe29   :  { %v11161_v13 = vpop.xlane.xlu0 %3573  ;;  %3532 = vmin.xlane.f32.xlu1 %v3531_v32 }
 0xe2a   :  { %vm3575_vm15 = vcmp.eq.f32.partialorder %v11087_v26, %v11161_v13  ;;  %v11165_v3 = vpop.xlane.xlu1 %3558  ;;  %v3490_v26 = vcvt.f32.s32 %v3484_v54 }
 0xe2b   :  { %v3576_v11 = vsel %vm3575_vm15, %v3571_v57, inf  ;;  %vm3560_vm0 = vcmp.eq.f32.partialorder %v11093_v10, %v11165_v3 }
 0xe2c   :  { %3577 = vmin.xlane.f32.xlu0 %v3576_v11  ;;  %v3561_v19 = vsel %vm3560_vm0, %v3556_v61, inf  ;;  %v3491_v28 = vshll.u32 %v3490_v26, 16 }
 0xe2d   :  { %3562 = vmin.xlane.f32.xlu1 %v3561_v19  ;;  %v3535_v19 = vcvt.f32.s32 %v11156_v25 }
 0xe2e   :  { %v11170_v9 = vpop.xlane.xlu1 %3588 }
 0xe2f   :  { %vm3590_vm2 = vcmp.eq.f32.partialorder %v11100_v21, %v11170_v9 }
 0xe30   :  { %v3591_v24 = vsel %vm3590_vm2, %v3586_v7, inf }
 0xe31   :  { %3592 = vmin.xlane.f32.xlu1 %v3591_v24 }
 0xea7   :  { %v3488_v43 = vpop.xlane.xlu0 %3487 }
 0xea8   :  { %v3489_v12 = vcvt.f32.s32 %v3488_v43  ;;  %v3580_v43 = vcvt.f32.s32 %v11161_v13 }
 0xeaa   :  { %v3492_v51 = vadd.s32 %v3491_v28, %v3489_v12 }
 0xeab   :  { %v3518_v27 = vpop.xlane.xlu0 %3517 }
 0xeac   :  { %v3519_v10 = vcvt.f32.s32 %v3518_v27  ;;  %vm3598_vm3 = vcmp.eq.s32.totalorder %v9171_v23, %v3492_v51  ;;  %v3565_v27 = vcvt.f32.s32 %v11165_v3 }
 0xead   :  { %v7439_v6 = vsel %vm3598_vm3, 1.0, %v13409_v41  ;;  %v11177_v32 = vsel %vm3598_vm3, inf, %v10909_v59  ;;  %v3550_v59 = vcvt.f32.s32 %v11151_v1  ;;  %v13462_v1 = vmax.f32 %v10680_v58, %v10928_v40 }
 0xeae   :  { %v3522_v21 = vadd.s32 %v3521_v5, %v3519_v10  ;;  %v3503_v57 = vpop.xlane.xlu1 %3502  ;;  %8380 = vmatprep.mubr.msk.f32.mxu1 %vm433_vm4, %v7439_v6  ;;  %v3864_v54 = vsel %vm433_vm4, %v11177_v32, inf  ;;  %v13463_v5 = vmax.f32 %v10688_v63, %v10934_v53  ;;  %v13465_v63 = vmax.f32 %v10707_v50, %v10952_v62 }
 0xeaf   :  { %v3504_v11 = vcvt.f32.s32 %v3503_v57  ;;  %3865 = vmin.xlane.f32.xlu0 %v3864_v54  ;;  %v3595_v50 = vcvt.f32.s32 %v11170_v9 }
 0xeb0   :  { %vm3600_vm5 = vcmp.eq.s32.totalorder %v9171_v23, %v3522_v21  ;;  %v8358_v0 = vpop.f32.mrb[60].mxu0  ;;  %v3551_v21 = vshll.u32 %v3550_v59, 16 }
 0xeb1   :  { %v3507_v61 = vadd.s32 %v3506_v60, %v3504_v11  ;;  %v11184_v48 = vsel %vm3600_vm5, inf, %v10918_v37  ;;  %v3400_v7 = vadd.f32 %v10925_v47, %v8358_v0  ;;  %v3391_v24 = vpop.f32.mrb[61].mxu0  ;;  %v7441_v37 = vsel %vm3600_vm5, 1.0, %v13409_v41 }
 0xeb2   :  { %v3870_v26 = vsel %vm433_vm4, %v11184_v48, inf  ;;  %v3392_v28 = vadd.f32 %v10925_v47, %v3391_v24  ;;  %v8359_v18 = vpop.f32.mrb[62].mxu0  ;;  %v3536_v60 = vshll.u32 %v3535_v19, 16 }
 0xeb3   :  { %vm3599_vm6 = vcmp.eq.s32.totalorder %v9171_v23, %v3507_v61  ;;  %3871 = vmin.xlane.f32.xlu0 %v3870_v26  ;;  %v11198_v25 = vmax.f32 %v13462_v1, %v3400_v7  ;;  %v3403_v51 = vadd.f32 %v10925_v47, %v8359_v18  ;;  %v3394_v55 = vpop.f32.mrb[63].mxu0  ;;  %v13466_v1 = vmax.f32 %v10726_v56, %v10967_v14 }
 0xeb4   :  { %v7440_v12 = vsel %vm3599_vm6, 1.0, %v13409_v41  ;;  %v11203_v13 = vsel %vm3599_vm6, inf, %v10947_v2  ;;  %v11209_v10 = vmax.f32 %v13463_v5, %v3392_v28  ;;  %v3395_v6 = vadd.f32 %v10925_v47, %v3394_v55 }
 0xeb5   :  { %v3548_v58 = vpop.xlane.xlu0 %3547  ;;  %8381 = vmatmul.mubr.msk.f32.vlgmr.msra.gmra.mrb[68].mxu1 %vm433_vm4, %v7440_v12  ;;  %v3867_v40 = vsel %vm433_vm4, %v11203_v13, inf  ;;  %v13464_v2 = vmax.f32 %v10699_v34, %v10944_v38  ;;  %v3581_v34 = vshll.u32 %v3580_v43, 16  ;;  %v3566_v38 = vshll.u32 %v3565_v27, 16 }
 0xeb6   :  { %v3549_v3 = vcvt.f32.s32 %v3548_v58  ;;  %3868 = vmin.xlane.f32.xlu1 %v3867_v40  ;;  %8383 = vmatprep.mubr.msk.f32.mxu1 %vm433_vm4, %v7441_v37  ;;  %v11224_v53 = vmax.f32 %v13465_v63, %v3395_v6  ;;  %v3533_v54 = vpop.xlane.xlu1 %3532  ;;  %v13468_v58 = vmax.f32 %v10742_v36, %v10981_v49  ;;  %v3596_v36 = vshll.u32 %v3595_v50, 16 }
 0xeb7   :  { %v11218_v57 = vmax.f32 %v13464_v2, %v3403_v51  ;;  %8891 = vmatpush3.bf16.msra.mxu1 %v9349_v35  ;;  %v3534_v0 = vcvt.f32.s32 %v3533_v54  ;;  %v13470_v2 = vld [vmem:[#allocation3_spill] sm:$0xff] }
 0xeb8   :  { %v3552_v11 = vadd.s32 %v3551_v21, %v3549_v3  ;;  %8893 = vmatprep.subr.bf16.mxu1 %v9347_v33  ;;  %v8362_v61 = vpop.f32.mrb[64].mxu0 }
 0xeb9   :  { %v3578_v59 = vpop.xlane.xlu0 %3577  ;;  %v3537_v7 = vadd.s32 %v3536_v60, %v3534_v0  ;;  %v3416_v24 = vadd.f32 %v10925_v47, %v8362_v61  ;;  %v3407_v28 = vpop.f32.mrb[65].mxu0 }
 0xeba   :  { %v3579_v26 = vcvt.f32.s32 %v3578_v59  ;;  %vm3602_vm7 = vcmp.eq.s32.totalorder %v9171_v23, %v3552_v11  ;;  %v3408_v62 = vadd.f32 %v10925_v47, %v3407_v28  ;;  %v3563_v19 = vpop.xlane.xlu1 %3562  ;;  %v8363_v18 = vpop.f32.mrb[66].mxu0  ;;  %v13476_v28 = vld [vmem:[#allocation9_spill] sm:$0xff] }
 0xebb   :  { %v11233_v37 = vsel %vm3602_vm7, inf, %v10970_v20  ;;  %v7443_v43 = vsel %vm3602_vm7, 1.0, %v13409_v41  ;;  %8895 = vmatpush3.bf16.msra.mxu1 %v9347_v33  ;;  %v11240_v12 = vmax.f32 %v13466_v1, %v3416_v24  ;;  %v3564_v55 = vcvt.f32.s32 %v3563_v19  ;;  %v3410_v27 = vpop.f32.mrb[67].mxu0  ;;  %v13475_v24 = vld [vmem:[#allocation2_spill] sm:$0xff] }
 0xebc   :  { %v3582_v51 = vadd.s32 %v3581_v34, %v3579_v26  ;;  %v3419_v9 = vadd.f32 %v10925_v47, %v8363_v18  ;;  %8897 = vmatprep.subr.bf16.mxu1 %v13426_v44  ;;  %v13467_v20 = vmax.f32 %v10732_v4, %v10974_v15  ;;  %v3411_v6 = vadd.f32 %v10925_v47, %v3410_v27  ;;  %v13469_v15 = vld [vmem:[#allocation6_spill] sm:$0xff]  ;;  %v13474_v34 = vld [vmem:[#allocation8_spill] sm:$0xff] }
 0xebd   :  { %vm3601_vm1 = vcmp.eq.s32.totalorder %v9171_v23, %v3537_v7  ;;  %v3876_v56 = vsel %vm433_vm4, %v11233_v37, inf  ;;  %v3567_v14 = vadd.s32 %v3566_v38, %v3564_v55  ;;  %v13471_v47 = vmax.f32 %v13469_v15, %v13470_v2 }
 0xebe   :  { %v11247_v5 = vmax.f32 %v13467_v20, %v3408_v62  ;;  %v11256_v40 = vmax.f32 %v13468_v58, %v3419_v9  ;;  %v7442_v21 = vsel %vm3601_vm1, 1.0, %v13409_v41  ;;  %3877 = vmin.xlane.f32.xlu0 %v3876_v56  ;;  %v11260_v4 = vsel %vm3601_vm1, inf, %v10994_v45  ;;  %v3593_v54 = vpop.xlane.xlu1 %3592  ;;  %v13473_v45 = vld [vmem:[#allocation7_spill] sm:$0xff] }
 0xebf   :  { %v11265_v3 = vmax.f32 %v13471_v47, %v3411_v6  ;;  %8384 = vmatmul.mubr.msk.f32.gmra.mrb[70].mxu1 %vm433_vm4, %v7442_v21  ;;  %v3873_v63 = vsel %vm433_vm4, %v11260_v4, inf  ;;  %vm3604_vm8 = vcmp.eq.s32.totalorder %v9171_v23, %v3582_v51  ;;  %v3594_v49 = vcvt.f32.s32 %v3593_v54 }
 0xec0   :  { %3874 = vmin.xlane.f32.xlu1 %v3873_v63  ;;  %8386 = vmatprep.mubr.msk.f32.mxu1 %vm433_vm4, %v7443_v43  ;;  %vm3603_vm9 = vcmp.eq.s32.totalorder %v9171_v23, %v3567_v14  ;;  %v11274_v60 = vsel %vm3604_vm8, inf, %v13473_v45  ;;  %v7445_v61 = vsel %vm3604_vm8, 1.0, %v13409_v41 }
 0xec1   :  { %13472 = vst [vmem:[#allocation5_spill] sm:$0xff] %v11265_v3  ;;  %v7444_v11 = vsel %vm3603_vm9, 1.0, %v13409_v41  ;;  %v3882_v0 = vsel %vm433_vm4, %v11274_v60, inf  ;;  %v11280_v38 = vsel %vm3603_vm9, inf, %v13474_v34  ;;  %8899 = vmatpush3.bf16.msra.mxu1 %v13426_v44  ;;  %v3597_v59 = vadd.s32 %v3596_v36, %v3594_v49 }
 0xec2   :  { %3883 = vmin.xlane.f32.xlu0 %v3882_v0  ;;  %v3879_v7 = vsel %vm433_vm4, %v11280_v38, inf  ;;  %8901 = vmatprep.subr.bf16.mxu1 %v13475_v24 }
 0xec3   :  { %8387 = vmatmul.mubr.msk.f32.gmra.mrb[72].mxu1 %vm433_vm4, %v7444_v11  ;;  %vm3605_vm10 = vcmp.eq.s32.totalorder %v9171_v23, %v3597_v59 }
 0xec4   :  { %3880 = vmin.xlane.f32.xlu1 %v3879_v7  ;;  %8389 = vmatprep.mubr.msk.f32.mxu1 %vm433_vm4, %v7445_v61  ;;  %v7446_v26 = vsel %vm3605_vm10, 1.0, %v13409_v41  ;;  %v11292_v50 = vsel %vm3605_vm10, inf, %v13476_v28 }
 0xec5   :  { %13477 = vst [vmem:[#allocation6_spill] sm:$0xff] %v11292_v50  ;;  %8903 = vmatpush3.bf16.msra.mxu1 %v13475_v24  ;;  %v3885_v62 = vsel %vm433_vm4, %v11292_v50, inf }
 0xec6   :  { %8905 = vmatprep.subr.bf16.mxu1 %v9349_v35 }
 0xec7   :  { %8390 = vmatmul.mubr.msk.f32.gmra.mrb[74].mxu1 %vm433_vm4, %v7446_v26 }
 0xec8   :  { %3886 = vmin.xlane.f32.xlu1 %v3885_v62 }
 0xf3c   :  { %v3866_v19 = vpop.xlane.xlu0 %3865 }
 0xf3d   :  { %vm3888_vm11 = vcmp.le.f32.partialorder %v11177_v32, %v3866_v19 }
 0xf3e   :  { %v3896_v18 = vsel %vm3888_vm11, %v9171_v23, 64 }
 0xf3f   :  { %v11302_v43 = vsel %vm433_vm4, %v3896_v18, 2147483647 }
 0xf40   :  { %v3872_v1 = vpop.xlane.xlu0 %3871  ;;  %v3906_v51 = vshra.s32 %v11302_v43, 16 }
 0xf41   :  { %vm3890_vm12 = vcmp.le.f32.partialorder %v11184_v48, %v3872_v1 }
 0xf42   :  { %v3898_v55 = vsel %vm3890_vm12, %v9171_v23, 64  ;;  %v11307_v9 = vcvt.s32.f32 %v3906_v51 }
 0xf43   :  { %v11310_v27 = vsel %vm433_vm4, %v3898_v55, 2147483647  ;;  %v3869_v20 = vpop.xlane.xlu1 %3868 }
 0xf44   :  { %vm3889_vm13 = vcmp.le.f32.partialorder %v11203_v13, %v3869_v20  ;;  %3909 = vmin.xlane.f32.xlu0 %v11307_v9  ;;  %v3936_v6 = vshra.s32 %v11310_v27, 16 }
 0xf45   :  { %v3897_v56 = vsel %vm3889_vm13, %v9171_v23, 64 }
 0xf46   :  { %v11317_v14 = vsel %vm433_vm4, %v3897_v56, 2147483647  ;;  %v11319_v58 = vcvt.s32.f32 %v3936_v6 }
 0xf47   :  { %v3921_v21 = vshra.s32 %v11317_v14, 16 }
 0xf48   :  { %3939 = vmin.xlane.f32.xlu0 %v11319_v58 }
 0xf49   :  { %v11323_v15 = vcvt.s32.f32 %v3921_v21 }
 0xf4b   :  { %v3878_v2 = vpop.xlane.xlu0 %3877  ;;  %3924 = vmin.xlane.f32.xlu1 %v11323_v15 }
 0xf4c   :  { %vm3892_vm14 = vcmp.le.f32.partialorder %v11233_v37, %v3878_v2 }
 0xf4d   :  { %v3900_v47 = vsel %vm3892_vm14, %v9171_v23, 64  ;;  %v3875_v63 = vpop.xlane.xlu1 %3874 }
 0xf4e   :  { %v11329_v54 = vsel %vm433_vm4, %v3900_v47, 2147483647  ;;  %vm3891_vm15 = vcmp.le.f32.partialorder %v11260_v4, %v3875_v63  ;;  %v13478_v47 = vld [vmem:[#allocation4_spill] sm:$0xff] }
 0xf4f   :  { %v3899_v36 = vsel %vm3891_vm15, %v9171_v23, 64  ;;  %v3884_v49 = vpop.xlane.xlu0 %3883  ;;  %v3966_v45 = vshra.s32 %v11329_v54, 16 }
 0xf50   :  { %v11335_v11 = vsel %vm433_vm4, %v3899_v36, 2147483647  ;;  %vm3894_vm0 = vcmp.le.f32.partialorder %v11274_v60, %v3884_v49 }
 0xf51   :  { %v3902_v0 = vsel %vm3894_vm0, %v9171_v23, 64  ;;  %v3881_v34 = vpop.xlane.xlu1 %3880  ;;  %v11339_v61 = vcvt.s32.f32 %v3966_v45  ;;  %v3951_v59 = vshra.s32 %v11335_v11, 16 }
 0xf52   :  { %v11343_v7 = vsel %vm433_vm4, %v3902_v0, 2147483647  ;;  %vm3893_vm2 = vcmp.le.f32.partialorder %v11280_v38, %v3881_v34 }
 0xf53   :  { %v3901_v26 = vsel %vm3893_vm2, %v9171_v23, 64  ;;  %3969 = vmin.xlane.f32.xlu0 %v11339_v61  ;;  %v11348_v28 = vcvt.s32.f32 %v3951_v59  ;;  %v3996_v62 = vshra.s32 %v11343_v7, 16 }
 0xf54   :  { %v11352_v19 = vsel %vm433_vm4, %v3901_v26, 2147483647 }
 0xf55   :  { %3954 = vmin.xlane.f32.xlu1 %v11348_v28  ;;  %v3887_v18 = vpop.xlane.xlu1 %3886  ;;  %v11355_v1 = vcvt.s32.f32 %v3996_v62  ;;  %v3981_v51 = vshra.s32 %v11352_v19, 16 }
 0xf56   :  { %vm3895_vm3 = vcmp.le.f32.partialorder %v11292_v50, %v3887_v18 }
 0xf57   :  { %v3903_v55 = vsel %vm3895_vm3, %v9171_v23, 64  ;;  %3999 = vmin.xlane.f32.xlu0 %v11355_v1  ;;  %v11361_v20 = vcvt.s32.f32 %v3981_v51 }
 0xf58   :  { %v11364_v6 = vsel %vm433_vm4, %v3903_v55, 2147483647 }
 0xf59   :  { %3984 = vmin.xlane.f32.xlu1 %v11361_v20  ;;  %v4011_v56 = vshra.s32 %v11364_v6, 16 }
 0xf5b   :  { %v11368_v21 = vcvt.s32.f32 %v4011_v56 }
 0xf5d   :  { %4014 = vmin.xlane.f32.xlu1 %v11368_v21 }
 0xf88   :  { %v8382_v2 = vpop.f32.mrb[68].mxu1 }
 0xf89   :  { %v3752_v63 = vadd.f32 %v8382_v2, %v13478_v47  ;;  %v3712_v36 = vpop.f32.mrb[69].mxu1 }
 0xf8a   :  { %v3751_v49 = vadd.f32 %v3712_v36, %v13415_v52 }
 0xf8b   :  { %v3760_v45 = vmax.f32 %v3752_v63, 0.0 }
 0xf8c   :  { %v3759_v0 = vmax.f32 %v3751_v49, 0.0 }
 0xf8e   :  { %v3767_v34 = vpack.c.bf16 %v3760_v45, %v3759_v0 }
 0xf90   :  { %8400 = vmatprep.mubr.msk.bf16.mxu0 %vm433_vm4, %v3767_v34 }
 0xf92   :  { %v8385_v59 = vpop.f32.mrb[70].mxu1 }
 0xf93   :  { %v3754_v26 = vadd.f32 %v8385_v59, %v9583_v46  ;;  %v3722_v62 = vpop.f32.mrb[71].mxu1 }
 0xf94   :  { %v3753_v18 = vadd.f32 %v3722_v62, %v9587_v42 }
 0xf95   :  { %v3762_v51 = vmax.f32 %v3754_v26, 0.0 }
 0xf96   :  { %v3761_v55 = vmax.f32 %v3753_v18, 0.0  ;;  %v8388_v56 = vpop.f32.mrb[72].mxu1 }
 0xf97   :  { %v3756_v50 = vadd.f32 %v8388_v56, %v9591_v31  ;;  %v3732_v2 = vpop.f32.mrb[73].mxu1  ;;  %v3935_v56 = vand.u32 65535, %v11310_v27  ;;  %v3965_v27 = vand.u32 65535, %v11329_v54 }
 0xf98   :  { %v3768_v47 = vpack.c.bf16 %v3762_v51, %v3761_v55  ;;  %v3755_v36 = vadd.f32 %v3732_v2, %v9595_v30  ;;  %v3920_v2 = vand.u32 65535, %v11317_v14  ;;  %v3995_v14 = vand.u32 65535, %v11343_v7 }
 0xf99   :  { %v3764_v63 = vmax.f32 %v3756_v50, 0.0 }
 0xf9a   :  { %v3763_v49 = vmax.f32 %v3755_v36, 0.0  ;;  %v8391_v45 = vpop.f32.mrb[74].mxu1  ;;  %8401 = vmatmul.mubr.msk.bf16.vlgmr.msra.gmra.mrb[68].mxu0 %vm433_vm4, %v3768_v47  ;;  %v3905_v47 = vand.u32 65535, %v11302_v43 }
 0xf9b   :  { %v3758_v0 = vadd.f32 %v8391_v45, %v9600_v17  ;;  %v3742_v34 = vpop.f32.mrb[75].mxu1  ;;  %8437 = vmatpush3.bf16.msra.mxu0 %v11115_v29  ;;  %v3967_v45 = vcvt.s32.f32 %v3965_v27 }
 0xf9c   :  { %v3769_v59 = vpack.c.bf16 %v3764_v63, %v3763_v49  ;;  %v3757_v26 = vadd.f32 %v3742_v34, %v9604_v22  ;;  %8438 = vmatprep.subr.bf16.mxu0 %v11122_v8  ;;  %v3907_v55 = vcvt.s32.f32 %v3905_v47 }
 0xf9d   :  { %v3766_v62 = vmax.f32 %v3758_v0, 0.0 }
 0xf9e   :  { %v3765_v18 = vmax.f32 %v3757_v26, 0.0  ;;  %8404 = vmatprep.mubr.msk.bf16.mxu0 %vm433_vm4, %v3769_v59  ;;  %v3997_v59 = vcvt.s32.f32 %v3995_v14 }
 0xf9f   :  { %8439 = vmatpush3.bf16.msra.mxu0 %v11122_v8 }
 0xfa0   :  { %v3770_v50 = vpack.c.bf16 %v3766_v62, %v3765_v18  ;;  %8440 = vmatprep.subr.bf16.mxu0 %v11130_v16  ;;  %v4010_v62 = vand.u32 65535, %v11364_v6 }
 0xfa2   :  { %8405 = vmatmul.mubr.msk.bf16.gmra.mrb[72].mxu0 %vm433_vm4, %v3770_v50  ;;  %v4012_v18 = vcvt.s32.f32 %v4010_v62 }
 0xfa3   :  { %8441 = vmatpush3.bf16.msra.mxu0 %v11130_v16  ;;  %v3937_v16 = vcvt.s32.f32 %v3935_v56 }
 0xfa4   :  { %8442 = vmatprep.subr.bf16.mxu0 %v11138_v39 }
 0xfa7   :  { %8443 = vmatpush3.bf16.msra.mxu0 %v11138_v39 }
 0xfa8   :  { %8480 = vmatprep.subr.bf16.mxu0 %v11115_v29  ;;  %v3922_v29 = vcvt.s32.f32 %v3920_v2 }
 0xfd1   :  { %v3910_v51 = vpop.xlane.xlu0 %3909 }
 0xfd2   :  { %vm3911_vm5 = vcmp.eq.f32.partialorder %v11307_v9, %v3910_v51  ;;  %v3950_v9 = vand.u32 65535, %v11335_v11 }
 0xfd3   :  { %v3912_v8 = vsel %vm3911_vm5, %v3907_v55, inf }
 0xfd4   :  { %3913 = vmin.xlane.f32.xlu0 %v3912_v8  ;;  %v3952_v34 = vcvt.s32.f32 %v3950_v9 }
 0xfd5   :  { %v3940_v36 = vpop.xlane.xlu0 %3939 }
 0xfd6   :  { %vm3941_vm6 = vcmp.eq.f32.partialorder %v11319_v58, %v3940_v36  ;;  %v3946_v56 = vcvt.f32.s32 %v3940_v36 }
 0xfd7   :  { %v3942_v63 = vsel %vm3941_vm6, %v3937_v16, inf }
 0xfd8   :  { %v3925_v39 = vpop.xlane.xlu1 %3924  ;;  %3943 = vmin.xlane.f32.xlu0 %v3942_v63  ;;  %v3947_v63 = vshll.u32 %v3946_v56, 16 }
 0xfd9   :  { %vm3926_vm7 = vcmp.eq.f32.partialorder %v11323_v15, %v3925_v39  ;;  %v3980_v15 = vand.u32 65535, %v11352_v19  ;;  %v3931_v2 = vcvt.f32.s32 %v3925_v39 }
 0xfda   :  { %v3927_v43 = vsel %vm3926_vm7, %v3922_v29, inf }
 0xfdb   :  { %3928 = vmin.xlane.f32.xlu1 %v3927_v43  ;;  %v3982_v26 = vcvt.s32.f32 %v3980_v15  ;;  %v3932_v36 = vshll.u32 %v3931_v2, 16  ;;  %v11442_v15 = vld [vmem:[%s13353_s7] ss:$0 sm:$0xff] }
 0xfe0   :  { %v11399_v49 = vpop.xlane.xlu0 %3969 }
 0xfe1   :  { %vm3971_vm1 = vcmp.eq.f32.partialorder %v11339_v61, %v11399_v49  ;;  %v3976_v14 = vcvt.f32.s32 %v11399_v49 }
 0xfe2   :  { %v11404_v58 = vpop.xlane.xlu1 %3954  ;;  %v3972_v0 = vsel %vm3971_vm1, %v3967_v45, inf }
 0xfe3   :  { %3973 = vmin.xlane.f32.xlu0 %v3972_v0  ;;  %vm3956_vm8 = vcmp.eq.f32.partialorder %v11348_v28, %v11404_v58 }
 0xfe4   :  { %v3957_v54 = vsel %vm3956_vm8, %v3952_v34, inf  ;;  %v11409_v11 = vpop.xlane.xlu0 %3999 }
 0xfe5   :  { %3958 = vmin.xlane.f32.xlu1 %v3957_v54  ;;  %vm4001_vm9 = vcmp.eq.f32.partialorder %v11355_v1, %v11409_v11  ;;  %v3916_v1 = vcvt.f32.s32 %v3910_v51 }
 0xfe6   :  { %v11413_v7 = vpop.xlane.xlu1 %3984  ;;  %v4002_v61 = vsel %vm4001_vm9, %v3997_v59, inf }
 0xfe7   :  { %4003 = vmin.xlane.f32.xlu0 %v4002_v61  ;;  %vm3986_vm10 = vcmp.eq.f32.partialorder %v11361_v20, %v11413_v7  ;;  %v3917_v55 = vshll.u32 %v3916_v1, 16  ;;  %v3961_v61 = vcvt.f32.s32 %v11404_v58 }
 0xfe8   :  { %v3987_v19 = vsel %vm3986_vm10, %v3982_v26, inf }
 0xfe9   :  { %3988 = vmin.xlane.f32.xlu1 %v3987_v19 }
 0xfea   :  { %v11418_v28 = vpop.xlane.xlu1 %4014 }
 0xfeb   :  { %vm4016_vm11 = vcmp.eq.f32.partialorder %v11368_v21, %v11418_v28 }
 0xfec   :  { %v4017_v50 = vsel %vm4016_vm11, %v4012_v18, inf  ;;  %v3977_v18 = vshll.u32 %v3976_v14, 16 }
 0xfed   :  { %4018 = vmin.xlane.f32.xlu1 %v4017_v50  ;;  %v4006_v50 = vcvt.f32.s32 %v11409_v11 }
0x1061   :  { %v3914_v47 = vpop.xlane.xlu0 %3913 }
0x1062   :  { %v3915_v8 = vcvt.f32.s32 %v3914_v47 }
0x1064   :  { %v3918_v6 = vadd.s32 %v3917_v55, %v3915_v8  ;;  %v3991_v55 = vcvt.f32.s32 %v11413_v7 }
0x1065   :  { %v3944_v16 = vpop.xlane.xlu0 %3943 }
0x1066   :  { %v3945_v20 = vcvt.f32.s32 %v3944_v16  ;;  %vm4024_vm12 = vcmp.eq.s32.totalorder %v9171_v23, %v3918_v6  ;;  %v3962_v16 = vshll.u32 %v3961_v61, 16 }
0x1067   :  { %v7459_v29 = vsel %vm4024_vm12, 1.0, %v13409_v41  ;;  %v11425_v43 = vsel %vm4024_vm12, inf, %v11177_v32 }
0x1068   :  { %v3948_v21 = vadd.s32 %v3947_v63, %v3945_v20  ;;  %v3929_v27 = vpop.xlane.xlu1 %3928  ;;  %8424 = vmatprep.mubr.msk.f32.mxu1 %vm433_vm4, %v7459_v29  ;;  %v4290_v51 = vsel %vm433_vm4, %v11425_v43, inf  ;;  %v4007_v29 = vshll.u32 %v4006_v50, 16 }
0x1069   :  { %v3930_v9 = vcvt.f32.s32 %v3929_v27  ;;  %4291 = vmin.xlane.f32.xlu0 %v4290_v51  ;;  %v3992_v27 = vshll.u32 %v3991_v55, 16 }
0x106a   :  { %vm4026_vm13 = vcmp.eq.s32.totalorder %v9171_v23, %v3948_v21 }
0x106b   :  { %v3933_v39 = vadd.s32 %v3932_v36, %v3930_v9  ;;  %v11432_v45 = vsel %vm4026_vm13, inf, %v11184_v48  ;;  %v7461_v34 = vsel %vm4026_vm13, 1.0, %v13409_v41 }
0x106c   :  { %v4296_v32 = vsel %vm433_vm4, %v11432_v45, inf }
0x106d   :  { %v8402_v0 = vpop.f32.mrb[68].mxu0  ;;  %vm4025_vm14 = vcmp.eq.s32.totalorder %v9171_v23, %v3933_v39  ;;  %4297 = vmin.xlane.f32.xlu0 %v4296_v32  ;;  %v4021_v39 = vcvt.f32.s32 %v11418_v28  ;;  %v13484_v28 = vld [vmem:[#allocation4_spill] sm:$0xff] }
0x106e   :  { %v11445_v54 = vadd.f32 %v11442_v15, %v8402_v0  ;;  %v3817_v48 = vpop.f32.mrb[69].mxu0  ;;  %v7460_v49 = vsel %vm4025_vm14, 1.0, %v13409_v41  ;;  %v11449_v59 = vsel %vm4025_vm14, inf, %v11203_v13 }
0x106f   :  { %v11453_v26 = vadd.f32 %v11442_v15, %v3817_v48  ;;  %v8403_v62 = vpop.f32.mrb[70].mxu0  ;;  %8425 = vmatmul.mubr.msk.f32.vlgmr.msra.gmra.mrb[76].mxu1 %vm433_vm4, %v7460_v49  ;;  %v4293_v19 = vsel %vm433_vm4, %v11449_v59, inf }
0x1070   :  { %v11462_v13 = vadd.f32 %v11442_v15, %v8403_v62  ;;  %v3820_v47 = vpop.f32.mrb[71].mxu0  ;;  %v3974_v58 = vpop.xlane.xlu0 %3973  ;;  %4294 = vmin.xlane.f32.xlu1 %v4293_v19  ;;  %8427 = vmatprep.mubr.msk.f32.mxu1 %vm433_vm4, %v7461_v34 }
0x1071   :  { %v11469_v8 = vadd.f32 %v11442_v15, %v3820_v47  ;;  %v3975_v11 = vcvt.f32.s32 %v3974_v58  ;;  %8907 = vmatpush3.bf16.msra.mxu1 %v9349_v35 }
0x1072   :  { %v3959_v2 = vpop.xlane.xlu1 %3958  ;;  %8909 = vmatprep.subr.bf16.mxu1 %v9347_v33 }
0x1073   :  { %v3978_v7 = vadd.s32 %v3977_v18, %v3975_v11  ;;  %v3960_v20 = vcvt.f32.s32 %v3959_v2 }
0x1074   :  { %v4004_v21 = vpop.xlane.xlu0 %4003 }
0x1075   :  { %v3963_v51 = vadd.s32 %v3962_v16, %v3960_v20  ;;  %v8406_v36 = vpop.f32.mrb[72].mxu0  ;;  %v4005_v9 = vcvt.f32.s32 %v4004_v21  ;;  %vm4028_vm15 = vcmp.eq.s32.totalorder %v9171_v23, %v3978_v7  ;;  %8911 = vmatpush3.bf16.msra.mxu1 %v9347_v33  ;;  %v4022_v16 = vshll.u32 %v4021_v39, 16 }
0x1076   :  { %v11481_v14 = vadd.f32 %v11442_v15, %v8406_v36  ;;  %v3833_v32 = vpop.f32.mrb[73].mxu0  ;;  %v3989_v0 = vpop.xlane.xlu1 %3988  ;;  %v11484_v34 = vsel %vm4028_vm15, inf, %v11233_v37  ;;  %v7463_v48 = vsel %vm4028_vm15, 1.0, %v13409_v41  ;;  %8913 = vmatprep.subr.bf16.mxu1 %v13426_v44 }
0x1077   :  { %v4008_v49 = vadd.s32 %v4007_v29, %v4005_v9  ;;  %v11489_v61 = vadd.f32 %v11442_v15, %v3833_v32  ;;  %v3990_v62 = vcvt.f32.s32 %v3989_v0  ;;  %v8407_v19 = vpop.f32.mrb[74].mxu0  ;;  %vm4027_vm0 = vcmp.eq.s32.totalorder %v9171_v23, %v3963_v51  ;;  %v13482_v0 = vld [vmem:[#allocation6_spill] sm:$0xff] }
0x1078   :  { %v11495_v18 = vadd.f32 %v11442_v15, %v8407_v19  ;;  %v3836_v37 = vpop.f32.mrb[75].mxu0  ;;  %v7462_v50 = vsel %vm4027_vm0, 1.0, %v13409_v41  ;;  %v4302_v47 = vsel %vm433_vm4, %v11484_v34, inf  ;;  %v11507_v2 = vsel %vm4027_vm0, inf, %v11260_v4 }
0x1079   :  { %v3993_v55 = vadd.s32 %v3992_v27, %v3990_v62  ;;  %v11503_v11 = vadd.f32 %v11442_v15, %v3836_v37  ;;  %8428 = vmatmul.mubr.msk.f32.gmra.mrb[78].mxu1 %vm433_vm4, %v7462_v50  ;;  %4303 = vmin.xlane.f32.xlu0 %v4302_v47  ;;  %v4299_v20 = vsel %vm433_vm4, %v11507_v2, inf  ;;  %vm4030_vm2 = vcmp.eq.s32.totalorder %v9171_v23, %v4008_v49 }
0x107a   :  { %8430 = vmatprep.mubr.msk.f32.mxu1 %vm433_vm4, %v7463_v48  ;;  %v4019_v29 = vpop.xlane.xlu1 %4018  ;;  %8915 = vmatpush3.bf16.msra.mxu1 %v13426_v44  ;;  %v11520_v27 = vsel %vm4030_vm2, inf, %v11274_v60  ;;  %v7465_v39 = vsel %vm4030_vm2, 1.0, %v13409_v41 }
0x107b   :  { %13479 = vst [vmem:[#allocation3_spill] sm:$0xff] %v11503_v11  ;;  %4300 = vmin.xlane.f32.xlu1 %v4299_v20  ;;  %v4020_v4 = vcvt.f32.s32 %v4019_v29  ;;  %vm4029_vm3 = vcmp.eq.s32.totalorder %v9171_v23, %v3993_v55  ;;  %13480 = vst [vmem:[#allocation7_spill] sm:$0xff] %v11520_v27  ;;  %8917 = vmatprep.subr.bf16.mxu1 %v13475_v24  ;;  %v4308_v36 = vsel %vm433_vm4, %v11520_v27, inf }
0x107c   :  { %v7464_v51 = vsel %vm4029_vm3, 1.0, %v13409_v41  ;;  %v11527_v9 = vsel %vm4029_vm3, inf, %v11280_v38 }
0x107d   :  { %13481 = vst [vmem:[#allocation8_spill] sm:$0xff] %v11527_v9  ;;  %v4023_v32 = vadd.s32 %v4022_v16, %v4020_v4  ;;  %8431 = vmatmul.mubr.msk.f32.gmra.mrb[80].mxu1 %vm433_vm4, %v7464_v51  ;;  %4309 = vmin.xlane.f32.xlu0 %v4308_v36  ;;  %v4305_v60 = vsel %vm433_vm4, %v11527_v9, inf }
0x107e   :  { %8433 = vmatprep.mubr.msk.f32.mxu1 %vm433_vm4, %v7465_v39  ;;  %8919 = vmatpush3.bf16.msra.mxu1 %v13475_v24 }
0x107f   :  { %4306 = vmin.xlane.f32.xlu1 %v4305_v60  ;;  %vm4031_vm5 = vcmp.eq.s32.totalorder %v9171_v23, %v4023_v32  ;;  %8921 = vmatprep.subr.bf16.mxu1 %v9349_v35 }
0x1080   :  { %v7466_v38 = vsel %vm4031_vm5, 1.0, %v13409_v41  ;;  %v11539_v48 = vsel %vm4031_vm5, inf, %v13482_v0 }
0x1081   :  { %13483 = vst [vmem:[#allocation9_spill] sm:$0xff] %v11539_v48  ;;  %8434 = vmatmul.mubr.msk.f32.gmra.mrb[82].mxu1 %vm433_vm4, %v7466_v38  ;;  %v4311_v49 = vsel %vm433_vm4, %v11539_v48, inf }
0x1083   :  { %4312 = vmin.xlane.f32.xlu1 %v4311_v49 }
0x10f6   :  { %v4292_v62 = vpop.xlane.xlu0 %4291 }
0x10f7   :  { %vm4314_vm6 = vcmp.le.f32.partialorder %v11425_v43, %v4292_v62 }
0x10f8   :  { %v4322_v19 = vsel %vm4314_vm6, %v9171_v23, 64 }
0x10f9   :  { %v11547_v37 = vsel %vm433_vm4, %v4322_v19, 2147483647 }
0x10fa   :  { %v4298_v50 = vpop.xlane.xlu0 %4297  ;;  %v4332_v47 = vshra.s32 %v11547_v37, 16 }
0x10fb   :  { %vm4316_vm7 = vcmp.le.f32.partialorder %v11432_v45, %v4298_v50 }
0x10fc   :  { %v4324_v55 = vsel %vm4316_vm7, %v9171_v23, 64  ;;  %v11552_v16 = vcvt.s32.f32 %v4332_v47 }
0x10fd   :  { %v11555_v20 = vsel %vm433_vm4, %v4324_v55, 2147483647  ;;  %v4295_v29 = vpop.xlane.xlu1 %4294 }
0x10fe   :  { %vm4315_vm1 = vcmp.le.f32.partialorder %v11449_v59, %v4295_v29  ;;  %4335 = vmin.xlane.f32.xlu0 %v11552_v16  ;;  %v4362_v4 = vshra.s32 %v11555_v20, 16 }
0x10ff   :  { %v4323_v51 = vsel %vm4315_vm1, %v9171_v23, 64 }
0x1100   :  { %v11562_v36 = vsel %vm433_vm4, %v4323_v51, 2147483647  ;;  %v11564_v39 = vcvt.s32.f32 %v4362_v4 }
0x1101   :  { %v4347_v32 = vshra.s32 %v11562_v36, 16 }
0x1102   :  { %4365 = vmin.xlane.f32.xlu0 %v11564_v39 }
0x1103   :  { %v11568_v60 = vcvt.s32.f32 %v4347_v32 }
0x1105   :  { %4350 = vmin.xlane.f32.xlu1 %v11568_v60 }
0x1106   :  { %v4304_v38 = vpop.xlane.xlu0 %4303 }
0x1107   :  { %vm4318_vm8 = vcmp.le.f32.partialorder %v11484_v34, %v4304_v38 }
0x1108   :  { %v4326_v0 = vsel %vm4318_vm8, %v9171_v23, 64  ;;  %v4301_v49 = vpop.xlane.xlu1 %4300 }
0x1109   :  { %v11574_v62 = vsel %vm433_vm4, %v4326_v0, 2147483647  ;;  %vm4317_vm9 = vcmp.le.f32.partialorder %v11507_v2, %v4301_v49 }
0x110a   :  { %v4325_v19 = vsel %vm4317_vm9, %v9171_v23, 64  ;;  %v4310_v50 = vpop.xlane.xlu0 %4309  ;;  %v4392_v47 = vshra.s32 %v11574_v62, 16 }
0x110b   :  { %v11580_v55 = vsel %vm433_vm4, %v4325_v19, 2147483647  ;;  %vm4320_vm10 = vcmp.le.f32.partialorder %v11520_v27, %v4310_v50 }
0x110c   :  { %v4328_v29 = vsel %vm4320_vm10, %v9171_v23, 64  ;;  %v4307_v4 = vpop.xlane.xlu1 %4306  ;;  %v11584_v51 = vcvt.s32.f32 %v4392_v47  ;;  %v4377_v32 = vshra.s32 %v11580_v55, 16 }
0x110d   :  { %v11588_v38 = vsel %vm433_vm4, %v4328_v29, 2147483647  ;;  %vm4319_vm11 = vcmp.le.f32.partialorder %v11527_v9, %v4307_v4 }
0x110e   :  { %v4327_v0 = vsel %vm4319_vm11, %v9171_v23, 64  ;;  %4395 = vmin.xlane.f32.xlu0 %v11584_v51  ;;  %v11593_v49 = vcvt.s32.f32 %v4377_v32  ;;  %v4422_v19 = vshra.s32 %v11588_v38, 16 }
0x110f   :  { %v11597_v50 = vsel %vm433_vm4, %v4327_v0, 2147483647 }
0x1110   :  { %4380 = vmin.xlane.f32.xlu1 %v11593_v49  ;;  %v4313_v47 = vpop.xlane.xlu1 %4312  ;;  %v11600_v21 = vcvt.s32.f32 %v4422_v19  ;;  %v4407_v29 = vshra.s32 %v11597_v50, 16 }
0x1111   :  { %vm4321_vm12 = vcmp.le.f32.partialorder %v11539_v48, %v4313_v47 }
0x1112   :  { %v4329_v4 = vsel %vm4321_vm12, %v9171_v23, 64  ;;  %4425 = vmin.xlane.f32.xlu0 %v11600_v21  ;;  %v11606_v32 = vcvt.s32.f32 %v4407_v29 }
0x1113   :  { %v11609_v7 = vsel %vm433_vm4, %v4329_v4, 2147483647 }
0x1114   :  { %4410 = vmin.xlane.f32.xlu1 %v11606_v32  ;;  %v4437_v0 = vshra.s32 %v11609_v7, 16 }
0x1116   :  { %v11613_v58 = vcvt.s32.f32 %v4437_v0 }
0x1118   :  { %4440 = vmin.xlane.f32.xlu1 %v11613_v58 }
0x1142   :  { %v8426_v19 = vpop.f32.mrb[76].mxu1 }
0x1143   :  { %v4178_v47 = vadd.f32 %v8426_v19, %v13484_v28  ;;  %v4138_v63 = vpop.f32.mrb[77].mxu1 }
0x1144   :  { %v4177_v6 = vadd.f32 %v4138_v63, %v13415_v52 }
0x1145   :  { %v4186_v56 = vmax.f32 %v4178_v47, 0.0 }
0x1146   :  { %v4185_v29 = vmax.f32 %v4177_v6, 0.0 }
0x1148   :  { %v4193_v1 = vpack.c.bf16 %v4186_v56, %v4185_v29 }
0x114a   :  { %8444 = vmatprep.mubr.msk.bf16.mxu0 %vm433_vm4, %v4193_v1 }
0x114c   :  { %v8429_v4 = vpop.f32.mrb[78].mxu1 }
0x114d   :  { %v4180_v48 = vadd.f32 %v8429_v4, %v9583_v46  ;;  %v4148_v9 = vpop.f32.mrb[79].mxu1  ;;  %v11643_v4 = vld [vmem:[%s13351_s6 + $0x10] sm:$0xff]  }
0x114e   :  { %v4179_v0 = vadd.f32 %v4148_v9, %v9587_v42  ;;  %v11628_v9 = vld [vmem:[%s13351_s6] sm:$0xff]  }
0x114f   :  { %v4188_v27 = vmax.f32 %v4180_v48, 0.0 }
0x1150   :  { %v4187_v11 = vmax.f32 %v4179_v0, 0.0  ;;  %v8432_v3 = vpop.f32.mrb[80].mxu1  ;;  %v11651_v0 = vld [vmem:[%s13351_s6 + $0x18] sm:$0xff]  }
0x1151   :  { %v4182_v24 = vadd.f32 %v8432_v3, %v9591_v31  ;;  %v4158_v19 = vpop.f32.mrb[81].mxu1 }
0x1152   :  { %v4194_v28 = vpack.c.bf16 %v4188_v27, %v4187_v11  ;;  %v4181_v63 = vadd.f32 %v4158_v19, %v9595_v30  ;;  %v4331_v19 = vand.u32 65535, %v11547_v37 }
0x1153   :  { %v4190_v47 = vmax.f32 %v4182_v24, 0.0  ;;  %v11635_v24 = vld [vmem:[%s13351_s6 + $0x8] sm:$0xff]  }
0x1154   :  { %v4189_v6 = vmax.f32 %v4181_v63, 0.0  ;;  %v8435_v56 = vpop.f32.mrb[82].mxu1  ;;  %8445 = vmatmul.mubr.msk.bf16.vlgmr.msra.gmra.mrb[76].mxu0 %vm433_vm4, %v4194_v28 }
0x1155   :  { %v4184_v1 = vadd.f32 %v8435_v56, %v9600_v17  ;;  %v4168_v29 = vpop.f32.mrb[83].mxu1  ;;  %8481 = vmatpush3.bf16.msra.mxu0 %v11628_v9 }
0x1156   :  { %v4195_v3 = vpack.c.bf16 %v4190_v47, %v4189_v6  ;;  %v4183_v11 = vadd.f32 %v4168_v29, %v9604_v22  ;;  %8482 = vmatprep.subr.bf16.mxu0 %v11635_v24  ;;  %v4333_v47 = vcvt.s32.f32 %v4331_v19  ;;  %v4361_v6 = vand.u32 65535, %v11555_v20 }
0x1157   :  { %v4192_v28 = vmax.f32 %v4184_v1, 0.0  ;;  %v4346_v1 = vand.u32 65535, %v11562_v36  ;;  %v4391_v20 = vand.u32 65535, %v11574_v62  ;;  %v4421_v36 = vand.u32 65535, %v11588_v38 }
0x1158   :  { %v4191_v27 = vmax.f32 %v4183_v11, 0.0  ;;  %8448 = vmatprep.mubr.msk.bf16.mxu0 %vm433_vm4, %v4195_v3  ;;  %v4363_v3 = vcvt.s32.f32 %v4361_v6 }
0x1159   :  { %8483 = vmatpush3.bf16.msra.mxu0 %v11635_v24  ;;  %v4393_v19 = vcvt.s32.f32 %v4391_v20 }
0x115a   :  { %v4196_v48 = vpack.c.bf16 %v4192_v28, %v4191_v27  ;;  %8484 = vmatprep.subr.bf16.mxu0 %v11643_v4  ;;  %v4348_v27 = vcvt.s32.f32 %v4346_v1 }
0x115c   :  { %8449 = vmatmul.mubr.msk.bf16.gmra.mrb[80].mxu0 %vm433_vm4, %v4196_v48 }
0x115d   :  { %8485 = vmatpush3.bf16.msra.mxu0 %v11643_v4 }
0x115e   :  { %8486 = vmatprep.subr.bf16.mxu0 %v11651_v0 }
0x1161   :  { %8487 = vmatpush3.bf16.msra.mxu0 %v11651_v0 }
0x1162   :  { %8524 = vmatprep.subr.bf16.mxu0 %v11628_v9 }
0x118b   :  { %v4336_v63 = vpop.xlane.xlu0 %4335 }
0x118c   :  { %vm4337_vm13 = vcmp.eq.f32.partialorder %v11552_v16, %v4336_v63  ;;  %v4376_v16 = vand.u32 65535, %v11580_v55 }
0x118d   :  { %v4338_v56 = vsel %vm4337_vm13, %v4333_v47, inf }
0x118e   :  { %4339 = vmin.xlane.f32.xlu0 %v4338_v56  ;;  %v4378_v6 = vcvt.s32.f32 %v4376_v16  ;;  %v4423_v56 = vcvt.s32.f32 %v4421_v36 }
0x118f   :  { %v4366_v29 = vpop.xlane.xlu0 %4365 }
0x1190   :  { %vm4367_vm14 = vcmp.eq.f32.partialorder %v11564_v39, %v4366_v29  ;;  %v4372_v16 = vcvt.f32.s32 %v4366_v29 }
0x1191   :  { %v4368_v11 = vsel %vm4367_vm14, %v4363_v3, inf  ;;  %v4436_v3 = vand.u32 65535, %v11609_v7 }
0x1192   :  { %v4351_v28 = vpop.xlane.xlu1 %4350  ;;  %4369 = vmin.xlane.f32.xlu0 %v4368_v11 }
0x1193   :  { %vm4352_vm15 = vcmp.eq.f32.partialorder %v11568_v60, %v4351_v28  ;;  %v4406_v60 = vand.u32 65535, %v11597_v50  ;;  %v4438_v11 = vcvt.s32.f32 %v4436_v3  ;;  %v4357_v36 = vcvt.f32.s32 %v4351_v28 }
0x1194   :  { %v4353_v37 = vsel %vm4352_vm15, %v4348_v27, inf }
0x1195   :  { %4354 = vmin.xlane.f32.xlu1 %v4353_v37  ;;  %v4408_v1 = vcvt.s32.f32 %v4406_v60  ;;  %v4358_v29 = vshll.u32 %v4357_v36, 16 }
0x119b   :  { %v11664_v48 = vpop.xlane.xlu0 %4395 }
0x119c   :  { %vm4397_vm0 = vcmp.eq.f32.partialorder %v11584_v51, %v11664_v48 }
0x119d   :  { %v11669_v39 = vpop.xlane.xlu1 %4380  ;;  %v4398_v47 = vsel %vm4397_vm0, %v4393_v19, inf }
0x119e   :  { %4399 = vmin.xlane.f32.xlu0 %v4398_v47  ;;  %vm4382_vm2 = vcmp.eq.f32.partialorder %v11593_v49, %v11669_v39 }
0x119f   :  { %v4383_v62 = vsel %vm4382_vm2, %v4378_v6, inf  ;;  %v11674_v55 = vpop.xlane.xlu0 %4425  ;;  %v4373_v6 = vshll.u32 %v4372_v16, 16 }
0x11a0   :  { %4384 = vmin.xlane.f32.xlu1 %v4383_v62  ;;  %vm4427_vm3 = vcmp.eq.f32.partialorder %v11600_v21, %v11674_v55  ;;  %v4342_v21 = vcvt.f32.s32 %v4336_v63 }
0x11a1   :  { %v11678_v38 = vpop.xlane.xlu1 %4410  ;;  %v4428_v51 = vsel %vm4427_vm3, %v4423_v56, inf }
0x11a2   :  { %4429 = vmin.xlane.f32.xlu0 %v4428_v51  ;;  %vm4412_vm5 = vcmp.eq.f32.partialorder %v11606_v32, %v11678_v38  ;;  %v4343_v20 = vshll.u32 %v4342_v21, 16 }
0x11a3   :  { %v4413_v50 = vsel %vm4412_vm5, %v4408_v1, inf }
0x11a4   :  { %4414 = vmin.xlane.f32.xlu1 %v4413_v50 }
0x11a5   :  { %v11683_v49 = vpop.xlane.xlu1 %4440 }
0x11a6   :  { %vm4442_vm6 = vcmp.eq.f32.partialorder %v11613_v58, %v11683_v49 }
0x11a7   :  { %v4443_v27 = vsel %vm4442_vm6, %v4438_v11, inf  ;;  %v4402_v11 = vcvt.f32.s32 %v11664_v48  ;;  %v13485_v48 = vmax.f32 %v11198_v25, %v11445_v54 }
0x11a8   :  { %4444 = vmin.xlane.f32.xlu1 %v4443_v27 }
0x11a9   :  { %v4403_v54 = vshll.u32 %v4402_v11, 16 }
0x121b   :  { %v4340_v37 = vpop.xlane.xlu0 %4339 }
0x121c   :  { %v4341_v19 = vcvt.f32.s32 %v4340_v37 }
0x121e   :  { %v4344_v7 = vadd.s32 %v4343_v20, %v4341_v19 }
0x121f   :  { %v4370_v47 = vpop.xlane.xlu0 %4369 }
0x1220   :  { %v4371_v32 = vcvt.f32.s32 %v4370_v47  ;;  %vm4450_vm7 = vcmp.eq.s32.totalorder %v9171_v23, %v4344_v7  ;;  %v4387_v7 = vcvt.f32.s32 %v11669_v39 }
0x1221   :  { %v7479_v60 = vsel %vm4450_vm7, 1.0, %v13409_v41  ;;  %v11690_v62 = vsel %vm4450_vm7, inf, %v11425_v43 }
0x1222   :  { %v4374_v58 = vadd.s32 %v4373_v6, %v4371_v32  ;;  %v4355_v56 = vpop.xlane.xlu1 %4354  ;;  %8468 = vmatprep.mubr.msk.f32.mxu1 %vm433_vm4, %v7479_v60  ;;  %v4716_v63 = vsel %vm433_vm4, %v11690_v62, inf  ;;  %v4417_v32 = vcvt.f32.s32 %v11678_v38  ;;  %v13486_v60 = vmax.f32 %v11209_v10, %v11453_v26 }
0x1223   :  { %v4356_v51 = vcvt.f32.s32 %v4355_v56  ;;  %4717 = vmin.xlane.f32.xlu0 %v4716_v63  ;;  %v13487_v56 = vmax.f32 %v11218_v57, %v11462_v13  ;;  %v4388_v38 = vshll.u32 %v4387_v7, 16  ;;  %v13489_v7 = vmax.f32 %v11240_v12, %v11481_v14 }
0x1224   :  { %vm4452_vm1 = vcmp.eq.s32.totalorder %v9171_v23, %v4374_v58  ;;  %v13491_v14 = vmax.f32 %v11256_v40, %v11495_v18 }
0x1225   :  { %v4359_v28 = vadd.s32 %v4358_v29, %v4356_v51  ;;  %v11697_v1 = vsel %vm4452_vm1, inf, %v11432_v45  ;;  %v7481_v50 = vsel %vm4452_vm1, 1.0, %v13409_v41 }
0x1226   :  { %v4722_v43 = vsel %vm433_vm4, %v11697_v1, inf }
0x1227   :  { %v8446_v3 = vpop.f32.mrb[76].mxu0  ;;  %vm4451_vm8 = vcmp.eq.s32.totalorder %v9171_v23, %v4359_v28  ;;  %4723 = vmin.xlane.f32.xlu0 %v4722_v43 }
0x1228   :  { %v4252_v27 = vadd.f32 %v11442_v15, %v8446_v3  ;;  %v4243_v21 = vpop.f32.mrb[77].mxu0  ;;  %v7480_v37 = vsel %vm4451_vm8, 1.0, %v13409_v41  ;;  %v11707_v20 = vsel %vm4451_vm8, inf, %v11449_v59  ;;  %v4432_v59 = vcvt.f32.s32 %v11674_v55 }
0x1229   :  { %v4244_v45 = vadd.f32 %v11442_v15, %v4243_v21  ;;  %v8447_v16 = vpop.f32.mrb[78].mxu0  ;;  %8469 = vmatmul.mubr.msk.f32.vlgmr.msra.gmra.mrb[84].mxu1 %vm433_vm4, %v7480_v37  ;;  %v4719_v19 = vsel %vm433_vm4, %v11707_v20, inf  ;;  %v13488_v55 = vmax.f32 %v11224_v53, %v11469_v8  ;;  %v4418_v3 = vshll.u32 %v4417_v32, 16 }
0x122a   :  { %v11717_v36 = vmax.f32 %v13485_v48, %v4252_v27  ;;  %v4255_v47 = vadd.f32 %v11442_v15, %v8447_v16  ;;  %v4246_v6 = vpop.f32.mrb[79].mxu0  ;;  %4720 = vmin.xlane.f32.xlu1 %v4719_v19  ;;  %8471 = vmatprep.mubr.msk.f32.mxu1 %vm433_vm4, %v7481_v50  ;;  %v4433_v43 = vshll.u32 %v4432_v59, 16  ;;  %v4447_v53 = vcvt.f32.s32 %v11683_v49 }
0x122b   :  { %v11726_v58 = vmax.f32 %v13486_v60, %v4244_v45  ;;  %v4247_v39 = vadd.f32 %v11442_v15, %v4246_v6  ;;  %v4400_v25 = vpop.xlane.xlu0 %4399  ;;  %8923 = vmatpush3.bf16.msra.mxu1 %v9349_v35  ;;  %v13490_v49 = vmax.f32 %v11247_v5, %v11489_v61  ;;  %v13493_v61 = vld [vmem:[#allocation5_spill] sm:$0xff] }
0x122c   :  { %v11733_v63 = vmax.f32 %v13487_v56, %v4255_v47  ;;  %v4401_v29 = vcvt.f32.s32 %v4400_v25  ;;  %8925 = vmatprep.subr.bf16.mxu1 %v9347_v33  ;;  %v13494_v56 = vld [vmem:[#allocation3_spill] sm:$0xff] }
0x122d   :  { %v11739_v10 = vmax.f32 %v13488_v55, %v4247_v39  ;;  %v4385_v26 = vpop.xlane.xlu1 %4384 }
0x122e   :  { %v4404_v51 = vadd.s32 %v4403_v54, %v4401_v29  ;;  %v4386_v28 = vcvt.f32.s32 %v4385_v26  ;;  %v13495_v29 = vmax.f32 %v13493_v61, %v13494_v56  ;;  %v4448_v26 = vshll.u32 %v4447_v53, 16 }
0x122f   :  { %v8450_v50 = vpop.f32.mrb[80].mxu0  ;;  %v4430_v11 = vpop.xlane.xlu0 %4429  ;;  %8927 = vmatpush3.bf16.msra.mxu1 %v9347_v33 }
0x1230   :  { %v4389_v57 = vadd.s32 %v4388_v38, %v4386_v28  ;;  %v4268_v13 = vadd.f32 %v11442_v15, %v8450_v50  ;;  %v4431_v27 = vcvt.f32.s32 %v4430_v11  ;;  %v4259_v21 = vpop.f32.mrb[81].mxu0  ;;  %vm4454_vm9 = vcmp.eq.s32.totalorder %v9171_v23, %v4404_v51  ;;  %8929 = vmatprep.subr.bf16.mxu1 %v13426_v44  ;;  %v13497_v38 = vld [vmem:[#allocation7_spill] sm:$0xff] }
0x1231   :  { %v4260_v8 = vadd.f32 %v11442_v15, %v4259_v21  ;;  %v4415_v37 = vpop.xlane.xlu1 %4414  ;;  %v8451_v45 = vpop.f32.mrb[82].mxu0  ;;  %v11748_v16 = vsel %vm4454_vm9, inf, %v11484_v34  ;;  %v7483_v19 = vsel %vm4454_vm9, 1.0, %v13409_v41  ;;  %v13499_v21 = vld [vmem:[#allocation9_spill] sm:$0xff] }
0x1232   :  { %v11754_v48 = vmax.f32 %v13489_v7, %v4268_v13  ;;  %v4434_v47 = vadd.s32 %v4433_v43, %v4431_v27  ;;  %v4416_v6 = vcvt.f32.s32 %v4415_v37  ;;  %v4271_v59 = vadd.f32 %v11442_v15, %v8451_v45  ;;  %v4262_v32 = vpop.f32.mrb[83].mxu0 }
0x1233   :  { %v11760_v60 = vmax.f32 %v13490_v49, %v4260_v8  ;;  %v4263_v34 = vadd.f32 %v11442_v15, %v4262_v32  ;;  %vm4453_vm10 = vcmp.eq.s32.totalorder %v9171_v23, %v4389_v57  ;;  %v4728_v39 = vsel %vm433_vm4, %v11748_v16, inf  ;;  %8931 = vmatpush3.bf16.msra.mxu1 %v13426_v44  ;;  %v13492_v15 = vld [vmem:[#allocation2_spill] sm:$0xff] }
0x1234   :  { %v4419_v12 = vadd.s32 %v4418_v3, %v4416_v6  ;;  %v11770_v25 = vmax.f32 %v13491_v14, %v4271_v59  ;;  %v7482_v54 = vsel %vm4453_vm10, 1.0, %v13409_v41  ;;  %4729 = vmin.xlane.f32.xlu0 %v4728_v39  ;;  %v11774_v5 = vsel %vm4453_vm10, inf, %v11507_v2  ;;  %8933 = vmatprep.subr.bf16.mxu1 %v13492_v15  ;;  %v13498_v3 = vld [vmem:[#allocation8_spill] sm:$0xff] }
0x1235   :  { %v11780_v55 = vmax.f32 %v13495_v29, %v4263_v34  ;;  %8472 = vmatmul.mubr.msk.f32.gmra.mrb[86].mxu1 %vm433_vm4, %v7482_v54  ;;  %v4725_v40 = vsel %vm433_vm4, %v11774_v5, inf  ;;  %v4445_v18 = vpop.xlane.xlu1 %4444  ;;  %vm4456_vm11 = vcmp.eq.s32.totalorder %v9171_v23, %v4434_v47 }
0x1236   :  { %4726 = vmin.xlane.f32.xlu1 %v4725_v40  ;;  %8474 = vmatprep.mubr.msk.f32.mxu1 %vm433_vm4, %v7483_v19  ;;  %v4446_v2 = vcvt.f32.s32 %v4445_v18  ;;  %vm4455_vm12 = vcmp.eq.s32.totalorder %v9171_v23, %v4419_v12  ;;  %v11789_v51 = vsel %vm4456_vm11, inf, %v13497_v38  ;;  %v7485_v11 = vsel %vm4456_vm11, 1.0, %v13409_v41 }
0x1237   :  { %13496 = vst [vmem:[#allocation6_spill] sm:$0xff] %v11780_v55  ;;  %v7484_v28 = vsel %vm4455_vm12, 1.0, %v13409_v41  ;;  %v4734_v43 = vsel %vm433_vm4, %v11789_v51, inf  ;;  %v11795_v50 = vsel %vm4455_vm12, inf, %v13498_v3  ;;  %8935 = vmatpush3.bf16.msra.mxu1 %v13492_v15 }
0x1238   :  { %v4449_v57 = vadd.s32 %v4448_v26, %v4446_v2  ;;  %4735 = vmin.xlane.f32.xlu0 %v4734_v43  ;;  %v4731_v13 = vsel %vm433_vm4, %v11795_v50, inf  ;;  %8937 = vmatprep.subr.bf16.mxu1 %v9349_v35 }
0x1239   :  { %8475 = vmatmul.mubr.msk.f32.gmra.mrb[88].mxu1 %vm433_vm4, %v7484_v28 }
0x123a   :  { %4732 = vmin.xlane.f32.xlu1 %v4731_v13  ;;  %8477 = vmatprep.mubr.msk.f32.mxu1 %vm433_vm4, %v7485_v11  ;;  %vm4457_vm13 = vcmp.eq.s32.totalorder %v9171_v23, %v4449_v57 }
0x123b   :  { %v7486_v27 = vsel %vm4457_vm13, 1.0, %v13409_v41  ;;  %v11807_v53 = vsel %vm4457_vm13, inf, %v13499_v21 }
0x123c   :  { %13500 = vst [vmem:[#allocation2_spill] sm:$0xff] %v11807_v53  ;;  %v4737_v8 = vsel %vm433_vm4, %v11807_v53, inf }
0x123d   :  { %8478 = vmatmul.mubr.msk.f32.gmra.mrb[90].mxu1 %vm433_vm4, %v7486_v27 }
0x123e   :  { %4738 = vmin.xlane.f32.xlu1 %v4737_v8 }
0x12b0   :  { %v4718_v37 = vpop.xlane.xlu0 %4717 }
0x12b1   :  { %vm4740_vm14 = vcmp.le.f32.partialorder %v11690_v62, %v4718_v37 }
0x12b2   :  { %v4748_v45 = vsel %vm4740_vm14, %v9171_v23, 64 }
0x12b3   :  { %v11815_v19 = vsel %vm433_vm4, %v4748_v45, 2147483647 }
0x12b4   :  { %v4724_v7 = vpop.xlane.xlu0 %4723  ;;  %v4758_v47 = vshra.s32 %v11815_v19, 16 }
0x12b5   :  { %vm4742_vm15 = vcmp.le.f32.partialorder %v11697_v1, %v4724_v7 }
0x12b6   :  { %v4750_v6 = vsel %vm4742_vm15, %v9171_v23, 64  ;;  %v11820_v59 = vcvt.s32.f32 %v4758_v47 }
0x12b7   :  { %v11823_v32 = vsel %vm433_vm4, %v4750_v6, 2147483647  ;;  %v4721_v49 = vpop.xlane.xlu1 %4720 }
0x12b8   :  { %vm4741_vm0 = vcmp.le.f32.partialorder %v11707_v20, %v4721_v49  ;;  %4761 = vmin.xlane.f32.xlu0 %v11820_v59  ;;  %v4788_v34 = vshra.s32 %v11823_v32, 16 }
0x12b9   :  { %v4749_v39 = vsel %vm4741_vm0, %v9171_v23, 64 }
0x12ba   :  { %v11830_v12 = vsel %vm433_vm4, %v4749_v39, 2147483647  ;;  %v11832_v14 = vcvt.s32.f32 %v4788_v34 }
0x12bb   :  { %v4773_v54 = vshra.s32 %v11830_v12, 16 }
0x12bc   :  { %4791 = vmin.xlane.f32.xlu0 %v11832_v14 }
0x12bd   :  { %v11836_v61 = vcvt.s32.f32 %v4773_v54 }
0x12bf   :  { %4776 = vmin.xlane.f32.xlu1 %v11836_v61 }
0x12c1   :  { %v4730_v56 = vpop.xlane.xlu0 %4729 }
0x12c2   :  { %vm4744_vm2 = vcmp.le.f32.partialorder %v11748_v16, %v4730_v56 }
0x12c3   :  { %v4752_v29 = vsel %vm4744_vm2, %v9171_v23, 64  ;;  %v4727_v40 = vpop.xlane.xlu1 %4726 }
0x12c4   :  { %v11842_v18 = vsel %vm433_vm4, %v4752_v29, 2147483647  ;;  %vm4743_vm3 = vcmp.le.f32.partialorder %v11774_v5, %v4727_v40  ;;  %v13501_v29 = vld [vmem:[#allocation4_spill] sm:$0xff] }
0x12c5   :  { %v4751_v26 = vsel %vm4743_vm3, %v9171_v23, 64  ;;  %v4736_v2 = vpop.xlane.xlu0 %4735  ;;  %v4818_v38 = vshra.s32 %v11842_v18, 16 }
0x12c6   :  { %v11848_v28 = vsel %vm433_vm4, %v4751_v26, 2147483647  ;;  %vm4746_vm5 = vcmp.le.f32.partialorder %v11789_v51, %v4736_v2 }
0x12c7   :  { %v4754_v43 = vsel %vm4746_vm5, %v9171_v23, 64  ;;  %v4733_v3 = vpop.xlane.xlu1 %4732  ;;  %v11852_v11 = vcvt.s32.f32 %v4818_v38  ;;  %v4803_v57 = vshra.s32 %v11848_v28, 16 }
0x12c8   :  { %v11856_v13 = vsel %vm433_vm4, %v4754_v43, 2147483647  ;;  %vm4745_vm6 = vcmp.le.f32.partialorder %v11795_v50, %v4733_v3 }
0x12c9   :  { %v4753_v27 = vsel %vm4745_vm6, %v9171_v23, 64  ;;  %4821 = vmin.xlane.f32.xlu0 %v11852_v11  ;;  %v11861_v21 = vcvt.s32.f32 %v4803_v57  ;;  %v4848_v8 = vshra.s32 %v11856_v13, 16 }
0x12ca   :  { %v11865_v37 = vsel %vm433_vm4, %v4753_v27, 2147483647 }
0x12cb   :  { %4806 = vmin.xlane.f32.xlu1 %v11861_v21  ;;  %v4739_v45 = vpop.xlane.xlu1 %4738  ;;  %v11868_v7 = vcvt.s32.f32 %v4848_v8  ;;  %v4833_v47 = vshra.s32 %v11865_v37, 16 }
0x12cc   :  { %vm4747_vm7 = vcmp.le.f32.partialorder %v11807_v53, %v4739_v45 }
0x12cd   :  { %v4755_v6 = vsel %vm4747_vm7, %v9171_v23, 64  ;;  %4851 = vmin.xlane.f32.xlu0 %v11868_v7  ;;  %v11874_v49 = vcvt.s32.f32 %v4833_v47 }
0x12ce   :  { %v11877_v34 = vsel %vm433_vm4, %v4755_v6, 2147483647 }
0x12cf   :  { %4836 = vmin.xlane.f32.xlu1 %v11874_v49  ;;  %v4863_v39 = vshra.s32 %v11877_v34, 16 }
0x12d1   :  { %v11881_v54 = vcvt.s32.f32 %v4863_v39 }
0x12d3   :  { %4866 = vmin.xlane.f32.xlu1 %v11881_v54 }
0x12fc   :  { %v8470_v56 = vpop.f32.mrb[84].mxu1 }
0x12fd   :  { %v4604_v40 = vadd.f32 %v8470_v56, %v13501_v29  ;;  %v4564_v26 = vpop.f32.mrb[85].mxu1 }
0x12fe   :  { %v4603_v2 = vadd.f32 %v4564_v26, %v13415_v52 }
0x12ff   :  { %v4612_v38 = vmax.f32 %v4604_v40, 0.0 }
0x1300   :  { %v4611_v43 = vmax.f32 %v4603_v2, 0.0 }
0x1302   :  { %v4619_v3 = vpack.c.bf16 %v4612_v38, %v4611_v43 }
0x1304   :  { %8488 = vmatprep.mubr.msk.bf16.mxu0 %vm433_vm4, %v4619_v3 }
0x1308   :  { %v8473_v57 = vpop.f32.mrb[86].mxu1 }
0x1309   :  { %v4606_v27 = vadd.f32 %v8473_v57, %v9583_v46  ;;  %v4574_v8 = vpop.f32.mrb[87].mxu1 }
0x130a   :  { %v4605_v45 = vadd.f32 %v4574_v8, %v9587_v42 }
0x130b   :  { %v4614_v47 = vmax.f32 %v4606_v27, 0.0 }
0x130c   :  { %v4613_v6 = vmax.f32 %v4605_v45, 0.0  ;;  %v8476_v39 = vpop.f32.mrb[88].mxu1 }
0x130d   :  { %v4608_v53 = vadd.f32 %v8476_v39, %v9591_v31  ;;  %v4584_v56 = vpop.f32.mrb[89].mxu1  ;;  %v4787_v39 = vand.u32 65535, %v11823_v32  ;;  %v4817_v32 = vand.u32 65535, %v11842_v18 }
0x130e   :  { %v4620_v29 = vpack.c.bf16 %v4614_v47, %v4613_v6  ;;  %v4607_v26 = vadd.f32 %v4584_v56, %v9595_v30  ;;  %v4772_v56 = vand.u32 65535, %v11830_v12  ;;  %v4847_v12 = vand.u32 65535, %v11856_v13 }
0x130f   :  { %v4616_v40 = vmax.f32 %v4608_v53, 0.0 }
0x1310   :  { %v4615_v2 = vmax.f32 %v4607_v26, 0.0  ;;  %v8479_v38 = vpop.f32.mrb[90].mxu1  ;;  %8489 = vmatmul.mubr.msk.bf16.vlgmr.msra.gmra.mrb[84].mxu0 %vm433_vm4, %v4620_v29  ;;  %v4757_v29 = vand.u32 65535, %v11815_v19 }
0x1311   :  { %v4610_v43 = vadd.f32 %v8479_v38, %v9600_v17  ;;  %v4594_v3 = vpop.f32.mrb[91].mxu1  ;;  %8525 = vmatpush3.bf16.msra.mxu0 %v11628_v9  ;;  %v4819_v38 = vcvt.s32.f32 %v4817_v32 }
0x1312   :  { %v4621_v57 = vpack.c.bf16 %v4616_v40, %v4615_v2  ;;  %v4609_v27 = vadd.f32 %v4594_v3, %v9604_v22  ;;  %8526 = vmatprep.subr.bf16.mxu0 %v11635_v24  ;;  %v4759_v6 = vcvt.s32.f32 %v4757_v29 }
0x1313   :  { %v4618_v8 = vmax.f32 %v4610_v43, 0.0 }
0x1314   :  { %v4617_v45 = vmax.f32 %v4609_v27, 0.0  ;;  %8492 = vmatprep.mubr.msk.bf16.mxu0 %vm433_vm4, %v4621_v57  ;;  %v4849_v57 = vcvt.s32.f32 %v4847_v12 }
0x1315   :  { %8527 = vmatpush3.bf16.msra.mxu0 %v11635_v24 }
0x1316   :  { %v4622_v53 = vpack.c.bf16 %v4618_v8, %v4617_v45  ;;  %8528 = vmatprep.subr.bf16.mxu0 %v11643_v4  ;;  %v4862_v8 = vand.u32 65535, %v11877_v34 }
0x1318   :  { %8493 = vmatmul.mubr.msk.bf16.gmra.mrb[88].mxu0 %vm433_vm4, %v4622_v53  ;;  %v4864_v45 = vcvt.s32.f32 %v4862_v8 }
0x1319   :  { %8529 = vmatpush3.bf16.msra.mxu0 %v11643_v4  ;;  %v4789_v4 = vcvt.s32.f32 %v4787_v39 }
0x131a   :  { %8530 = vmatprep.subr.bf16.mxu0 %v11651_v0 }
0x131d   :  { %8531 = vmatpush3.bf16.msra.mxu0 %v11651_v0 }
0x131e   :  { %8568 = vmatprep.subr.bf16.mxu0 %v11628_v9  ;;  %v4774_v9 = vcvt.s32.f32 %v4772_v56 }
0x1345   :  { %v4762_v47 = vpop.xlane.xlu0 %4761 }
0x1346   :  { %vm4763_vm1 = vcmp.eq.f32.partialorder %v11820_v59, %v4762_v47  ;;  %v4802_v59 = vand.u32 65535, %v11848_v28 }
0x1347   :  { %v4764_v24 = vsel %vm4763_vm1, %v4759_v6, inf }
0x1348   :  { %4765 = vmin.xlane.f32.xlu0 %v4764_v24  ;;  %v4804_v3 = vcvt.s32.f32 %v4802_v59 }
0x1349   :  { %v4792_v26 = vpop.xlane.xlu0 %4791 }
0x134a   :  { %vm4793_vm8 = vcmp.eq.f32.partialorder %v11832_v14, %v4792_v26  ;;  %v4798_v39 = vcvt.f32.s32 %v4792_v26 }
0x134b   :  { %v4794_v40 = vsel %vm4793_vm8, %v4789_v4, inf }
0x134c   :  { %v4777_v0 = vpop.xlane.xlu1 %4776  ;;  %4795 = vmin.xlane.f32.xlu0 %v4794_v40  ;;  %v4799_v40 = vshll.u32 %v4798_v39, 16 }
0x134d   :  { %vm4778_vm9 = vcmp.eq.f32.partialorder %v11836_v61, %v4777_v0  ;;  %v4832_v61 = vand.u32 65535, %v11865_v37  ;;  %v4783_v56 = vcvt.f32.s32 %v4777_v0 }
0x134e   :  { %v4779_v19 = vsel %vm4778_vm9, %v4774_v9, inf }
0x134f   :  { %4780 = vmin.xlane.f32.xlu1 %v4779_v19  ;;  %v4834_v27 = vcvt.s32.f32 %v4832_v61  ;;  %v4784_v26 = vshll.u32 %v4783_v56, 16 }
0x1356   :  { %v11912_v2 = vpop.xlane.xlu0 %4821 }
0x1357   :  { %vm4823_vm10 = vcmp.eq.f32.partialorder %v11852_v11, %v11912_v2 }
0x1358   :  { %v11917_v14 = vpop.xlane.xlu1 %4806  ;;  %v4824_v43 = vsel %vm4823_vm10, %v4819_v38, inf }
0x1359   :  { %4825 = vmin.xlane.f32.xlu0 %v4824_v43  ;;  %vm4808_vm11 = vcmp.eq.f32.partialorder %v11861_v21, %v11917_v14  ;;  %v4828_v43 = vcvt.f32.s32 %v11912_v2 }
0x135a   :  { %v4809_v18 = vsel %vm4808_vm11, %v4804_v3, inf  ;;  %v11922_v28 = vpop.xlane.xlu0 %4851 }
0x135b   :  { %4810 = vmin.xlane.f32.xlu1 %v4809_v18  ;;  %vm4853_vm12 = vcmp.eq.f32.partialorder %v11868_v7, %v11922_v28  ;;  %v4768_v7 = vcvt.f32.s32 %v4762_v47 }
0x135c   :  { %v11926_v13 = vpop.xlane.xlu1 %4836  ;;  %v4854_v11 = vsel %vm4853_vm12, %v4849_v57, inf  ;;  %v11962_v57 = vld [vmem:[%s13353_s7] ss:$0 sm:$0xff] }
0x135d   :  { %4855 = vmin.xlane.f32.xlu0 %v4854_v11  ;;  %vm4838_vm13 = vcmp.eq.f32.partialorder %v11874_v49, %v11926_v13  ;;  %v4769_v6 = vshll.u32 %v4768_v7, 16 }
0x135e   :  { %v4839_v37 = vsel %vm4838_vm13, %v4834_v27, inf }
0x135f   :  { %4840 = vmin.xlane.f32.xlu1 %v4839_v37  ;;  %v4829_v37 = vshll.u32 %v4828_v43, 16 }
0x1360   :  { %v11931_v21 = vpop.xlane.xlu1 %4866 }
0x1361   :  { %vm4868_vm14 = vcmp.eq.f32.partialorder %v11881_v54, %v11931_v21 }
0x1362   :  { %v4869_v53 = vsel %vm4868_vm14, %v4864_v45, inf  ;;  %v4858_v45 = vcvt.f32.s32 %v11922_v28 }
0x1363   :  { %4870 = vmin.xlane.f32.xlu1 %v4869_v53 }
0x13d5   :  { %v4766_v29 = vpop.xlane.xlu0 %4765 }
0x13d6   :  { %v4767_v24 = vcvt.f32.s32 %v4766_v29 }
0x13d8   :  { %v4770_v34 = vadd.s32 %v4769_v6, %v4767_v24 }
0x13d9   :  { %v4796_v4 = vpop.xlane.xlu0 %4795 }
0x13da   :  { %v4797_v49 = vcvt.f32.s32 %v4796_v4  ;;  %vm4876_vm15 = vcmp.eq.s32.totalorder %v9171_v23, %v4770_v34 }
0x13db   :  { %v7499_v9 = vsel %vm4876_vm15, 1.0, %v13409_v41  ;;  %v11938_v19 = vsel %vm4876_vm15, inf, %v11690_v62 }
0x13dc   :  { %v4800_v54 = vadd.s32 %v4799_v40, %v4797_v49  ;;  %v4781_v32 = vpop.xlane.xlu1 %4780  ;;  %8512 = vmatprep.mubr.msk.f32.mxu1 %vm433_vm4, %v7499_v9  ;;  %v5142_v47 = vsel %vm433_vm4, %v11938_v19, inf }
0x13dd   :  { %v4782_v59 = vcvt.f32.s32 %v4781_v32  ;;  %5143 = vmin.xlane.f32.xlu0 %v5142_v47 }
0x13de   :  { %vm4878_vm0 = vcmp.eq.s32.totalorder %v9171_v23, %v4800_v54 }
0x13df   :  { %v4785_v0 = vadd.s32 %v4784_v26, %v4782_v59  ;;  %v11945_v38 = vsel %vm4878_vm0, inf, %v11697_v1  ;;  %v7501_v12 = vsel %vm4878_vm0, 1.0, %v13409_v41 }
0x13e0   :  { %v5148_v62 = vsel %vm433_vm4, %v11945_v38, inf }
0x13e1   :  { %vm4877_vm2 = vcmp.eq.s32.totalorder %v9171_v23, %v4785_v0  ;;  %5149 = vmin.xlane.f32.xlu0 %v5148_v62  ;;  %v4873_v0 = vcvt.f32.s32 %v11931_v21  ;;  %v13508_v21 = vld [vmem:[#allocation4_spill] sm:$0xff] }
0x13e2   :  { %v7500_v3 = vsel %vm4877_vm2, 1.0, %v13409_v41  ;;  %v11954_v61 = vsel %vm4877_vm2, inf, %v11707_v20  ;;  %v4813_v20 = vcvt.f32.s32 %v11917_v14  ;;  %v4843_v14 = vcvt.f32.s32 %v11926_v13 }
0x13e3   :  { %v8490_v18 = vpop.f32.mrb[84].mxu0  ;;  %8513 = vmatmul.mubr.msk.f32.vlgmr.msra.gmra.mrb[92].mxu1 %vm433_vm4, %v7500_v3  ;;  %v5145_v1 = vsel %vm433_vm4, %v11954_v61, inf  ;;  %v4859_v13 = vshll.u32 %v4858_v45, 16 }
0x13e4   :  { %v11965_v11 = vadd.f32 %v11962_v57, %v8490_v18  ;;  %v4669_v2 = vpop.f32.mrb[85].mxu0  ;;  %5146 = vmin.xlane.f32.xlu1 %v5145_v1  ;;  %8515 = vmatprep.mubr.msk.f32.mxu1 %vm433_vm4, %v7501_v12  ;;  %v4814_v4 = vshll.u32 %v4813_v20, 16  ;;  %v4844_v32 = vshll.u32 %v4843_v14, 16 }
0x13e5   :  { %v11970_v27 = vadd.f32 %v11962_v57, %v4669_v2  ;;  %v8491_v8 = vpop.f32.mrb[86].mxu0  ;;  %8939 = vmatpush3.bf16.msra.mxu1 %v9349_v35 }
0x13e6   :  { %v11977_v7 = vadd.f32 %v11962_v57, %v8491_v8  ;;  %v4672_v29 = vpop.f32.mrb[87].mxu0  ;;  %v4826_v6 = vpop.xlane.xlu0 %4825  ;;  %8941 = vmatprep.subr.bf16.mxu1 %v9347_v33 }
0x13e7   :  { %v11984_v24 = vadd.f32 %v11962_v57, %v4672_v29  ;;  %v4827_v34 = vcvt.f32.s32 %v4826_v6 }
0x13e8   :  { %v4811_v56 = vpop.xlane.xlu1 %4810 }
0x13e9   :  { %v4830_v49 = vadd.s32 %v4829_v37, %v4827_v34  ;;  %v4812_v9 = vcvt.f32.s32 %v4811_v56  ;;  %8943 = vmatpush3.bf16.msra.mxu1 %v9347_v33 }
0x13ea   :  { %v4856_v54 = vpop.xlane.xlu0 %4855  ;;  %8945 = vmatprep.subr.bf16.mxu1 %v13426_v44 }
0x13eb   :  { %v4815_v47 = vadd.s32 %v4814_v4, %v4812_v9  ;;  %v8494_v26 = vpop.f32.mrb[88].mxu0  ;;  %v4857_v59 = vcvt.f32.s32 %v4856_v54  ;;  %vm4880_vm3 = vcmp.eq.s32.totalorder %v9171_v23, %v4830_v49  ;;  %v4874_v4 = vshll.u32 %v4873_v0, 16 }
0x13ec   :  { %v11995_v62 = vadd.f32 %v11962_v57, %v8494_v26  ;;  %v4685_v12 = vpop.f32.mrb[89].mxu0  ;;  %v4841_v43 = vpop.xlane.xlu1 %4840  ;;  %v11998_v3 = vsel %vm4880_vm3, inf, %v11748_v16  ;;  %v7503_v18 = vsel %vm4880_vm3, 1.0, %v13409_v41 }
0x13ed   :  { %v4860_v1 = vadd.s32 %v4859_v13, %v4857_v59  ;;  %v12002_v2 = vadd.f32 %v11962_v57, %v4685_v12  ;;  %v4842_v20 = vcvt.f32.s32 %v4841_v43  ;;  %v8495_v8 = vpop.f32.mrb[90].mxu0  ;;  %vm4879_vm5 = vcmp.eq.s32.totalorder %v9171_v23, %v4815_v47  ;;  %8947 = vmatpush3.bf16.msra.mxu1 %v13426_v44 }
0x13ee   :  { %v12009_v37 = vadd.f32 %v11962_v57, %v8495_v8  ;;  %v4688_v16 = vpop.f32.mrb[91].mxu0  ;;  %v7502_v45 = vsel %vm4879_vm5, 1.0, %v13409_v41  ;;  %v5154_v29 = vsel %vm433_vm4, %v11998_v3, inf  ;;  %8949 = vmatprep.subr.bf16.mxu1 %v13492_v15  ;;  %v12022_v56 = vsel %vm4879_vm5, inf, %v11774_v5 }
0x13ef   :  { %v4845_v14 = vadd.s32 %v4844_v32, %v4842_v20  ;;  %v12018_v34 = vadd.f32 %v11962_v57, %v4688_v16  ;;  %8516 = vmatmul.mubr.msk.f32.gmra.mrb[94].mxu1 %vm433_vm4, %v7502_v45  ;;  %5155 = vmin.xlane.f32.xlu0 %v5154_v29  ;;  %13503 = vst [vmem:[#allocation3_spill] sm:$0xff] %v12022_v56  ;;  %v5151_v9 = vsel %vm433_vm4, %v12022_v56, inf }
0x13f0   :  { %8518 = vmatprep.mubr.msk.f32.mxu1 %vm433_vm4, %v7503_v18  ;;  %v4871_v13 = vpop.xlane.xlu1 %4870  ;;  %vm4882_vm6 = vcmp.eq.s32.totalorder %v9171_v23, %v4860_v1  ;;  %5152 = vmin.xlane.f32.xlu1 %v5151_v9 }
0x13f1   :  { %13502 = vst [vmem:[#allocation5_spill] sm:$0xff] %v12018_v34  ;;  %v4872_v32 = vcvt.f32.s32 %v4871_v13  ;;  %vm4881_vm7 = vcmp.eq.s32.totalorder %v9171_v23, %v4845_v14  ;;  %v12034_v5 = vsel %vm4882_vm6, inf, %v11789_v51  ;;  %8951 = vmatpush3.bf16.msra.mxu1 %v13492_v15  ;;  %v7505_v0 = vsel %vm4882_vm6, 1.0, %v13409_v41 }
0x13f2   :  { %13504 = vst [vmem:[#allocation7_spill] sm:$0xff] %v12034_v5  ;;  %v7504_v47 = vsel %vm4881_vm7, 1.0, %v13409_v41  ;;  %v5160_v26 = vsel %vm433_vm4, %v12034_v5, inf  ;;  %v12041_v59 = vsel %vm4881_vm7, inf, %v11795_v50  ;;  %8953 = vmatprep.subr.bf16.mxu1 %v9349_v35  ;;  %v13506_v50 = vld [vmem:[#allocation2_spill] sm:$0xff] }
0x13f3   :  { %13505 = vst [vmem:[#allocation8_spill] sm:$0xff] %v12041_v59  ;;  %v4875_v12 = vadd.s32 %v4874_v4, %v4872_v32  ;;  %8519 = vmatmul.mubr.msk.f32.gmra.mrb[96].mxu1 %vm433_vm4, %v7504_v47  ;;  %5161 = vmin.xlane.f32.xlu0 %v5160_v26  ;;  %v5157_v51 = vsel %vm433_vm4, %v12041_v59, inf }
0x13f4   :  { %8521 = vmatprep.mubr.msk.f32.mxu1 %vm433_vm4, %v7505_v0  ;;  %5158 = vmin.xlane.f32.xlu1 %v5157_v51 }
0x13f5   :  { %vm4883_vm1 = vcmp.eq.s32.totalorder %v9171_v23, %v4875_v12 }
0x13f6   :  { %v7506_v43 = vsel %vm4883_vm1, 1.0, %v13409_v41  ;;  %v12052_v18 = vsel %vm4883_vm1, inf, %v13506_v50 }
0x13f7   :  { %13507 = vst [vmem:[#allocation9_spill] sm:$0xff] %v12052_v18  ;;  %8522 = vmatmul.mubr.msk.f32.gmra.mrb[98].mxu1 %vm433_vm4, %v7506_v43  ;;  %v5163_v1 = vsel %vm433_vm4, %v12052_v18, inf }
0x13f8   :  { %5164 = vmin.xlane.f32.xlu1 %v5163_v1 }
0x146a   :  { %v5144_v20 = vpop.xlane.xlu0 %5143 }
0x146b   :  { %vm5166_vm8 = vcmp.le.f32.partialorder %v11938_v19, %v5144_v20 }
0x146c   :  { %v5174_v8 = vsel %vm5166_vm8, %v9171_v23, 64 }
0x146d   :  { %v12060_v16 = vsel %vm433_vm4, %v5174_v8, 2147483647 }
0x146e   :  { %v5150_v45 = vpop.xlane.xlu0 %5149  ;;  %v5184_v29 = vshra.s32 %v12060_v16, 16 }
0x146f   :  { %vm5168_vm9 = vcmp.le.f32.partialorder %v11945_v38, %v5150_v45 }
0x1470   :  { %v5176_v14 = vsel %vm5168_vm9, %v9171_v23, 64  ;;  %v12065_v4 = vcvt.s32.f32 %v5184_v29 }
0x1471   :  { %v12068_v9 = vsel %vm433_vm4, %v5176_v14, 2147483647  ;;  %v5147_v13 = vpop.xlane.xlu1 %5146 }
0x1472   :  { %vm5167_vm10 = vcmp.le.f32.partialorder %v11954_v61, %v5147_v13  ;;  %5187 = vmin.xlane.f32.xlu0 %v12065_v4  ;;  %v5214_v32 = vshra.s32 %v12068_v9, 16 }
0x1473   :  { %v5175_v47 = vsel %vm5167_vm10, %v9171_v23, 64 }
0x1474   :  { %v12075_v26 = vsel %vm433_vm4, %v5175_v47, 2147483647  ;;  %v12077_v0 = vcvt.s32.f32 %v5214_v32 }
0x1475   :  { %v5199_v12 = vshra.s32 %v12075_v26, 16 }
0x1476   :  { %5217 = vmin.xlane.f32.xlu0 %v12077_v0 }
0x1477   :  { %v12081_v51 = vcvt.s32.f32 %v5199_v12 }
0x1479   :  { %5202 = vmin.xlane.f32.xlu1 %v12081_v51 }
0x147c   :  { %v5156_v43 = vpop.xlane.xlu0 %5155 }
0x147d   :  { %vm5170_vm11 = vcmp.le.f32.partialorder %v11998_v3, %v5156_v43  ;;  %v5153_v1 = vpop.xlane.xlu1 %5152 }
0x147e   :  { %v5178_v50 = vsel %vm5170_vm11, %v9171_v23, 64  ;;  %vm5169_vm12 = vcmp.le.f32.partialorder %v12022_v56, %v5153_v1 }
0x147f   :  { %v12087_v20 = vsel %vm433_vm4, %v5178_v50, 2147483647  ;;  %v5177_v8 = vsel %vm5169_vm12, %v9171_v23, 64 }
0x1480   :  { %v5162_v45 = vpop.xlane.xlu0 %5161  ;;  %v5244_v29 = vshra.s32 %v12087_v20, 16  ;;  %v12093_v14 = vsel %vm433_vm4, %v5177_v8, 2147483647 }
0x1481   :  { %vm5172_vm13 = vcmp.le.f32.partialorder %v12034_v5, %v5162_v45  ;;  %v5159_v32 = vpop.xlane.xlu1 %5158  ;;  %v5229_v12 = vshra.s32 %v12093_v14, 16 }
0x1482   :  { %v5180_v13 = vsel %vm5172_vm13, %v9171_v23, 64  ;;  %v12097_v47 = vcvt.s32.f32 %v5244_v29  ;;  %vm5171_vm14 = vcmp.le.f32.partialorder %v12041_v59, %v5159_v32 }
0x1483   :  { %v12101_v43 = vsel %vm433_vm4, %v5180_v13, 2147483647  ;;  %v5179_v50 = vsel %vm5171_vm14, %v9171_v23, 64  ;;  %v12106_v1 = vcvt.s32.f32 %v5229_v12 }
0x1484   :  { %5247 = vmin.xlane.f32.xlu0 %v12097_v47  ;;  %v5274_v8 = vshra.s32 %v12101_v43, 16  ;;  %v12110_v45 = vsel %vm433_vm4, %v5179_v50, 2147483647 }
0x1485   :  { %5232 = vmin.xlane.f32.xlu1 %v12106_v1  ;;  %v5165_v29 = vpop.xlane.xlu1 %5164  ;;  %v5259_v13 = vshra.s32 %v12110_v45, 16 }
0x1486   :  { %v12113_v54 = vcvt.s32.f32 %v5274_v8  ;;  %vm5173_vm15 = vcmp.le.f32.partialorder %v12052_v18, %v5165_v29 }
0x1487   :  { %v5181_v32 = vsel %vm5173_vm15, %v9171_v23, 64  ;;  %v12119_v12 = vcvt.s32.f32 %v5259_v13 }
0x1488   :  { %5277 = vmin.xlane.f32.xlu0 %v12113_v54  ;;  %v12122_v49 = vsel %vm433_vm4, %v5181_v32, 2147483647 }
0x1489   :  { %5262 = vmin.xlane.f32.xlu1 %v12119_v12  ;;  %v5289_v50 = vshra.s32 %v12122_v49, 16 }
0x148b   :  { %v12126_v6 = vcvt.s32.f32 %v5289_v50 }
0x148d   :  { %5292 = vmin.xlane.f32.xlu1 %v12126_v6 }
0x14b6   :  { %v8514_v8 = vpop.f32.mrb[92].mxu1 }
0x14b7   :  { %v5030_v29 = vadd.f32 %v8514_v8, %v13508_v21  ;;  %v4990_v40 = vpop.f32.mrb[93].mxu1 }
0x14b8   :  { %v5029_v28 = vadd.f32 %v4990_v40, %v13415_v52 }
0x14b9   :  { %v5038_v39 = vmax.f32 %v5030_v29, 0.0 }
0x14ba   :  { %v5037_v13 = vmax.f32 %v5029_v28, 0.0 }
0x14bc   :  { %v5045_v53 = vpack.c.bf16 %v5038_v39, %v5037_v13 }
0x14be   :  { %8532 = vmatprep.mubr.msk.bf16.mxu0 %vm433_vm4, %v5045_v53 }
0x14c2   :  { %v8517_v32 = vpop.f32.mrb[94].mxu1 }
0x14c3   :  { %v5032_v18 = vadd.f32 %v8517_v32, %v9583_v46  ;;  %v5000_v59 = vpop.f32.mrb[95].mxu1  ;;  %v12156_v32 = vld [vmem:[%s13351_s6 + $0x10] sm:$0xff]  }
0x14c4   :  { %v5031_v50 = vadd.f32 %v5000_v59, %v9587_v42  ;;  %v12141_v59 = vld [vmem:[%s13351_s6] sm:$0xff]  }
0x14c5   :  { %v5040_v5 = vmax.f32 %v5032_v18, 0.0 }
0x14c6   :  { %v5039_v56 = vmax.f32 %v5031_v50, 0.0  ;;  %v8520_v34 = vpop.f32.mrb[96].mxu1  ;;  %v12164_v50 = vld [vmem:[%s13351_s6 + $0x18] sm:$0xff]  }
0x14c7   :  { %v5034_v55 = vadd.f32 %v8520_v34, %v9591_v31  ;;  %v5010_v8 = vpop.f32.mrb[97].mxu1 }
0x14c8   :  { %v5046_v21 = vpack.c.bf16 %v5040_v5, %v5039_v56  ;;  %v5033_v40 = vadd.f32 %v5010_v8, %v9595_v30  ;;  %v5183_v8 = vand.u32 65535, %v12060_v16 }
0x14c9   :  { %v5042_v29 = vmax.f32 %v5034_v55, 0.0  ;;  %v12148_v55 = vld [vmem:[%s13351_s6 + $0x8] sm:$0xff]  }
0x14ca   :  { %v5041_v28 = vmax.f32 %v5033_v40, 0.0  ;;  %v8523_v39 = vpop.f32.mrb[98].mxu1  ;;  %8533 = vmatmul.mubr.msk.bf16.vlgmr.msra.gmra.mrb[92].mxu0 %vm433_vm4, %v5046_v21 }
0x14cb   :  { %v5036_v53 = vadd.f32 %v8523_v39, %v9600_v17  ;;  %v5020_v13 = vpop.f32.mrb[99].mxu1  ;;  %8569 = vmatpush3.bf16.msra.mxu0 %v12141_v59 }
0x14cc   :  { %v5047_v34 = vpack.c.bf16 %v5042_v29, %v5041_v28  ;;  %v5035_v56 = vadd.f32 %v5020_v13, %v9604_v22  ;;  %8570 = vmatprep.subr.bf16.mxu0 %v12148_v55  ;;  %v5185_v29 = vcvt.s32.f32 %v5183_v8  ;;  %v5213_v28 = vand.u32 65535, %v12068_v9 }
0x14cd   :  { %v5044_v21 = vmax.f32 %v5036_v53, 0.0  ;;  %v5198_v53 = vand.u32 65535, %v12075_v26  ;;  %v5243_v9 = vand.u32 65535, %v12087_v20  ;;  %v5273_v26 = vand.u32 65535, %v12101_v43 }
0x14ce   :  { %v5043_v5 = vmax.f32 %v5035_v56, 0.0  ;;  %8536 = vmatprep.mubr.msk.bf16.mxu0 %vm433_vm4, %v5047_v34  ;;  %v5215_v34 = vcvt.s32.f32 %v5213_v28 }
0x14cf   :  { %8571 = vmatpush3.bf16.msra.mxu0 %v12148_v55  ;;  %v5245_v8 = vcvt.s32.f32 %v5243_v9 }
0x14d0   :  { %v5048_v18 = vpack.c.bf16 %v5044_v21, %v5043_v5  ;;  %8572 = vmatprep.subr.bf16.mxu0 %v12156_v32  ;;  %v5200_v5 = vcvt.s32.f32 %v5198_v53 }
0x14d2   :  { %8537 = vmatmul.mubr.msk.bf16.gmra.mrb[96].mxu0 %vm433_vm4, %v5048_v18 }
0x14d3   :  { %8573 = vmatpush3.bf16.msra.mxu0 %v12156_v32 }
0x14d4   :  { %8574 = vmatprep.subr.bf16.mxu0 %v12164_v50 }
0x14d7   :  { %8575 = vmatpush3.bf16.msra.mxu0 %v12164_v50 }
0x14d8   :  { %8612 = vmatprep.subr.bf16.mxu0 %v12141_v59 }
0x14ff   :  { %v5188_v40 = vpop.xlane.xlu0 %5187 }
0x1500   :  { %vm5189_vm0 = vcmp.eq.f32.partialorder %v12065_v4, %v5188_v40  ;;  %v5228_v4 = vand.u32 65535, %v12093_v14 }
0x1501   :  { %v5190_v39 = vsel %vm5189_vm0, %v5185_v29, inf }
0x1502   :  { %5191 = vmin.xlane.f32.xlu0 %v5190_v39  ;;  %v5230_v28 = vcvt.s32.f32 %v5228_v4  ;;  %v5275_v39 = vcvt.s32.f32 %v5273_v26 }
0x1503   :  { %v5218_v13 = vpop.xlane.xlu0 %5217 }
0x1504   :  { %vm5219_vm2 = vcmp.eq.f32.partialorder %v12077_v0, %v5218_v13  ;;  %v5224_v4 = vcvt.f32.s32 %v5218_v13 }
0x1505   :  { %v5220_v56 = vsel %vm5219_vm2, %v5215_v34, inf  ;;  %v5288_v34 = vand.u32 65535, %v12122_v49 }
0x1506   :  { %v5203_v21 = vpop.xlane.xlu1 %5202  ;;  %5221 = vmin.xlane.f32.xlu0 %v5220_v56 }
0x1507   :  { %vm5204_vm3 = vcmp.eq.f32.partialorder %v12081_v51, %v5203_v21  ;;  %v5258_v51 = vand.u32 65535, %v12110_v45  ;;  %v5290_v56 = vcvt.s32.f32 %v5288_v34  ;;  %v5209_v26 = vcvt.f32.s32 %v5203_v21 }
0x1508   :  { %v5205_v16 = vsel %vm5204_vm3, %v5200_v5, inf }
0x1509   :  { %5206 = vmin.xlane.f32.xlu1 %v5205_v16  ;;  %v5260_v53 = vcvt.s32.f32 %v5258_v51  ;;  %v5210_v13 = vshll.u32 %v5209_v26, 16 }
0x1511   :  { %v12177_v18 = vpop.xlane.xlu0 %5247 }
0x1512   :  { %vm5249_vm5 = vcmp.eq.f32.partialorder %v12097_v47, %v12177_v18  ;;  %v12182_v0 = vpop.xlane.xlu1 %5232 }
0x1513   :  { %v5250_v29 = vsel %vm5249_vm5, %v5245_v8, inf  ;;  %vm5234_vm6 = vcmp.eq.f32.partialorder %v12106_v1, %v12182_v0 }
0x1514   :  { %5251 = vmin.xlane.f32.xlu0 %v5250_v29  ;;  %v5235_v20 = vsel %vm5234_vm6, %v5230_v28, inf  ;;  %v5225_v28 = vshll.u32 %v5224_v4, 16 }
0x1515   :  { %v12187_v14 = vpop.xlane.xlu0 %5277  ;;  %5236 = vmin.xlane.f32.xlu1 %v5235_v20 }
0x1516   :  { %vm5279_vm7 = vcmp.eq.f32.partialorder %v12113_v54, %v12187_v14  ;;  %v12191_v43 = vpop.xlane.xlu1 %5262  ;;  %v5194_v54 = vcvt.f32.s32 %v5188_v40 }
0x1517   :  { %v5280_v47 = vsel %vm5279_vm7, %v5275_v39, inf  ;;  %vm5264_vm1 = vcmp.eq.f32.partialorder %v12119_v12, %v12191_v43 }
0x1518   :  { %5281 = vmin.xlane.f32.xlu0 %v5280_v47  ;;  %v5265_v45 = vsel %vm5264_vm1, %v5260_v53, inf  ;;  %v5195_v9 = vshll.u32 %v5194_v54, 16  ;;  %v5254_v54 = vcvt.f32.s32 %v12177_v18 }
0x1519   :  { %5266 = vmin.xlane.f32.xlu1 %v5265_v45 }
0x151a   :  { %v12196_v1 = vpop.xlane.xlu1 %5292 }
0x151b   :  { %vm5294_vm8 = vcmp.eq.f32.partialorder %v12126_v6, %v12196_v1 }
0x151c   :  { %v5295_v5 = vsel %vm5294_vm8, %v5290_v56, inf }
0x151d   :  { %5296 = vmin.xlane.f32.xlu1 %v5295_v5 }
0x158f   :  { %v5192_v16 = vpop.xlane.xlu0 %5191 }
0x1590   :  { %v5193_v8 = vcvt.f32.s32 %v5192_v16 }
0x1592   :  { %v5196_v49 = vadd.s32 %v5195_v9, %v5193_v8 }
0x1593   :  { %v5222_v29 = vpop.xlane.xlu0 %5221 }
0x1594   :  { %v5223_v12 = vcvt.f32.s32 %v5222_v29  ;;  %vm5302_vm9 = vcmp.eq.s32.totalorder %v9171_v23, %v5196_v49  ;;  %v13509_v49 = vmax.f32 %v11717_v36, %v11965_v11  ;;  %v5255_v36 = vshll.u32 %v5254_v54, 16 }
0x1595   :  { %v7519_v51 = vsel %vm5302_vm9, 1.0, %v13409_v41  ;;  %v12203_v20 = vsel %vm5302_vm9, inf, %v11938_v19  ;;  %v13511_v11 = vmax.f32 %v11733_v63, %v11977_v7 }
0x1596   :  { %v5226_v6 = vadd.s32 %v5225_v28, %v5223_v12  ;;  %v5207_v39 = vpop.xlane.xlu1 %5206  ;;  %8556 = vmatprep.mubr.msk.f32.mxu1 %vm433_vm4, %v7519_v51  ;;  %v5568_v40 = vsel %vm433_vm4, %v12203_v20, inf  ;;  %v5284_v28 = vcvt.f32.s32 %v12187_v14  ;;  %v5269_v12 = vcvt.f32.s32 %v12191_v43 }
0x1597   :  { %v5208_v47 = vcvt.f32.s32 %v5207_v39  ;;  %5569 = vmin.xlane.f32.xlu0 %v5568_v40  ;;  %v13510_v51 = vmax.f32 %v11726_v58, %v11970_v27  ;;  %v13512_v14 = vmax.f32 %v11739_v10, %v11984_v24  ;;  %v5299_v10 = vcvt.f32.s32 %v12196_v1 }
0x1598   :  { %vm5304_vm10 = vcmp.eq.s32.totalorder %v9171_v23, %v5226_v6 }
0x1599   :  { %v5211_v21 = vadd.s32 %v5210_v13, %v5208_v47  ;;  %v12210_v53 = vsel %vm5304_vm10, inf, %v11945_v38  ;;  %v7521_v34 = vsel %vm5304_vm10, 1.0, %v13409_v41 }
0x159a   :  { %v5574_v19 = vsel %vm433_vm4, %v12210_v53, inf }
0x159b   :  { %vm5303_vm11 = vcmp.eq.s32.totalorder %v9171_v23, %v5211_v21  ;;  %5575 = vmin.xlane.f32.xlu0 %v5574_v19  ;;  %v5285_v19 = vshll.u32 %v5284_v28, 16 }
0x159c   :  { %v7520_v45 = vsel %vm5303_vm11, 1.0, %v13409_v41  ;;  %v12218_v56 = vsel %vm5303_vm11, inf, %v11954_v61  ;;  %v5239_v61 = vcvt.f32.s32 %v12182_v0 }
0x159d   :  { %v8534_v5 = vpop.f32.mrb[92].mxu0  ;;  %8557 = vmatmul.mubr.msk.f32.vlgmr.msra.gmra.mrb[100].mxu1 %vm433_vm4, %v7520_v45  ;;  %v5571_v38 = vsel %vm433_vm4, %v12218_v56, inf }
0x159e   :  { %v5104_v16 = vadd.f32 %v11962_v57, %v8534_v5  ;;  %v5095_v9 = vpop.f32.mrb[93].mxu0  ;;  %5572 = vmin.xlane.f32.xlu1 %v5571_v38  ;;  %8559 = vmatprep.mubr.msk.f32.mxu1 %vm433_vm4, %v7521_v34  ;;  %v5240_v58 = vshll.u32 %v5239_v61, 16  ;;  %v5270_v34 = vshll.u32 %v5269_v12, 16  ;;  %v13513_v61 = vmax.f32 %v11754_v48, %v11995_v62 }
0x159f   :  { %v5096_v4 = vadd.f32 %v11962_v57, %v5095_v9  ;;  %v8535_v8 = vpop.f32.mrb[94].mxu0  ;;  %8955 = vmatpush3.bf16.msra.mxu1 %v9349_v35 }
0x15a0   :  { %v12232_v26 = vmax.f32 %v13509_v49, %v5104_v16  ;;  %v5107_v18 = vadd.f32 %v11962_v57, %v8535_v8  ;;  %v5098_v29 = vpop.f32.mrb[95].mxu0  ;;  %8957 = vmatprep.subr.bf16.mxu1 %v9347_v33 }
0x15a1   :  { %v12241_v6 = vmax.f32 %v13510_v51, %v5096_v4  ;;  %v5099_v0 = vadd.f32 %v11962_v57, %v5098_v29  ;;  %v5252_v39 = vpop.xlane.xlu0 %5251 }
0x15a2   :  { %v12247_v40 = vmax.f32 %v13511_v11, %v5107_v18  ;;  %v5253_v13 = vcvt.f32.s32 %v5252_v39  ;;  %v5237_v43 = vpop.xlane.xlu1 %5236  ;;  %v13517_v11 = vld [vmem:[#allocation5_spill] sm:$0xff] }
0x15a3   :  { %v12252_v47 = vmax.f32 %v13512_v14, %v5099_v0  ;;  %8959 = vmatpush3.bf16.msra.mxu1 %v9347_v33  ;;  %v5238_v21 = vcvt.f32.s32 %v5237_v43  ;;  %v13515_v0 = vmax.f32 %v11770_v25, %v12009_v37  ;;  %v13520_v14 = vld [vmem:[#allocation3_spill] sm:$0xff] }
0x15a4   :  { %v5256_v27 = vadd.s32 %v5255_v36, %v5253_v13  ;;  %8961 = vmatprep.subr.bf16.mxu1 %v13426_v44 }
0x15a5   :  { %v8538_v45 = vpop.f32.mrb[96].mxu0  ;;  %v5282_v63 = vpop.xlane.xlu0 %5281  ;;  %v5241_v7 = vadd.s32 %v5240_v58, %v5238_v21 }
0x15a6   :  { %v5120_v5 = vadd.f32 %v11962_v57, %v8538_v45  ;;  %v5283_v38 = vcvt.f32.s32 %v5282_v63  ;;  %v5111_v54 = vpop.f32.mrb[97].mxu0  ;;  %vm5306_vm12 = vcmp.eq.s32.totalorder %v9171_v23, %v5256_v27  ;;  %v5267_v16 = vpop.xlane.xlu1 %5266  ;;  %v13521_v27 = vld [vmem:[#allocation7_spill] sm:$0xff]  ;;  %v13522_v45 = vld [vmem:[#allocation8_spill] sm:$0xff] }
0x15a7   :  { %v5112_v24 = vadd.f32 %v11962_v57, %v5111_v54  ;;  %v8539_v9 = vpop.f32.mrb[98].mxu0  ;;  %v12261_v4 = vsel %vm5306_vm12, inf, %v11998_v3  ;;  %v7523_v8 = vsel %vm5306_vm12, 1.0, %v13409_v41  ;;  %8963 = vmatpush3.bf16.msra.mxu1 %v13426_v44  ;;  %v5268_v29 = vcvt.f32.s32 %v5267_v16 }
0x15a8   :  { %v12268_v49 = vmax.f32 %v13513_v61, %v5120_v5  ;;  %v5286_v18 = vadd.s32 %v5285_v19, %v5283_v38  ;;  %v5123_v1 = vadd.f32 %v11962_v57, %v8539_v9  ;;  %v5114_v28 = vpop.f32.mrb[99].mxu0  ;;  %8965 = vmatprep.subr.bf16.mxu1 %v13492_v15  ;;  %v13514_v3 = vmax.f32 %v11760_v60, %v12002_v2  ;;  %v13516_v2 = vld [vmem:[#allocation6_spill] sm:$0xff] }
0x15a9   :  { %v5115_v51 = vadd.f32 %v11962_v57, %v5114_v28  ;;  %vm5305_vm13 = vcmp.eq.s32.totalorder %v9171_v23, %v5241_v7  ;;  %v5580_v48 = vsel %vm433_vm4, %v12261_v4, inf  ;;  %v5271_v62 = vadd.s32 %v5270_v34, %v5268_v29 }
0x15aa   :  { %v12275_v12 = vmax.f32 %v13514_v3, %v5112_v24  ;;  %vm5308_vm14 = vcmp.eq.s32.totalorder %v9171_v23, %v5286_v18  ;;  %v12285_v39 = vmax.f32 %v13515_v0, %v5123_v1  ;;  %v7522_v36 = vsel %vm5305_vm13, 1.0, %v13409_v41  ;;  %5581 = vmin.xlane.f32.xlu0 %v5580_v48  ;;  %v5297_v58 = vpop.xlane.xlu1 %5296 }
0x15ab   :  { %v5300_v60 = vshll.u32 %v5299_v10, 16  ;;  %v13518_v57 = vmax.f32 %v13516_v2, %v13517_v11  ;;  %8560 = vmatmul.mubr.msk.f32.gmra.mrb[102].mxu1 %vm433_vm4, %v7522_v36  ;;  %v12295_v43 = vsel %vm5305_vm13, inf, %v13520_v14  ;;  %v12300_v25 = vsel %vm5308_vm14, inf, %v13521_v27  ;;  %v13523_v10 = vld [vmem:[#allocation9_spill] sm:$0xff] }
0x15ac   :  { %v5577_v37 = vsel %vm433_vm4, %v12295_v43, inf  ;;  %8562 = vmatprep.mubr.msk.f32.mxu1 %vm433_vm4, %v7523_v8  ;;  %v5298_v21 = vcvt.f32.s32 %v5297_v58  ;;  %vm5307_vm15 = vcmp.eq.s32.totalorder %v9171_v23, %v5271_v62  ;;  %v5586_v19 = vsel %vm433_vm4, %v12300_v25, inf  ;;  %8967 = vmatpush3.bf16.msra.mxu1 %v13492_v15 }
0x15ad   :  { %v12291_v13 = vmax.f32 %v13518_v57, %v5115_v51  ;;  %5578 = vmin.xlane.f32.xlu1 %v5577_v37  ;;  %v7524_v34 = vsel %vm5307_vm15, 1.0, %v13409_v41  ;;  %v12311_v63 = vsel %vm5307_vm15, inf, %v13522_v45  ;;  %v7525_v7 = vsel %vm5308_vm14, 1.0, %v13409_v41  ;;  %8969 = vmatprep.subr.bf16.mxu1 %v9349_v35 }
0x15ae   :  { %v5301_v5 = vadd.s32 %v5300_v60, %v5298_v21  ;;  %5587 = vmin.xlane.f32.xlu0 %v5586_v19  ;;  %v5583_v38 = vsel %vm433_vm4, %v12311_v63, inf }
0x15af   :  { %13519 = vst [vmem:[#allocation2_spill] sm:$0xff] %v12291_v13  ;;  %8563 = vmatmul.mubr.msk.f32.gmra.mrb[104].mxu1 %vm433_vm4, %v7524_v34 }
0x15b0   :  { %8565 = vmatprep.mubr.msk.f32.mxu1 %vm433_vm4, %v7525_v7  ;;  %vm5309_vm0 = vcmp.eq.s32.totalorder %v9171_v23, %v5301_v5 }
0x15b1   :  { %5584 = vmin.xlane.f32.xlu1 %v5583_v38  ;;  %v7526_v54 = vsel %vm5309_vm0, 1.0, %v13409_v41  ;;  %v12324_v24 = vsel %vm5309_vm0, inf, %v13523_v10 }
0x15b2   :  { %13524 = vst [vmem:[#allocation6_spill] sm:$0xff] %v12324_v24  ;;  %v5589_v16 = vsel %vm433_vm4, %v12324_v24, inf }
0x15b3   :  { %8566 = vmatmul.mubr.msk.f32.gmra.mrb[106].mxu1 %vm433_vm4, %v7526_v54 }
0x15b5   :  { %5590 = vmin.xlane.f32.xlu1 %v5589_v16 }
0x1624   :  { %v5570_v9 = vpop.xlane.xlu0 %5569 }
0x1625   :  { %vm5592_vm2 = vcmp.le.f32.partialorder %v12203_v20, %v5570_v9 }
0x1626   :  { %v5600_v8 = vsel %vm5592_vm2, %v9171_v23, 64 }
0x1627   :  { %v12332_v61 = vsel %vm433_vm4, %v5600_v8, 2147483647 }
0x1628   :  { %v5610_v18 = vshra.s32 %v12332_v61, 16  ;;  %v5576_v29 = vpop.xlane.xlu0 %5575 }
0x1629   :  { %vm5594_vm3 = vcmp.le.f32.partialorder %v12210_v53, %v5576_v29 }
0x162a   :  { %v5602_v1 = vsel %vm5594_vm3, %v9171_v23, 64  ;;  %v12337_v28 = vcvt.s32.f32 %v5610_v18 }
0x162b   :  { %v12340_v3 = vsel %vm433_vm4, %v5602_v1, 2147483647  ;;  %v5573_v51 = vpop.xlane.xlu1 %5572 }
0x162c   :  { %v5640_v48 = vshra.s32 %v12340_v3, 16  ;;  %vm5593_vm5 = vcmp.le.f32.partialorder %v12218_v56, %v5573_v51  ;;  %5613 = vmin.xlane.f32.xlu0 %v12337_v28 }
0x162d   :  { %v5601_v62 = vsel %vm5593_vm5, %v9171_v23, 64 }
0x162e   :  { %v12347_v0 = vsel %vm433_vm4, %v5601_v62, 2147483647  ;;  %v12349_v36 = vcvt.s32.f32 %v5640_v48 }
0x162f   :  { %v5625_v60 = vshra.s32 %v12347_v0, 16 }
0x1630   :  { %5643 = vmin.xlane.f32.xlu0 %v12349_v36 }
0x1631   :  { %v12353_v2 = vcvt.s32.f32 %v5625_v60 }
0x1633   :  { %5628 = vmin.xlane.f32.xlu1 %v12353_v2 }
0x1637   :  { %v5582_v11 = vpop.xlane.xlu0 %5581 }
0x1638   :  { %vm5596_vm6 = vcmp.le.f32.partialorder %v12261_v4, %v5582_v11 }
0x1639   :  { %v5604_v57 = vsel %vm5596_vm6, %v9171_v23, 64 }
0x163a   :  { %v12359_v14 = vsel %vm433_vm4, %v5604_v57, 2147483647  ;;  %v5579_v58 = vpop.xlane.xlu1 %5578  ;;  %v13525_v57 = vld [vmem:[#allocation4_spill] sm:$0xff] }
0x163b   :  { %v5670_v27 = vshra.s32 %v12359_v14, 16  ;;  %vm5595_vm7 = vcmp.le.f32.partialorder %v12295_v43, %v5579_v58  ;;  %v5588_v37 = vpop.xlane.xlu0 %5587 }
0x163c   :  { %v5603_v21 = vsel %vm5595_vm7, %v9171_v23, 64  ;;  %vm5598_vm1 = vcmp.le.f32.partialorder %v12300_v25, %v5588_v37 }
0x163d   :  { %v12366_v19 = vsel %vm433_vm4, %v5603_v21, 2147483647  ;;  %v5606_v34 = vsel %vm5598_vm1, %v9171_v23, 64  ;;  %v12369_v45 = vcvt.s32.f32 %v5670_v27 }
0x163e   :  { %v5655_v7 = vshra.s32 %v12366_v19, 16  ;;  %v12373_v5 = vsel %vm433_vm4, %v5606_v34, 2147483647  ;;  %v5585_v38 = vpop.xlane.xlu1 %5584 }
0x163f   :  { %v5700_v54 = vshra.s32 %v12373_v5, 16  ;;  %vm5597_vm8 = vcmp.le.f32.partialorder %v12311_v63, %v5585_v38  ;;  %5673 = vmin.xlane.f32.xlu0 %v12369_v45 }
0x1640   :  { %v5605_v10 = vsel %vm5597_vm8, %v9171_v23, 64  ;;  %v12379_v16 = vcvt.s32.f32 %v5655_v7 }
0x1641   :  { %v12382_v9 = vsel %vm433_vm4, %v5605_v10, 2147483647  ;;  %v12384_v8 = vcvt.s32.f32 %v5700_v54 }
0x1642   :  { %v5685_v18 = vshra.s32 %v12382_v9, 16  ;;  %5658 = vmin.xlane.f32.xlu1 %v12379_v16  ;;  %v5591_v29 = vpop.xlane.xlu1 %5590 }
0x1643   :  { %vm5599_vm9 = vcmp.le.f32.partialorder %v12324_v24, %v5591_v29  ;;  %5703 = vmin.xlane.f32.xlu0 %v12384_v8 }
0x1644   :  { %v5607_v1 = vsel %vm5599_vm9, %v9171_v23, 64  ;;  %v12391_v51 = vcvt.s32.f32 %v5685_v18 }
0x1645   :  { %v12394_v48 = vsel %vm433_vm4, %v5607_v1, 2147483647 }
0x1646   :  { %v5715_v62 = vshra.s32 %v12394_v48, 16  ;;  %5688 = vmin.xlane.f32.xlu1 %v12391_v51 }
0x1648   :  { %v12398_v60 = vcvt.s32.f32 %v5715_v62 }
0x164a   :  { %5718 = vmin.xlane.f32.xlu1 %v12398_v60 }
0x1670   :  { %v8558_v11 = vpop.f32.mrb[100].mxu1 }
0x1671   :  { %v5456_v58 = vadd.f32 %v8558_v11, %v13525_v57  ;;  %v5416_v27 = vpop.f32.mrb[101].mxu1 }
0x1672   :  { %v5455_v37 = vadd.f32 %v5416_v27, %v13415_v52 }
0x1673   :  { %v5464_v21 = vmax.f32 %v5456_v58, 0.0 }
0x1674   :  { %v5463_v34 = vmax.f32 %v5455_v37, 0.0 }
0x1676   :  { %v5471_v7 = vpack.c.bf16 %v5464_v21, %v5463_v34 }
0x1678   :  { %8576 = vmatprep.mubr.msk.bf16.mxu0 %vm433_vm4, %v5471_v7 }
0x167e   :  { %v8561_v38 = vpop.f32.mrb[102].mxu1 }
0x167f   :  { %v5458_v54 = vadd.f32 %v8561_v38, %v9583_v46  ;;  %v5426_v10 = vpop.f32.mrb[103].mxu1 }
0x1680   :  { %v5457_v18 = vadd.f32 %v5426_v10, %v9587_v42 }
0x1681   :  { %v5466_v29 = vmax.f32 %v5458_v54, 0.0 }
0x1682   :  { %v5465_v1 = vmax.f32 %v5457_v18, 0.0  ;;  %v8564_v62 = vpop.f32.mrb[104].mxu1 }
0x1683   :  { %v5460_v24 = vadd.f32 %v8564_v62, %v9591_v31  ;;  %v5436_v11 = vpop.f32.mrb[105].mxu1 }
0x1684   :  { %v5472_v57 = vpack.c.bf16 %v5466_v29, %v5465_v1  ;;  %v5459_v27 = vadd.f32 %v5436_v11, %v9595_v30  ;;  %v5639_v29 = vand.u32 65535, %v12340_v3  ;;  %v5624_v11 = vand.u32 65535, %v12347_v0 }
0x1685   :  { %v5468_v58 = vmax.f32 %v5460_v24, 0.0  ;;  %v5669_v3 = vand.u32 65535, %v12359_v14 }
0x1686   :  { %v5467_v37 = vmax.f32 %v5459_v27, 0.0  ;;  %v8567_v21 = vpop.f32.mrb[106].mxu1  ;;  %8577 = vmatmul.mubr.msk.bf16.vlgmr.msra.gmra.mrb[100].mxu0 %vm433_vm4, %v5472_v57  ;;  %v5609_v57 = vand.u32 65535, %v12332_v61 }
0x1687   :  { %v5462_v34 = vadd.f32 %v8567_v21, %v9600_v17  ;;  %v5446_v7 = vpop.f32.mrb[107].mxu1  ;;  %8613 = vmatpush3.bf16.msra.mxu0 %v12141_v59  ;;  %v5671_v21 = vcvt.s32.f32 %v5669_v3 }
0x1688   :  { %v5473_v38 = vpack.c.bf16 %v5468_v58, %v5467_v37  ;;  %v5461_v54 = vadd.f32 %v5446_v7, %v9604_v22  ;;  %8614 = vmatprep.subr.bf16.mxu0 %v12148_v55  ;;  %v5611_v62 = vcvt.s32.f32 %v5609_v57  ;;  %v5699_v37 = vand.u32 65535, %v12373_v5 }
0x1689   :  { %v5470_v10 = vmax.f32 %v5462_v34, 0.0  ;;  %v5684_v34 = vand.u32 65535, %v12382_v9 }
0x168a   :  { %v5469_v18 = vmax.f32 %v5461_v54, 0.0  ;;  %8580 = vmatprep.mubr.msk.bf16.mxu0 %vm433_vm4, %v5473_v38 }
0x168b   :  { %8615 = vmatpush3.bf16.msra.mxu0 %v12148_v55  ;;  %v5686_v9 = vcvt.s32.f32 %v5684_v34 }
0x168c   :  { %v5474_v24 = vpack.c.bf16 %v5470_v10, %v5469_v18  ;;  %8616 = vmatprep.subr.bf16.mxu0 %v12156_v32 }
0x168e   :  { %8581 = vmatmul.mubr.msk.bf16.gmra.mrb[104].mxu0 %vm433_vm4, %v5474_v24 }
0x168f   :  { %8617 = vmatpush3.bf16.msra.mxu0 %v12156_v32  ;;  %v5641_v32 = vcvt.s32.f32 %v5639_v29 }
0x1690   :  { %8618 = vmatprep.subr.bf16.mxu0 %v12164_v50 }
0x1693   :  { %8619 = vmatpush3.bf16.msra.mxu0 %v12164_v50 }
0x1694   :  { %8656 = vmatprep.subr.bf16.mxu0 %v12141_v59  ;;  %v5626_v59 = vcvt.s32.f32 %v5624_v11 }
0x16b9   :  { %v5614_v1 = vpop.xlane.xlu0 %5613 }
0x16ba   :  { %vm5615_vm10 = vcmp.eq.f32.partialorder %v12337_v28, %v5614_v1  ;;  %v5654_v28 = vand.u32 65535, %v12366_v19  ;;  %v5701_v19 = vcvt.s32.f32 %v5699_v37  ;;  %v5620_v24 = vcvt.f32.s32 %v5614_v1 }
0x16bb   :  { %v5616_v55 = vsel %vm5615_vm10, %v5611_v62, inf }
0x16bc   :  { %5617 = vmin.xlane.f32.xlu0 %v5616_v55 }
0x16bd   :  { %v5644_v27 = vpop.xlane.xlu0 %5643 }
0x16be   :  { %vm5645_vm11 = vcmp.eq.f32.partialorder %v12349_v36, %v5644_v27  ;;  %v5650_v29 = vcvt.f32.s32 %v5644_v27 }
0x16bf   :  { %v5646_v58 = vsel %vm5645_vm11, %v5641_v32, inf }
0x16c0   :  { %v5629_v50 = vpop.xlane.xlu1 %5628  ;;  %5647 = vmin.xlane.f32.xlu0 %v5646_v58  ;;  %v5651_v58 = vshll.u32 %v5650_v29, 16 }
0x16c1   :  { %vm5630_vm12 = vcmp.eq.f32.partialorder %v12353_v2, %v5629_v50  ;;  %v5656_v2 = vcvt.s32.f32 %v5654_v28  ;;  %v5635_v11 = vcvt.f32.s32 %v5629_v50 }
0x16c2   :  { %v5631_v61 = vsel %vm5630_vm12, %v5626_v59, inf }
0x16c3   :  { %5632 = vmin.xlane.f32.xlu1 %v5631_v61  ;;  %v5636_v27 = vshll.u32 %v5635_v11, 16 }
0x16cc   :  { %v12430_v0 = vpop.xlane.xlu0 %5673 }
0x16cd   :  { %vm5675_vm13 = vcmp.eq.f32.partialorder %v12369_v45, %v12430_v0  ;;  %v5714_v45 = vand.u32 65535, %v12394_v48  ;;  %v5621_v48 = vshll.u32 %v5620_v24, 16 }
0x16ce   :  { %v5676_v36 = vsel %vm5675_vm13, %v5671_v21, inf }
0x16cf   :  { %v12435_v7 = vpop.xlane.xlu1 %5658  ;;  %5677 = vmin.xlane.f32.xlu0 %v5676_v36  ;;  %v5716_v18 = vcvt.s32.f32 %v5714_v45 }
0x16d0   :  { %vm5660_vm14 = vcmp.eq.f32.partialorder %v12379_v16, %v12435_v7  ;;  %v12439_v14 = vpop.xlane.xlu0 %5703 }
0x16d1   :  { %v5661_v5 = vsel %vm5660_vm14, %v5656_v2, inf  ;;  %vm5705_vm15 = vcmp.eq.f32.partialorder %v12384_v8, %v12439_v14  ;;  %v5680_v2 = vcvt.f32.s32 %v12430_v0 }
0x16d2   :  { %5662 = vmin.xlane.f32.xlu1 %v5661_v5  ;;  %v5706_v38 = vsel %vm5705_vm15, %v5701_v19, inf  ;;  %v12481_v5 = vld [vmem:[%s13353_s7] ss:$0 sm:$0xff] }
0x16d3   :  { %v12444_v54 = vpop.xlane.xlu1 %5688  ;;  %5707 = vmin.xlane.f32.xlu0 %v5706_v38  ;;  %v5681_v38 = vshll.u32 %v5680_v2, 16 }
0x16d4   :  { %vm5690_vm0 = vcmp.eq.f32.partialorder %v12391_v51, %v12444_v54  ;;  %v5695_v29 = vcvt.f32.s32 %v12444_v54 }
0x16d5   :  { %v5691_v10 = vsel %vm5690_vm0, %v5686_v9, inf }
0x16d6   :  { %5692 = vmin.xlane.f32.xlu1 %v5691_v10  ;;  %v5665_v10 = vcvt.f32.s32 %v12435_v7 }
0x16d7   :  { %v12448_v16 = vpop.xlane.xlu1 %5718 }
0x16d8   :  { %vm5720_vm2 = vcmp.eq.f32.partialorder %v12398_v60, %v12448_v16  ;;  %v5666_v54 = vshll.u32 %v5665_v10, 16 }
0x16d9   :  { %v5721_v8 = vsel %vm5720_vm2, %v5716_v18, inf  ;;  %v5710_v18 = vcvt.f32.s32 %v12439_v14 }
0x16da   :  { %5722 = vmin.xlane.f32.xlu1 %v5721_v8 }
0x1749   :  { %v5618_v57 = vpop.xlane.xlu0 %5617 }
0x174a   :  { %v5619_v62 = vcvt.f32.s32 %v5618_v57 }
0x174c   :  { %v5622_v55 = vadd.s32 %v5621_v48, %v5619_v62 }
0x174d   :  { %v5648_v32 = vpop.xlane.xlu0 %5647 }
0x174e   :  { %v5649_v51 = vcvt.f32.s32 %v5648_v32  ;;  %vm5728_vm3 = vcmp.eq.s32.totalorder %v9171_v23, %v5622_v55 }
0x174f   :  { %v7539_v59 = vsel %vm5728_vm3, 1.0, %v13409_v41  ;;  %v12455_v61 = vsel %vm5728_vm3, inf, %v12203_v20 }
0x1750   :  { %v5652_v60 = vadd.s32 %v5651_v58, %v5649_v51  ;;  %v5633_v3 = vpop.xlane.xlu1 %5632  ;;  %8600 = vmatprep.mubr.msk.f32.mxu1 %vm433_vm4, %v7539_v59  ;;  %v5994_v1 = vsel %vm433_vm4, %v12455_v61, inf }
0x1751   :  { %v5634_v28 = vcvt.f32.s32 %v5633_v3  ;;  %5995 = vmin.xlane.f32.xlu0 %v5994_v1  ;;  %v5696_v3 = vshll.u32 %v5695_v29, 16 }
0x1752   :  { %vm5730_vm5 = vcmp.eq.s32.totalorder %v9171_v23, %v5652_v60  ;;  %v5711_v60 = vshll.u32 %v5710_v18, 16 }
0x1753   :  { %v5637_v50 = vadd.s32 %v5636_v27, %v5634_v28  ;;  %v12462_v37 = vsel %vm5730_vm5, inf, %v12210_v53  ;;  %v7541_v21 = vsel %vm5730_vm5, 1.0, %v13409_v41  ;;  %v5725_v28 = vcvt.f32.s32 %v12448_v16 }
0x1754   :  { %v6000_v20 = vsel %vm433_vm4, %v12462_v37, inf }
0x1755   :  { %vm5729_vm6 = vcmp.eq.s32.totalorder %v9171_v23, %v5637_v50  ;;  %6001 = vmin.xlane.f32.xlu0 %v6000_v20 }
0x1756   :  { %v7540_v36 = vsel %vm5729_vm6, 1.0, %v13409_v41  ;;  %v12470_v34 = vsel %vm5729_vm6, inf, %v12218_v56 }
0x1757   :  { %8601 = vmatmul.mubr.msk.f32.vlgmr.msra.gmra.mrb[108].mxu1 %vm433_vm4, %v7540_v36  ;;  %v5997_v53 = vsel %vm433_vm4, %v12470_v34, inf }
0x1758   :  { %5998 = vmin.xlane.f32.xlu1 %v5997_v53  ;;  %8603 = vmatprep.mubr.msk.f32.mxu1 %vm433_vm4, %v7541_v21 }
0x1759   :  { %v8578_v19 = vpop.f32.mrb[100].mxu0  ;;  %8971 = vmatpush3.bf16.msra.mxu1 %v9349_v35 }
0x175a   :  { %v12484_v56 = vadd.f32 %v12481_v5, %v8578_v19  ;;  %v5521_v0 = vpop.f32.mrb[101].mxu0  ;;  %8973 = vmatprep.subr.bf16.mxu1 %v9347_v33 }
0x175b   :  { %v12488_v45 = vadd.f32 %v12481_v5, %v5521_v0  ;;  %v8579_v9 = vpop.f32.mrb[102].mxu0 }
0x175c   :  { %v12495_v24 = vadd.f32 %v12481_v5, %v8579_v9  ;;  %v5524_v57 = vpop.f32.mrb[103].mxu0  ;;  %v5678_v48 = vpop.xlane.xlu0 %5677  ;;  %v13532_v9 = vld [vmem:[#allocation4_spill] sm:$0xff] }
0x175d   :  { %v12501_v55 = vadd.f32 %v12481_v5, %v5524_v57  ;;  %v5679_v11 = vcvt.f32.s32 %v5678_v48  ;;  %8975 = vmatpush3.bf16.msra.mxu1 %v9347_v33 }
0x175e   :  { %8977 = vmatprep.subr.bf16.mxu1 %v13426_v44 }
0x175f   :  { %v5682_v32 = vadd.s32 %v5681_v38, %v5679_v11  ;;  %v5663_v58 = vpop.xlane.xlu1 %5662 }
0x1760   :  { %v5664_v51 = vcvt.f32.s32 %v5663_v58  ;;  %v5708_v59 = vpop.xlane.xlu0 %5707 }
0x1761   :  { %vm5732_vm7 = vcmp.eq.s32.totalorder %v9171_v23, %v5682_v32  ;;  %v8582_v1 = vpop.f32.mrb[104].mxu0  ;;  %v5709_v27 = vcvt.f32.s32 %v5708_v59  ;;  %8979 = vmatpush3.bf16.msra.mxu1 %v13426_v44 }
0x1762   :  { %v5667_v50 = vadd.s32 %v5666_v54, %v5664_v51  ;;  %v12513_v20 = vadd.f32 %v12481_v5, %v8582_v1  ;;  %v5537_v21 = vpop.f32.mrb[105].mxu0  ;;  %v12516_v36 = vsel %vm5732_vm7, inf, %v12261_v4  ;;  %8981 = vmatprep.subr.bf16.mxu1 %v13492_v15  ;;  %v7543_v16 = vsel %vm5732_vm7, 1.0, %v13409_v41 }
0x1763   :  { %v5712_v2 = vadd.s32 %v5711_v60, %v5709_v27  ;;  %v12520_v53 = vadd.f32 %v12481_v5, %v5537_v21  ;;  %v5693_v19 = vpop.xlane.xlu1 %5692  ;;  %v8583_v0 = vpop.f32.mrb[106].mxu0  ;;  %v6006_v38 = vsel %vm433_vm4, %v12516_v36, inf }
0x1764   :  { %v5694_v10 = vcvt.f32.s32 %v5693_v19  ;;  %v12528_v4 = vadd.f32 %v12481_v5, %v8583_v0  ;;  %v5540_v18 = vpop.f32.mrb[107].mxu0  ;;  %vm5731_vm1 = vcmp.eq.s32.totalorder %v9171_v23, %v5667_v50  ;;  %6007 = vmin.xlane.f32.xlu0 %v6006_v38 }
0x1765   :  { %vm5734_vm8 = vcmp.eq.s32.totalorder %v9171_v23, %v5712_v2  ;;  %v12535_v48 = vadd.f32 %v12481_v5, %v5540_v18  ;;  %v7542_v29 = vsel %vm5731_vm1, 1.0, %v13409_v41  ;;  %8983 = vmatpush3.bf16.msra.mxu1 %v13492_v15  ;;  %v12543_v58 = vsel %vm5731_vm1, inf, %v12295_v43  ;;  %v13530_v2 = vld [vmem:[#allocation6_spill] sm:$0xff] }
0x1766   :  { %13526 = vst [vmem:[#allocation5_spill] sm:$0xff] %v12528_v4  ;;  %v5697_v11 = vadd.s32 %v5696_v3, %v5694_v10  ;;  %8604 = vmatmul.mubr.msk.f32.gmra.mrb[110].mxu1 %vm433_vm4, %v7542_v29  ;;  %13528 = vst [vmem:[#allocation7_spill] sm:$0xff] %v12543_v58  ;;  %v12548_v54 = vsel %vm5734_vm8, inf, %v12300_v25  ;;  %8985 = vmatprep.subr.bf16.mxu1 %v9349_v35  ;;  %v6003_v59 = vsel %vm433_vm4, %v12543_v58, inf  ;;  %v5726_v3 = vshll.u32 %v5725_v28, 16 }
0x1767   :  { %13527 = vst [vmem:[#allocation3_spill] sm:$0xff] %v12535_v48  ;;  %8606 = vmatprep.mubr.msk.f32.mxu1 %vm433_vm4, %v7543_v16  ;;  %v5723_v60 = vpop.xlane.xlu1 %5722  ;;  %v6012_v43 = vsel %vm433_vm4, %v12548_v54, inf  ;;  %6004 = vmin.xlane.f32.xlu1 %v6003_v59  ;;  %v7545_v25 = vsel %vm5734_vm8, 1.0, %v13409_v41 }
0x1768   :  { %v5724_v1 = vcvt.f32.s32 %v5723_v60  ;;  %vm5733_vm9 = vcmp.eq.s32.totalorder %v9171_v23, %v5697_v11  ;;  %6013 = vmin.xlane.f32.xlu0 %v6012_v43 }
0x1769   :  { %v7544_v27 = vsel %vm5733_vm9, 1.0, %v13409_v41  ;;  %v12564_v50 = vsel %vm5733_vm9, inf, %v12311_v63 }
0x176a   :  { %13529 = vst [vmem:[#allocation8_spill] sm:$0xff] %v12564_v50  ;;  %v5727_v21 = vadd.s32 %v5726_v3, %v5724_v1  ;;  %8607 = vmatmul.mubr.msk.f32.gmra.mrb[112].mxu1 %vm433_vm4, %v7544_v27  ;;  %v6009_v28 = vsel %vm433_vm4, %v12564_v50, inf }
0x176b   :  { %8609 = vmatprep.mubr.msk.f32.mxu1 %vm433_vm4, %v7545_v25  ;;  %6010 = vmin.xlane.f32.xlu1 %v6009_v28 }
0x176c   :  { %vm5735_vm10 = vcmp.eq.s32.totalorder %v9171_v23, %v5727_v21 }
0x176d   :  { %v7546_v19 = vsel %vm5735_vm10, 1.0, %v13409_v41  ;;  %v12573_v0 = vsel %vm5735_vm10, inf, %v13530_v2 }
0x176e   :  { %13531 = vst [vmem:[#allocation9_spill] sm:$0xff] %v12573_v0  ;;  %8610 = vmatmul.mubr.msk.f32.gmra.mrb[114].mxu1 %vm433_vm4, %v7546_v19  ;;  %v6015_v63 = vsel %vm433_vm4, %v12573_v0, inf }
0x176f   :  { %6016 = vmin.xlane.f32.xlu1 %v6015_v63 }
0x17de   :  { %v5996_v38 = vpop.xlane.xlu0 %5995 }
0x17df   :  { %vm6018_vm11 = vcmp.le.f32.partialorder %v12455_v61, %v5996_v38 }
0x17e0   :  { %v6026_v16 = vsel %vm6018_vm11, %v9171_v23, 64 }
0x17e1   :  { %v12581_v10 = vsel %vm433_vm4, %v6026_v16, 2147483647 }
0x17e2   :  { %v6036_v18 = vshra.s32 %v12581_v10, 16  ;;  %v6002_v29 = vpop.xlane.xlu0 %6001 }
0x17e3   :  { %vm6020_vm12 = vcmp.le.f32.partialorder %v12462_v37, %v6002_v29 }
0x17e4   :  { %v6028_v11 = vsel %vm6020_vm12, %v9171_v23, 64  ;;  %v12586_v59 = vcvt.s32.f32 %v6036_v18 }
0x17e5   :  { %v12589_v60 = vsel %vm433_vm4, %v6028_v11, 2147483647  ;;  %v5999_v43 = vpop.xlane.xlu1 %5998 }
0x17e6   :  { %v6066_v3 = vshra.s32 %v12589_v60, 16  ;;  %vm6019_vm13 = vcmp.le.f32.partialorder %v12470_v34, %v5999_v43  ;;  %6039 = vmin.xlane.f32.xlu0 %v12586_v59 }
0x17e7   :  { %v6027_v1 = vsel %vm6019_vm13, %v9171_v23, 64 }
0x17e8   :  { %v12596_v25 = vsel %vm433_vm4, %v6027_v1, 2147483647  ;;  %v12598_v27 = vcvt.s32.f32 %v6066_v3 }
0x17e9   :  { %v6051_v21 = vshra.s32 %v12596_v25, 16 }
0x17ea   :  { %6069 = vmin.xlane.f32.xlu0 %v12598_v27 }
0x17eb   :  { %v12602_v28 = vcvt.s32.f32 %v6051_v21 }
0x17ed   :  { %6054 = vmin.xlane.f32.xlu1 %v12602_v28 }
0x17f1   :  { %v6008_v19 = vpop.xlane.xlu0 %6007 }
0x17f2   :  { %vm6022_vm14 = vcmp.le.f32.partialorder %v12516_v36, %v6008_v19 }
0x17f3   :  { %v6030_v2 = vsel %vm6022_vm14, %v9171_v23, 64 }
0x17f4   :  { %v12608_v63 = vsel %vm433_vm4, %v6030_v2, 2147483647  ;;  %v6005_v16 = vpop.xlane.xlu1 %6004 }
0x17f5   :  { %v6096_v38 = vshra.s32 %v12608_v63, 16  ;;  %v6014_v18 = vpop.xlane.xlu0 %6013  ;;  %vm6021_vm15 = vcmp.le.f32.partialorder %v12543_v58, %v6005_v16 }
0x17f6   :  { %vm6024_vm0 = vcmp.le.f32.partialorder %v12548_v54, %v6014_v18  ;;  %v6029_v29 = vsel %vm6021_vm15, %v9171_v23, 64 }
0x17f7   :  { %v6032_v11 = vsel %vm6024_vm0, %v9171_v23, 64  ;;  %v12615_v43 = vcvt.s32.f32 %v6096_v38  ;;  %v12618_v3 = vsel %vm433_vm4, %v6029_v29, 2147483647 }
0x17f8   :  { %v12621_v1 = vsel %vm433_vm4, %v6032_v11, 2147483647  ;;  %v6081_v21 = vshra.s32 %v12618_v3, 16  ;;  %v6011_v2 = vpop.xlane.xlu1 %6010 }
0x17f9   :  { %v6126_v19 = vshra.s32 %v12621_v1, 16  ;;  %6099 = vmin.xlane.f32.xlu0 %v12615_v43  ;;  %vm6023_vm2 = vcmp.le.f32.partialorder %v12564_v50, %v6011_v2 }
0x17fa   :  { %v6031_v16 = vsel %vm6023_vm2, %v9171_v23, 64  ;;  %v12628_v18 = vcvt.s32.f32 %v6081_v21 }
0x17fb   :  { %v12630_v38 = vcvt.s32.f32 %v6126_v19  ;;  %v12633_v29 = vsel %vm433_vm4, %v6031_v16, 2147483647 }
0x17fc   :  { %v6111_v11 = vshra.s32 %v12633_v29, 16  ;;  %6084 = vmin.xlane.f32.xlu1 %v12628_v18  ;;  %v6017_v51 = vpop.xlane.xlu1 %6016 }
0x17fd   :  { %6129 = vmin.xlane.f32.xlu0 %v12630_v38  ;;  %vm6025_vm3 = vcmp.le.f32.partialorder %v12573_v0, %v6017_v51 }
0x17fe   :  { %v6033_v2 = vsel %vm6025_vm3, %v9171_v23, 64  ;;  %v12640_v32 = vcvt.s32.f32 %v6111_v11 }
0x17ff   :  { %v12643_v21 = vsel %vm433_vm4, %v6033_v2, 2147483647 }
0x1800   :  { %v6141_v19 = vshra.s32 %v12643_v21, 16  ;;  %6114 = vmin.xlane.f32.xlu1 %v12640_v32 }
0x1802   :  { %v12647_v16 = vcvt.s32.f32 %v6141_v19 }
0x1804   :  { %6144 = vmin.xlane.f32.xlu1 %v12647_v16 }
0x182a   :  { %v8602_v57 = vpop.f32.mrb[108].mxu1 }
0x182b   :  { %v5882_v14 = vadd.f32 %v8602_v57, %v13532_v9  ;;  %v5842_v7 = vpop.f32.mrb[109].mxu1 }
0x182c   :  { %v5881_v51 = vadd.f32 %v5842_v7, %v13415_v52 }
0x182d   :  { %v5890_v62 = vmax.f32 %v5882_v14, 0.0 }
0x182e   :  { %v5889_v11 = vmax.f32 %v5881_v51, 0.0 }
0x1830   :  { %v5897_v8 = vpack.c.bf16 %v5890_v62, %v5889_v11 }
0x1832   :  { %8620 = vmatprep.mubr.msk.bf16.mxu0 %vm433_vm4, %v5897_v8 }
0x1839   :  { %v8605_v2 = vpop.f32.mrb[110].mxu1 }
0x183a   :  { %v5884_v0 = vadd.f32 %v8605_v2, %v9583_v46  ;;  %v5852_v50 = vpop.f32.mrb[111].mxu1  ;;  %v12677_v2 = vld [vmem:[%s13351_s6 + $0x10] sm:$0xff]  }
0x183b   :  { %v5883_v19 = vadd.f32 %v5852_v50, %v9587_v42  ;;  %v12662_v50 = vld [vmem:[%s13351_s6] sm:$0xff]  }
0x183c   :  { %v5892_v48 = vmax.f32 %v5884_v0, 0.0 }
0x183d   :  { %v5891_v13 = vmax.f32 %v5883_v19, 0.0  ;;  %v8608_v58 = vpop.f32.mrb[112].mxu1  ;;  %v12685_v19 = vld [vmem:[%s13351_s6 + $0x18] sm:$0xff]  }
0x183e   :  { %v5886_v4 = vadd.f32 %v8608_v58, %v9591_v31  ;;  %v5862_v57 = vpop.f32.mrb[113].mxu1 }
0x183f   :  { %v5898_v9 = vpack.c.bf16 %v5892_v48, %v5891_v13  ;;  %v5885_v7 = vadd.f32 %v5862_v57, %v9595_v30  ;;  %v6035_v57 = vand.u32 65535, %v12581_v10 }
0x1840   :  { %v5894_v14 = vmax.f32 %v5886_v4, 0.0  ;;  %v12669_v4 = vld [vmem:[%s13351_s6 + $0x8] sm:$0xff]  }
0x1841   :  { %v5893_v51 = vmax.f32 %v5885_v7, 0.0  ;;  %v8611_v62 = vpop.f32.mrb[114].mxu1  ;;  %8621 = vmatmul.mubr.msk.bf16.vlgmr.msra.gmra.mrb[108].mxu0 %vm433_vm4, %v5898_v9  ;;  %v6065_v7 = vand.u32 65535, %v12589_v60  ;;  %v6095_v60 = vand.u32 65535, %v12608_v63 }
0x1842   :  { %v5888_v8 = vadd.f32 %v8611_v62, %v9600_v17  ;;  %v5872_v11 = vpop.f32.mrb[115].mxu1  ;;  %8657 = vmatpush3.bf16.msra.mxu0 %v12662_v50 }
0x1843   :  { %v5899_v58 = vpack.c.bf16 %v5894_v14, %v5893_v51  ;;  %v5887_v13 = vadd.f32 %v5872_v11, %v9604_v22  ;;  %8658 = vmatprep.subr.bf16.mxu0 %v12669_v4  ;;  %v6037_v51 = vcvt.s32.f32 %v6035_v57  ;;  %v6097_v57 = vcvt.s32.f32 %v6095_v60 }
0x1844   :  { %v5896_v9 = vmax.f32 %v5888_v8, 0.0  ;;  %v6050_v8 = vand.u32 65535, %v12596_v25 }
0x1845   :  { %v5895_v48 = vmax.f32 %v5887_v13, 0.0  ;;  %8624 = vmatprep.mubr.msk.bf16.mxu0 %vm433_vm4, %v5899_v58  ;;  %v6067_v58 = vcvt.s32.f32 %v6065_v7  ;;  %v6110_v7 = vand.u32 65535, %v12633_v29 }
0x1846   :  { %8659 = vmatpush3.bf16.msra.mxu0 %v12669_v4 }
0x1847   :  { %v5900_v0 = vpack.c.bf16 %v5896_v9, %v5895_v48  ;;  %8660 = vmatprep.subr.bf16.mxu0 %v12677_v2  ;;  %v6052_v48 = vcvt.s32.f32 %v6050_v8  ;;  %v6112_v29 = vcvt.s32.f32 %v6110_v7 }
0x1849   :  { %8625 = vmatmul.mubr.msk.bf16.gmra.mrb[112].mxu0 %vm433_vm4, %v5900_v0  ;;  %v6125_v0 = vand.u32 65535, %v12621_v1 }
0x184a   :  { %8661 = vmatpush3.bf16.msra.mxu0 %v12677_v2 }
0x184b   :  { %8662 = vmatprep.subr.bf16.mxu0 %v12685_v19  ;;  %v6127_v63 = vcvt.s32.f32 %v6125_v0 }
0x184e   :  { %8663 = vmatpush3.bf16.msra.mxu0 %v12685_v19 }
0x184f   :  { %8700 = vmatprep.subr.bf16.mxu0 %v12662_v50 }
0x1873   :  { %v6040_v14 = vpop.xlane.xlu0 %6039 }
0x1874   :  { %vm6041_vm5 = vcmp.eq.f32.partialorder %v12586_v59, %v6040_v14  ;;  %v6080_v59 = vand.u32 65535, %v12618_v3 }
0x1875   :  { %v6042_v62 = vsel %vm6041_vm5, %v6037_v51, inf }
0x1876   :  { %6043 = vmin.xlane.f32.xlu0 %v6042_v62 }
0x1877   :  { %v6070_v11 = vpop.xlane.xlu0 %6069 }
0x1878   :  { %vm6071_vm6 = vcmp.eq.f32.partialorder %v12598_v27, %v6070_v11 }
0x1879   :  { %v6072_v13 = vsel %vm6071_vm6, %v6067_v58, inf }
0x187a   :  { %v6055_v9 = vpop.xlane.xlu1 %6054  ;;  %6073 = vmin.xlane.f32.xlu0 %v6072_v13 }
0x187b   :  { %vm6056_vm7 = vcmp.eq.f32.partialorder %v12602_v28, %v6055_v9  ;;  %v6082_v28 = vcvt.s32.f32 %v6080_v59 }
0x187c   :  { %v6057_v10 = vsel %vm6056_vm7, %v6052_v48, inf  ;;  %v6046_v48 = vcvt.f32.s32 %v6040_v14 }
0x187d   :  { %6058 = vmin.xlane.f32.xlu1 %v6057_v10 }
0x187e   :  { %v6047_v60 = vshll.u32 %v6046_v48, 16 }
0x1886   :  { %v12699_v25 = vpop.xlane.xlu0 %6099 }
0x1887   :  { %vm6101_vm1 = vcmp.eq.f32.partialorder %v12615_v43, %v12699_v25  ;;  %v6140_v43 = vand.u32 65535, %v12643_v21  ;;  %v6076_v21 = vcvt.f32.s32 %v6070_v11 }
0x1888   :  { %v6102_v27 = vsel %vm6101_vm1, %v6097_v57, inf  ;;  %v6061_v57 = vcvt.f32.s32 %v6055_v9 }
0x1889   :  { %6103 = vmin.xlane.f32.xlu0 %v6102_v27  ;;  %v12704_v51 = vpop.xlane.xlu1 %6084  ;;  %v6077_v7 = vshll.u32 %v6076_v21, 16 }
0x188a   :  { %v12706_v62 = vpop.xlane.xlu0 %6129  ;;  %vm6086_vm8 = vcmp.eq.f32.partialorder %v12628_v18, %v12704_v51  ;;  %v6142_v18 = vcvt.s32.f32 %v6140_v43  ;;  %v6062_v11 = vshll.u32 %v6061_v57, 16  ;;  %v6091_v21 = vcvt.f32.s32 %v12704_v51 }
0x188b   :  { %vm6131_vm9 = vcmp.eq.f32.partialorder %v12630_v38, %v12706_v62  ;;  %v6087_v3 = vsel %vm6086_vm8, %v6082_v28, inf  ;;  %v13534_v51 = vmax.f32 %v12241_v6, %v12488_v45 }
0x188c   :  { %v6132_v1 = vsel %vm6131_vm9, %v6127_v63, inf  ;;  %6088 = vmin.xlane.f32.xlu1 %v6087_v3 }
0x188d   :  { %6133 = vmin.xlane.f32.xlu0 %v6132_v1  ;;  %v12713_v8 = vpop.xlane.xlu1 %6114 }
0x188e   :  { %vm6116_vm10 = vcmp.eq.f32.partialorder %v12640_v32, %v12713_v8 }
0x188f   :  { %v6117_v58 = vsel %vm6116_vm10, %v6112_v29, inf }
0x1890   :  { %6118 = vmin.xlane.f32.xlu1 %v6117_v58 }
0x1891   :  { %v12717_v13 = vpop.xlane.xlu1 %6144 }
0x1892   :  { %vm6146_vm11 = vcmp.eq.f32.partialorder %v12647_v16, %v12717_v13 }
0x1893   :  { %v6147_v38 = vsel %vm6146_vm11, %v6142_v18, inf }
0x1894   :  { %6148 = vmin.xlane.f32.xlu1 %v6147_v38 }
0x1903   :  { %v6044_v10 = vpop.xlane.xlu0 %6043 }
0x1904   :  { %v6045_v59 = vcvt.f32.s32 %v6044_v10 }
0x1906   :  { %v6048_v0 = vadd.s32 %v6047_v60, %v6045_v59 }
0x1907   :  { %v6074_v27 = vpop.xlane.xlu0 %6073 }
0x1908   :  { %v6075_v32 = vcvt.f32.s32 %v6074_v27  ;;  %vm6154_vm12 = vcmp.eq.s32.totalorder %v9171_v23, %v6048_v0  ;;  %v13533_v27 = vmax.f32 %v12232_v26, %v12484_v56  ;;  %v13535_v26 = vmax.f32 %v12247_v40, %v12495_v24 }
0x1909   :  { %v7559_v28 = vsel %vm6154_vm12, 1.0, %v13409_v41  ;;  %v12724_v63 = vsel %vm6154_vm12, inf, %v12455_v61 }
0x190a   :  { %v6078_v16 = vadd.s32 %v6077_v7, %v6075_v32  ;;  %v6059_v3 = vpop.xlane.xlu1 %6058  ;;  %8644 = vmatprep.mubr.msk.f32.mxu1 %vm433_vm4, %v7559_v28  ;;  %v6420_v14 = vsel %vm433_vm4, %v12724_v63, inf }
0x190b   :  { %v6060_v1 = vcvt.f32.s32 %v6059_v3  ;;  %6421 = vmin.xlane.f32.xlu0 %v6420_v14 }
0x190c   :  { %vm6156_vm13 = vcmp.eq.s32.totalorder %v9171_v23, %v6078_v16 }
0x190d   :  { %v6063_v9 = vadd.s32 %v6062_v11, %v6060_v1  ;;  %v12731_v43 = vsel %vm6156_vm13, inf, %v12462_v37  ;;  %v7561_v29 = vsel %vm6156_vm13, 1.0, %v13409_v41  ;;  %v6106_v37 = vcvt.f32.s32 %v12699_v25 }
0x190e   :  { %v6426_v61 = vsel %vm433_vm4, %v12731_v43, inf  ;;  %v6136_v25 = vcvt.f32.s32 %v12706_v62  ;;  %v6092_v11 = vshll.u32 %v6091_v21, 16  ;;  %v6121_v1 = vcvt.f32.s32 %v12713_v8 }
0x190f   :  { %vm6155_vm14 = vcmp.eq.s32.totalorder %v9171_v23, %v6063_v9  ;;  %6427 = vmin.xlane.f32.xlu0 %v6426_v61  ;;  %v13536_v9 = vmax.f32 %v12252_v47, %v12501_v55 }
0x1910   :  { %v7560_v58 = vsel %vm6155_vm14, 1.0, %v13409_v41  ;;  %v12739_v18 = vsel %vm6155_vm14, inf, %v12470_v34  ;;  %v6107_v34 = vshll.u32 %v6106_v37, 16 }
0x1911   :  { %8645 = vmatmul.mubr.msk.f32.vlgmr.msra.gmra.mrb[116].mxu1 %vm433_vm4, %v7560_v58  ;;  %v6423_v38 = vsel %vm433_vm4, %v12739_v18, inf }
0x1912   :  { %6424 = vmin.xlane.f32.xlu1 %v6423_v38  ;;  %8647 = vmatprep.mubr.msk.f32.mxu1 %vm433_vm4, %v7561_v29  ;;  %v6137_v29 = vshll.u32 %v6136_v25, 16 }
0x1913   :  { %8987 = vmatpush3.bf16.msra.mxu1 %v9349_v35 }
0x1914   :  { %v8622_v48 = vpop.f32.mrb[108].mxu0  ;;  %8989 = vmatprep.subr.bf16.mxu1 %v9347_v33 }
0x1915   :  { %v5956_v10 = vadd.f32 %v12481_v5, %v8622_v48  ;;  %v5947_v60 = vpop.f32.mrb[109].mxu0 }
0x1916   :  { %v5948_v59 = vadd.f32 %v12481_v5, %v5947_v60  ;;  %v8623_v0 = vpop.f32.mrb[110].mxu0  ;;  %v6104_v57 = vpop.xlane.xlu0 %6103  ;;  %v6151_v60 = vcvt.f32.s32 %v12717_v13 }
0x1917   :  { %v12755_v7 = vmax.f32 %v13533_v27, %v5956_v10  ;;  %v5959_v32 = vadd.f32 %v12481_v5, %v8623_v0  ;;  %v5950_v28 = vpop.f32.mrb[111].mxu0  ;;  %v6105_v16 = vcvt.f32.s32 %v6104_v57  ;;  %8991 = vmatpush3.bf16.msra.mxu1 %v9347_v33  ;;  %v6122_v10 = vshll.u32 %v6121_v1, 16 }
0x1918   :  { %v12762_v3 = vmax.f32 %v13534_v51, %v5948_v59  ;;  %v5951_v14 = vadd.f32 %v12481_v5, %v5950_v28  ;;  %8993 = vmatprep.subr.bf16.mxu1 %v13426_v44  ;;  %v13537_v0 = vmax.f32 %v12268_v49, %v12513_v20  ;;  %v13539_v51 = vld [vmem:[#allocation5_spill] sm:$0xff] }
0x1919   :  { %v12769_v56 = vmax.f32 %v13535_v26, %v5959_v32  ;;  %v6108_v62 = vadd.s32 %v6107_v34, %v6105_v16  ;;  %v6089_v6 = vpop.xlane.xlu1 %6088  ;;  %v13538_v32 = vmax.f32 %v12275_v12, %v12520_v53  ;;  %v13541_v53 = vld [vmem:[#allocation7_spill] sm:$0xff] }
0x191a   :  { %v12775_v61 = vmax.f32 %v13536_v9, %v5951_v14  ;;  %v6134_v45 = vpop.xlane.xlu0 %6133  ;;  %v6090_v58 = vcvt.f32.s32 %v6089_v6  ;;  %v13540_v14 = vmax.f32 %v12285_v39, %v13539_v51 }
0x191b   :  { %vm6158_vm15 = vcmp.eq.s32.totalorder %v9171_v23, %v6108_v62  ;;  %v6135_v38 = vcvt.f32.s32 %v6134_v45  ;;  %8995 = vmatpush3.bf16.msra.mxu1 %v13426_v44  ;;  %v6152_v45 = vshll.u32 %v6151_v60, 16 }
0x191c   :  { %v8626_v40 = vpop.f32.mrb[112].mxu0  ;;  %v12782_v24 = vsel %vm6158_vm15, inf, %v12516_v36  ;;  %8997 = vmatprep.subr.bf16.mxu1 %v13492_v15  ;;  %v6093_v47 = vadd.s32 %v6092_v11, %v6090_v58  ;;  %v7563_v36 = vsel %vm6158_vm15, 1.0, %v13409_v41  ;;  %v13543_v11 = vld [vmem:[#allocation3_spill] sm:$0xff] }
0x191d   :  { %v5972_v55 = vadd.f32 %v12481_v5, %v8626_v40  ;;  %v6138_v8 = vadd.s32 %v6137_v29, %v6135_v38  ;;  %v5963_v37 = vpop.f32.mrb[113].mxu0  ;;  %v6432_v48 = vsel %vm433_vm4, %v12782_v24, inf  ;;  %v6119_v21 = vpop.xlane.xlu1 %6118  ;;  %v13545_v38 = vld [vmem:[#allocation8_spill] sm:$0xff] }
0x191e   :  { %v5964_v34 = vadd.f32 %v12481_v5, %v5963_v37  ;;  %v8627_v59 = vpop.f32.mrb[114].mxu0  ;;  %6433 = vmin.xlane.f32.xlu0 %v6432_v48  ;;  %v6120_v25 = vcvt.f32.s32 %v6119_v21  ;;  %vm6157_vm2 = vcmp.eq.s32.totalorder %v9171_v23, %v6093_v47 }
0x191f   :  { %v12796_v57 = vmax.f32 %v13537_v0, %v5972_v55  ;;  %vm6160_vm0 = vcmp.eq.s32.totalorder %v9171_v23, %v6138_v8  ;;  %v5975_v27 = vadd.f32 %v12481_v5, %v8627_v59  ;;  %v5966_v13 = vpop.f32.mrb[115].mxu0  ;;  %8999 = vmatpush3.bf16.msra.mxu1 %v13492_v15  ;;  %v7562_v12 = vsel %vm6157_vm2, 1.0, %v13409_v41 }
0x1920   :  { %v12804_v28 = vmax.f32 %v13538_v32, %v5964_v34  ;;  %v5967_v16 = vadd.f32 %v12481_v5, %v5966_v13  ;;  %v12811_v49 = vsel %vm6160_vm0, inf, %v12548_v54  ;;  %9001 = vmatprep.subr.bf16.mxu1 %v9349_v35  ;;  %v6123_v20 = vadd.s32 %v6122_v10, %v6120_v25  ;;  %v13542_v5 = vld [vmem:[#allocation2_spill] sm:$0xff]  ;;  %8648 = vmatmul.mubr.msk.f32.gmra.mrb[118].mxu1 %vm433_vm4, %v7562_v12  ;;  %v13546_v10 = vld [vmem:[#allocation9_spill] sm:$0xff] }
0x1921   :  { %v12817_v26 = vmax.f32 %v13540_v14, %v5975_v27  ;;  %v12821_v62 = vsel %vm6157_vm2, inf, %v13541_v53  ;;  %v13544_v1 = vmax.f32 %v13542_v5, %v13543_v11  ;;  %v6149_v6 = vpop.xlane.xlu1 %6148  ;;  %v6438_v39 = vsel %vm433_vm4, %v12811_v49, inf  ;;  %8650 = vmatprep.mubr.msk.f32.mxu1 %vm433_vm4, %v7563_v36 }
0x1922   :  { %v6429_v54 = vsel %vm433_vm4, %v12821_v62, inf  ;;  %v6150_v29 = vcvt.f32.s32 %v6149_v6  ;;  %vm6159_vm3 = vcmp.eq.s32.totalorder %v9171_v23, %v6123_v20  ;;  %6439 = vmin.xlane.f32.xlu0 %v6438_v39  ;;  %v7565_v47 = vsel %vm6160_vm0, 1.0, %v13409_v41 }
0x1923   :  { %v12826_v9 = vmax.f32 %v13544_v1, %v5967_v16  ;;  %6430 = vmin.xlane.f32.xlu1 %v6429_v54  ;;  %v7564_v58 = vsel %vm6159_vm3, 1.0, %v13409_v41  ;;  %v12837_v40 = vsel %vm6159_vm3, inf, %v13545_v38 }
0x1924   :  { %v6153_v55 = vadd.s32 %v6152_v45, %v6150_v29  ;;  %v6435_v37 = vsel %vm433_vm4, %v12837_v40, inf  ;;  %8651 = vmatmul.mubr.msk.f32.gmra.mrb[120].mxu1 %vm433_vm4, %v7564_v58 }
0x1925   :  { %8653 = vmatprep.mubr.msk.f32.mxu1 %vm433_vm4, %v7565_v47 }
0x1926   :  { %vm6161_vm5 = vcmp.eq.s32.totalorder %v9171_v23, %v6153_v55 }
0x1927   :  { %6436 = vmin.xlane.f32.xlu1 %v6435_v37  ;;  %v7566_v48 = vsel %vm6161_vm5, 1.0, %v13409_v41  ;;  %v12849_v60 = vsel %vm6161_vm5, inf, %v13546_v10 }
0x1928   :  { %13547 = vst [vmem:[#allocation6_spill] sm:$0xff] %v12849_v60  ;;  %v6441_v8 = vsel %vm433_vm4, %v12849_v60, inf  ;;  %8654 = vmatmul.mubr.msk.f32.gmra.mrb[122].mxu1 %vm433_vm4, %v7566_v48 }
0x192b   :  { %6442 = vmin.xlane.f32.xlu1 %v6441_v8 }
0x1998   :  { %v6422_v34 = vpop.xlane.xlu0 %6421 }
0x1999   :  { %vm6444_vm6 = vcmp.le.f32.partialorder %v12724_v63, %v6422_v34 }
0x199a   :  { %v6452_v21 = vsel %vm6444_vm6, %v9171_v23, 64 }
0x199b   :  { %v12857_v59 = vsel %vm433_vm4, %v6452_v21, 2147483647 }
0x199c   :  { %v6462_v36 = vshra.s32 %v12857_v59, 16  ;;  %v6428_v0 = vpop.xlane.xlu0 %6427 }
0x199d   :  { %vm6446_vm7 = vcmp.le.f32.partialorder %v12731_v43, %v6428_v0 }
0x199e   :  { %v6454_v25 = vsel %vm6446_vm7, %v9171_v23, 64  ;;  %v12862_v27 = vcvt.s32.f32 %v6462_v36 }
0x199f   :  { %v12865_v13 = vsel %vm433_vm4, %v6454_v25, 2147483647  ;;  %v6425_v32 = vpop.xlane.xlu1 %6424 }
0x19a0   :  { %v6492_v16 = vshra.s32 %v12865_v13, 16  ;;  %vm6445_vm1 = vcmp.le.f32.partialorder %v12739_v18, %v6425_v32  ;;  %6465 = vmin.xlane.f32.xlu0 %v12862_v27 }
0x19a1   :  { %v6453_v20 = vsel %vm6445_vm1, %v9171_v23, 64 }
0x19a2   :  { %v12872_v51 = vsel %vm433_vm4, %v6453_v20, 2147483647  ;;  %v12874_v14 = vcvt.s32.f32 %v6492_v16 }
0x19a3   :  { %v6477_v12 = vshra.s32 %v12872_v51, 16 }
0x19a4   :  { %6495 = vmin.xlane.f32.xlu0 %v12874_v14 }
0x19a5   :  { %v12878_v53 = vcvt.s32.f32 %v6477_v12 }
0x19a7   :  { %6480 = vmin.xlane.f32.xlu1 %v12878_v53 }
0x19ab   :  { %v6434_v5 = vpop.xlane.xlu0 %6433 }
0x19ac   :  { %vm6448_vm8 = vcmp.le.f32.partialorder %v12782_v24, %v6434_v5 }
0x19ad   :  { %v6456_v11 = vsel %vm6448_vm8, %v9171_v23, 64 }
0x19ae   :  { %v12884_v1 = vsel %vm433_vm4, %v6456_v11, 2147483647  ;;  %v13548_v11 = vld [vmem:[#allocation4_spill] sm:$0xff] }
0x19af   :  { %v6522_v54 = vshra.s32 %v12884_v1, 16  ;;  %v6440_v39 = vpop.xlane.xlu0 %6439 }
0x19b0   :  { %v6431_v6 = vpop.xlane.xlu1 %6430  ;;  %vm6450_vm10 = vcmp.le.f32.partialorder %v12811_v49, %v6440_v39 }
0x19b1   :  { %vm6447_vm9 = vcmp.le.f32.partialorder %v12821_v62, %v6431_v6  ;;  %v12888_v45 = vcvt.s32.f32 %v6522_v54  ;;  %v6458_v38 = vsel %vm6450_vm10, %v9171_v23, 64 }
0x19b2   :  { %v6455_v29 = vsel %vm6447_vm9, %v9171_v23, 64  ;;  %v12899_v55 = vsel %vm433_vm4, %v6458_v38, 2147483647 }
0x19b3   :  { %v12893_v58 = vsel %vm433_vm4, %v6455_v29, 2147483647  ;;  %6525 = vmin.xlane.f32.xlu0 %v12888_v45  ;;  %v6552_v48 = vshra.s32 %v12899_v55, 16 }
0x19b4   :  { %v6507_v47 = vshra.s32 %v12893_v58, 16  ;;  %v6437_v37 = vpop.xlane.xlu1 %6436 }
0x19b5   :  { %vm6449_vm11 = vcmp.le.f32.partialorder %v12837_v40, %v6437_v37  ;;  %v12909_v21 = vcvt.s32.f32 %v6552_v48 }
0x19b6   :  { %v6457_v10 = vsel %vm6449_vm11, %v9171_v23, 64  ;;  %v12904_v8 = vcvt.s32.f32 %v6507_v47 }
0x19b7   :  { %v12907_v34 = vsel %vm433_vm4, %v6457_v10, 2147483647  ;;  %6555 = vmin.xlane.f32.xlu0 %v12909_v21 }
0x19b8   :  { %v6537_v36 = vshra.s32 %v12907_v34, 16  ;;  %6510 = vmin.xlane.f32.xlu1 %v12904_v8  ;;  %v6443_v0 = vpop.xlane.xlu1 %6442 }
0x19b9   :  { %vm6451_vm12 = vcmp.le.f32.partialorder %v12849_v60, %v6443_v0 }
0x19ba   :  { %v6459_v25 = vsel %vm6451_vm12, %v9171_v23, 64  ;;  %v12916_v32 = vcvt.s32.f32 %v6537_v36 }
0x19bb   :  { %v12919_v16 = vsel %vm433_vm4, %v6459_v25, 2147483647 }
0x19bc   :  { %v6567_v20 = vshra.s32 %v12919_v16, 16  ;;  %6540 = vmin.xlane.f32.xlu1 %v12916_v32 }
0x19be   :  { %v12923_v12 = vcvt.s32.f32 %v6567_v20 }
0x19c0   :  { %6570 = vmin.xlane.f32.xlu1 %v12923_v12 }
0x19e4   :  { %v8646_v5 = vpop.f32.mrb[116].mxu1 }
0x19e5   :  { %v6308_v54 = vadd.f32 %v8646_v5, %v13548_v11  ;;  %v6268_v6 = vpop.f32.mrb[117].mxu1 }
0x19e6   :  { %v6307_v39 = vadd.f32 %v6268_v6, %v13415_v52 }
0x19e7   :  { %v6316_v29 = vmax.f32 %v6308_v54, 0.0 }
0x19e8   :  { %v6315_v38 = vmax.f32 %v6307_v39, 0.0 }
0x19ea   :  { %v6323_v47 = vpack.c.bf16 %v6316_v29, %v6315_v38 }
0x19ec   :  { %8664 = vmatprep.mubr.msk.bf16.mxu0 %vm433_vm4, %v6323_v47 }
0x19f3   :  { %v8649_v37 = vpop.f32.mrb[118].mxu1 }
0x19f4   :  { %v6310_v48 = vadd.f32 %v8649_v37, %v9583_v46  ;;  %v6278_v10 = vpop.f32.mrb[119].mxu1 }
0x19f5   :  { %v6309_v36 = vadd.f32 %v6278_v10, %v9587_v42 }
0x19f6   :  { %v6318_v0 = vmax.f32 %v6310_v48, 0.0 }
0x19f7   :  { %v6317_v25 = vmax.f32 %v6309_v36, 0.0  ;;  %v8652_v20 = vpop.f32.mrb[120].mxu1 }
0x19f8   :  { %v6312_v60 = vadd.f32 %v8652_v20, %v9591_v31  ;;  %v6288_v5 = vpop.f32.mrb[121].mxu1 }
0x19f9   :  { %v6324_v11 = vpack.c.bf16 %v6318_v0, %v6317_v25  ;;  %v6311_v6 = vadd.f32 %v6288_v5, %v9595_v30  ;;  %v6491_v0 = vand.u32 65535, %v12865_v13  ;;  %v6476_v5 = vand.u32 65535, %v12872_v51 }
0x19fa   :  { %v6320_v54 = vmax.f32 %v6312_v60, 0.0  ;;  %v6521_v13 = vand.u32 65535, %v12884_v1  ;;  %v6506_v51 = vand.u32 65535, %v12893_v58  ;;  %v6566_v58 = vand.u32 65535, %v12919_v16 }
0x19fb   :  { %v6319_v39 = vmax.f32 %v6311_v6, 0.0  ;;  %v8655_v29 = vpop.f32.mrb[122].mxu1  ;;  %8665 = vmatmul.mubr.msk.bf16.vlgmr.msra.gmra.mrb[116].mxu0 %vm433_vm4, %v6324_v11  ;;  %v6461_v11 = vand.u32 65535, %v12857_v59 }
0x19fc   :  { %v6314_v38 = vadd.f32 %v8655_v29, %v9600_v17  ;;  %v6298_v47 = vpop.f32.mrb[123].mxu1  ;;  %8701 = vmatpush3.bf16.msra.mxu0 %v12662_v50 }
0x19fd   :  { %v6325_v37 = vpack.c.bf16 %v6320_v54, %v6319_v39  ;;  %v6313_v48 = vadd.f32 %v6298_v47, %v9604_v22  ;;  %8702 = vmatprep.subr.bf16.mxu0 %v12669_v4  ;;  %v6463_v20 = vcvt.s32.f32 %v6461_v11 }
0x19fe   :  { %v6322_v10 = vmax.f32 %v6314_v38, 0.0  ;;  %v6536_v38 = vand.u32 65535, %v12907_v34 }
0x19ff   :  { %v6321_v36 = vmax.f32 %v6313_v48, 0.0  ;;  %8668 = vmatprep.mubr.msk.bf16.mxu0 %vm433_vm4, %v6325_v37 }
0x1a00   :  { %8703 = vmatpush3.bf16.msra.mxu0 %v12669_v4  ;;  %v6538_v34 = vcvt.s32.f32 %v6536_v38 }
0x1a01   :  { %v6326_v60 = vpack.c.bf16 %v6322_v10, %v6321_v36  ;;  %8704 = vmatprep.subr.bf16.mxu0 %v12677_v2  ;;  %v6568_v36 = vcvt.s32.f32 %v6566_v58 }
0x1a03   :  { %8669 = vmatmul.mubr.msk.bf16.gmra.mrb[120].mxu0 %vm433_vm4, %v6326_v60 }
0x1a04   :  { %8705 = vmatpush3.bf16.msra.mxu0 %v12677_v2  ;;  %v6493_v2 = vcvt.s32.f32 %v6491_v0 }
0x1a05   :  { %8706 = vmatprep.subr.bf16.mxu0 %v12685_v19 }
0x1a08   :  { %8707 = vmatpush3.bf16.msra.mxu0 %v12685_v19 }
0x1a09   :  { %8744 = vmatprep.subr.bf16.mxu0 %v12662_v50  ;;  %v6478_v50 = vcvt.s32.f32 %v6476_v5 }
0x1a2d   :  { %v6466_v25 = vpop.xlane.xlu0 %6465 }
0x1a2e   :  { %vm6467_vm13 = vcmp.eq.f32.partialorder %v12862_v27, %v6466_v25  ;;  %v6523_v27 = vcvt.s32.f32 %v6521_v13  ;;  %v6472_v60 = vcvt.f32.s32 %v6466_v25 }
0x1a2f   :  { %v6468_v4 = vsel %vm6467_vm13, %v6463_v20, inf }
0x1a30   :  { %6469 = vmin.xlane.f32.xlu0 %v6468_v4  ;;  %v6473_v16 = vshll.u32 %v6472_v60, 16 }
0x1a31   :  { %v6496_v6 = vpop.xlane.xlu0 %6495 }
0x1a32   :  { %vm6497_vm14 = vcmp.eq.f32.partialorder %v12874_v14, %v6496_v6  ;;  %v6551_v14 = vand.u32 65535, %v12899_v55  ;;  %v6502_v0 = vcvt.f32.s32 %v6496_v6 }
0x1a33   :  { %v6498_v54 = vsel %vm6497_vm14, %v6493_v2, inf }
0x1a34   :  { %v6481_v19 = vpop.xlane.xlu1 %6480  ;;  %6499 = vmin.xlane.f32.xlu0 %v6498_v54  ;;  %v6553_v37 = vcvt.s32.f32 %v6551_v14  ;;  %v6503_v54 = vshll.u32 %v6502_v0, 16 }
0x1a35   :  { %vm6482_vm15 = vcmp.eq.f32.partialorder %v12878_v53, %v6481_v19  ;;  %v6508_v53 = vcvt.s32.f32 %v6506_v51  ;;  %v6487_v5 = vcvt.f32.s32 %v6481_v19 }
0x1a36   :  { %v6483_v59 = vsel %vm6482_vm15, %v6478_v50, inf }
0x1a37   :  { %6484 = vmin.xlane.f32.xlu1 %v6483_v59  ;;  %v6488_v6 = vshll.u32 %v6487_v5, 16 }
0x1a40   :  { %v12953_v39 = vpop.xlane.xlu0 %6525 }
0x1a41   :  { %vm6527_vm0 = vcmp.eq.f32.partialorder %v12888_v45, %v12953_v39 }
0x1a42   :  { %v6528_v29 = vsel %vm6527_vm0, %v6523_v27, inf }
0x1a43   :  { %6529 = vmin.xlane.f32.xlu0 %v6528_v29 }
0x1a44   :  { %v12964_v1 = vpop.xlane.xlu0 %6555 }
0x1a45   :  { %v12960_v47 = vpop.xlane.xlu1 %6510  ;;  %vm6557_vm3 = vcmp.eq.f32.partialorder %v12909_v21, %v12964_v1 }
0x1a46   :  { %vm6512_vm2 = vcmp.eq.f32.partialorder %v12904_v8, %v12960_v47  ;;  %v6558_v45 = vsel %vm6557_vm3, %v6553_v37, inf }
0x1a47   :  { %v6513_v48 = vsel %vm6512_vm2, %v6508_v53, inf  ;;  %6559 = vmin.xlane.f32.xlu0 %v6558_v45 }
0x1a48   :  { %6514 = vmin.xlane.f32.xlu1 %v6513_v48 }
0x1a49   :  { %v12969_v55 = vpop.xlane.xlu1 %6540 }
0x1a4a   :  { %vm6542_vm5 = vcmp.eq.f32.partialorder %v12916_v32, %v12969_v55 }
0x1a4b   :  { %v6543_v10 = vsel %vm6542_vm5, %v6538_v34, inf }
0x1a4c   :  { %6544 = vmin.xlane.f32.xlu1 %v6543_v10 }
0x1a4d   :  { %v12973_v8 = vpop.xlane.xlu1 %6570 }
0x1a4e   :  { %vm6572_vm6 = vcmp.eq.f32.partialorder %v12923_v12, %v12973_v8 }
0x1a4f   :  { %v6573_v21 = vsel %vm6572_vm6, %v6568_v36, inf }
0x1a50   :  { %6574 = vmin.xlane.f32.xlu1 %v6573_v21  ;;  %v6562_v21 = vcvt.f32.s32 %v12964_v1 }
0x1abd   :  { %v6470_v11 = vpop.xlane.xlu0 %6469 }
0x1abe   :  { %v6471_v20 = vcvt.f32.s32 %v6470_v11 }
0x1ac0   :  { %v6474_v4 = vadd.s32 %v6473_v16, %v6471_v20  ;;  %v6547_v20 = vcvt.f32.s32 %v12969_v55  ;;  %v6563_v55 = vshll.u32 %v6562_v21, 16 }
0x1ac1   :  { %v6500_v2 = vpop.xlane.xlu0 %6499 }
0x1ac2   :  { %v6501_v32 = vcvt.f32.s32 %v6500_v2  ;;  %vm6580_vm7 = vcmp.eq.s32.totalorder %v9171_v23, %v6474_v4 }
0x1ac3   :  { %v7579_v50 = vsel %vm6580_vm7, 1.0, %v13409_v41  ;;  %v12980_v59 = vsel %vm6580_vm7, inf, %v12724_v63 }
0x1ac4   :  { %v6504_v12 = vadd.s32 %v6503_v54, %v6501_v32  ;;  %v6485_v13 = vpop.xlane.xlu1 %6484  ;;  %8688 = vmatprep.mubr.msk.f32.mxu1 %vm433_vm4, %v7579_v50  ;;  %v6846_v25 = vsel %vm433_vm4, %v12980_v59, inf }
0x1ac5   :  { %v6486_v27 = vcvt.f32.s32 %v6485_v13  ;;  %6847 = vmin.xlane.f32.xlu0 %v6846_v25 }
0x1ac6   :  { %vm6582_vm1 = vcmp.eq.s32.totalorder %v9171_v23, %v6504_v12 }
0x1ac7   :  { %v6489_v19 = vadd.s32 %v6488_v6, %v6486_v27  ;;  %v12987_v51 = vsel %vm6582_vm1, inf, %v12731_v43  ;;  %v7581_v14 = vsel %vm6582_vm1, 1.0, %v13409_v41  ;;  %v6532_v43 = vcvt.f32.s32 %v12953_v39 }
0x1ac8   :  { %v6852_v63 = vsel %vm433_vm4, %v12987_v51, inf  ;;  %v6517_v39 = vcvt.f32.s32 %v12960_v47  ;;  %v6548_v6 = vshll.u32 %v6547_v20, 16  ;;  %v6577_v27 = vcvt.f32.s32 %v12973_v8 }
0x1ac9   :  { %vm6581_vm8 = vcmp.eq.s32.totalorder %v9171_v23, %v6489_v19  ;;  %6853 = vmin.xlane.f32.xlu0 %v6852_v63  ;;  %v6533_v45 = vshll.u32 %v6532_v43, 16 }
0x1aca   :  { %v7580_v29 = vsel %vm6581_vm8, 1.0, %v13409_v41  ;;  %v12995_v38 = vsel %vm6581_vm8, inf, %v12739_v18  ;;  %v13007_v18 = vld [vmem:[%s13353_s7] ss:$0 sm:$0xff]  ;;  %v6518_v5 = vshll.u32 %v6517_v39, 16 }
0x1acb   :  { %8689 = vmatmul.mubr.msk.f32.vlgmr.msra.gmra.mrb[124].mxu1 %vm433_vm4, %v7580_v29  ;;  %v6849_v53 = vsel %vm433_vm4, %v12995_v38, inf }
0x1acc   :  { %6850 = vmin.xlane.f32.xlu1 %v6849_v53  ;;  %8691 = vmatprep.mubr.msk.f32.mxu1 %vm433_vm4, %v7581_v14 }
0x1acd   :  { %9003 = vmatpush3.bf16.msra.mxu1 %v9349_v35 }
0x1ace   :  { %9005 = vmatprep.subr.bf16.mxu1 %v9347_v33  ;;  %v8666_v37 = vpop.f32.mrb[116].mxu0 }
0x1acf   :  { %v13010_v58 = vadd.f32 %v13007_v18, %v8666_v37  ;;  %v6373_v34 = vpop.f32.mrb[117].mxu0 }
0x1ad0   :  { %v6530_v48 = vpop.xlane.xlu0 %6529  ;;  %v13015_v35 = vadd.f32 %v13007_v18, %v6373_v34  ;;  %v8667_v36 = vpop.f32.mrb[118].mxu0 }
0x1ad1   :  { %v6531_v10 = vcvt.f32.s32 %v6530_v48  ;;  %9007 = vmatpush3.bf16.msra.mxu1 %v9347_v33  ;;  %v6406_v60 = vmax.f32 %v12755_v7, %v13010_v58  ;;  %v13022_v11 = vadd.f32 %v13007_v18, %v8667_v36  ;;  %v6376_v16 = vpop.f32.mrb[119].mxu0 }
0x1ad2   :  { %9009 = vmatprep.subr.bf16.mxu1 %v13426_v44  ;;  %v6404_v33 = vmax.f32 %v12762_v3, %v13015_v35  ;;  %v13027_v47 = vadd.f32 %v13007_v18, %v6376_v16  ;;  %v6578_v16 = vshll.u32 %v6577_v27, 16 }
0x1ad3   :  { %v6534_v0 = vadd.s32 %v6533_v45, %v6531_v10  ;;  %v6407_v4 = vmax.f32 %v12769_v56, %v13022_v11 }
0x1ad4   :  { %v6405_v2 = vmax.f32 %v12775_v61, %v13027_v47  ;;  %v6560_v32 = vpop.xlane.xlu0 %6559 }
0x1ad5   :  { %v6515_v1 = vpop.xlane.xlu1 %6514  ;;  %vm6584_vm9 = vcmp.eq.s32.totalorder %v9171_v23, %v6534_v0  ;;  %9011 = vmatpush3.bf16.msra.mxu1 %v13426_v44  ;;  %v6561_v12 = vcvt.f32.s32 %v6560_v32 }
0x1ad6   :  { %v6516_v54 = vcvt.f32.s32 %v6515_v1  ;;  %v13039_v50 = vsel %vm6584_vm9, inf, %v12782_v24  ;;  %9013 = vmatprep.subr.bf16.mxu1 %v13492_v15  ;;  %v8670_v44 = vpop.f32.mrb[120].mxu0  ;;  %v7583_v37 = vsel %vm6584_vm9, 1.0, %v13409_v41 }
0x1ad7   :  { %v6858_v13 = vsel %vm433_vm4, %v13039_v50, inf  ;;  %v13046_v19 = vadd.f32 %v13007_v18, %v8670_v44  ;;  %v6564_v63 = vadd.s32 %v6563_v55, %v6561_v12  ;;  %v6389_v14 = vpop.f32.mrb[121].mxu0  ;;  %v13549_v44 = vld [vmem:[#allocation6_spill] sm:$0xff] }
0x1ad8   :  { %v6519_v25 = vadd.s32 %v6518_v5, %v6516_v54  ;;  %6859 = vmin.xlane.f32.xlu0 %v6858_v13  ;;  %v13050_v29 = vadd.f32 %v13007_v18, %v6389_v14  ;;  %v8671_v43 = vpop.f32.mrb[122].mxu0 }
0x1ad9   :  { %v6545_v24 = vpop.xlane.xlu1 %6544  ;;  %9015 = vmatpush3.bf16.msra.mxu1 %v13492_v15  ;;  %v6410_v8 = vmax.f32 %v12796_v57, %v13046_v19  ;;  %v13059_v48 = vadd.f32 %v13007_v18, %v8671_v43  ;;  %v6392_v45 = vpop.f32.mrb[123].mxu0  ;;  %vm6586_vm11 = vcmp.eq.s32.totalorder %v9171_v23, %v6564_v63 }
0x1ada   :  { %v6546_v53 = vcvt.f32.s32 %v6545_v24  ;;  %vm6583_vm10 = vcmp.eq.s32.totalorder %v9171_v23, %v6519_v25  ;;  %v13066_v36 = vadd.f32 %v13007_v18, %v6392_v45  ;;  %v6844_v5 = vsel %vm6586_vm11, inf, %v12811_v49 }
0x1adb   :  { %v7582_v15 = vsel %vm6583_vm10, 1.0, %v13409_v41  ;;  %v6841_v34 = vsel %vm6583_vm10, inf, %v12821_v62  ;;  %v6864_v32 = vsel %vm433_vm4, %v6844_v5, inf  ;;  %v7585_v12 = vsel %vm6586_vm11, 1.0, %v13409_v41 }
0x1adc   :  { %v6549_v39 = vadd.s32 %v6548_v6, %v6546_v53  ;;  %8692 = vmatmul.mubr.msk.f32.gmra.mrb[126].mxu1 %vm433_vm4, %v7582_v15  ;;  %v6855_v21 = vsel %vm433_vm4, %v6841_v34, inf  ;;  %6865 = vmin.xlane.f32.xlu0 %v6864_v32  ;;  %v13552_v57 = vmax.f32 %v12817_v26, %v13059_v48 }
0x1add   :  { %6856 = vmin.xlane.f32.xlu1 %v6855_v21  ;;  %8694 = vmatprep.mubr.msk.f32.mxu1 %vm433_vm4, %v7583_v37  ;;  %v6575_v20 = vpop.xlane.xlu1 %6574 }
0x1ade   :  { %v6576_v1 = vcvt.f32.s32 %v6575_v20  ;;  %vm6585_vm12 = vcmp.eq.s32.totalorder %v9171_v23, %v6549_v39 }
0x1adf   :  { %v7584_v54 = vsel %vm6585_vm12, 1.0, %v13409_v41  ;;  %v6843_v55 = vsel %vm6585_vm12, inf, %v12837_v40 }
0x1ae0   :  { %v6579_v13 = vadd.s32 %v6578_v16, %v6576_v1  ;;  %8695 = vmatmul.mubr.msk.f32.gmra.mrb[128].mxu1 %vm433_vm4, %v7584_v54  ;;  %v6861_v25 = vsel %vm433_vm4, %v6843_v55, inf }
0x1ae1   :  { %6862 = vmin.xlane.f32.xlu1 %v6861_v25  ;;  %8697 = vmatprep.mubr.msk.f32.mxu1 %vm433_vm4, %v7585_v12 }
0x1ae2   :  { %vm6587_vm13 = vcmp.eq.s32.totalorder %v9171_v23, %v6579_v13 }
0x1ae3   :  { %v7586_v49 = vsel %vm6587_vm13, 1.0, %v13409_v41  ;;  %v6845_v6 = vsel %vm6587_vm13, inf, %v13549_v44 }
0x1ae4   :  { %8698 = vmatmul.mubr.msk.f32.gmra.mrb[130].mxu1 %vm433_vm4, %v7586_v49  ;;  %v6867_v40 = vsel %vm433_vm4, %v6845_v6, inf }
0x1ae5   :  { %6868 = vmin.xlane.f32.xlu1 %v6867_v40 }
0x1b52   :  { %v6848_v27 = vpop.xlane.xlu0 %6847 }
0x1b53   :  { %vm6870_vm14 = vcmp.le.f32.partialorder %v12980_v59, %v6848_v27 }
0x1b54   :  { %v6878_v63 = vsel %vm6870_vm14, %v9171_v23, 64 }
0x1b55   :  { %v13093_v14 = vsel %vm433_vm4, %v6878_v63, 2147483647 }
0x1b56   :  { %v6888_v24 = vshra.s32 %v13093_v14, 16  ;;  %v6854_v53 = vpop.xlane.xlu0 %6853 }
0x1b57   :  { %vm6872_vm15 = vcmp.le.f32.partialorder %v12987_v51, %v6854_v53 }
0x1b58   :  { %v6880_v43 = vsel %vm6872_vm15, %v9171_v23, 64  ;;  %v13098_v37 = vcvt.s32.f32 %v6888_v24 }
0x1b59   :  { %v13101_v45 = vsel %vm433_vm4, %v6880_v43, 2147483647  ;;  %v6851_v15 = vpop.xlane.xlu1 %6850 }
0x1b5a   :  { %v6918_v59 = vshra.s32 %v13101_v45, 16  ;;  %vm6871_vm0 = vcmp.le.f32.partialorder %v12995_v38, %v6851_v15  ;;  %6891 = vmin.xlane.f32.xlu0 %v13098_v37 }
0x1b5b   :  { %v6879_v39 = vsel %vm6871_vm0, %v9171_v23, 64 }
0x1b5c   :  { %v13108_v21 = vsel %vm433_vm4, %v6879_v39, 2147483647  ;;  %v13110_v51 = vcvt.s32.f32 %v6918_v59 }
0x1b5d   :  { %v6903_v16 = vshra.s32 %v13108_v21, 16 }
0x1b5e   :  { %6921 = vmin.xlane.f32.xlu0 %v13110_v51 }
0x1b5f   :  { %v13114_v20 = vcvt.s32.f32 %v6903_v16 }
0x1b61   :  { %6906 = vmin.xlane.f32.xlu1 %v13114_v20 }
0x1b65   :  { %v6860_v1 = vpop.xlane.xlu0 %6859 }
0x1b66   :  { %vm6874_vm2 = vcmp.le.f32.partialorder %v13039_v50, %v6860_v1 }
0x1b67   :  { %v6882_v38 = vsel %vm6874_vm2, %v9171_v23, 64 }
0x1b68   :  { %v13120_v54 = vsel %vm433_vm4, %v6882_v38, 2147483647 }
0x1b69   :  { %v6948_v32 = vshra.s32 %v13120_v54, 16  ;;  %v6866_v44 = vpop.xlane.xlu0 %6865 }
0x1b6a   :  { %v6857_v12 = vpop.xlane.xlu1 %6856  ;;  %vm6876_vm5 = vcmp.le.f32.partialorder %v6844_v5, %v6866_v44 }
0x1b6b   :  { %vm6873_vm3 = vcmp.le.f32.partialorder %v6841_v34, %v6857_v12  ;;  %v13123_v13 = vcvt.s32.f32 %v6948_v32  ;;  %v6884_v27 = vsel %vm6876_vm5, %v9171_v23, 64  ;;  %v13550_v32 = vld [vmem:[#allocation4_spill] sm:$0xff] }
0x1b6c   :  { %v6881_v25 = vsel %vm6873_vm3, %v9171_v23, 64  ;;  %v13133_v63 = vsel %vm433_vm4, %v6884_v27, 2147483647 }
0x1b6d   :  { %v13127_v49 = vsel %vm433_vm4, %v6881_v25, 2147483647  ;;  %6951 = vmin.xlane.f32.xlu0 %v13123_v13  ;;  %v6978_v53 = vshra.s32 %v13133_v63, 16 }
0x1b6e   :  { %v6933_v50 = vshra.s32 %v13127_v49, 16  ;;  %v6863_v40 = vpop.xlane.xlu1 %6862 }
0x1b6f   :  { %vm6875_vm6 = vcmp.le.f32.partialorder %v6843_v55, %v6863_v40  ;;  %v13144_v59 = vcvt.s32.f32 %v6978_v53 }
0x1b70   :  { %v6883_v34 = vsel %vm6875_vm6, %v9171_v23, 64  ;;  %v13136_v24 = vcvt.s32.f32 %v6933_v50 }
0x1b71   :  { %v13140_v43 = vsel %vm433_vm4, %v6883_v34, 2147483647  ;;  %6981 = vmin.xlane.f32.xlu0 %v13144_v59 }
0x1b72   :  { %v6963_v15 = vshra.s32 %v13140_v43, 16  ;;  %6936 = vmin.xlane.f32.xlu1 %v13136_v24  ;;  %v6869_v5 = vpop.xlane.xlu1 %6868 }
0x1b73   :  { %vm6877_vm7 = vcmp.le.f32.partialorder %v6845_v6, %v6869_v5 }
0x1b74   :  { %v6885_v55 = vsel %vm6877_vm7, %v9171_v23, 64  ;;  %v13147_v39 = vcvt.s32.f32 %v6963_v15 }
0x1b75   :  { %v13150_v16 = vsel %vm433_vm4, %v6885_v55, 2147483647 }
0x1b76   :  { %v6993_v1 = vshra.s32 %v13150_v16, 16  ;;  %6966 = vmin.xlane.f32.xlu1 %v13147_v39 }
0x1b78   :  { %v13155_v38 = vcvt.s32.f32 %v6993_v1 }
0x1b7a   :  { %6996 = vmin.xlane.f32.xlu1 %v13155_v38 }
0x1b9e   :  { %v8690_v6 = vpop.f32.mrb[124].mxu1 }
0x1b9f   :  { %v6734_v12 = vadd.f32 %v8690_v6, %v13550_v32  ;;  %v6694_v25 = vpop.f32.mrb[125].mxu1 }
0x1ba0   :  { %v6733_v44 = vadd.f32 %v6694_v25, %v13415_v52 }
0x1ba1   :  { %v6742_v50 = vmax.f32 %v6734_v12, 0.0 }
0x1ba2   :  { %v6741_v40 = vmax.f32 %v6733_v44, 0.0 }
0x1ba4   :  { %v6749_v27 = vpack.c.bf16 %v6742_v50, %v6741_v40 }
0x1ba6   :  { %8708 = vmatprep.mubr.msk.bf16.mxu0 %vm433_vm4, %v6749_v27 }
0x1baf   :  { %v8693_v34 = vpop.f32.mrb[126].mxu1 }
0x1bb0   :  { %v6736_v53 = vadd.f32 %v8693_v34, %v9583_v46  ;;  %v6704_v15 = vpop.f32.mrb[127].mxu1  ;;  %v9054_v34 = vld [vmem:[%s13351_s6] sm:$0xff]  }
0x1bb1   :  { %v6735_v5 = vadd.f32 %v6704_v15, %v9587_v42  ;;  %v9055_v15 = vld [vmem:[%s13351_s6 + $0x8] sm:$0xff]  }
0x1bb2   :  { %v6744_v55 = vmax.f32 %v6736_v53, 0.0 }
0x1bb3   :  { %v6743_v1 = vmax.f32 %v6735_v5, 0.0  ;;  %v8696_v62 = vpop.f32.mrb[128].mxu1 }
0x1bb4   :  { %v6738_v0 = vadd.f32 %v8696_v62, %v9591_v31  ;;  %v6714_v6 = vpop.f32.mrb[129].mxu1 }
0x1bb5   :  { %v6750_v10 = vpack.c.bf16 %v6744_v55, %v6743_v1  ;;  %v6737_v25 = vadd.f32 %v6714_v6, %v9595_v30  ;;  %v9056_v55 = vld [vmem:[%s13351_s6 + $0x10] sm:$0xff]   ;;  %v9057_v1 = vld [vmem:[%s13351_s6 + $0x18] sm:$0xff]   ;;  %v6887_v6 = vand.u32 65535, %v13093_v14 }
0x1bb6   :  { %v6746_v12 = vmax.f32 %v6738_v0, 0.0 }
0x1bb7   :  { %v6745_v44 = vmax.f32 %v6737_v25, 0.0  ;;  %v8699_v50 = vpop.f32.mrb[130].mxu1  ;;  %8709 = vmatmul.mubr.msk.bf16.vlgmr.msra.gmra.mrb[124].mxu0 %vm433_vm4, %v6750_v10  ;;  %v6917_v25 = vand.u32 65535, %v13101_v45  ;;  %v6947_v45 = vand.u32 65535, %v13120_v54 }
0x1bb8   :  { %v6740_v40 = vadd.f32 %v8699_v50, %v9600_v17  ;;  %v6724_v27 = vpop.f32.mrb[131].mxu1  ;;  %8745 = vmatpush3.bf16.msra.mxu0 %v9054_v34 }
0x1bb9   :  { %v6751_v53 = vpack.c.bf16 %v6746_v12, %v6745_v44  ;;  %v6739_v62 = vadd.f32 %v6724_v27, %v9604_v22  ;;  %8746 = vmatprep.subr.bf16.mxu0 %v9055_v15  ;;  %v6889_v44 = vcvt.s32.f32 %v6887_v6  ;;  %v6919_v34 = vcvt.s32.f32 %v6917_v25 }
0x1bba   :  { %v6748_v0 = vmax.f32 %v6740_v40, 0.0  ;;  %v6902_v40 = vand.u32 65535, %v13108_v21 }
0x1bbb   :  { %v6747_v5 = vmax.f32 %v6739_v62, 0.0  ;;  %8712 = vmatprep.mubr.msk.bf16.mxu0 %vm433_vm4, %v6751_v53 }
0x1bbc   :  { %8747 = vmatpush3.bf16.msra.mxu0 %v9055_v15  ;;  %v6904_v15 = vcvt.s32.f32 %v6902_v40 }
0x1bbd   :  { %v6752_v10 = vpack.c.bf16 %v6748_v0, %v6747_v5  ;;  %8748 = vmatprep.subr.bf16.mxu0 %v9056_v55  ;;  %v6932_v5 = vand.u32 65535, %v13127_v49  ;;  %v6992_v49 = vand.u32 65535, %v13150_v16 }
0x1bbf   :  { %8713 = vmatmul.mubr.msk.bf16.gmra.mrb[128].mxu0 %vm433_vm4, %v6752_v10  ;;  %v6962_v10 = vand.u32 65535, %v13140_v43 }
0x1bc0   :  { %8749 = vmatpush3.bf16.msra.mxu0 %v9056_v55 }
0x1bc1   :  { %8750 = vmatprep.subr.bf16.mxu0 %v9057_v1 }
0x1bc4   :  { %8751 = vmatpush3.bf16.msra.mxu0 %v9057_v1  ;;  %v6934_v1 = vcvt.s32.f32 %v6932_v5 }
0x1be7   :  { %v6892_v12 = vpop.xlane.xlu0 %6891 }
0x1be8   :  { %vm6893_vm1 = vcmp.eq.f32.partialorder %v13098_v37, %v6892_v12  ;;  %v6949_v37 = vcvt.s32.f32 %v6947_v45 }
0x1be9   :  { %v6894_v50 = vsel %vm6893_vm1, %v6889_v44, inf  ;;  %v6994_v44 = vcvt.s32.f32 %v6992_v49 }
0x1bea   :  { %6895 = vmin.xlane.f32.xlu0 %v6894_v50  ;;  %v6898_v50 = vcvt.f32.s32 %v6892_v12 }
0x1beb   :  { %v6922_v27 = vpop.xlane.xlu0 %6921 }
0x1bec   :  { %vm6923_vm8 = vcmp.eq.f32.partialorder %v13110_v51, %v6922_v27  ;;  %v6977_v51 = vand.u32 65535, %v13133_v63  ;;  %v6964_v63 = vcvt.s32.f32 %v6962_v10  ;;  %v6899_v40 = vshll.u32 %v6898_v50, 16 }
0x1bed   :  { %v6924_v53 = vsel %vm6923_vm8, %v6919_v34, inf  ;;  %v6928_v34 = vcvt.f32.s32 %v6922_v27 }
0x1bee   :  { %v6907_v62 = vpop.xlane.xlu1 %6906  ;;  %6925 = vmin.xlane.f32.xlu0 %v6924_v53  ;;  %v6979_v6 = vcvt.s32.f32 %v6977_v51 }
0x1bef   :  { %vm6908_vm9 = vcmp.eq.f32.partialorder %v13114_v20, %v6907_v62  ;;  %v6929_v45 = vshll.u32 %v6928_v34, 16 }
0x1bf0   :  { %v6909_v14 = vsel %vm6908_vm9, %v6904_v15, inf }
0x1bf1   :  { %6910 = vmin.xlane.f32.xlu1 %v6909_v14  ;;  %v6913_v14 = vcvt.f32.s32 %v6907_v62 }
0x1bfa   :  { %v6952_v0 = vpop.xlane.xlu0 %6951 }
0x1bfb   :  { %vm6953_vm10 = vcmp.eq.f32.partialorder %v13123_v13, %v6952_v0 }
0x1bfc   :  { %v6954_v21 = vsel %vm6953_vm10, %v6949_v37, inf }
0x1bfd   :  { %6955 = vmin.xlane.f32.xlu0 %v6954_v21 }
0x1bfe   :  { %v13197_v54 = vpop.xlane.xlu0 %6981 }
0x1bff   :  { %v13193_v55 = vpop.xlane.xlu1 %6936  ;;  %vm6983_vm12 = vcmp.eq.f32.partialorder %v13144_v59, %v13197_v54 }
0x1c00   :  { %vm6938_vm11 = vcmp.eq.f32.partialorder %v13136_v24, %v13193_v55  ;;  %v6984_v43 = vsel %vm6983_vm12, %v6979_v6, inf }
0x1c01   :  { %v6939_v20 = vsel %vm6938_vm11, %v6934_v1, inf  ;;  %6985 = vmin.xlane.f32.xlu0 %v6984_v43  ;;  %v6958_v1 = vcvt.f32.s32 %v6952_v0 }
0x1c02   :  { %6940 = vmin.xlane.f32.xlu1 %v6939_v20 }
0x1c03   :  { %v13202_v13 = vpop.xlane.xlu1 %6966  ;;  %v6959_v49 = vshll.u32 %v6958_v1, 16 }
0x1c04   :  { %vm6968_vm13 = vcmp.eq.f32.partialorder %v13147_v39, %v13202_v13 }
0x1c05   :  { %v6969_v25 = vsel %vm6968_vm13, %v6964_v63, inf }
0x1c06   :  { %6970 = vmin.xlane.f32.xlu1 %v6969_v25 }
0x1c07   :  { %v13206_v24 = vpop.xlane.xlu1 %6996 }
0x1c08   :  { %vm6998_vm14 = vcmp.eq.f32.partialorder %v13155_v38, %v13206_v24  ;;  %v6914_v38 = vshll.u32 %v6913_v14, 16  ;;  %v6973_v14 = vcvt.f32.s32 %v13202_v13 }
0x1c09   :  { %v6999_v16 = vsel %vm6998_vm14, %v6994_v44, inf  ;;  %v6943_v44 = vcvt.f32.s32 %v13193_v55 }
0x1c0a   :  { %7000 = vmin.xlane.f32.xlu1 %v6999_v16  ;;  %v6974_v13 = vshll.u32 %v6973_v14, 16 }
0x1c77   :  { %v6896_v59 = vpop.xlane.xlu0 %6895 }
0x1c78   :  { %v6897_v53 = vcvt.f32.s32 %v6896_v59 }
0x1c7a   :  { %v6900_v15 = vadd.s32 %v6899_v40, %v6897_v53  ;;  %v6988_v53 = vcvt.f32.s32 %v13197_v54 }
0x1c7b   :  { %v6926_v39 = vpop.xlane.xlu0 %6925 }
0x1c7c   :  { %v6927_v37 = vcvt.f32.s32 %v6926_v39  ;;  %vm7006_vm15 = vcmp.eq.s32.totalorder %v9171_v23, %v6900_v15  ;;  %v6989_v3 = vshll.u32 %v6988_v53, 16 }
0x1c7d   :  { %v7599_v5 = vsel %vm7006_vm15, 1.0, %v13409_v41 }
0x1c7e   :  { %v6930_v21 = vadd.s32 %v6929_v45, %v6927_v37  ;;  %v6911_v51 = vpop.xlane.xlu1 %6910  ;;  %8732 = vmatprep.mubr.msk.f32.mxu1 %vm433_vm4, %v7599_v5  ;;  %v7003_v37 = vcvt.f32.s32 %v13206_v24 }
0x1c7f   :  { %v6912_v10 = vcvt.f32.s32 %v6911_v51 }
0x1c80   :  { %vm7008_vm0 = vcmp.eq.s32.totalorder %v9171_v23, %v6930_v21 }
0x1c81   :  { %v6915_v12 = vadd.s32 %v6914_v38, %v6912_v10  ;;  %v7601_v27 = vsel %vm7008_vm0, 1.0, %v13409_v41 }
0x1c83   :  { %vm7007_vm2 = vcmp.eq.s32.totalorder %v9171_v23, %v6915_v12 }
0x1c84   :  { %v7600_v62 = vsel %vm7007_vm2, 1.0, %v13409_v41 }
0x1c85   :  { %8733 = vmatmul.mubr.msk.f32.vlgmr.msra.gmra.mrb[132].mxu1 %vm433_vm4, %v7600_v62 }
0x1c86   :  { %8735 = vmatprep.mubr.msk.f32.mxu1 %vm433_vm4, %v7601_v27  ;;  %v13551_v27 = vmax.f32 %v12804_v28, %v13050_v29  ;;  %v13553_v28 = vmax.f32 %v12826_v9, %v13066_v36 }
0x1c8a   :  { %v8710_v20 = vpop.f32.mrb[124].mxu0  ;;  %v6956_v6 = vpop.xlane.xlu0 %6955 }
0x1c8b   :  { %v6808_v63 = vadd.f32 %v13007_v18, %v8710_v20  ;;  %v6799_v43 = vpop.f32.mrb[125].mxu0  ;;  %v6957_v25 = vcvt.f32.s32 %v6956_v6  ;;  %v7004_v6 = vshll.u32 %v7003_v37, 16 }
0x1c8c   :  { %v6800_v16 = vadd.f32 %v13007_v18, %v6799_v43  ;;  %v8711_v50 = vpop.f32.mrb[126].mxu0 }
0x1c8d   :  { %v13225_v59 = vmax.f32 %v6406_v60, %v6808_v63  ;;  %v6811_v40 = vadd.f32 %v13007_v18, %v8711_v50  ;;  %v6802_v0 = vpop.f32.mrb[127].mxu0  ;;  %v6960_v34 = vadd.s32 %v6959_v49, %v6957_v25  ;;  %v6944_v60 = vshll.u32 %v6943_v44, 16 }
0x1c8e   :  { %v13232_v15 = vmax.f32 %v6404_v33, %v6800_v16  ;;  %v6803_v55 = vadd.f32 %v13007_v18, %v6802_v0  ;;  %v6986_v45 = vpop.xlane.xlu0 %6985 }
0x1c8f   :  { %v13239_v7 = vmax.f32 %v6407_v4, %v6811_v40  ;;  %v6941_v58 = vpop.xlane.xlu1 %6940  ;;  %vm7010_vm3 = vcmp.eq.s32.totalorder %v9171_v23, %v6960_v34  ;;  %v6987_v11 = vcvt.f32.s32 %v6986_v45 }
0x1c90   :  { %v13244_v54 = vmax.f32 %v6405_v2, %v6803_v55  ;;  %v6942_v39 = vcvt.f32.s32 %v6941_v58  ;;  %v7603_v2 = vsel %vm7010_vm3, 1.0, %v13409_v41 }
0x1c91   :  { %v6990_v38 = vadd.s32 %v6989_v3, %v6987_v11 }
0x1c92   :  { %v6945_v35 = vadd.s32 %v6944_v60, %v6942_v39  ;;  %v8714_v33 = vpop.f32.mrb[128].mxu0 }
0x1c93   :  { %v6824_v56 = vadd.f32 %v13007_v18, %v8714_v33  ;;  %v6815_v4 = vpop.f32.mrb[129].mxu0  ;;  %v6971_v5 = vpop.xlane.xlu1 %6970  ;;  %vm7012_vm6 = vcmp.eq.s32.totalorder %v9171_v23, %v6990_v38 }
0x1c94   :  { %v6816_v21 = vadd.f32 %v13007_v18, %v6815_v4  ;;  %v6972_v61 = vcvt.f32.s32 %v6971_v5  ;;  %v8715_v47 = vpop.f32.mrb[130].mxu0  ;;  %vm7009_vm5 = vcmp.eq.s32.totalorder %v9171_v23, %v6945_v35  ;;  %v7605_v63 = vsel %vm7012_vm6, 1.0, %v13409_v41 }
0x1c95   :  { %v13255_v51 = vmax.f32 %v6410_v8, %v6824_v56  ;;  %v6827_v24 = vadd.f32 %v13007_v18, %v8715_v47  ;;  %v6818_v10 = vpop.f32.mrb[131].mxu0  ;;  %v7602_v12 = vsel %vm7009_vm5, 1.0, %v13409_v41 }
0x1c96   :  { %v13262_v62 = vmax.f32 %v13551_v27, %v6816_v21  ;;  %v6975_v1 = vadd.s32 %v6974_v13, %v6972_v61  ;;  %v6819_v20 = vadd.f32 %v13007_v18, %v6818_v10  ;;  %8736 = vmatmul.mubr.msk.f32.gmra.mrb[134].mxu1 %vm433_vm4, %v7602_v12 }
0x1c97   :  { %v13270_v19 = vmax.f32 %v13552_v57, %v6827_v24  ;;  %8738 = vmatprep.mubr.msk.f32.mxu1 %vm433_vm4, %v7603_v2  ;;  %v7001_v8 = vpop.xlane.xlu1 %7000 }
0x1c98   :  { %v13276_v29 = vmax.f32 %v13553_v28, %v6819_v20  ;;  %v7002_v49 = vcvt.f32.s32 %v7001_v8  ;;  %vm7011_vm7 = vcmp.eq.s32.totalorder %v9171_v23, %v6975_v1 }
0x1c99   :  { %v7604_v43 = vsel %vm7011_vm7, 1.0, %v13409_v41 }
0x1c9a   :  { %v7005_v25 = vadd.s32 %v7004_v6, %v7002_v49  ;;  %8739 = vmatmul.mubr.msk.f32.gmra.mrb[136].mxu1 %vm433_vm4, %v7604_v43 }
0x1c9b   :  { %8741 = vmatprep.mubr.msk.f32.mxu1 %vm433_vm4, %v7605_v63 }
0x1c9c   :  { %vm7013_vm1 = vcmp.eq.s32.totalorder %v9171_v23, %v7005_v25 }
0x1c9d   :  { %v7606_v26 = vsel %vm7013_vm1, 1.0, %v13409_v41 }
0x1c9e   :  { %8742 = vmatmul.mubr.msk.f32.gmra.mrb[138].mxu1 %vm433_vm4, %v7606_v26 }
0x1d58   :  { %v8734_v9 = vpop.f32.mrb[132].mxu1 }
0x1d59   :  { %v7160_v48 = vadd.f32 %v8734_v9, %v13550_v32  ;;  %v7120_v36 = vpop.f32.mrb[133].mxu1 }
0x1d5a   :  { %v7159_v44 = vadd.f32 %v7120_v36, %v13415_v52 }
0x1d5b   :  { %v7168_v16 = vmax.f32 %v7160_v48, 0.0 }
0x1d5c   :  { %v7167_v50 = vmax.f32 %v7159_v44, 0.0 }
0x1d5e   :  { %v7175_v40 = vpack.c.bf16 %v7168_v16, %v7167_v50 }
0x1d60   :  { %8752 = vmatprep.mubr.msk.bf16.mxu0 %vm433_vm4, %v7175_v40 }
0x1d69   :  { %v8737_v0 = vpop.f32.mrb[134].mxu1 }
0x1d6a   :  { %v7162_v34 = vadd.f32 %v8737_v0, %v9583_v46  ;;  %v7130_v53 = vpop.f32.mrb[135].mxu1 }
0x1d6b   :  { %v7161_v23 = vadd.f32 %v7130_v53, %v9587_v42 }
0x1d6c   :  { %v7170_v41 = vmax.f32 %v7162_v34, 0.0 }
0x1d6d   :  { %v7169_v55 = vmax.f32 %v7161_v23, 0.0  ;;  %v8740_v14 = vpop.f32.mrb[136].mxu1 }
0x1d6e   :  { %v7164_v58 = vadd.f32 %v8740_v14, %v9591_v31  ;;  %v7140_v32 = vpop.f32.mrb[137].mxu1 }
0x1d6f   :  { %v7176_v60 = vpack.c.bf16 %v7170_v41, %v7169_v55  ;;  %v7163_v52 = vadd.f32 %v7140_v32, %v9595_v30 }
0x1d70   :  { %v7172_v39 = vmax.f32 %v7164_v58, 0.0 }
0x1d71   :  { %v7171_v3 = vmax.f32 %v7163_v52, 0.0  ;;  %v8743_v35 = vpop.f32.mrb[138].mxu1  ;;  %8753 = vmatmul.mubr.msk.bf16.vlgmr.msra.gmra.mrb[132].mxu0 %vm433_vm4, %v7176_v60 }
0x1d72   :  { %v7166_v33 = vadd.f32 %v8743_v35, %v9600_v17  ;;  %v7150_v46 = vpop.f32.mrb[139].mxu1 }
0x1d73   :  { %v7177_v45 = vpack.c.bf16 %v7172_v39, %v7171_v3  ;;  %v7165_v42 = vadd.f32 %v7150_v46, %v9604_v22 }
0x1d74   :  { %v7174_v13 = vmax.f32 %v7166_v33, 0.0 }
0x1d75   :  { %v7173_v37 = vmax.f32 %v7165_v42, 0.0  ;;  %8756 = vmatprep.mubr.msk.bf16.mxu0 %vm433_vm4, %v7177_v45 }
0x1d77   :  { %v7178_v31 = vpack.c.bf16 %v7174_v13, %v7173_v37 }
0x1d79   :  { %8757 = vmatmul.mubr.msk.bf16.gmra.mrb[136].mxu0 %vm433_vm4, %v7178_v31 }
0x1e44   :  { %v8754_v56 = vpop.f32.mrb[132].mxu0 }
0x1e45   :  { %v7234_v30 = vadd.f32 %v13007_v18, %v8754_v56  ;;  %v7225_v11 = vpop.f32.mrb[133].mxu0 }
0x1e46   :  { %v7226_v4 = vadd.f32 %v13007_v18, %v7225_v11  ;;  %v8755_v5 = vpop.f32.mrb[134].mxu0 }
0x1e47   :  { %v7258_v17 = vmax.f32 %v13225_v59, %v7234_v30  ;;  %v7237_v21 = vadd.f32 %v13007_v18, %v8755_v5  ;;  %v7228_v61 = vpop.f32.mrb[135].mxu0 }
0x1e48   :  { %v7256_v22 = vmax.f32 %v13232_v15, %v7226_v4  ;;  %v7229_v47 = vadd.f32 %v13007_v18, %v7228_v61 }
0x1e49   :  { %7266 = vst.msk [vmem:[%s13354_s8 + $0x10] sm:$0xff] %vm433_vm4, %v7258_v17  ;;  %v7259_v2 = vmax.f32 %v13239_v7, %v7237_v21 }
0x1e4a   :  { %7264 = vst.msk [vmem:[%s13354_s8] sm:$0xff] %vm433_vm4, %v7256_v22  ;;  %v7257_v59 = vmax.f32 %v13244_v54, %v7229_v47 }
0x1e4b   :  { %7267 = vst.msk [vmem:[%s13354_s8 + $0x18] sm:$0xff] %vm433_vm4, %v7259_v2 }
0x1e4c   :  { %7265 = vst.msk [vmem:[%s13354_s8 + $0x8] sm:$0xff] %vm433_vm4, %v7257_v59  ;;  %v8758_v15 = vpop.f32.mrb[136].mxu0 }
0x1e4d   :  { %v7250_v7 = vadd.f32 %v13007_v18, %v8758_v15  ;;  %v7241_v38 = vpop.f32.mrb[137].mxu0 }
0x1e4e   :  { %v7242_v24 = vadd.f32 %v13007_v18, %v7241_v38  ;;  %v8759_v10 = vpop.f32.mrb[138].mxu0 }
0x1e4f   :  { %v7262_v12 = vmax.f32 %v13255_v51, %v7250_v7  ;;  %v7253_v54 = vadd.f32 %v13007_v18, %v8759_v10  ;;  %v7244_v27 = vpop.f32.mrb[139].mxu0 }
0x1e50   :  { %v7260_v1 = vmax.f32 %v13262_v62, %v7242_v24  ;;  %v7245_v20 = vadd.f32 %v13007_v18, %v7244_v27 }
0x1e51   :  { %7270 = vst.msk [vmem:[%s13354_s8 + $0x30] sm:$0xff] %vm433_vm4, %v7262_v12  ;;  %v7263_v6 = vmax.f32 %v13270_v19, %v7253_v54 }
0x1e52   :  { %7268 = vst.msk [vmem:[%s13354_s8 + $0x20] sm:$0xff] %vm433_vm4, %v7260_v1  ;;  %v7261_v51 = vmax.f32 %v13276_v29, %v7245_v20 }
0x1e53   :  { %7271 = vst.msk [vmem:[%s13354_s8 + $0x38] sm:$0xff] %vm433_vm4, %v7263_v6 }
0x1e54   :  { %7269 = vst.msk [vmem:[%s13354_s8 + $0x28] sm:$0xff] %vm433_vm4, %v7261_v51 }

</bundles_post_ra>
